<compile_context>
chip_gen: v7x
topology: tpu7x:2x2x1
jax: 0.10.0
libtpu: 0.0.40
codegen_flags: <defaults>
</compile_context>

<pallas_src>
import math

import jax
import jax.numpy as jnp
from jax.experimental import pallas as pl
from jax.experimental.pallas import tpu as pltpu


# Sublane-aligned offset at which the image interior is stored inside the
# padded VMEM activation scratch (keeps the interior store tile-aligned; the
# halo columns live in the zero-filled region around it).
_WOFF = 8


# ----------------------------------------------------------------------------
# Fused conv stack: 3x (Conv2d stride=1 "same" + ReLU), single kernel.
# ----------------------------------------------------------------------------
def _conv_stack_kernel(x_ref, w1_ref, b1_ref, w2_ref, b2_ref, w3_ref, b3_ref,
                       y_ref, a1p_ref, a2p_ref):
    # x_ref : (N, H+2p, W+2p, Cin)   zero-padded NHWC input
    # w*_ref: (K*K, Cin_l, Cout_l)   tap-major conv weights (cross-correlation)
    # b*_ref: (1, Cout_l)
    # y_ref : (N*H*W, C3)            conv3 output (post-ReLU), rows = (n, h, w)
    # a*p_ref: zero-padded VMEM scratch for the intermediate activations
    taps = w1_ref.shape[0]
    K = math.isqrt(taps)
    pad = (K - 1) // 2
    N = x_ref.shape[0]
    H = x_ref.shape[1] - 2 * pad
    W = x_ref.shape[2] - 2 * pad
    M = N * H * W

    def conv_relu(a_ref, w_ref, b_ref, w0):
        # The padded image occupies cols [w0, w0 + W + 2*pad) of a_ref's W axis.
        cin = a_ref.shape[-1]
        cout = w_ref.shape[-1]
        acc = jnp.zeros((M, cout), jnp.float32)
        # Per-tap (M, Cin) @ (Cin, Cout) matmuls accumulated on the MXU.
        for kh in range(K):
            for kw in range(K):
                patch = a_ref[:, kh:kh + H, w0 + kw:w0 + kw + W, :].reshape(M, cin)
                acc = acc + jnp.dot(patch, w_ref[kh * K + kw],
                                    preferred_element_type=jnp.float32)
        return jnp.maximum(acc + b_ref[...], 0.0)

    def stash(padded_ref, y):
        # Zero the halo, then write the image interior at a tile-aligned offset.
        cout = padded_ref.shape[-1]
        padded_ref[...] = jnp.zeros_like(padded_ref)
        padded_ref[:, pad:pad + H, _WOFF:_WOFF + W, :] = y.reshape(N, H, W, cout)

    y1 = conv_relu(x_ref, w1_ref, b1_ref, 0)                 # (M, C1)
    # TODO(synk): nn.Dropout2d between layers is an inference-time identity here.
    stash(a1p_ref, y1)
    y2 = conv_relu(a1p_ref, w2_ref, b2_ref, _WOFF - pad)     # (M, C2)
    stash(a2p_ref, y2)
    y_ref[...] = conv_relu(a2p_ref, w3_ref, b3_ref, _WOFF - pad)  # (M, C3)


def conv_stack(x_pad_nhwc, w1, b1, w2, b2, w3, b3):
    """x_pad_nhwc: (N, H+2p, W+2p, Cin). Returns (N*H*W, C3) post-ReLU conv3."""
    N, Hp, Wp, _ = x_pad_nhwc.shape
    K = math.isqrt(w1.shape[0])
    pad = (K - 1) // 2
    H, W = Hp - 2 * pad, Wp - 2 * pad
    C1, C2, C3 = w1.shape[-1], w2.shape[-1], w3.shape[-1]
    scratch_w = _WOFF + W + pad
    return pl.pallas_call(
        _conv_stack_kernel,
        out_shape=jax.ShapeDtypeStruct((N * H * W, C3), jnp.float32),
        scratch_shapes=[
            pltpu.VMEM((N, H + 2 * pad, scratch_w, C1), jnp.float32),
            pltpu.VMEM((N, H + 2 * pad, scratch_w, C2), jnp.float32),
        ],
    )(x_pad_nhwc, w1, b1, w2, b2, w3, b3)


# ----------------------------------------------------------------------------
# Fused FC heads: out = x_flat @ Wfc + bfc, Wfc = [W_mu^T | W_logvar^T] with
# rows permuted to NHWC flatten order. K-tiled grid pipelines the weight DMA.
# ----------------------------------------------------------------------------
def _fc_fused_kernel(x_ref, w_ref, b_ref, o_ref, acc_ref):
    k = pl.program_id(0)

    @pl.when(k == 0)
    def _():
        acc_ref[...] = jnp.zeros_like(acc_ref)

    acc_ref[...] += jnp.dot(x_ref[...], w_ref[...],
                            preferred_element_type=jnp.float32)

    @pl.when(k == pl.num_programs(0) - 1)
    def _():
        o_ref[...] = acc_ref[...] + b_ref[...]


def fc_heads_fused(x_flat, wfc, bfc, *, tk=2048):
    """x_flat: (N, F); wfc: (F, 2L); bfc: (1, 2L) -> (N, 2L) = [mu | logvar]."""
    N, F = x_flat.shape
    two_l = wfc.shape[1]
    if F % tk != 0:          # fallback for odd configs: single reduction step
        tk = F
    nk = F // tk
    return pl.pallas_call(
        _fc_fused_kernel,
        out_shape=jax.ShapeDtypeStruct((N, two_l), jnp.float32),
        grid=(nk,),
        in_specs=[
            pl.BlockSpec((N, tk), lambda k: (0, k)),
            pl.BlockSpec((tk, two_l), lambda k: (k, 0)),
            pl.BlockSpec((1, two_l), lambda k: (0, 0)),
        ],
        out_specs=pl.BlockSpec((N, two_l), lambda k: (0, 0)),
        scratch_shapes=[pltpu.VMEM((N, two_l), jnp.float32)],
        compiler_params=pltpu.CompilerParams(
            dimension_semantics=("arbitrary",)),
    )(x_flat, wfc, bfc)


# ----------------------------------------------------------------------------
# Parameter construction / one-time kernel-layout preparation
# ----------------------------------------------------------------------------
def init_params(key, in_channels, hidden_channels, latent_dim,
                kernel_size, one_hot_rows, one_hot_columns):
    c1 = hidden_channels // 2
    c2 = hidden_channels
    c3 = hidden_channels * 2
    feat = c3 * one_hot_rows * one_hot_columns
    ks = jax.random.split(key, 10)
    s = 0.05
    return {
        "w1": s * jax.random.normal(ks[0], (c1, in_channels, kernel_size, kernel_size), jnp.float32),
        "b1": s * jax.random.normal(ks[1], (c1,), jnp.float32),
        "w2": s * jax.random.normal(ks[2], (c2, c1, kernel_size, kernel_size), jnp.float32),
        "b2": s * jax.random.normal(ks[3], (c2,), jnp.float32),
        "w3": s * jax.random.normal(ks[4], (c3, c2, kernel_size, kernel_size), jnp.float32),
        "b3": s * jax.random.normal(ks[5], (c3,), jnp.float32),
        "w_mu": s * jax.random.normal(ks[6], (latent_dim, feat), jnp.float32),
        "b_mu": s * jax.random.normal(ks[7], (latent_dim,), jnp.float32),
        "w_lv": s * jax.random.normal(ks[8], (latent_dim, feat), jnp.float32),
        "b_lv": s * jax.random.normal(ks[9], (latent_dim,), jnp.float32),
    }


def prepare_kernel_params(params, one_hot_rows, one_hot_columns):
    """One-time layout prep (outside the forward hot path)."""
    def conv_w(w):  # PyTorch OIHW -> tap-major (KH*KW, Cin, Cout)
        cout, cin, kh, kw = w.shape
        return jnp.transpose(w, (2, 3, 1, 0)).reshape(kh * kw, cin, cout)

    c3 = params["w3"].shape[0]
    hw = one_hot_rows * one_hot_columns
    latent = params["w_mu"].shape[0]
    # Fuse mu/logvar heads into one weight; permute rows from PyTorch's NCHW
    # flatten order (c, h, w) to the kernel's NHWC order (h, w, c).
    w_cat = jnp.concatenate([params["w_mu"], params["w_lv"]], axis=0)  # (2L, C3*HW)
    wfc = (w_cat.reshape(2 * latent, c3, hw)
                .transpose(2, 1, 0)
                .reshape(hw * c3, 2 * latent))
    bfc = jnp.concatenate([params["b_mu"], params["b_lv"]]).reshape(1, 2 * latent)
    return {
        "w1": conv_w(params["w1"]), "b1": params["b1"].reshape(1, -1),
        "w2": conv_w(params["w2"]), "b2": params["b2"].reshape(1, -1),
        "w3": conv_w(params["w3"]), "b3": params["b3"].reshape(1, -1),
        "wfc": wfc, "bfc": bfc,
    }


# ----------------------------------------------------------------------------
# ConvEncoder forward (2 pallas_calls + tiny glue)
# ----------------------------------------------------------------------------
def conv_encoder_forward(kp, x_nchw):
    K = math.isqrt(kp["w1"].shape[0])
    pad = (K - 1) // 2          # "same" conv (required for the FC in_features)
    N = x_nchw.shape[0]
    x = jnp.transpose(x_nchw, (0, 2, 3, 1)).astype(jnp.float32)       # NCHW->NHWC (tiny)
    x_pad = jnp.pad(x, ((0, 0), (pad, pad), (pad, pad), (0, 0)))
    y3 = conv_stack(x_pad, kp["w1"], kp["b1"], kp["w2"], kp["b2"],
                    kp["w3"], kp["b3"])                               # (N*H*W, C3)
    x_flat = y3.reshape(N, -1)   # (N, H*W*C3); wfc rows were permuted to match
    out = fc_heads_fused(x_flat, kp["wfc"], kp["bfc"])                # (N, 2L)
    latent = out.shape[1] // 2
    return out[:, :latent], out[:, latent:]


# ----------------------------------------------------------------------------
# Pure-JAX reference (PyTorch semantics) for the correctness check
# ----------------------------------------------------------------------------
def reference_forward(params, x_nchw, *, padding):
    y = x_nchw.astype(jnp.float32)
    for wi, bi in (("w1", "b1"), ("w2", "b2"), ("w3", "b3")):
        y = jax.lax.conv_general_dilated(
            y, params[wi], window_strides=(1, 1),
            padding=[(padding, padding), (padding, padding)],
            dimension_numbers=("NCHW", "OIHW", "NCHW"))
        y = jnp.maximum(y + params[bi][None, :, None, None], 0.0)
    flat = y.reshape(y.shape[0], -1)
    mu = flat @ params["w_mu"].T + params["b_mu"]
    lv = flat @ params["w_lv"].T + params["b_lv"]
    return mu, lv


if __name__ == "__main__":
    # Module hyperparameters (stride=1, padding=1 keep spatial dims, consistent
    # with fc in_features = hidden_channels*2 * one_hot_rows * one_hot_columns).
    in_channels = 4
    hidden_channels = 32
    latent_dim = 32
    kernel_size = 3
    stride = 1
    padding = 1
    one_hot_rows = 16
    one_hot_columns = 16
    batch = 2
    assert stride == 1 and padding == (kernel_size - 1) // 2

    key = jax.random.PRNGKey(0)
    k_param, k_x = jax.random.split(key)
    params = init_params(k_param, in_channels, hidden_channels, latent_dim,
                         kernel_size, one_hot_rows, one_hot_columns)
    kparams = prepare_kernel_params(params, one_hot_rows, one_hot_columns)
    x = jax.random.normal(
        k_x, (batch, in_channels, one_hot_rows, one_hot_columns), jnp.float32)

    fwd = jax.jit(conv_encoder_forward)
    mu, logvar = fwd(kparams, x)
    jax.block_until_ready((mu, logvar))

    mu_ref, lv_ref = reference_forward(params, x, padding=padding)
    assert mu.shape == (batch, latent_dim) and logvar.shape == (batch, latent_dim)
    assert jnp.allclose(mu, mu_ref, rtol=1e-3, atol=1e-3)
    assert jnp.allclose(logvar, lv_ref, rtol=1e-3, atol=1e-3)

    print("KERNEL_OK")
</pallas_src>

<mosaic_0001>
module attributes {stable_mosaic.version = 11 : i64} {
  func.func @_conv_stack_kernel(%arg0: memref<2x18x18x4xf32, #tpu.memory_space<vmem>>, %arg1: memref<9x4x16xf32, #tpu.memory_space<vmem>>, %arg2: memref<1x16xf32, #tpu.memory_space<vmem>>, %arg3: memref<9x16x32xf32, #tpu.memory_space<vmem>>, %arg4: memref<1x32xf32, #tpu.memory_space<vmem>>, %arg5: memref<9x32x64xf32, #tpu.memory_space<vmem>>, %arg6: memref<1x64xf32, #tpu.memory_space<vmem>>, %arg7: memref<512x64xf32, #tpu.memory_space<vmem>>, %arg8: memref<2x18x25x16xf32, #tpu.memory_space<vmem>>, %arg9: memref<2x18x25x32xf32, #tpu.memory_space<vmem>>) attributes {dimension_semantics = [], scalar_prefetch = 0 : i64, scratch_operands = 2 : i64, tpu.core_type = #tpu.core_type<tc>} {
    %cst = arith.constant 0.000000e+00 : f32
    %0 = vector.broadcast %cst : f32 to vector<512x16xf32>
    %c0 = arith.constant 0 : index
    %c0_0 = arith.constant 0 : index
    %c0_1 = arith.constant 0 : index
    %c0_2 = arith.constant 0 : index
    %1 = vector.load %arg0[%c0, %c0_0, %c0_1, %c0_2] : memref<2x18x18x4xf32, #tpu.memory_space<vmem>>, vector<2x16x16x4xf32>
    %2 = vector.shape_cast %1 : vector<2x16x16x4xf32> to vector<512x4xf32>
    %c0_3 = arith.constant 0 : index
    %c0_4 = arith.constant 0 : index
    %c0_5 = arith.constant 0 : index
    %3 = vector.load %arg1[%c0_3, %c0_4, %c0_5] : memref<9x4x16xf32, #tpu.memory_space<vmem>>, vector<1x4x16xf32>
    %4 = vector.shape_cast %3 : vector<1x4x16xf32> to vector<4x16xf32>
    %cst_6 = arith.constant dense<0.000000e+00> : vector<512x16xf32>
    %5 = tpu.matmul %2, %4, %cst_6 {dimension_numbers = #tpu.dot_dimension_numbers<[1], [0], [0], [1], [0, 0, 1, 1], [], []>} : vector<512x4xf32>, vector<4x16xf32>, vector<512x16xf32> -> vector<512x16xf32>
    %6 = arith.addf %0, %5 : vector<512x16xf32>
    %c0_7 = arith.constant 0 : index
    %c0_8 = arith.constant 0 : index
    %c1 = arith.constant 1 : index
    %c0_9 = arith.constant 0 : index
    %7 = vector.load %arg0[%c0_7, %c0_8, %c1, %c0_9] : memref<2x18x18x4xf32, #tpu.memory_space<vmem>>, vector<2x16x16x4xf32>
    %8 = vector.shape_cast %7 : vector<2x16x16x4xf32> to vector<512x4xf32>
    %c1_10 = arith.constant 1 : index
    %c0_11 = arith.constant 0 : index
    %c0_12 = arith.constant 0 : index
    %9 = vector.load %arg1[%c1_10, %c0_11, %c0_12] : memref<9x4x16xf32, #tpu.memory_space<vmem>>, vector<1x4x16xf32>
    %10 = vector.shape_cast %9 : vector<1x4x16xf32> to vector<4x16xf32>
    %cst_13 = arith.constant dense<0.000000e+00> : vector<512x16xf32>
    %11 = tpu.matmul %8, %10, %cst_13 {dimension_numbers = #tpu.dot_dimension_numbers<[1], [0], [0], [1], [0, 0, 1, 1], [], []>} : vector<512x4xf32>, vector<4x16xf32>, vector<512x16xf32> -> vector<512x16xf32>
    %12 = arith.addf %6, %11 : vector<512x16xf32>
    %c0_14 = arith.constant 0 : index
    %c0_15 = arith.constant 0 : index
    %c2 = arith.constant 2 : index
    %c0_16 = arith.constant 0 : index
    %13 = vector.load %arg0[%c0_14, %c0_15, %c2, %c0_16] : memref<2x18x18x4xf32, #tpu.memory_space<vmem>>, vector<2x16x16x4xf32>
    %14 = vector.shape_cast %13 : vector<2x16x16x4xf32> to vector<512x4xf32>
    %c2_17 = arith.constant 2 : index
    %c0_18 = arith.constant 0 : index
    %c0_19 = arith.constant 0 : index
    %15 = vector.load %arg1[%c2_17, %c0_18, %c0_19] : memref<9x4x16xf32, #tpu.memory_space<vmem>>, vector<1x4x16xf32>
    %16 = vector.shape_cast %15 : vector<1x4x16xf32> to vector<4x16xf32>
    %cst_20 = arith.constant dense<0.000000e+00> : vector<512x16xf32>
    %17 = tpu.matmul %14, %16, %cst_20 {dimension_numbers = #tpu.dot_dimension_numbers<[1], [0], [0], [1], [0, 0, 1, 1], [], []>} : vector<512x4xf32>, vector<4x16xf32>, vector<512x16xf32> -> vector<512x16xf32>
    %18 = arith.addf %12, %17 : vector<512x16xf32>
    %c0_21 = arith.constant 0 : index
    %c1_22 = arith.constant 1 : index
    %c0_23 = arith.constant 0 : index
    %c0_24 = arith.constant 0 : index
    %19 = vector.load %arg0[%c0_21, %c1_22, %c0_23, %c0_24] : memref<2x18x18x4xf32, #tpu.memory_space<vmem>>, vector<2x16x16x4xf32>
    %20 = vector.shape_cast %19 : vector<2x16x16x4xf32> to vector<512x4xf32>
    %c3 = arith.constant 3 : index
    %c0_25 = arith.constant 0 : index
    %c0_26 = arith.constant 0 : index
    %21 = vector.load %arg1[%c3, %c0_25, %c0_26] : memref<9x4x16xf32, #tpu.memory_space<vmem>>, vector<1x4x16xf32>
    %22 = vector.shape_cast %21 : vector<1x4x16xf32> to vector<4x16xf32>
    %cst_27 = arith.constant dense<0.000000e+00> : vector<512x16xf32>
    %23 = tpu.matmul %20, %22, %cst_27 {dimension_numbers = #tpu.dot_dimension_numbers<[1], [0], [0], [1], [0, 0, 1, 1], [], []>} : vector<512x4xf32>, vector<4x16xf32>, vector<512x16xf32> -> vector<512x16xf32>
    %24 = arith.addf %18, %23 : vector<512x16xf32>
    %c0_28 = arith.constant 0 : index
    %c1_29 = arith.constant 1 : index
    %c1_30 = arith.constant 1 : index
    %c0_31 = arith.constant 0 : index
    %25 = vector.load %arg0[%c0_28, %c1_29, %c1_30, %c0_31] : memref<2x18x18x4xf32, #tpu.memory_space<vmem>>, vector<2x16x16x4xf32>
    %26 = vector.shape_cast %25 : vector<2x16x16x4xf32> to vector<512x4xf32>
    %c4 = arith.constant 4 : index
    %c0_32 = arith.constant 0 : index
    %c0_33 = arith.constant 0 : index
    %27 = vector.load %arg1[%c4, %c0_32, %c0_33] : memref<9x4x16xf32, #tpu.memory_space<vmem>>, vector<1x4x16xf32>
    %28 = vector.shape_cast %27 : vector<1x4x16xf32> to vector<4x16xf32>
    %cst_34 = arith.constant dense<0.000000e+00> : vector<512x16xf32>
    %29 = tpu.matmul %26, %28, %cst_34 {dimension_numbers = #tpu.dot_dimension_numbers<[1], [0], [0], [1], [0, 0, 1, 1], [], []>} : vector<512x4xf32>, vector<4x16xf32>, vector<512x16xf32> -> vector<512x16xf32>
    %30 = arith.addf %24, %29 : vector<512x16xf32>
    %c0_35 = arith.constant 0 : index
    %c1_36 = arith.constant 1 : index
    %c2_37 = arith.constant 2 : index
    %c0_38 = arith.constant 0 : index
    %31 = vector.load %arg0[%c0_35, %c1_36, %c2_37, %c0_38] : memref<2x18x18x4xf32, #tpu.memory_space<vmem>>, vector<2x16x16x4xf32>
    %32 = vector.shape_cast %31 : vector<2x16x16x4xf32> to vector<512x4xf32>
    %c5 = arith.constant 5 : index
    %c0_39 = arith.constant 0 : index
    %c0_40 = arith.constant 0 : index
    %33 = vector.load %arg1[%c5, %c0_39, %c0_40] : memref<9x4x16xf32, #tpu.memory_space<vmem>>, vector<1x4x16xf32>
    %34 = vector.shape_cast %33 : vector<1x4x16xf32> to vector<4x16xf32>
    %cst_41 = arith.constant dense<0.000000e+00> : vector<512x16xf32>
    %35 = tpu.matmul %32, %34, %cst_41 {dimension_numbers = #tpu.dot_dimension_numbers<[1], [0], [0], [1], [0, 0, 1, 1], [], []>} : vector<512x4xf32>, vector<4x16xf32>, vector<512x16xf32> -> vector<512x16xf32>
    %36 = arith.addf %30, %35 : vector<512x16xf32>
    %c0_42 = arith.constant 0 : index
    %c2_43 = arith.constant 2 : index
    %c0_44 = arith.constant 0 : index
    %c0_45 = arith.constant 0 : index
    %37 = vector.load %arg0[%c0_42, %c2_43, %c0_44, %c0_45] : memref<2x18x18x4xf32, #tpu.memory_space<vmem>>, vector<2x16x16x4xf32>
    %38 = vector.shape_cast %37 : vector<2x16x16x4xf32> to vector<512x4xf32>
    %c6 = arith.constant 6 : index
    %c0_46 = arith.constant 0 : index
    %c0_47 = arith.constant 0 : index
    %39 = vector.load %arg1[%c6, %c0_46, %c0_47] : memref<9x4x16xf32, #tpu.memory_space<vmem>>, vector<1x4x16xf32>
    %40 = vector.shape_cast %39 : vector<1x4x16xf32> to vector<4x16xf32>
    %cst_48 = arith.constant dense<0.000000e+00> : vector<512x16xf32>
    %41 = tpu.matmul %38, %40, %cst_48 {dimension_numbers = #tpu.dot_dimension_numbers<[1], [0], [0], [1], [0, 0, 1, 1], [], []>} : vector<512x4xf32>, vector<4x16xf32>, vector<512x16xf32> -> vector<512x16xf32>
    %42 = arith.addf %36, %41 : vector<512x16xf32>
    %c0_49 = arith.constant 0 : index
    %c2_50 = arith.constant 2 : index
    %c1_51 = arith.constant 1 : index
    %c0_52 = arith.constant 0 : index
    %43 = vector.load %arg0[%c0_49, %c2_50, %c1_51, %c0_52] : memref<2x18x18x4xf32, #tpu.memory_space<vmem>>, vector<2x16x16x4xf32>
    %44 = vector.shape_cast %43 : vector<2x16x16x4xf32> to vector<512x4xf32>
    %c7 = arith.constant 7 : index
    %c0_53 = arith.constant 0 : index
    %c0_54 = arith.constant 0 : index
    %45 = vector.load %arg1[%c7, %c0_53, %c0_54] : memref<9x4x16xf32, #tpu.memory_space<vmem>>, vector<1x4x16xf32>
    %46 = vector.shape_cast %45 : vector<1x4x16xf32> to vector<4x16xf32>
    %cst_55 = arith.constant dense<0.000000e+00> : vector<512x16xf32>
    %47 = tpu.matmul %44, %46, %cst_55 {dimension_numbers = #tpu.dot_dimension_numbers<[1], [0], [0], [1], [0, 0, 1, 1], [], []>} : vector<512x4xf32>, vector<4x16xf32>, vector<512x16xf32> -> vector<512x16xf32>
    %48 = arith.addf %42, %47 : vector<512x16xf32>
    %c0_56 = arith.constant 0 : index
    %c2_57 = arith.constant 2 : index
    %c2_58 = arith.constant 2 : index
    %c0_59 = arith.constant 0 : index
    %49 = vector.load %arg0[%c0_56, %c2_57, %c2_58, %c0_59] : memref<2x18x18x4xf32, #tpu.memory_space<vmem>>, vector<2x16x16x4xf32>
    %50 = vector.shape_cast %49 : vector<2x16x16x4xf32> to vector<512x4xf32>
    %c8 = arith.constant 8 : index
    %c0_60 = arith.constant 0 : index
    %c0_61 = arith.constant 0 : index
    %51 = vector.load %arg1[%c8, %c0_60, %c0_61] : memref<9x4x16xf32, #tpu.memory_space<vmem>>, vector<1x4x16xf32>
    %52 = vector.shape_cast %51 : vector<1x4x16xf32> to vector<4x16xf32>
    %cst_62 = arith.constant dense<0.000000e+00> : vector<512x16xf32>
    %53 = tpu.matmul %50, %52, %cst_62 {dimension_numbers = #tpu.dot_dimension_numbers<[1], [0], [0], [1], [0, 0, 1, 1], [], []>} : vector<512x4xf32>, vector<4x16xf32>, vector<512x16xf32> -> vector<512x16xf32>
    %54 = arith.addf %48, %53 : vector<512x16xf32>
    %c0_63 = arith.constant 0 : index
    %c0_64 = arith.constant 0 : index
    %55 = vector.load %arg2[%c0_63, %c0_64] : memref<1x16xf32, #tpu.memory_space<vmem>>, vector<1x16xf32>
    %56 = vector.broadcast %55 : vector<1x16xf32> to vector<512x16xf32>
    %57 = arith.addf %54, %56 : vector<512x16xf32>
    %cst_65 = arith.constant 0.000000e+00 : f32
    %58 = vector.broadcast %cst_65 : f32 to vector<512x16xf32>
    %59 = arith.maximumf %57, %58 : vector<512x16xf32>
    %cst_66 = arith.constant 0.000000e+00 : f32
    %60 = vector.broadcast %cst_66 : f32 to vector<2x18x25x16xf32>
    %c0_67 = arith.constant 0 : index
    %c0_68 = arith.constant 0 : index
    %c0_69 = arith.constant 0 : index
    %c0_70 = arith.constant 0 : index
    %61 = vector.load %arg8[%c0_67, %c0_68, %c0_69, %c0_70] : memref<2x18x25x16xf32, #tpu.memory_space<vmem>>, vector<2x18x25x16xf32>
    tpu.vector_store %arg8[%c0_67, %c0_68, %c0_69, %c0_70], %60 {strides = array<i32>} : memref<2x18x25x16xf32, #tpu.memory_space<vmem>>, vector<2x18x25x16xf32>,
    %62 = vector.shape_cast %59 : vector<512x16xf32> to vector<2x16x16x16xf32>
    %c0_71 = arith.constant 0 : index
    %c1_72 = arith.constant 1 : index
    %c8_73 = arith.constant 8 : index
    %c0_74 = arith.constant 0 : index
    %63 = vector.load %arg8[%c0_71, %c1_72, %c8_73, %c0_74] : memref<2x18x25x16xf32, #tpu.memory_space<vmem>>, vector<2x16x16x16xf32>
    tpu.vector_store %arg8[%c0_71, %c1_72, %c8_73, %c0_74], %62 {strides = array<i32>} : memref<2x18x25x16xf32, #tpu.memory_space<vmem>>, vector<2x16x16x16xf32>,
    %cst_75 = arith.constant 0.000000e+00 : f32
    %64 = vector.broadcast %cst_75 : f32 to vector<512x32xf32>
    %c0_76 = arith.constant 0 : index
    %c0_77 = arith.constant 0 : index
    %c7_78 = arith.constant 7 : index
    %c0_79 = arith.constant 0 : index
    %65 = vector.load %arg8[%c0_76, %c0_77, %c7_78, %c0_79] : memref<2x18x25x16xf32, #tpu.memory_space<vmem>>, vector<2x16x16x16xf32>
    %66 = vector.shape_cast %65 : vector<2x16x16x16xf32> to vector<512x16xf32>
    %c0_80 = arith.constant 0 : index
    %c0_81 = arith.constant 0 : index
    %c0_82 = arith.constant 0 : index
    %67 = vector.load %arg3[%c0_80, %c0_81, %c0_82] : memref<9x16x32xf32, #tpu.memory_space<vmem>>, vector<1x16x32xf32>
    %68 = vector.shape_cast %67 : vector<1x16x32xf32> to vector<16x32xf32>
    %cst_83 = arith.constant dense<0.000000e+00> : vector<512x32xf32>
    %69 = tpu.matmul %66, %68, %cst_83 {dimension_numbers = #tpu.dot_dimension_numbers<[1], [0], [0], [1], [0, 0, 1, 1], [], []>} : vector<512x16xf32>, vector<16x32xf32>, vector<512x32xf32> -> vector<512x32xf32>
    %70 = arith.addf %64, %69 : vector<512x32xf32>
    %c0_84 = arith.constant 0 : index
    %c0_85 = arith.constant 0 : index
    %c8_86 = arith.constant 8 : index
    %c0_87 = arith.constant 0 : index
    %71 = vector.load %arg8[%c0_84, %c0_85, %c8_86, %c0_87] : memref<2x18x25x16xf32, #tpu.memory_space<vmem>>, vector<2x16x16x16xf32>
    %72 = vector.shape_cast %71 : vector<2x16x16x16xf32> to vector<512x16xf32>
    %c1_88 = arith.constant 1 : index
    %c0_89 = arith.constant 0 : index
    %c0_90 = arith.constant 0 : index
    %73 = vector.load %arg3[%c1_88, %c0_89, %c0_90] : memref<9x16x32xf32, #tpu.memory_space<vmem>>, vector<1x16x32xf32>
    %74 = vector.shape_cast %73 : vector<1x16x32xf32> to vector<16x32xf32>
    %cst_91 = arith.constant dense<0.000000e+00> : vector<512x32xf32>
    %75 = tpu.matmul %72, %74, %cst_91 {dimension_numbers = #tpu.dot_dimension_numbers<[1], [0], [0], [1], [0, 0, 1, 1], [], []>} : vector<512x16xf32>, vector<16x32xf32>, vector<512x32xf32> -> vector<512x32xf32>
    %76 = arith.addf %70, %75 : vector<512x32xf32>
    %c0_92 = arith.constant 0 : index
    %c0_93 = arith.constant 0 : index
    %c9 = arith.constant 9 : index
    %c0_94 = arith.constant 0 : index
    %77 = vector.load %arg8[%c0_92, %c0_93, %c9, %c0_94] : memref<2x18x25x16xf32, #tpu.memory_space<vmem>>, vector<2x16x16x16xf32>
    %78 = vector.shape_cast %77 : vector<2x16x16x16xf32> to vector<512x16xf32>
    %c2_95 = arith.constant 2 : index
    %c0_96 = arith.constant 0 : index
    %c0_97 = arith.constant 0 : index
    %79 = vector.load %arg3[%c2_95, %c0_96, %c0_97] : memref<9x16x32xf32, #tpu.memory_space<vmem>>, vector<1x16x32xf32>
    %80 = vector.shape_cast %79 : vector<1x16x32xf32> to vector<16x32xf32>
    %cst_98 = arith.constant dense<0.000000e+00> : vector<512x32xf32>
    %81 = tpu.matmul %78, %80, %cst_98 {dimension_numbers = #tpu.dot_dimension_numbers<[1], [0], [0], [1], [0, 0, 1, 1], [], []>} : vector<512x16xf32>, vector<16x32xf32>, vector<512x32xf32> -> vector<512x32xf32>
    %82 = arith.addf %76, %81 : vector<512x32xf32>
    %c0_99 = arith.constant 0 : index
    %c1_100 = arith.constant 1 : index
    %c7_101 = arith.constant 7 : index
    %c0_102 = arith.constant 0 : index
    %83 = vector.load %arg8[%c0_99, %c1_100, %c7_101, %c0_102] : memref<2x18x25x16xf32, #tpu.memory_space<vmem>>, vector<2x16x16x16xf32>
    %84 = vector.shape_cast %83 : vector<2x16x16x16xf32> to vector<512x16xf32>
    %c3_103 = arith.constant 3 : index
    %c0_104 = arith.constant 0 : index
    %c0_105 = arith.constant 0 : index
    %85 = vector.load %arg3[%c3_103, %c0_104, %c0_105] : memref<9x16x32xf32, #tpu.memory_space<vmem>>, vector<1x16x32xf32>
    %86 = vector.shape_cast %85 : vector<1x16x32xf32> to vector<16x32xf32>
    %cst_106 = arith.constant dense<0.000000e+00> : vector<512x32xf32>
    %87 = tpu.matmul %84, %86, %cst_106 {dimension_numbers = #tpu.dot_dimension_numbers<[1], [0], [0], [1], [0, 0, 1, 1], [], []>} : vector<512x16xf32>, vector<16x32xf32>, vector<512x32xf32> -> vector<512x32xf32>
    %88 = arith.addf %82, %87 : vector<512x32xf32>
    %c0_107 = arith.constant 0 : index
    %c1_108 = arith.constant 1 : index
    %c8_109 = arith.constant 8 : index
    %c0_110 = arith.constant 0 : index
    %89 = vector.load %arg8[%c0_107, %c1_108, %c8_109, %c0_110] : memref<2x18x25x16xf32, #tpu.memory_space<vmem>>, vector<2x16x16x16xf32>
    %90 = vector.shape_cast %89 : vector<2x16x16x16xf32> to vector<512x16xf32>
    %c4_111 = arith.constant 4 : index
    %c0_112 = arith.constant 0 : index
    %c0_113 = arith.constant 0 : index
    %91 = vector.load %arg3[%c4_111, %c0_112, %c0_113] : memref<9x16x32xf32, #tpu.memory_space<vmem>>, vector<1x16x32xf32>
    %92 = vector.shape_cast %91 : vector<1x16x32xf32> to vector<16x32xf32>
    %cst_114 = arith.constant dense<0.000000e+00> : vector<512x32xf32>
    %93 = tpu.matmul %90, %92, %cst_114 {dimension_numbers = #tpu.dot_dimension_numbers<[1], [0], [0], [1], [0, 0, 1, 1], [], []>} : vector<512x16xf32>, vector<16x32xf32>, vector<512x32xf32> -> vector<512x32xf32>
    %94 = arith.addf %88, %93 : vector<512x32xf32>
    %c0_115 = arith.constant 0 : index
    %c1_116 = arith.constant 1 : index
    %c9_117 = arith.constant 9 : index
    %c0_118 = arith.constant 0 : index
    %95 = vector.load %arg8[%c0_115, %c1_116, %c9_117, %c0_118] : memref<2x18x25x16xf32, #tpu.memory_space<vmem>>, vector<2x16x16x16xf32>
    %96 = vector.shape_cast %95 : vector<2x16x16x16xf32> to vector<512x16xf32>
    %c5_119 = arith.constant 5 : index
    %c0_120 = arith.constant 0 : index
    %c0_121 = arith.constant 0 : index
    %97 = vector.load %arg3[%c5_119, %c0_120, %c0_121] : memref<9x16x32xf32, #tpu.memory_space<vmem>>, vector<1x16x32xf32>
    %98 = vector.shape_cast %97 : vector<1x16x32xf32> to vector<16x32xf32>
    %cst_122 = arith.constant dense<0.000000e+00> : vector<512x32xf32>
    %99 = tpu.matmul %96, %98, %cst_122 {dimension_numbers = #tpu.dot_dimension_numbers<[1], [0], [0], [1], [0, 0, 1, 1], [], []>} : vector<512x16xf32>, vector<16x32xf32>, vector<512x32xf32> -> vector<512x32xf32>
    %100 = arith.addf %94, %99 : vector<512x32xf32>
    %c0_123 = arith.constant 0 : index
    %c2_124 = arith.constant 2 : index
    %c7_125 = arith.constant 7 : index
    %c0_126 = arith.constant 0 : index
    %101 = vector.load %arg8[%c0_123, %c2_124, %c7_125, %c0_126] : memref<2x18x25x16xf32, #tpu.memory_space<vmem>>, vector<2x16x16x16xf32>
    %102 = vector.shape_cast %101 : vector<2x16x16x16xf32> to vector<512x16xf32>
    %c6_127 = arith.constant 6 : index
    %c0_128 = arith.constant 0 : index
    %c0_129 = arith.constant 0 : index
    %103 = vector.load %arg3[%c6_127, %c0_128, %c0_129] : memref<9x16x32xf32, #tpu.memory_space<vmem>>, vector<1x16x32xf32>
    %104 = vector.shape_cast %103 : vector<1x16x32xf32> to vector<16x32xf32>
    %cst_130 = arith.constant dense<0.000000e+00> : vector<512x32xf32>
    %105 = tpu.matmul %102, %104, %cst_130 {dimension_numbers = #tpu.dot_dimension_numbers<[1], [0], [0], [1], [0, 0, 1, 1], [], []>} : vector<512x16xf32>, vector<16x32xf32>, vector<512x32xf32> -> vector<512x32xf32>
    %106 = arith.addf %100, %105 : vector<512x32xf32>
    %c0_131 = arith.constant 0 : index
    %c2_132 = arith.constant 2 : index
    %c8_133 = arith.constant 8 : index
    %c0_134 = arith.constant 0 : index
    %107 = vector.load %arg8[%c0_131, %c2_132, %c8_133, %c0_134] : memref<2x18x25x16xf32, #tpu.memory_space<vmem>>, vector<2x16x16x16xf32>
    %108 = vector.shape_cast %107 : vector<2x16x16x16xf32> to vector<512x16xf32>
    %c7_135 = arith.constant 7 : index
    %c0_136 = arith.constant 0 : index
    %c0_137 = arith.constant 0 : index
    %109 = vector.load %arg3[%c7_135, %c0_136, %c0_137] : memref<9x16x32xf32, #tpu.memory_space<vmem>>, vector<1x16x32xf32>
    %110 = vector.shape_cast %109 : vector<1x16x32xf32> to vector<16x32xf32>
    %cst_138 = arith.constant dense<0.000000e+00> : vector<512x32xf32>
    %111 = tpu.matmul %108, %110, %cst_138 {dimension_numbers = #tpu.dot_dimension_numbers<[1], [0], [0], [1], [0, 0, 1, 1], [], []>} : vector<512x16xf32>, vector<16x32xf32>, vector<512x32xf32> -> vector<512x32xf32>
    %112 = arith.addf %106, %111 : vector<512x32xf32>
    %c0_139 = arith.constant 0 : index
    %c2_140 = arith.constant 2 : index
    %c9_141 = arith.constant 9 : index
    %c0_142 = arith.constant 0 : index
    %113 = vector.load %arg8[%c0_139, %c2_140, %c9_141, %c0_142] : memref<2x18x25x16xf32, #tpu.memory_space<vmem>>, vector<2x16x16x16xf32>
    %114 = vector.shape_cast %113 : vector<2x16x16x16xf32> to vector<512x16xf32>
    %c8_143 = arith.constant 8 : index
    %c0_144 = arith.constant 0 : index
    %c0_145 = arith.constant 0 : index
    %115 = vector.load %arg3[%c8_143, %c0_144, %c0_145] : memref<9x16x32xf32, #tpu.memory_space<vmem>>, vector<1x16x32xf32>
    %116 = vector.shape_cast %115 : vector<1x16x32xf32> to vector<16x32xf32>
    %cst_146 = arith.constant dense<0.000000e+00> : vector<512x32xf32>
    %117 = tpu.matmul %114, %116, %cst_146 {dimension_numbers = #tpu.dot_dimension_numbers<[1], [0], [0], [1], [0, 0, 1, 1], [], []>} : vector<512x16xf32>, vector<16x32xf32>, vector<512x32xf32> -> vector<512x32xf32>
    %118 = arith.addf %112, %117 : vector<512x32xf32>
    %c0_147 = arith.constant 0 : index
    %c0_148 = arith.constant 0 : index
    %119 = vector.load %arg4[%c0_147, %c0_148] : memref<1x32xf32, #tpu.memory_space<vmem>>, vector<1x32xf32>
    %120 = vector.broadcast %119 : vector<1x32xf32> to vector<512x32xf32>
    %121 = arith.addf %118, %120 : vector<512x32xf32>
    %cst_149 = arith.constant 0.000000e+00 : f32
    %122 = vector.broadcast %cst_149 : f32 to vector<512x32xf32>
    %123 = arith.maximumf %121, %122 : vector<512x32xf32>
    %cst_150 = arith.constant 0.000000e+00 : f32
    %124 = vector.broadcast %cst_150 : f32 to vector<2x18x25x32xf32>
    %c0_151 = arith.constant 0 : index
    %c0_152 = arith.constant 0 : index
    %c0_153 = arith.constant 0 : index
    %c0_154 = arith.constant 0 : index
    %125 = vector.load %arg9[%c0_151, %c0_152, %c0_153, %c0_154] : memref<2x18x25x32xf32, #tpu.memory_space<vmem>>, vector<2x18x25x32xf32>
    tpu.vector_store %arg9[%c0_151, %c0_152, %c0_153, %c0_154], %124 {strides = array<i32>} : memref<2x18x25x32xf32, #tpu.memory_space<vmem>>, vector<2x18x25x32xf32>,
    %126 = vector.shape_cast %123 : vector<512x32xf32> to vector<2x16x16x32xf32>
    %c0_155 = arith.constant 0 : index
    %c1_156 = arith.constant 1 : index
    %c8_157 = arith.constant 8 : index
    %c0_158 = arith.constant 0 : index
    %127 = vector.load %arg9[%c0_155, %c1_156, %c8_157, %c0_158] : memref<2x18x25x32xf32, #tpu.memory_space<vmem>>, vector<2x16x16x32xf32>
    tpu.vector_store %arg9[%c0_155, %c1_156, %c8_157, %c0_158], %126 {strides = array<i32>} : memref<2x18x25x32xf32, #tpu.memory_space<vmem>>, vector<2x16x16x32xf32>,
    %cst_159 = arith.constant 0.000000e+00 : f32
    %128 = vector.broadcast %cst_159 : f32 to vector<512x64xf32>
    %c0_160 = arith.constant 0 : index
    %c0_161 = arith.constant 0 : index
    %c7_162 = arith.constant 7 : index
    %c0_163 = arith.constant 0 : index
    %129 = vector.load %arg9[%c0_160, %c0_161, %c7_162, %c0_163] : memref<2x18x25x32xf32, #tpu.memory_space<vmem>>, vector<2x16x16x32xf32>
    %130 = vector.shape_cast %129 : vector<2x16x16x32xf32> to vector<512x32xf32>
    %c0_164 = arith.constant 0 : index
    %c0_165 = arith.constant 0 : index
    %c0_166 = arith.constant 0 : index
    %131 = vector.load %arg5[%c0_164, %c0_165, %c0_166] : memref<9x32x64xf32, #tpu.memory_space<vmem>>, vector<1x32x64xf32>
    %132 = vector.shape_cast %131 : vector<1x32x64xf32> to vector<32x64xf32>
    %cst_167 = arith.constant dense<0.000000e+00> : vector<512x64xf32>
    %133 = tpu.matmul %130, %132, %cst_167 {dimension_numbers = #tpu.dot_dimension_numbers<[1], [0], [0], [1], [0, 0, 1, 1], [], []>} : vector<512x32xf32>, vector<32x64xf32>, vector<512x64xf32> -> vector<512x64xf32>
    %134 = arith.addf %128, %133 : vector<512x64xf32>
    %c0_168 = arith.constant 0 : index
    %c0_169 = arith.constant 0 : index
    %c8_170 = arith.constant 8 : index
    %c0_171 = arith.constant 0 : index
    %135 = vector.load %arg9[%c0_168, %c0_169, %c8_170, %c0_171] : memref<2x18x25x32xf32, #tpu.memory_space<vmem>>, vector<2x16x16x32xf32>
    %136 = vector.shape_cast %135 : vector<2x16x16x32xf32> to vector<512x32xf32>
    %c1_172 = arith.constant 1 : index
    %c0_173 = arith.constant 0 : index
    %c0_174 = arith.constant 0 : index
    %137 = vector.load %arg5[%c1_172, %c0_173, %c0_174] : memref<9x32x64xf32, #tpu.memory_space<vmem>>, vector<1x32x64xf32>
    %138 = vector.shape_cast %137 : vector<1x32x64xf32> to vector<32x64xf32>
    %cst_175 = arith.constant dense<0.000000e+00> : vector<512x64xf32>
    %139 = tpu.matmul %136, %138, %cst_175 {dimension_numbers = #tpu.dot_dimension_numbers<[1], [0], [0], [1], [0, 0, 1, 1], [], []>} : vector<512x32xf32>, vector<32x64xf32>, vector<512x64xf32> -> vector<512x64xf32>
    %140 = arith.addf %134, %139 : vector<512x64xf32>
    %c0_176 = arith.constant 0 : index
    %c0_177 = arith.constant 0 : index
    %c9_178 = arith.constant 9 : index
    %c0_179 = arith.constant 0 : index
    %141 = vector.load %arg9[%c0_176, %c0_177, %c9_178, %c0_179] : memref<2x18x25x32xf32, #tpu.memory_space<vmem>>, vector<2x16x16x32xf32>
    %142 = vector.shape_cast %141 : vector<2x16x16x32xf32> to vector<512x32xf32>
    %c2_180 = arith.constant 2 : index
    %c0_181 = arith.constant 0 : index
    %c0_182 = arith.constant 0 : index
    %143 = vector.load %arg5[%c2_180, %c0_181, %c0_182] : memref<9x32x64xf32, #tpu.memory_space<vmem>>, vector<1x32x64xf32>
    %144 = vector.shape_cast %143 : vector<1x32x64xf32> to vector<32x64xf32>
    %cst_183 = arith.constant dense<0.000000e+00> : vector<512x64xf32>
    %145 = tpu.matmul %142, %144, %cst_183 {dimension_numbers = #tpu.dot_dimension_numbers<[1], [0], [0], [1], [0, 0, 1, 1], [], []>} : vector<512x32xf32>, vector<32x64xf32>, vector<512x64xf32> -> vector<512x64xf32>
    %146 = arith.addf %140, %145 : vector<512x64xf32>
    %c0_184 = arith.constant 0 : index
    %c1_185 = arith.constant 1 : index
    %c7_186 = arith.constant 7 : index
    %c0_187 = arith.constant 0 : index
    %147 = vector.load %arg9[%c0_184, %c1_185, %c7_186, %c0_187] : memref<2x18x25x32xf32, #tpu.memory_space<vmem>>, vector<2x16x16x32xf32>
    %148 = vector.shape_cast %147 : vector<2x16x16x32xf32> to vector<512x32xf32>
    %c3_188 = arith.constant 3 : index
    %c0_189 = arith.constant 0 : index
    %c0_190 = arith.constant 0 : index
    %149 = vector.load %arg5[%c3_188, %c0_189, %c0_190] : memref<9x32x64xf32, #tpu.memory_space<vmem>>, vector<1x32x64xf32>
    %150 = vector.shape_cast %149 : vector<1x32x64xf32> to vector<32x64xf32>
    %cst_191 = arith.constant dense<0.000000e+00> : vector<512x64xf32>
    %151 = tpu.matmul %148, %150, %cst_191 {dimension_numbers = #tpu.dot_dimension_numbers<[1], [0], [0], [1], [0, 0, 1, 1], [], []>} : vector<512x32xf32>, vector<32x64xf32>, vector<512x64xf32> -> vector<512x64xf32>
    %152 = arith.addf %146, %151 : vector<512x64xf32>
    %c0_192 = arith.constant 0 : index
    %c1_193 = arith.constant 1 : index
    %c8_194 = arith.constant 8 : index
    %c0_195 = arith.constant 0 : index
    %153 = vector.load %arg9[%c0_192, %c1_193, %c8_194, %c0_195] : memref<2x18x25x32xf32, #tpu.memory_space<vmem>>, vector<2x16x16x32xf32>
    %154 = vector.shape_cast %153 : vector<2x16x16x32xf32> to vector<512x32xf32>
    %c4_196 = arith.constant 4 : index
    %c0_197 = arith.constant 0 : index
    %c0_198 = arith.constant 0 : index
    %155 = vector.load %arg5[%c4_196, %c0_197, %c0_198] : memref<9x32x64xf32, #tpu.memory_space<vmem>>, vector<1x32x64xf32>
    %156 = vector.shape_cast %155 : vector<1x32x64xf32> to vector<32x64xf32>
    %cst_199 = arith.constant dense<0.000000e+00> : vector<512x64xf32>
    %157 = tpu.matmul %154, %156, %cst_199 {dimension_numbers = #tpu.dot_dimension_numbers<[1], [0], [0], [1], [0, 0, 1, 1], [], []>} : vector<512x32xf32>, vector<32x64xf32>, vector<512x64xf32> -> vector<512x64xf32>
    %158 = arith.addf %152, %157 : vector<512x64xf32>
    %c0_200 = arith.constant 0 : index
    %c1_201 = arith.constant 1 : index
    %c9_202 = arith.constant 9 : index
    %c0_203 = arith.constant 0 : index
    %159 = vector.load %arg9[%c0_200, %c1_201, %c9_202, %c0_203] : memref<2x18x25x32xf32, #tpu.memory_space<vmem>>, vector<2x16x16x32xf32>
    %160 = vector.shape_cast %159 : vector<2x16x16x32xf32> to vector<512x32xf32>
    %c5_204 = arith.constant 5 : index
    %c0_205 = arith.constant 0 : index
    %c0_206 = arith.constant 0 : index
    %161 = vector.load %arg5[%c5_204, %c0_205, %c0_206] : memref<9x32x64xf32, #tpu.memory_space<vmem>>, vector<1x32x64xf32>
    %162 = vector.shape_cast %161 : vector<1x32x64xf32> to vector<32x64xf32>
    %cst_207 = arith.constant dense<0.000000e+00> : vector<512x64xf32>
    %163 = tpu.matmul %160, %162, %cst_207 {dimension_numbers = #tpu.dot_dimension_numbers<[1], [0], [0], [1], [0, 0, 1, 1], [], []>} : vector<512x32xf32>, vector<32x64xf32>, vector<512x64xf32> -> vector<512x64xf32>
    %164 = arith.addf %158, %163 : vector<512x64xf32>
    %c0_208 = arith.constant 0 : index
    %c2_209 = arith.constant 2 : index
    %c7_210 = arith.constant 7 : index
    %c0_211 = arith.constant 0 : index
    %165 = vector.load %arg9[%c0_208, %c2_209, %c7_210, %c0_211] : memref<2x18x25x32xf32, #tpu.memory_space<vmem>>, vector<2x16x16x32xf32>
    %166 = vector.shape_cast %165 : vector<2x16x16x32xf32> to vector<512x32xf32>
    %c6_212 = arith.constant 6 : index
    %c0_213 = arith.constant 0 : index
    %c0_214 = arith.constant 0 : index
    %167 = vector.load %arg5[%c6_212, %c0_213, %c0_214] : memref<9x32x64xf32, #tpu.memory_space<vmem>>, vector<1x32x64xf32>
    %168 = vector.shape_cast %167 : vector<1x32x64xf32> to vector<32x64xf32>
    %cst_215 = arith.constant dense<0.000000e+00> : vector<512x64xf32>
    %169 = tpu.matmul %166, %168, %cst_215 {dimension_numbers = #tpu.dot_dimension_numbers<[1], [0], [0], [1], [0, 0, 1, 1], [], []>} : vector<512x32xf32>, vector<32x64xf32>, vector<512x64xf32> -> vector<512x64xf32>
    %170 = arith.addf %164, %169 : vector<512x64xf32>
    %c0_216 = arith.constant 0 : index
    %c2_217 = arith.constant 2 : index
    %c8_218 = arith.constant 8 : index
    %c0_219 = arith.constant 0 : index
    %171 = vector.load %arg9[%c0_216, %c2_217, %c8_218, %c0_219] : memref<2x18x25x32xf32, #tpu.memory_space<vmem>>, vector<2x16x16x32xf32>
    %172 = vector.shape_cast %171 : vector<2x16x16x32xf32> to vector<512x32xf32>
    %c7_220 = arith.constant 7 : index
    %c0_221 = arith.constant 0 : index
    %c0_222 = arith.constant 0 : index
    %173 = vector.load %arg5[%c7_220, %c0_221, %c0_222] : memref<9x32x64xf32, #tpu.memory_space<vmem>>, vector<1x32x64xf32>
    %174 = vector.shape_cast %173 : vector<1x32x64xf32> to vector<32x64xf32>
    %cst_223 = arith.constant dense<0.000000e+00> : vector<512x64xf32>
    %175 = tpu.matmul %172, %174, %cst_223 {dimension_numbers = #tpu.dot_dimension_numbers<[1], [0], [0], [1], [0, 0, 1, 1], [], []>} : vector<512x32xf32>, vector<32x64xf32>, vector<512x64xf32> -> vector<512x64xf32>
    %176 = arith.addf %170, %175 : vector<512x64xf32>
    %c0_224 = arith.constant 0 : index
    %c2_225 = arith.constant 2 : index
    %c9_226 = arith.constant 9 : index
    %c0_227 = arith.constant 0 : index
    %177 = vector.load %arg9[%c0_224, %c2_225, %c9_226, %c0_227] : memref<2x18x25x32xf32, #tpu.memory_space<vmem>>, vector<2x16x16x32xf32>
    %178 = vector.shape_cast %177 : vector<2x16x16x32xf32> to vector<512x32xf32>
    %c8_228 = arith.constant 8 : index
    %c0_229 = arith.constant 0 : index
    %c0_230 = arith.constant 0 : index
    %179 = vector.load %arg5[%c8_228, %c0_229, %c0_230] : memref<9x32x64xf32, #tpu.memory_space<vmem>>, vector<1x32x64xf32>
    %180 = vector.shape_cast %179 : vector<1x32x64xf32> to vector<32x64xf32>
    %cst_231 = arith.constant dense<0.000000e+00> : vector<512x64xf32>
    %181 = tpu.matmul %178, %180, %cst_231 {dimension_numbers = #tpu.dot_dimension_numbers<[1], [0], [0], [1], [0, 0, 1, 1], [], []>} : vector<512x32xf32>, vector<32x64xf32>, vector<512x64xf32> -> vector<512x64xf32>
    %182 = arith.addf %176, %181 : vector<512x64xf32>
    %c0_232 = arith.constant 0 : index
    %c0_233 = arith.constant 0 : index
    %183 = vector.load %arg6[%c0_232, %c0_233] : memref<1x64xf32, #tpu.memory_space<vmem>>, vector<1x64xf32>
    %184 = vector.broadcast %183 : vector<1x64xf32> to vector<512x64xf32>
    %185 = arith.addf %182, %184 : vector<512x64xf32>
    %cst_234 = arith.constant 0.000000e+00 : f32
    %186 = vector.broadcast %cst_234 : f32 to vector<512x64xf32>
    %187 = arith.maximumf %185, %186 : vector<512x64xf32>
    %c0_235 = arith.constant 0 : index
    %c0_236 = arith.constant 0 : index
    %188 = vector.load %arg7[%c0_235, %c0_236] : memref<512x64xf32, #tpu.memory_space<vmem>>, vector<512x64xf32>
    tpu.vector_store %arg7[%c0_235, %c0_236], %187 {strides = array<i32>} : memref<512x64xf32, #tpu.memory_space<vmem>>, vector<512x64xf32>,
    return
  }
}

module attributes {stable_mosaic.version = 11 : i64} {
  func.func @_fc_fused_kernel(%arg0: i32, %arg1: memref<2x2048xf32, #tpu.memory_space<vmem>>, %arg2: memref<2048x64xf32, #tpu.memory_space<vmem>>, %arg3: memref<1x64xf32, #tpu.memory_space<vmem>>, %arg4: memref<2x64xf32, #tpu.memory_space<vmem>>, %arg5: memref<2x64xf32, #tpu.memory_space<vmem>>) attributes {dimension_semantics = [#tpu.dimension_semantics<arbitrary>], iteration_bounds = array<i64: 8>, scalar_prefetch = 0 : i64, scratch_operands = 1 : i64, tpu.core_type = #tpu.core_type<tc>, window_params = [{transform_indices = @transform_0, window_bounds = array<i64: 2, 2048>}, {transform_indices = @transform_1, window_bounds = array<i64: 2048, 64>}, {pipeline_mode = #tpu.pipeline_mode<synchronous>, transform_indices = @transform_2, window_bounds = array<i64: 1, 64>}, {pipeline_mode = #tpu.pipeline_mode<synchronous>, transform_indices = @transform_3, window_bounds = array<i64: 2, 64>}]} {
    %c0_i32 = arith.constant 0 : i32
    %0 = arith.cmpi eq, %arg0, %c0_i32 : i32
    %1 = arith.extui %0 : i1 to i32
    %c0_i32_0 = arith.constant 0 : i32
    %2 = arith.cmpi ne, %1, %c0_i32_0 : i32
    scf.if %2 {
      %cst_9 = arith.constant 0.000000e+00 : f32
      %12 = vector.broadcast %cst_9 : f32 to vector<2x64xf32>
      %c0_10 = arith.constant 0 : index
      %c0_11 = arith.constant 0 : index
      %13 = vector.load %arg5[%c0_10, %c0_11] : memref<2x64xf32, #tpu.memory_space<vmem>>, vector<2x64xf32>
      tpu.vector_store %arg5[%c0_10, %c0_11], %12 {strides = array<i32>} : memref<2x64xf32, #tpu.memory_space<vmem>>, vector<2x64xf32>,
    } else {
    }
    %c0 = arith.constant 0 : index
    %c0_1 = arith.constant 0 : index
    %3 = vector.load %arg5[%c0, %c0_1] : memref<2x64xf32, #tpu.memory_space<vmem>>, vector<2x64xf32>
    %c0_2 = arith.constant 0 : index
    %c0_3 = arith.constant 0 : index
    %4 = vector.load %arg1[%c0_2, %c0_3] : memref<2x2048xf32, #tpu.memory_space<vmem>>, vector<2x2048xf32>
    %c0_4 = arith.constant 0 : index
    %c0_5 = arith.constant 0 : index
    %5 = vector.load %arg2[%c0_4, %c0_5] : memref<2048x64xf32, #tpu.memory_space<vmem>>, vector<2048x64xf32>
    %cst = arith.constant dense<0.000000e+00> : vector<2x64xf32>
    %6 = tpu.matmul %4, %5, %cst {dimension_numbers = #tpu.dot_dimension_numbers<[1], [0], [0], [1], [0, 0, 1, 1], [], []>} : vector<2x2048xf32>, vector<2048x64xf32>, vector<2x64xf32> -> vector<2x64xf32>
    %7 = arith.addf %3, %6 : vector<2x64xf32>
    %c0_6 = arith.constant 0 : index
    %c0_7 = arith.constant 0 : index
    %8 = vector.load %arg5[%c0_6, %c0_7] : memref<2x64xf32, #tpu.memory_space<vmem>>, vector<2x64xf32>
    tpu.vector_store %arg5[%c0_6, %c0_7], %7 {strides = array<i32>} : memref<2x64xf32, #tpu.memory_space<vmem>>, vector<2x64xf32>,
    %c7_i32 = arith.constant 7 : i32
    %9 = arith.cmpi eq, %arg0, %c7_i32 : i32
    %10 = arith.extui %9 : i1 to i32
    %c0_i32_8 = arith.constant 0 : i32
    %11 = arith.cmpi ne, %10, %c0_i32_8 : i32
    scf.if %11 {
      %c0_9 = arith.constant 0 : index
      %c0_10 = arith.constant 0 : index
      %12 = vector.load %arg5[%c0_9, %c0_10] : memref<2x64xf32, #tpu.memory_space<vmem>>, vector<2x64xf32>
      %c0_11 = arith.constant 0 : index
      %c0_12 = arith.constant 0 : index
      %13 = vector.load %arg3[%c0_11, %c0_12] : memref<1x64xf32, #tpu.memory_space<vmem>>, vector<1x64xf32>
      %14 = vector.broadcast %13 : vector<1x64xf32> to vector<2x64xf32>
      %15 = arith.addf %12, %14 : vector<2x64xf32>
      %c0_13 = arith.constant 0 : index
      %c0_14 = arith.constant 0 : index
      %16 = vector.load %arg4[%c0_13, %c0_14] : memref<2x64xf32, #tpu.memory_space<vmem>>, vector<2x64xf32>
      tpu.vector_store %arg4[%c0_13, %c0_14], %15 {strides = array<i32>} : memref<2x64xf32, #tpu.memory_space<vmem>>, vector<2x64xf32>,
    } else {
    }
    return
  }
  func.func @transform_0(%arg0: i32) -> (i32, i32) {
    %c0_i32 = arith.constant 0 : i32
    %c0_i32_0 = arith.constant 0 : i32
    return %c0_i32, %arg0 : i32, i32
  }
  func.func @transform_1(%arg0: i32) -> (i32, i32) {
    %c0_i32 = arith.constant 0 : i32
    %c0_i32_0 = arith.constant 0 : i32
    return %arg0, %c0_i32 : i32, i32
  }
  func.func @transform_2(%arg0: i32) -> (i32, i32) {
    %c0_i32 = arith.constant 0 : i32
    %c0_i32_0 = arith.constant 0 : i32
    %c0_i32_1 = arith.constant 0 : i32
    return %c0_i32, %c0_i32_0 : i32, i32
  }
  func.func @transform_3(%arg0: i32) -> (i32, i32) {
    %c0_i32 = arith.constant 0 : i32
    %c0_i32_0 = arith.constant 0 : i32
    %c0_i32_1 = arith.constant 0 : i32
    return %c0_i32, %c0_i32_0 : i32, i32
  }
}

</mosaic_0001>

<bundles_post_ra>
// kernel: conv_encoder_forward.3
= control target key start
LH: loop header
LB: loop body
LE: loop exit
PB: predicated region body
PF: predicated region fallthrough
CT: control target
= control target key end

     0   :  { %s1745_s12 = smov 0   ;;  %s2078_s0 = inlined_call_operand.vmem [shape: f32[2,16384], index: 0, kind: input, shape index: {}]   ;;  %s2079_s1 = inlined_call_operand.vmem [shape: f32[16384,64], index: 1, kind: input, shape index: {}]   ;;  %s2080_s2 = inlined_call_operand.vmem [shape: f32[1,64], index: 2, kind: input, shape index: {}]   ;;  %s2081_s3 = inlined_call_operand.vmem [shape: f32[2,64], index: 3, kind: output, shape index: {}]  }
   0x1 LB: > { %s1751_s13 = sadd.s32 4294967295, %s1721_s12   ;;  %p1155_p0 = scmp.ge.s32.totalorder %s1721_s12, 1  ;;  %s1721_s12 = sphi %s1745_s12, %s13_s12  }
   0x2   : > { %p144_p1 = scmp.lt.s32.totalorder %s1721_s12, 9 }
   0x4   : > { %p145_p2 = pnand %p1155_p0, %p144_p1 }
   0x5   : > { %s1156_s14 = sshll.u32 (!%p145_p2), %s1751_s13, 4  ;;  %s1158_s15 = sshll.u32 (!%p145_p2), %s1751_s13, 8 }
   0x6   : > { %148 = sbr.rel (%p145_p2) target bundleno = 387 (0x183), region = 32  ;;  %p169_p3 = scmp.lt.s32.totalorder (!%p145_p2), %s1156_s14, 127 }
   0x7   : > { %p175_p4 = scmp.lt.s32.totalorder (!%p145_p2), %s1158_s15, 2047  ;;  %p1160_p5 = scmp.ne.s32.totalorder (!%p145_p2), %s1751_s13, 0 }
   0xd   : > { %s2083_s14 = smov (!%p169_p3, %s1156_s14), 127  ;;  %s2085_s15 = smov (!%p175_p4, %s1158_s15), 2047 }
   0xe   : > { %s1157_s16 = sshll.u32 %s2083_s14, 1  ;;  %s1159_s20 = sshll.u32 %s2085_s15, 3  ;;  %vm184_vm0 = vcmask (!%p1160_p5), 517120   ;;  %v1723_v0 = vmov (!%p1160_p5), 0.0  }
   0xf   : > { %s1760_s19 = scalar_lea.vmem %s2078_s0, %s1157_s16  ;;  %s1765_s23 = scalar_lea.vmem %s2079_s1, %s1159_s20  ;;  %185 = vst.msk [vmem:[#allocation2] sm:$0x3] (!%p1160_p5), %vm184_vm0, %v1723_v0 }
  0x10   : > { %183 = sbr.rel (%p1160_p5) target bundleno = 23 (0x17), region = 36 }
  0x17 PF: > { %v207_v1 = vld [vmem:[%s1765_s23 + $0x80] sm:$0xff]  ;;  %v208_v2 = vld [vmem:[%s1765_s23 + $0x88] sm:$0xff]  ;;  %v209_v12 = vld [vmem:[%s1765_s23 + $0x90] sm:$0xff]  ;;  %v1724_v48 = vmov 1983009808   ;;  %v455_v50 = vlaneseq  ;;  %vm1096_vm1 = vcmask 517120  }
  0x18   : > { %v239_v3 = vld [vmem:[%s1765_s23 + $0x180] sm:$0xff]  ;;  %v1445_v4 = vpack.c.bf16 %v208_v2, %v207_v1  ;;  %v240_v5 = vld [vmem:[%s1765_s23 + $0x188] sm:$0xff]  ;;  %v210_v14 = vld [vmem:[%s1765_s23 + $0x98] sm:$0xff]  ;;  %v453_v49 = vunpack.c.l.s4 %v1724_v48  ;;  %p1161_p6 = scmp.ne.s32.totalorder %s1751_s13, 7 }
  0x19   : > { %v191_v6 = vld [vmem:[%s1765_s23] sm:$0xff]  ;;  %v192_v7 = vld [vmem:[%s1765_s23 + $0x8] sm:$0xff]  ;;  %v1477_v8 = vpack.c.bf16 %v240_v5, %v239_v3  ;;  %v241_v15 = vld [vmem:[%s1765_s23 + $0x190] sm:$0xff]  ;;  %v1449_v17 = vpack.c.bf16 %v210_v14, %v209_v12  ;;  %v456_v1 = vshrl.u32 %v455_v50, 7 }
  0x1a   : > { %v1447_v9 = vpack.c.bf16 %v192_v7, %v191_v6  ;;  %v223_v10 = vld [vmem:[%s1765_s23 + $0x100] sm:$0xff]  ;;  %v224_v11 = vld [vmem:[%s1765_s23 + $0x108] sm:$0xff]  ;;  %1446 = vmatprep.subr.bf16.mxu0 %v1445_v4  ;;  %v242_v16 = vld [vmem:[%s1765_s23 + $0x198] sm:$0xff]  ;;  %v454_v0 = vunpack.c.0.s8 %v453_v49 }
  0x1b   : > { %v1479_v13 = vpack.c.bf16 %v224_v11, %v223_v10  ;;  %1478 = vmatprep.subr.bf16.mxu1 %v1477_v8  ;;  %v1481_v18 = vpack.c.bf16 %v242_v16, %v241_v15  ;;  %v193_v19 = vld [vmem:[%s1765_s23 + $0x10] sm:$0xff]  ;;  %v194_v20 = vld [vmem:[%s1765_s23 + $0x18] sm:$0xff]  ;;  %v211_v24 = vld [vmem:[%s1765_s23 + $0xa0] sm:$0xff] }
  0x1c   : > { %1448 = vmatpush3.bf16.msra.mxu0 %v1447_v9  ;;  %v225_v21 = vld [vmem:[%s1765_s23 + $0x110] sm:$0xff]  ;;  %v1451_v22 = vpack.c.bf16 %v194_v20, %v193_v19  ;;  %v226_v23 = vld [vmem:[%s1765_s23 + $0x118] sm:$0xff]  ;;  %v212_v25 = vld [vmem:[%s1765_s23 + $0xa8] sm:$0xff]  ;;  %v1818_v14 = vsub.s32 %v454_v0, %v456_v1 }
  0x1d   : > { %1480 = vmatpush3.bf16.msra.mxu1 %v1479_v13  ;;  %1450 = vmatprep.subr.bf16.mxu0 %v1449_v17  ;;  %v1483_v26 = vpack.c.bf16 %v226_v23, %v225_v21  ;;  %v1453_v27 = vpack.c.bf16 %v212_v25, %v211_v24  ;;  %v243_v28 = vld [vmem:[%s1765_s23 + $0x1a0] sm:$0xff]  ;;  %v244_v29 = vld [vmem:[%s1765_s23 + $0x1a8] sm:$0xff]  ;;  %v213_v36 = vld [vmem:[%s1765_s23 + $0xb0] sm:$0xff] }
  0x1e   : > { %1482 = vmatprep.subr.bf16.mxu1 %v1481_v18  ;;  %v195_v30 = vld [vmem:[%s1765_s23 + $0x20] sm:$0xff]  ;;  %v1485_v31 = vpack.c.bf16 %v244_v29, %v243_v28  ;;  %v196_v32 = vld [vmem:[%s1765_s23 + $0x28] sm:$0xff]  ;;  %v214_v37 = vld [vmem:[%s1765_s23 + $0xb8] sm:$0xff] }
  0x1f   : > { %v227_v33 = vld [vmem:[%s1765_s23 + $0x120] sm:$0xff]  ;;  %v228_v34 = vld [vmem:[%s1765_s23 + $0x128] sm:$0xff]  ;;  %v1455_v35 = vpack.c.bf16 %v196_v32, %v195_v30  ;;  %v245_v38 = vld [vmem:[%s1765_s23 + $0x1b0] sm:$0xff]  ;;  %v1457_v40 = vpack.c.bf16 %v214_v37, %v213_v36 }
  0x20   : > { %1452 = vmatpush3.bf16.msra.mxu0 %v1451_v22  ;;  %v1487_v39 = vpack.c.bf16 %v228_v34, %v227_v33  ;;  %v246_v41 = vld [vmem:[%s1765_s23 + $0x1b8] sm:$0xff]  ;;  %v197_v42 = vld [vmem:[%s1765_s23 + $0x30] sm:$0xff]  ;;  %v215_v47 = vld [vmem:[%s1765_s23 + $0xc0] sm:$0xff] }
  0x21   : > { %1484 = vmatpush3.bf16.msra.mxu1 %v1483_v26  ;;  %1454 = vmatprep.subr.bf16.mxu0 %v1453_v27  ;;  %v198_v43 = vld [vmem:[%s1765_s23 + $0x38] sm:$0xff]  ;;  %v1489_v44 = vpack.c.bf16 %v246_v41, %v245_v38  ;;  %v229_v45 = vld [vmem:[%s1765_s23 + $0x130] sm:$0xff]  ;;  %v216_v51 = vld [vmem:[%s1765_s23 + $0xc8] sm:$0xff] }
  0x22   : > { %1486 = vmatprep.subr.bf16.mxu1 %v1485_v31  ;;  %v230_v46 = vld [vmem:[%s1765_s23 + $0x138] sm:$0xff]  ;;  %v247_v52 = vld [vmem:[%s1765_s23 + $0x1c0] sm:$0xff]  ;;  %v248_v53 = vld [vmem:[%s1765_s23 + $0x1c8] sm:$0xff]  ;;  %v1459_v54 = vpack.c.bf16 %v198_v43, %v197_v42  ;;  %v1461_v56 = vpack.c.bf16 %v216_v51, %v215_v47 }
  0x23   : > { %v1491_v55 = vpack.c.bf16 %v230_v46, %v229_v45  ;;  %v199_v57 = vld [vmem:[%s1765_s23 + $0x40] sm:$0xff]  ;;  %v200_v58 = vld [vmem:[%s1765_s23 + $0x48] sm:$0xff]  ;;  %v1493_v60 = vpack.c.bf16 %v248_v53, %v247_v52  ;;  %v217_v62 = vld [vmem:[%s1765_s23 + $0xd0] sm:$0xff] }
  0x24   : > { %1456 = vmatpush3.bf16.msra.mxu0 %v1455_v35  ;;  %v231_v59 = vld [vmem:[%s1765_s23 + $0x140] sm:$0xff]  ;;  %v232_v61 = vld [vmem:[%s1765_s23 + $0x148] sm:$0xff]  ;;  %v218_v63 = vld [vmem:[%s1765_s23 + $0xd8] sm:$0xff]  ;;  %v1463_v4 = vpack.c.bf16 %v200_v58, %v199_v57 }
  0x25   : > { %1488 = vmatpush3.bf16.msra.mxu1 %v1487_v39  ;;  %1458 = vmatprep.subr.bf16.mxu0 %v1457_v40  ;;  %v249_v2 = vld [vmem:[%s1765_s23 + $0x1d0] sm:$0xff]  ;;  %v250_v3 = vld [vmem:[%s1765_s23 + $0x1d8] sm:$0xff]  ;;  %v1495_v5 = vpack.c.bf16 %v232_v61, %v231_v59  ;;  %v1465_v6 = vpack.c.bf16 %v218_v63, %v217_v62  ;;  %v219_v12 = vld [vmem:[%s1765_s23 + $0xe0] sm:$0xff] }
  0x26   : > { %1490 = vmatprep.subr.bf16.mxu1 %v1489_v44  ;;  %v201_v7 = vld [vmem:[%s1765_s23 + $0x50] sm:$0xff]  ;;  %v202_v8 = vld [vmem:[%s1765_s23 + $0x58] sm:$0xff]  ;;  %v1497_v10 = vpack.c.bf16 %v250_v3, %v249_v2  ;;  %v220_v13 = vld [vmem:[%s1765_s23 + $0xe8] sm:$0xff] }
  0x27   : > { %v233_v9 = vld [vmem:[%s1765_s23 + $0x150] sm:$0xff]  ;;  %v234_v11 = vld [vmem:[%s1765_s23 + $0x158] sm:$0xff]  ;;  %v251_v15 = vld [vmem:[%s1765_s23 + $0x1e0] sm:$0xff]  ;;  %v1467_v17 = vpack.c.bf16 %v202_v8, %v201_v7  ;;  %v1469_v20 = vpack.c.bf16 %v220_v13, %v219_v12 }
  0x28   : > { %1460 = vmatpush3.bf16.msra.mxu0 %v1459_v54  ;;  %v252_v16 = vld [vmem:[%s1765_s23 + $0x1e8] sm:$0xff]  ;;  %v203_v18 = vld [vmem:[%s1765_s23 + $0x60] sm:$0xff]  ;;  %v1499_v19 = vpack.c.bf16 %v234_v11, %v233_v9  ;;  %v221_v26 = vld [vmem:[%s1765_s23 + $0xf0] sm:$0xff] }
  0x29   : > { %1492 = vmatpush3.bf16.msra.mxu1 %v1491_v55  ;;  %1462 = vmatprep.subr.bf16.mxu0 %v1461_v56  ;;  %v204_v21 = vld [vmem:[%s1765_s23 + $0x68] sm:$0xff]  ;;  %v235_v22 = vld [vmem:[%s1765_s23 + $0x160] sm:$0xff]  ;;  %v1501_v24 = vpack.c.bf16 %v252_v16, %v251_v15  ;;  %v222_v27 = vld [vmem:[%s1765_s23 + $0xf8] sm:$0xff] }
  0x2a   : > { %1494 = vmatprep.subr.bf16.mxu1 %v1493_v60  ;;  %v187_v23 = vld [vmem:[%s1760_s19] sm:$0xff]  ;;  %v236_v25 = vld [vmem:[%s1765_s23 + $0x168] sm:$0xff]  ;;  %v253_v30 = vld [vmem:[%s1765_s23 + $0x1f0] sm:$0xff]  ;;  %v1471_v32 = vpack.c.bf16 %v204_v21, %v203_v18  ;;  %v1473_v36 = vpack.c.bf16 %v222_v27, %v221_v26 }
  0x2b   : > { %v458_v28 = vrot.slane %v187_v23, %v1818_v14  ;;  %v451_v29 = vcombine.high %v187_v23, %v187_v23  ;;  %v254_v31 = vld [vmem:[%s1765_s23 + $0x1f8] sm:$0xff]  ;;  %v1503_v35 = vpack.c.bf16 %v236_v25, %v235_v22  ;;  %v205_v37 = vld [vmem:[%s1765_s23 + $0x70] sm:$0xff]  ;;  %v271_v43 = vld [vmem:[%s1765_s23 + $0x280] sm:$0xff] }
  0x2c   : > { %1464 = vmatpush3.bf16.msra.mxu0 %v1463_v4  ;;  %v206_v38 = vld [vmem:[%s1765_s23 + $0x78] sm:$0xff]  ;;  %v237_v39 = vld [vmem:[%s1765_s23 + $0x170] sm:$0xff]  ;;  %v1505_v40 = vpack.c.bf16 %v254_v31, %v253_v30  ;;  %v272_v44 = vld [vmem:[%s1765_s23 + $0x288] sm:$0xff] }
  0x2d   : > { %1496 = vmatpush3.bf16.msra.mxu1 %v1495_v5  ;;  %1466 = vmatprep.subr.bf16.mxu0 %v1465_v6  ;;  %v466_v33 = vcombine.high %v458_v28, %v458_v28  ;;  %v465_v34 = vrot.slane %v451_v29, %v1818_v14  ;;  %v238_v41 = vld [vmem:[%s1765_s23 + $0x178] sm:$0xff]  ;;  %v303_v45 = vld [vmem:[%s1765_s23 + $0x380] sm:$0xff]  ;;  %v304_v46 = vld [vmem:[%s1765_s23 + $0x388] sm:$0xff]  ;;  %v1475_v47 = vpack.c.bf16 %v206_v38, %v205_v37 }
  0x2e   : > { %1498 = vmatprep.subr.bf16.mxu1 %v1497_v10  ;;  %v1507_v48 = vpack.c.bf16 %v238_v41, %v237_v39  ;;  %v1509_v49 = vpack.c.bf16 %v272_v44, %v271_v43  ;;  %v255_v50 = vld [vmem:[%s1765_s23 + $0x200] sm:$0xff]  ;;  %v256_v51 = vld [vmem:[%s1765_s23 + $0x208] sm:$0xff]  ;;  %v1541_v53 = vpack.c.bf16 %v304_v46, %v303_v45  ;;  %v273_v55 = vld [vmem:[%s1765_s23 + $0x290] sm:$0xff] }
  0x2f   : > { %599 = vmatprep.mubr.f32.mxu0 %v466_v33  ;;  %v467_v42 = vcombine.high %v465_v34, %v465_v34  ;;  %v287_v52 = vld [vmem:[%s1765_s23 + $0x300] sm:$0xff]  ;;  %v288_v54 = vld [vmem:[%s1765_s23 + $0x308] sm:$0xff]  ;;  %v274_v56 = vld [vmem:[%s1765_s23 + $0x298] sm:$0xff]  ;;  %v1511_v59 = vpack.c.bf16 %v256_v51, %v255_v50 }
  0x30   : > { %1468 = vmatpush3.bf16.msra.mxu0 %v1467_v17  ;;  %v305_v57 = vld [vmem:[%s1765_s23 + $0x390] sm:$0xff]  ;;  %v306_v58 = vld [vmem:[%s1765_s23 + $0x398] sm:$0xff]  ;;  %v1543_v60 = vpack.c.bf16 %v288_v54, %v287_v52  ;;  %v1513_v61 = vpack.c.bf16 %v274_v56, %v273_v55  ;;  %v275_v3 = vld [vmem:[%s1765_s23 + $0x2a0] sm:$0xff] }
  0x31   : > { %1500 = vmatpush3.bf16.msra.mxu1 %v1499_v19  ;;  %1470 = vmatprep.subr.bf16.mxu0 %v1469_v20  ;;  %v257_v62 = vld [vmem:[%s1765_s23 + $0x210] sm:$0xff]  ;;  %v258_v63 = vld [vmem:[%s1765_s23 + $0x218] sm:$0xff]  ;;  %v1545_v1 = vpack.c.bf16 %v306_v58, %v305_v57  ;;  %v276_v4 = vld [vmem:[%s1765_s23 + $0x2a8] sm:$0xff] }
  0x32   : > { %1502 = vmatprep.subr.bf16.mxu1 %v1501_v24  ;;  %669 = vmatprep.mubr.f32.mxu1 %v467_v42  ;;  %v289_v0 = vld [vmem:[%s1765_s23 + $0x310] sm:$0xff]  ;;  %v290_v2 = vld [vmem:[%s1765_s23 + $0x318] sm:$0xff]  ;;  %v307_v5 = vld [vmem:[%s1765_s23 + $0x3a0] sm:$0xff]  ;;  %v1515_v7 = vpack.c.bf16 %v258_v63, %v257_v62  ;;  %v1517_v9 = vpack.c.bf16 %v276_v4, %v275_v3 }
  0x33   : > { %v308_v6 = vld [vmem:[%s1765_s23 + $0x3a8] sm:$0xff]  ;;  %v1547_v8 = vpack.c.bf16 %v290_v2, %v289_v0  ;;  %v259_v10 = vld [vmem:[%s1765_s23 + $0x220] sm:$0xff]  ;;  %v277_v16 = vld [vmem:[%s1765_s23 + $0x2b0] sm:$0xff] }
  0x34   : > { %1472 = vmatpush3.bf16.msra.mxu0 %v1471_v32  ;;  %v260_v11 = vld [vmem:[%s1765_s23 + $0x228] sm:$0xff]  ;;  %v291_v12 = vld [vmem:[%s1765_s23 + $0x320] sm:$0xff]  ;;  %v1549_v13 = vpack.c.bf16 %v308_v6, %v307_v5  ;;  %v278_v17 = vld [vmem:[%s1765_s23 + $0x2b8] sm:$0xff] }
  0x35   : > { %1504 = vmatpush3.bf16.msra.mxu1 %v1503_v35  ;;  %1474 = vmatprep.subr.bf16.mxu0 %v1473_v36  ;;  %v292_v15 = vld [vmem:[%s1765_s23 + $0x328] sm:$0xff]  ;;  %v309_v18 = vld [vmem:[%s1765_s23 + $0x3b0] sm:$0xff]  ;;  %v310_v19 = vld [vmem:[%s1765_s23 + $0x3b8] sm:$0xff]  ;;  %v1519_v20 = vpack.c.bf16 %v260_v11, %v259_v10  ;;  %v1521_v22 = vpack.c.bf16 %v278_v17, %v277_v16 }
  0x36   : > { %1506 = vmatprep.subr.bf16.mxu1 %v1505_v40  ;;  %v1551_v21 = vpack.c.bf16 %v292_v15, %v291_v12  ;;  %v261_v23 = vld [vmem:[%s1765_s23 + $0x230] sm:$0xff]  ;;  %v262_v24 = vld [vmem:[%s1765_s23 + $0x238] sm:$0xff]  ;;  %v1553_v26 = vpack.c.bf16 %v310_v19, %v309_v18  ;;  %v280_v29 = vld [vmem:[%s1765_s23 + $0x2c8] sm:$0xff] }
  0x37   : > { %v293_v25 = vld [vmem:[%s1765_s23 + $0x330] sm:$0xff]  ;;  %v294_v27 = vld [vmem:[%s1765_s23 + $0x338] sm:$0xff]  ;;  %v311_v30 = vld [vmem:[%s1765_s23 + $0x3c0] sm:$0xff]  ;;  %v1523_v33 = vpack.c.bf16 %v262_v24, %v261_v23 }
  0x38   : > { %1476 = vmatpush3.bf16.msra.mxu0 %v1475_v47  ;;  %v312_v31 = vld [vmem:[%s1765_s23 + $0x3c8] sm:$0xff]  ;;  %v1555_v36 = vpack.c.bf16 %v294_v27, %v293_v25  ;;  %v263_v38 = vld [vmem:[%s1765_s23 + $0x240] sm:$0xff]  ;;  %v281_v43 = vld [vmem:[%s1765_s23 + $0x2d0] sm:$0xff] }
  0x39   : > { %1508 = vmatpush3.bf16.msra.mxu1 %v1507_v48  ;;  %1510 = vmatprep.subr.bf16.mxu0 %v1509_v49  ;;  %v188_v32 = vld [vmem:[%s1760_s19 + $0x8] sm:$0xff]  ;;  %v295_v40 = vld [vmem:[%s1765_s23 + $0x340] sm:$0xff]  ;;  %v1557_v41 = vpack.c.bf16 %v312_v31, %v311_v30  ;;  %v282_v44 = vld [vmem:[%s1765_s23 + $0x2d8] sm:$0xff] }
  0x3a   : > { %1542 = vmatprep.subr.bf16.mxu1 %v1541_v53  ;;  %v468_v35 = vcombine.high %v188_v32, %v188_v32  ;;  %v264_v39 = vld [vmem:[%s1765_s23 + $0x248] sm:$0xff]  ;;  %v313_v47 = vld [vmem:[%s1765_s23 + $0x3d0] sm:$0xff]  ;;  %v314_v48 = vld [vmem:[%s1765_s23 + $0x3d8] sm:$0xff]  ;;  %v1529_v52 = vpack.c.bf16 %v282_v44, %v281_v43 }
  0x3b   : > { %600 = vmatmul.mubr.f32.vlgmr.msra.gmra.mrb[0].mxu0 %v458_v28  ;;  %v279_v28 = vld [vmem:[%s1765_s23 + $0x2c0] sm:$0xff]  ;;  %v296_v42 = vld [vmem:[%s1765_s23 + $0x348] sm:$0xff]  ;;  %v1527_v49 = vpack.c.bf16 %v264_v39, %v263_v38  ;;  %v265_v53 = vld [vmem:[%s1765_s23 + $0x250] sm:$0xff]  ;;  %v1561_v56 = vpack.c.bf16 %v314_v48, %v313_v47 }
  0x3c   : > { %670 = vmatmul.mubr.f32.vlgmr.msra.gmra.mrb[0].mxu1 %v465_v34  ;;  %1512 = vmatpush3.bf16.msra.mxu0 %v1511_v59  ;;  %v1875_v34 = vrot.slane %v188_v32, %v1818_v14  ;;  %v1525_v37 = vpack.c.bf16 %v280_v29, %v279_v28  ;;  %v1886_v46 = vrot.slane %v468_v35, %v1818_v14  ;;  %v266_v54 = vld [vmem:[%s1765_s23 + $0x258] sm:$0xff]  ;;  %v297_v55 = vld [vmem:[%s1765_s23 + $0x350] sm:$0xff]  ;;  %v283_v58 = vld [vmem:[%s1765_s23 + $0x2e0] sm:$0xff] }
  0x3d   : > { %1544 = vmatpush3.bf16.msra.mxu1 %v1543_v60  ;;  %1514 = vmatprep.subr.bf16.mxu0 %v1513_v61  ;;  %v1559_v51 = vpack.c.bf16 %v296_v42, %v295_v40  ;;  %v298_v57 = vld [vmem:[%s1765_s23 + $0x358] sm:$0xff]  ;;  %v284_v59 = vld [vmem:[%s1765_s23 + $0x2e8] sm:$0xff]  ;;  %v315_v60 = vld [vmem:[%s1765_s23 + $0x3e0] sm:$0xff]  ;;  %v1531_v62 = vpack.c.bf16 %v266_v54, %v265_v53 }
  0x3e   : > { %1546 = vmatprep.subr.bf16.mxu1 %v1545_v1  ;;  %v483_v45 = vcombine.high %v1875_v34, %v1875_v34  ;;  %v484_v50 = vcombine.high %v1886_v46, %v1886_v46  ;;  %v316_v61 = vld [vmem:[%s1765_s23 + $0x3e8] sm:$0xff]  ;;  %v1563_v63 = vpack.c.bf16 %v298_v57, %v297_v55  ;;  %v1533_v0 = vpack.c.bf16 %v284_v59, %v283_v58  ;;  %v267_v1 = vld [vmem:[%s1765_s23 + $0x260] sm:$0xff]  ;;  %v285_v6 = vld [vmem:[%s1765_s23 + $0x2f0] sm:$0xff] }
  0x3f   : > { %v268_v2 = vld [vmem:[%s1765_s23 + $0x268] sm:$0xff]  ;;  %v299_v3 = vld [vmem:[%s1765_s23 + $0x360] sm:$0xff]  ;;  %v1565_v4 = vpack.c.bf16 %v316_v61, %v315_v60  ;;  %v270_v15 = vld [vmem:[%s1765_s23 + $0x278] sm:$0xff] }
  0x40   : > { %1516 = vmatpush3.bf16.msra.mxu0 %v1515_v7  ;;  %739 = vmatprep.mubr.f32.mxu0 %v483_v45  ;;  %v300_v5 = vld [vmem:[%s1765_s23 + $0x368] sm:$0xff]  ;;  %v286_v7 = vld [vmem:[%s1765_s23 + $0x2f8] sm:$0xff]  ;;  %v1535_v10 = vpack.c.bf16 %v268_v2, %v267_v1  ;;  %v301_v16 = vld [vmem:[%s1765_s23 + $0x370] sm:$0xff] }
  0x41   : > { %1548 = vmatpush3.bf16.msra.mxu1 %v1547_v8  ;;  %1518 = vmatprep.subr.bf16.mxu0 %v1517_v9  ;;  %v317_v8 = vld [vmem:[%s1765_s23 + $0x3f0] sm:$0xff]  ;;  %v318_v9 = vld [vmem:[%s1765_s23 + $0x3f8] sm:$0xff]  ;;  %v1567_v11 = vpack.c.bf16 %v300_v5, %v299_v3  ;;  %v1537_v12 = vpack.c.bf16 %v286_v7, %v285_v6  ;;  %v335_v19 = vld [vmem:[%s1765_s23 + $0x480] sm:$0xff] }
  0x42   : > { %1550 = vmatprep.subr.bf16.mxu1 %v1549_v13  ;;  %809 = vmatprep.mubr.f32.mxu1 %v484_v50  ;;  %v269_v13 = vld [vmem:[%s1765_s23 + $0x270] sm:$0xff]  ;;  %v1569_v17 = vpack.c.bf16 %v318_v9, %v317_v8  ;;  %v302_v18 = vld [vmem:[%s1765_s23 + $0x378] sm:$0xff]  ;;  %v319_v24 = vld [vmem:[%s1765_s23 + $0x400] sm:$0xff] }
  0x43   : > { %v1539_v23 = vpack.c.bf16 %v270_v15, %v269_v13  ;;  %v1571_v25 = vpack.c.bf16 %v302_v18, %v301_v16  ;;  %v320_v27 = vld [vmem:[%s1765_s23 + $0x408] sm:$0xff]  ;;  %v351_v28 = vld [vmem:[%s1765_s23 + $0x500] sm:$0xff]  ;;  %v337_v31 = vld [vmem:[%s1765_s23 + $0x490] sm:$0xff] }
  0x44   : > { %1520 = vmatpush3.bf16.msra.mxu0 %v1519_v20  ;;  %v336_v20 = vld [vmem:[%s1765_s23 + $0x488] sm:$0xff]  ;;  %v338_v32 = vld [vmem:[%s1765_s23 + $0x498] sm:$0xff]  ;;  %v189_v38 = vld [vmem:[%s1760_s19 + $0x10] sm:$0xff] }
  0x45   : > { %1552 = vmatpush3.bf16.msra.mxu1 %v1551_v21  ;;  %1522 = vmatprep.subr.bf16.mxu0 %v1521_v22  ;;  %v367_v21 = vld [vmem:[%s1765_s23 + $0x580] sm:$0xff]  ;;  %v368_v22 = vld [vmem:[%s1765_s23 + $0x588] sm:$0xff]  ;;  %v370_v35 = vld [vmem:[%s1765_s23 + $0x598] sm:$0xff]  ;;  %v1577_v39 = vpack.c.bf16 %v338_v32, %v337_v31  ;;  %v1929_v43 = vrot.slane %v189_v38, %v1818_v14  ;;  %v485_v44 = vcombine.high %v189_v38, %v189_v38 }
  0x46   : > { %1554 = vmatprep.subr.bf16.mxu1 %v1553_v26  ;;  %v1573_v26 = vpack.c.bf16 %v336_v20, %v335_v19  ;;  %v352_v29 = vld [vmem:[%s1765_s23 + $0x508] sm:$0xff]  ;;  %v1605_v30 = vpack.c.bf16 %v368_v22, %v367_v21  ;;  %v321_v40 = vld [vmem:[%s1765_s23 + $0x410] sm:$0xff]  ;;  %v354_v47 = vld [vmem:[%s1765_s23 + $0x518] sm:$0xff] }
  0x47   : > { %v353_v42 = vld [vmem:[%s1765_s23 + $0x510] sm:$0xff]  ;;  %v339_v48 = vld [vmem:[%s1765_s23 + $0x4a0] sm:$0xff]  ;;  %v1940_v53 = vrot.slane %v485_v44, %v1818_v14  ;;  %v324_v57 = vld [vmem:[%s1765_s23 + $0x428] sm:$0xff] }
  0x48   : > { %1524 = vmatpush3.bf16.msra.mxu0 %v1523_v33  ;;  %v369_v33 = vld [vmem:[%s1765_s23 + $0x590] sm:$0xff]  ;;  %v371_v50 = vld [vmem:[%s1765_s23 + $0x5a0] sm:$0xff]  ;;  %v356_v61 = vld [vmem:[%s1765_s23 + $0x528] sm:$0xff] }
  0x49   : > { %1556 = vmatpush3.bf16.msra.mxu1 %v1555_v36  ;;  %1526 = vmatprep.subr.bf16.mxu0 %v1525_v37  ;;  %v1575_v36 = vpack.c.bf16 %v320_v27, %v319_v24  ;;  %v1607_v37 = vpack.c.bf16 %v352_v29, %v351_v28  ;;  %v1609_v45 = vpack.c.bf16 %v370_v35, %v369_v33  ;;  %v355_v58 = vld [vmem:[%s1765_s23 + $0x520] sm:$0xff]  ;;  %v326_v5 = vld [vmem:[%s1765_s23 + $0x438] sm:$0xff]  ;;  %v357_v6 = vld [vmem:[%s1765_s23 + $0x530] sm:$0xff] }
  0x4a   : > { %1558 = vmatprep.subr.bf16.mxu1 %v1557_v41  ;;  %v322_v41 = vld [vmem:[%s1765_s23 + $0x418] sm:$0xff]  ;;  %v501_v59 = vcombine.high %v1940_v53, %v1940_v53  ;;  %v1615_v2 = vpack.c.bf16 %v356_v61, %v355_v58  ;;  %v343_v9 = vld [vmem:[%s1765_s23 + $0x4c0] sm:$0xff]  ;;  %v328_v18 = vld [vmem:[%s1765_s23 + $0x448] sm:$0xff] }
  0x4b   : > { %v1579_v54 = vpack.c.bf16 %v322_v41, %v321_v40  ;;  %v358_v8 = vld [vmem:[%s1765_s23 + $0x538] sm:$0xff]  ;;  %v359_v19 = vld [vmem:[%s1765_s23 + $0x540] sm:$0xff]  ;;  %v360_v21 = vld [vmem:[%s1765_s23 + $0x548] sm:$0xff] }
  0x4c   : > { %1528 = vmatpush3.bf16.msra.mxu0 %v1527_v49  ;;  %v340_v49 = vld [vmem:[%s1765_s23 + $0x4a8] sm:$0xff]  ;;  %v1619_v15 = vpack.c.bf16 %v358_v8, %v357_v6  ;;  %v345_v22 = vld [vmem:[%s1765_s23 + $0x4d0] sm:$0xff]  ;;  %v1623_v27 = vpack.c.bf16 %v360_v21, %v359_v19  ;;  %v362_v33 = vld [vmem:[%s1765_s23 + $0x558] sm:$0xff] }
  0x4d   : > { %1560 = vmatpush3.bf16.msra.mxu1 %v1559_v51  ;;  %1530 = vmatprep.subr.bf16.mxu0 %v1529_v52  ;;  %v372_v51 = vld [vmem:[%s1765_s23 + $0x5a8] sm:$0xff]  ;;  %v500_v52 = vcombine.high %v1929_v43, %v1929_v43  ;;  %v1581_v55 = vpack.c.bf16 %v340_v49, %v339_v48  ;;  %v377_v24 = vld [vmem:[%s1765_s23 + $0x5d0] sm:$0xff]  ;;  %v347_v35 = vld [vmem:[%s1765_s23 + $0x4e0] sm:$0xff] }
  0x4e   : > { %1562 = vmatprep.subr.bf16.mxu1 %v1561_v56  ;;  %v323_v56 = vld [vmem:[%s1765_s23 + $0x420] sm:$0xff]  ;;  %v1613_v60 = vpack.c.bf16 %v372_v51, %v371_v50  ;;  %v329_v29 = vld [vmem:[%s1765_s23 + $0x450] sm:$0xff]  ;;  %v380_v38 = vld [vmem:[%s1765_s23 + $0x5e8] sm:$0xff] }
  0x4f   : > { %v1583_v1 = vpack.c.bf16 %v324_v57, %v323_v56  ;;  %v361_v31 = vld [vmem:[%s1765_s23 + $0x550] sm:$0xff]  ;;  %v332_v44 = vld [vmem:[%s1765_s23 + $0x468] sm:$0xff]  ;;  %v350_v50 = vld [vmem:[%s1765_s23 + $0x4f8] sm:$0xff] }
  0x50   : > { %1532 = vmatpush3.bf16.msra.mxu0 %v1531_v62  ;;  %v342_v62 = vld [vmem:[%s1765_s23 + $0x4b8] sm:$0xff]  ;;  %v1627_v40 = vpack.c.bf16 %v362_v33, %v361_v31  ;;  %v364_v48 = vld [vmem:[%s1765_s23 + $0x568] sm:$0xff]  ;;  %v349_v49 = vld [vmem:[%s1765_s23 + $0x4f0] sm:$0xff] }
  0x51   : > { %1564 = vmatpush3.bf16.msra.mxu1 %v1563_v63  ;;  %1534 = vmatprep.subr.bf16.mxu0 %v1533_v0  ;;  %v373_v63 = vld [vmem:[%s1765_s23 + $0x5b0] sm:$0xff]  ;;  %v374_v0 = vld [vmem:[%s1765_s23 + $0x5b8] sm:$0xff]  ;;  %v1601_v56 = vpack.c.bf16 %v350_v50, %v349_v49  ;;  %v384_v6 = vld [vmem:[%s1765_s23 + $0x608] sm:$0xff] }
  0x52   : > { %1566 = vmatprep.subr.bf16.mxu1 %v1565_v4  ;;  %v325_v4 = vld [vmem:[%s1765_s23 + $0x430] sm:$0xff]  ;;  %v1617_v7 = vpack.c.bf16 %v374_v0, %v373_v63  ;;  %v334_v58 = vld [vmem:[%s1765_s23 + $0x478] sm:$0xff]  ;;  %v431_v63 = vld [vmem:[%s1765_s23 + $0x780] sm:$0xff] }
  0x53   : > { %v1587_v13 = vpack.c.bf16 %v326_v5, %v325_v4  ;;  %v381_v51 = vld [vmem:[%s1765_s23 + $0x5f0] sm:$0xff]  ;;  %v366_v61 = vld [vmem:[%s1765_s23 + $0x578] sm:$0xff]  ;;  %v432_v0 = vld [vmem:[%s1765_s23 + $0x788] sm:$0xff] }
  0x54   : > { %1536 = vmatpush3.bf16.msra.mxu0 %v1535_v10  ;;  %v344_v10 = vld [vmem:[%s1765_s23 + $0x4c8] sm:$0xff]  ;;  %v333_v57 = vld [vmem:[%s1765_s23 + $0x470] sm:$0xff]  ;;  %v383_v5 = vld [vmem:[%s1765_s23 + $0x600] sm:$0xff]  ;;  %v1669_v8 = vpack.c.bf16 %v432_v0, %v431_v63 }
  0x55   : > { %1568 = vmatpush3.bf16.msra.mxu1 %v1567_v11  ;;  %1538 = vmatprep.subr.bf16.mxu0 %v1537_v12  ;;  %v375_v11 = vld [vmem:[%s1765_s23 + $0x5c0] sm:$0xff]  ;;  %v376_v12 = vld [vmem:[%s1765_s23 + $0x5c8] sm:$0xff]  ;;  %v1589_v16 = vpack.c.bf16 %v344_v10, %v343_v9  ;;  %v401_v10 = vld [vmem:[%s1765_s23 + $0x690] sm:$0xff] }
  0x56   : > { %1570 = vmatprep.subr.bf16.mxu1 %v1569_v17  ;;  %v327_v17 = vld [vmem:[%s1765_s23 + $0x440] sm:$0xff]  ;;  %v1621_v20 = vpack.c.bf16 %v376_v12, %v375_v11  ;;  %v416_v9 = vld [vmem:[%s1765_s23 + $0x708] sm:$0xff]  ;;  %v402_v11 = vld [vmem:[%s1765_s23 + $0x698] sm:$0xff] }
  0x57   : > { %v1641_v19 = vpack.c.bf16 %v402_v11, %v401_v10  ;;  %v386_v21 = vld [vmem:[%s1765_s23 + $0x618] sm:$0xff]  ;;  %v387_v33 = vld [vmem:[%s1765_s23 + $0x620] sm:$0xff]  ;;  %v441_v0 = vld [vmem:[%s1765_s23 + $0x7d0] sm:$0xff] }
  0x58   : > { %1540 = vmatpush3.bf16.msra.mxu0 %v1539_v23  ;;  %v346_v23 = vld [vmem:[%s1765_s23 + $0x4d8] sm:$0xff]  ;;  %v411_v10 = vld [vmem:[%s1765_s23 + $0x6e0] sm:$0xff]  ;;  %v412_v11 = vld [vmem:[%s1765_s23 + $0x6e8] sm:$0xff] }
  0x59   : > { %1572 = vmatpush3.bf16.msra.mxu1 %v1571_v25  ;;  %1574 = vmatprep.subr.bf16.mxu0 %v1573_v26  ;;  %v378_v25 = vld [vmem:[%s1765_s23 + $0x5d8] sm:$0xff]  ;;  %v1591_v26 = vpack.c.bf16 %v328_v18, %v327_v17  ;;  %v1593_v28 = vpack.c.bf16 %v346_v23, %v345_v22  ;;  %v1639_v17 = vpack.c.bf16 %v384_v6, %v383_v5  ;;  %v417_v22 = vld [vmem:[%s1765_s23 + $0x710] sm:$0xff] }
  0x5a   : > { %1606 = vmatprep.subr.bf16.mxu1 %v1605_v30  ;;  %v330_v30 = vld [vmem:[%s1765_s23 + $0x458] sm:$0xff]  ;;  %v1625_v32 = vpack.c.bf16 %v378_v25, %v377_v24  ;;  %v403_v25 = vld [vmem:[%s1765_s23 + $0x6a0] sm:$0xff]  ;;  %v393_v5 = vld [vmem:[%s1765_s23 + $0x650] sm:$0xff] }
  0x5b   : > { %740 = vmatmul.mubr.f32.vlgmr.msra.gmra.mrb[2].mxu0 %v1875_v34  ;;  %v1611_v34 = vpack.c.bf16 %v354_v47, %v353_v42  ;;  %v331_v42 = vld [vmem:[%s1765_s23 + $0x460] sm:$0xff]  ;;  %v418_v24 = vld [vmem:[%s1765_s23 + $0x718] sm:$0xff] }
  0x5c   : > { %1576 = vmatpush3.bf16.msra.mxu0 %v1575_v36  ;;  %810 = vmatmul.mubr.f32.vlgmr.msra.gmra.mrb[2].mxu1 %v1886_v46  ;;  %v341_v46 = vld [vmem:[%s1765_s23 + $0x4b0] sm:$0xff]  ;;  %v348_v36 = vld [vmem:[%s1765_s23 + $0x4e8] sm:$0xff]  ;;  %v1675_v31 = vpack.c.bf16 %v418_v24, %v417_v22  ;;  %v422_v50 = vld [vmem:[%s1765_s23 + $0x738] sm:$0xff] }
  0x5d   : > { %1608 = vmatpush3.bf16.msra.mxu1 %v1607_v37  ;;  %1578 = vmatprep.subr.bf16.mxu0 %v1577_v39  ;;  %v1585_v3 = vpack.c.bf16 %v342_v62, %v341_v46  ;;  %v379_v37 = vld [vmem:[%s1765_s23 + $0x5e0] sm:$0xff]  ;;  %v1595_v39 = vpack.c.bf16 %v330_v30, %v329_v29  ;;  %v1597_v41 = vpack.c.bf16 %v348_v36, %v347_v35  ;;  %v400_v62 = vld [vmem:[%s1765_s23 + $0x688] sm:$0xff]  ;;  %v410_v63 = vld [vmem:[%s1765_s23 + $0x6d8] sm:$0xff] }
  0x5e   : > { %1610 = vmatprep.subr.bf16.mxu1 %v1609_v45  ;;  %879 = vmatprep.mubr.f32.mxu0 %v500_v52  ;;  %v363_v45 = vld [vmem:[%s1765_s23 + $0x560] sm:$0xff]  ;;  %v1629_v47 = vpack.c.bf16 %v380_v38, %v379_v37  ;;  %v382_v52 = vld [vmem:[%s1765_s23 + $0x5f8] sm:$0xff]  ;;  %v420_v37 = vld [vmem:[%s1765_s23 + $0x728] sm:$0xff] }
  0x5f   : > { %949 = vmatprep.mubr.f32.mxu1 %v501_v59  ;;  %v365_v59 = vld [vmem:[%s1765_s23 + $0x570] sm:$0xff]  ;;  %v399_v46 = vld [vmem:[%s1765_s23 + $0x680] sm:$0xff]  ;;  %v394_v6 = vld [vmem:[%s1765_s23 + $0x658] sm:$0xff] }
  0x60   : > { %1580 = vmatpush3.bf16.msra.mxu0 %v1579_v54  ;;  %v1599_v54 = vpack.c.bf16 %v332_v44, %v331_v42  ;;  %v1637_v4 = vpack.c.bf16 %v400_v62, %v399_v46  ;;  %v419_v35 = vld [vmem:[%s1765_s23 + $0x720] sm:$0xff]  ;;  %v405_v38 = vld [vmem:[%s1765_s23 + $0x6b0] sm:$0xff]  ;;  %v424_v46 = vld [vmem:[%s1765_s23 + $0x748] sm:$0xff] }
  0x61   : > { %1612 = vmatpush3.bf16.msra.mxu1 %v1611_v34  ;;  %1582 = vmatprep.subr.bf16.mxu0 %v1581_v55  ;;  %v190_v34 = vld [vmem:[%s1760_s19 + $0x18] sm:$0xff]  ;;  %v1631_v55 = vpack.c.bf16 %v364_v48, %v363_v45  ;;  %v1679_v42 = vpack.c.bf16 %v420_v37, %v419_v35  ;;  %v389_v45 = vld [vmem:[%s1765_s23 + $0x630] sm:$0xff]  ;;  %v427_v22 = vld [vmem:[%s1765_s23 + $0x760] sm:$0xff] }
  0x62   : > { %1614 = vmatprep.subr.bf16.mxu1 %v1613_v60  ;;  %v1633_v60 = vpack.c.bf16 %v382_v52, %v381_v51  ;;  %v2001_v12 = vrot.slane %v190_v34, %v1818_v14  ;;  %v421_v48 = vld [vmem:[%s1765_s23 + $0x730] sm:$0xff]  ;;  %v407_v51 = vld [vmem:[%s1765_s23 + $0x6c0] sm:$0xff]  ;;  %v408_v52 = vld [vmem:[%s1765_s23 + $0x6c8] sm:$0xff] }
  0x63   : > { %v409_v62 = vld [vmem:[%s1765_s23 + $0x6d0] sm:$0xff]  ;;  %v428_v24 = vld [vmem:[%s1765_s23 + $0x768] sm:$0xff]  ;;  %v430_v35 = vld [vmem:[%s1765_s23 + $0x778] sm:$0xff] }
  0x64   : > { %1584 = vmatpush3.bf16.msra.mxu0 %v1583_v1  ;;  %v502_v1 = vcombine.high %v190_v34, %v190_v34  ;;  %v440_v34 = vld [vmem:[%s1765_s23 + $0x7c8] sm:$0xff] }
  0x65   : > { %1616 = vmatpush3.bf16.msra.mxu1 %v1615_v2  ;;  %1586 = vmatprep.subr.bf16.mxu0 %v1585_v3  ;;  %v1603_v2 = vpack.c.bf16 %v334_v58, %v333_v57  ;;  %v1635_v3 = vpack.c.bf16 %v366_v61, %v365_v59  ;;  %v1653_v57 = vpack.c.bf16 %v408_v52, %v407_v51  ;;  %v391_v58 = vld [vmem:[%s1765_s23 + $0x640] sm:$0xff]  ;;  %v392_v59 = vld [vmem:[%s1765_s23 + $0x648] sm:$0xff] }
  0x66   : > { %1618 = vmatprep.subr.bf16.mxu1 %v1617_v7  ;;  %v415_v7 = vld [vmem:[%s1765_s23 + $0x700] sm:$0xff] }
  0x67   : > { %v1671_v18 = vpack.c.bf16 %v416_v9, %v415_v7  ;;  %v425_v7 = vld [vmem:[%s1765_s23 + $0x750] sm:$0xff]  ;;  %v426_v9 = vld [vmem:[%s1765_s23 + $0x758] sm:$0xff] }
  0x68   : > { %1588 = vmatpush3.bf16.msra.mxu0 %v1587_v13  ;;  %v433_v13 = vld [vmem:[%s1765_s23 + $0x790] sm:$0xff] }
  0x69   : > { %1620 = vmatpush3.bf16.msra.mxu1 %v1619_v15  ;;  %1590 = vmatprep.subr.bf16.mxu0 %v1589_v16  ;;  %v434_v15 = vld [vmem:[%s1765_s23 + $0x798] sm:$0xff]  ;;  %v2006_v16 = vrot.slane %v502_v1, %v1818_v14  ;;  %v404_v14 = vld [vmem:[%s1765_s23 + $0x6a8] sm:$0xff] }
  0x6a   : > { %1622 = vmatprep.subr.bf16.mxu1 %v1621_v20  ;;  %v385_v20 = vld [vmem:[%s1765_s23 + $0x610] sm:$0xff]  ;;  %v1673_v23 = vpack.c.bf16 %v434_v15, %v433_v13  ;;  %v442_v1 = vld [vmem:[%s1765_s23 + $0x7d8] sm:$0xff]  ;;  %v443_v13 = vld [vmem:[%s1765_s23 + $0x7e0] sm:$0xff] }
  0x6b   : > { %v518_v29 = vcombine.high %v2006_v16, %v2006_v16  ;;  %v1643_v30 = vpack.c.bf16 %v386_v21, %v385_v20  ;;  %v444_v15 = vld [vmem:[%s1765_s23 + $0x7e8] sm:$0xff]  ;;  %v395_v20 = vld [vmem:[%s1765_s23 + $0x660] sm:$0xff] }
  0x6c   : > { %1592 = vmatpush3.bf16.msra.mxu0 %v1591_v26  ;;  %v517_v26 = vcombine.high %v2001_v12, %v2001_v12  ;;  %v396_v21 = vld [vmem:[%s1765_s23 + $0x668] sm:$0xff] }
  0x6d   : > { %1624 = vmatpush3.bf16.msra.mxu1 %v1623_v27  ;;  %1594 = vmatprep.subr.bf16.mxu0 %v1593_v28  ;;  %v435_v27 = vld [vmem:[%s1765_s23 + $0x7a0] sm:$0xff]  ;;  %v436_v28 = vld [vmem:[%s1765_s23 + $0x7a8] sm:$0xff] }
  0x6e   : > { %1626 = vmatprep.subr.bf16.mxu1 %v1625_v32  ;;  %v1645_v32 = vpack.c.bf16 %v404_v14, %v403_v25  ;;  %v1677_v36 = vpack.c.bf16 %v436_v28, %v435_v27  ;;  %v413_v25 = vld [vmem:[%s1765_s23 + $0x6f0] sm:$0xff]  ;;  %v414_v14 = vld [vmem:[%s1765_s23 + $0x6f8] sm:$0xff]  ;;  %v1663_v28 = vpack.c.bf16 %v396_v21, %v395_v20 }
  0x6f   : > { %v446_v27 = vld [vmem:[%s1765_s23 + $0x7f8] sm:$0xff] }
  0x70   : > { %1596 = vmatpush3.bf16.msra.mxu0 %v1595_v39  ;;  %v406_v39 = vld [vmem:[%s1765_s23 + $0x6b8] sm:$0xff] }
  0x71   : > { %1628 = vmatpush3.bf16.msra.mxu1 %v1627_v40  ;;  %1598 = vmatprep.subr.bf16.mxu0 %v1597_v41  ;;  %v438_v40 = vld [vmem:[%s1765_s23 + $0x7b8] sm:$0xff]  ;;  %v1649_v44 = vpack.c.bf16 %v406_v39, %v405_v38 }
  0x72   : > { %1630 = vmatprep.subr.bf16.mxu1 %v1629_v47  ;;  %v390_v47 = vld [vmem:[%s1765_s23 + $0x638] sm:$0xff] }
  0x74   : > { %1600 = vmatpush3.bf16.msra.mxu0 %v1599_v54  ;;  %v439_v54 = vld [vmem:[%s1765_s23 + $0x7c0] sm:$0xff] }
  0x75   : > { %1632 = vmatpush3.bf16.msra.mxu1 %v1631_v55  ;;  %1602 = vmatprep.subr.bf16.mxu0 %v1601_v56  ;;  %v1651_v55 = vpack.c.bf16 %v390_v47, %v389_v45  ;;  %v1683_v56 = vpack.c.bf16 %v422_v50, %v421_v48  ;;  %v1685_v61 = vpack.c.bf16 %v440_v34, %v439_v54 }
  0x76   : > { %1634 = vmatprep.subr.bf16.mxu1 %v1633_v60  ;;  %v423_v60 = vld [vmem:[%s1765_s23 + $0x740] sm:$0xff] }
  0x78   : > { %1604 = vmatpush3.bf16.msra.mxu0 %v1603_v2  ;;  %v1655_v2 = vpack.c.bf16 %v392_v59, %v391_v58 }
  0x79   : > { %1636 = vmatpush3.bf16.msra.mxu1 %v1635_v3  ;;  %1638 = vmatprep.subr.bf16.mxu0 %v1637_v4  ;;  %v1687_v3 = vpack.c.bf16 %v424_v46, %v423_v60  ;;  %v1657_v4 = vpack.c.bf16 %v410_v63, %v409_v62 }
  0x7a   : > { %1670 = vmatprep.subr.bf16.mxu1 %v1669_v8  ;;  %v1689_v8 = vpack.c.bf16 %v442_v1, %v441_v0 }
  0x7b   : > { %880 = vmatmul.mubr.f32.vlgmr.msra.gmra.mrb[4].mxu0 %v1929_v43  ;;  %v388_v43 = vld [vmem:[%s1765_s23 + $0x628] sm:$0xff] }
  0x7c   : > { %1640 = vmatpush3.bf16.msra.mxu0 %v1639_v17  ;;  %950 = vmatmul.mubr.f32.vlgmr.msra.gmra.mrb[4].mxu1 %v1940_v53  ;;  %v437_v53 = vld [vmem:[%s1765_s23 + $0x7b0] sm:$0xff]  ;;  %v1647_v41 = vpack.c.bf16 %v388_v43, %v387_v33  ;;  %v1659_v17 = vpack.c.bf16 %v394_v6, %v393_v5  ;;  %v1162_v6 = vld [vmem:[%s2080_s2] ss:$0 sm:$0xff] (!%p1161_p6) }
  0x7d   : > { %1672 = vmatpush3.bf16.msra.mxu1 %v1671_v18  ;;  %1642 = vmatprep.subr.bf16.mxu0 %v1641_v19  ;;  %v1681_v49 = vpack.c.bf16 %v438_v40, %v437_v53  ;;  %v1691_v18 = vpack.c.bf16 %v426_v9, %v425_v7  ;;  %v1661_v19 = vpack.c.bf16 %v412_v11, %v411_v10  ;;  %v429_v43 = vld [vmem:[%s1765_s23 + $0x770] sm:$0xff] }
  0x7e   : > { %1674 = vmatprep.subr.bf16.mxu1 %v1673_v23  ;;  %1019 = vmatprep.mubr.f32.mxu0 %v517_v26  ;;  %v1693_v23 = vpack.c.bf16 %v444_v15, %v443_v13  ;;  %v445_v26 = vld [vmem:[%s1765_s23 + $0x7f0] sm:$0xff]  ;;  %v1699_v37 = vpack.c.bf16 %v430_v35, %v429_v43 }
  0x7f   : > { %1089 = vmatprep.mubr.f32.mxu1 %v518_v29  ;;  %v1695_v29 = vpack.c.bf16 %v428_v24, %v427_v22  ;;  %v1697_v33 = vpack.c.bf16 %v446_v27, %v445_v26 }
  0x80   : > { %1644 = vmatpush3.bf16.msra.mxu0 %v1643_v30  ;;  %v1665_v30 = vpack.c.bf16 %v414_v14, %v413_v25 }
  0x81   : > { %1676 = vmatpush3.bf16.msra.mxu1 %v1675_v31  ;;  %1646 = vmatprep.subr.bf16.mxu0 %v1645_v32  ;;  %v397_v31 = vld [vmem:[%s1765_s23 + $0x670] sm:$0xff]  ;;  %v398_v32 = vld [vmem:[%s1765_s23 + $0x678] sm:$0xff] }
  0x82   : > { %1678 = vmatprep.subr.bf16.mxu1 %v1677_v36  ;;  %v1667_v36 = vpack.c.bf16 %v398_v32, %v397_v31 }
  0x84   : > { %1648 = vmatpush3.bf16.msra.mxu0 %v1647_v41 }
  0x85   : > { %1680 = vmatpush3.bf16.msra.mxu1 %v1679_v42  ;;  %1650 = vmatprep.subr.bf16.mxu0 %v1649_v44 }
  0x86   : > { %1682 = vmatprep.subr.bf16.mxu1 %v1681_v49 }
  0x88   : > { %1652 = vmatpush3.bf16.msra.mxu0 %v1651_v55 }
  0x89   : > { %1684 = vmatpush3.bf16.msra.mxu1 %v1683_v56  ;;  %1654 = vmatprep.subr.bf16.mxu0 %v1653_v57 }
  0x8a   : > { %1686 = vmatprep.subr.bf16.mxu1 %v1685_v61 }
  0x8c   : > { %1656 = vmatpush3.bf16.msra.mxu0 %v1655_v2  ;;  %v186_v2 = vld [vmem:[#allocation2] sm:$0x3] }
  0x8d   : > { %1688 = vmatpush3.bf16.msra.mxu1 %v1687_v3  ;;  %1658 = vmatprep.subr.bf16.mxu0 %v1657_v4 }
  0x8e   : > { %1690 = vmatprep.subr.bf16.mxu1 %v1689_v8 }
  0x90   : > { %1660 = vmatpush3.bf16.msra.mxu0 %v1659_v17 }
  0x91   : > { %1692 = vmatpush3.bf16.msra.mxu1 %v1691_v18  ;;  %1662 = vmatprep.subr.bf16.mxu0 %v1661_v19 }
  0x92   : > { %1694 = vmatprep.subr.bf16.mxu1 %v1693_v23 }
  0x94   : > { %1664 = vmatpush3.bf16.msra.mxu0 %v1663_v28 }
  0x95   : > { %1696 = vmatpush3.bf16.msra.mxu1 %v1695_v29  ;;  %1666 = vmatprep.subr.bf16.mxu0 %v1665_v30 }
  0x96   : > { %1698 = vmatprep.subr.bf16.mxu1 %v1697_v33 }
  0x98   : > { %1668 = vmatpush3.bf16.msra.mxu0 %v1667_v36 }
  0x99   : > { %1700 = vmatpush3.bf16.msra.mxu1 %v1699_v37 }
  0x9b   : > { %1020 = vmatmul.mubr.f32.vlgmr.msra.gmra.mrb[6].mxu0 %v2001_v12 }
  0x9c   : > { %1090 = vmatmul.mubr.f32.vlgmr.msra.gmra.mrb[6].mxu1 %v2006_v16 }
 0x10e   : > { %v1197_v38 = vpop.f32.mrb[0].mxu0 }
 0x10f   : > { %v1232_v39 = vpop.f32.mrb[0].mxu1  ;;  %v1198_v53 = vpop.f32.mrb[1].mxu0 }
 0x110   : > { %v1199_v40 = vadd.f32 %v1198_v53, %v1197_v38  ;;  %v1233_v41 = vpop.f32.mrb[1].mxu1 }
 0x111   : > { %v1234_v42 = vadd.f32 %v1233_v41, %v1232_v39 }
 0x113   : > { %v672_v44 = vadd.f32 %v1234_v42, %v1199_v40 }
 0x12e   : > { %v1267_v45 = vpop.f32.mrb[2].mxu0 }
 0x12f   : > { %v1268_v47 = vpop.f32.mrb[3].mxu0  ;;  %v1302_v48 = vpop.f32.mrb[2].mxu1 }
 0x130   : > { %v1269_v49 = vadd.f32 %v1268_v47, %v1267_v45  ;;  %v1303_v50 = vpop.f32.mrb[3].mxu1 }
 0x131   : > { %v1304_v51 = vadd.f32 %v1303_v50, %v1302_v48 }
 0x132   : > { %v742_v52 = vadd.f32 %v1269_v49, %v672_v44 }
 0x134   : > { %v812_v54 = vadd.f32 %v1304_v51, %v742_v52 }
 0x14e   : > { %v1337_v34 = vpop.f32.mrb[4].mxu0 }
 0x14f   : > { %v1338_v55 = vpop.f32.mrb[5].mxu0  ;;  %v1372_v12 = vpop.f32.mrb[4].mxu1 }
 0x150   : > { %v1339_v56 = vadd.f32 %v1338_v55, %v1337_v34  ;;  %v1373_v16 = vpop.f32.mrb[5].mxu1 }
 0x151   : > { %v1374_v57 = vadd.f32 %v1373_v16, %v1372_v12 }
 0x152   : > { %v882_v58 = vadd.f32 %v1339_v56, %v812_v54 }
 0x154   : > { %v952_v59 = vadd.f32 %v1374_v57, %v882_v58 }
 0x16e   : > { %v1407_v60 = vpop.f32.mrb[6].mxu0 }
 0x16f   : > { %v1408_v61 = vpop.f32.mrb[7].mxu0  ;;  %v1442_v46 = vpop.f32.mrb[6].mxu1 }
 0x170   : > { %v1409_v62 = vadd.f32 %v1408_v61, %v1407_v60  ;;  %v1443_v63 = vpop.f32.mrb[7].mxu1 }
 0x171   : > { %v1444_v0 = vadd.f32 %v1443_v63, %v1442_v46 }
 0x172   : > { %v1022_v1 = vadd.f32 %v1409_v62, %v952_v59  ;;  %1101 = sbr.rel (%p1161_p6) target bundleno = 387 (0x183), region = 40 }
 0x174   : > { %v1092_v3 = vadd.f32 %v1444_v0, %v1022_v1 }
 0x176   : > { %v1095_v4 = vadd.f32 %v1092_v3, %v186_v2 }
 0x178   : > { %1097 = vst.msk [vmem:[#allocation2] sm:$0x3] %vm1096_vm1, %v1095_v4 }
 0x17f   : > { %v1102_v5 = vld [vmem:[#allocation2] sm:$0x3] }
 0x180   : > { %v1110_v7 = vadd.f32 %v1162_v6, %v1102_v5 }
 0x182   : > { %1111 = vst.msk [vmem:[%s2081_s3] sm:$0x3] %vm1096_vm1, %v1110_v7 }
 0x183 PF: > { %s13_s12 = sadd.s32 1, %s1721_s12  }
 0x184   : > { %p10_p7 = scmp.ge.s32.totalorder %s13_s12, 10  }
 0x186   :  { %12 = sbr.rel (!%p10_p7) target bundleno = 1 (0x1), region = 69 }

// kernel: conv_encoder_forward.2
= control target key start
LH: loop header
LB: loop body
LE: loop exit
PB: predicated region body
PF: predicated region fallthrough
CT: control target
= control target key end

     0   :  { %12 = vsyncpa [#allocation5], 0  ;;  %s34633_s0 = inlined_call_operand.vmem [shape: f32[2,18,18,4], index: 0, kind: input, shape index: {}]   ;;  %s34634_s1 = inlined_call_operand.hbm [shape: f32[9,4,16], index: 1, kind: input, shape index: {}]   ;;  %s34635_s2 = inlined_call_operand.hbm [shape: f32[1,16], index: 2, kind: input, shape index: {}]   ;;  %s34636_s3 = inlined_call_operand.hbm [shape: f32[9,16,32], index: 3, kind: input, shape index: {}]   ;;  %s34637_s4 = inlined_call_operand.hbm [shape: f32[1,32], index: 4, kind: input, shape index: {}]   ;;  %s34638_s5 = inlined_call_operand.hbm [shape: f32[9,32,64], index: 5, kind: input, shape index: {}]   ;;  %s34639_s6 = inlined_call_operand.hbm [shape: f32[1,64], index: 6, kind: input, shape index: {}]   ;;  %s34640_s7 = inlined_call_operand.vmem [shape: f32[512,64], index: 7, kind: output, shape index: {}]  }
   0x1   :  { %13 = vsyncpa [#allocation7], 0 }
   0x2   :  { %14 = vsyncpa [#allocation10], 0 }
   0x3   :  { %15 = vsyncpa [#allocation13], 0  ;;  %s28204_s24 = smov [#allocation6]   ;;  %s28205_s26 = smov [#allocation9]  }
   0x4   :  { %s36_s25 = sshll.u32 %s28204_s24, 4  ;;  %s58_s27 = sshll.u32 %s28205_s26, 4  ;;  %s37_s25 = int_to_ptr.vmem [resolvable:$true] %s36_s25  ;;  %s59_s27 = int_to_ptr.vmem [resolvable:$true] %s58_s27 }
   0x5   :  { %s28064_s30 = scalar_lea.hbm %s34635_s2, 16 }
   0x6   :  { %p28065_p0 = scmp.ne.s32.totalorder %s34635_s2, %s28064_s30  ;;  %p28068_p1 = scmp.lt.u32.totalorder %s28064_s30, %s34635_s2 }
   0x8   :  { %p28070_p2 = pnand %p28068_p1, %p28065_p0 }
   0xa   :  { %28073 = shalt.err (!%p28070_p2)
}
   0xb   :  { %s28074_s12 = scalar_lea.vmem %s37_s25, 16  ;;  %s28078_s13 = scalar_lea.vmem %s37_s25, 32 }
   0xc   :  { %p28075_p3 = scmp.ne.s32.totalorder %s37_s25, %s28074_s12  ;;  %p28079_p4 = scmp.lt.s32.totalorder %s37_s25, %s37_s25 }
   0xd   :  { %p28080_p5 = scmp.lt.s32.totalorder %s28078_s13, %s28074_s12 }
   0xf   :  { %p28081_p6 = por %p28080_p5, %p28079_p4 }
  0x11   :  { %p28082_p7 = pnand %p28081_p6, %p28075_p3 }
  0x13   :  { %28085 = shalt.err (!%p28082_p7)
}
  0x14   :  { %39 = dma.hbm_to_vmem [thread:$0]  %s34635_s2, 16, %s37_s25, [#allocation7]  }
  0x15   :  { %s28086_s18 = scalar_lea.hbm %s34637_s4, 16 }
  0x16   :  { %p28087_p8 = scmp.ne.s32.totalorder %s34637_s4, %s28086_s18  ;;  %p28090_p9 = scmp.lt.u32.totalorder %s28086_s18, %s34637_s4 }
  0x18   :  { %p28092_p10 = pnand %p28090_p9, %p28087_p8 }
  0x1a   :  { %28095 = shalt.err (!%p28092_p10)
}
  0x1b   :  { %s28096_s23 = scalar_lea.vmem %s59_s27, 16  ;;  %s28100_s24 = scalar_lea.vmem %s59_s27, 32 }
  0x1c   :  { %p28097_p11 = scmp.ne.s32.totalorder %s59_s27, %s28096_s23  ;;  %p28101_p12 = scmp.lt.s32.totalorder %s59_s27, %s59_s27 }
  0x1d   :  { %p28102_p13 = scmp.lt.s32.totalorder %s28100_s24, %s28096_s23 }
  0x1f   :  { %p28103_p0 = por %p28102_p13, %p28101_p12 }
  0x21   :  { %p28104_p1 = pnand %p28103_p0, %p28097_p11 }
  0x23   :  { %28107 = shalt.err (!%p28104_p1)
}
  0x24   :  { %61 = dma.hbm_to_vmem [thread:$0]  %s34637_s4, 16, %s59_s27, [#allocation10]  }
  0x25   :  { %s28206_s26 = smov [#allocation4]   ;;  %s28108_s8 = scalar_lea.hbm %s34634_s1, 576 }
  0x26   :  { %s23_s28 = sshll.u32 %s28206_s26, 4  ;;  %p28109_p2 = scmp.ne.s32.totalorder %s34634_s1, %s28108_s8  ;;  %s24_s28 = int_to_ptr.vmem [resolvable:$true] %s23_s28 }
  0x27   :  { %p28112_p3 = scmp.lt.u32.totalorder %s28108_s8, %s34634_s1 }
  0x29   :  { %p28114_p4 = pnand %p28112_p3, %p28109_p2 }
  0x2b   :  { %28117 = shalt.err (!%p28114_p4)
}
  0x2c   :  { %s28118_s13 = scalar_lea.vmem %s24_s28, 576  ;;  %p28123_p6 = scmp.lt.s32.totalorder %s24_s28, %s24_s28 }
  0x2d   :  { %p28119_p5 = scmp.ne.s32.totalorder %s24_s28, %s28118_s13  ;;  %p28124_p7 = scmp.lt.s32.totalorder %s28118_s13, %s28118_s13 }
  0x2f   :  { %p28125_p8 = por %p28124_p7, %p28123_p6 }
  0x31   :  { %p28126_p9 = pnand %p28125_p8, %p28119_p5 }
  0x33   :  { %28129 = shalt.err (!%p28126_p9)
}
  0x34   :  { %s28207_s4 = smov 64   ;;  %s28208_s27 = smov 4  }
  0x35   :  { %29 = dma.hbm_to_vmem [thread:$0]  %s34634_s1, 576, %s24_s28, [#allocation5], %s28207_s4, %s28207_s4, %s28208_s27  }
  0x36   :  { %s28209_s16 = smov [#allocation8]   ;;  %s28130_s20 = scalar_lea.hbm %s34636_s3, 2304 }
  0x37   :  { %s45_s17 = sshll.u32 %s28209_s16, 4  ;;  %p28131_p10 = scmp.ne.s32.totalorder %s34636_s3, %s28130_s20  ;;  %s46_s17 = int_to_ptr.vmem [resolvable:$true] %s45_s17 }
  0x38   :  { %p28134_p11 = scmp.lt.u32.totalorder %s28130_s20, %s34636_s3 }
  0x3a   :  { %p28136_p12 = pnand %p28134_p11, %p28131_p10 }
  0x3c   :  { %28139 = shalt.err (!%p28136_p12)
}
  0x3d   :  { %s28140_s2 = scalar_lea.vmem %s46_s17, 2304  ;;  %p28145_p0 = scmp.lt.s32.totalorder %s46_s17, %s46_s17 }
  0x3e   :  { %p28141_p13 = scmp.ne.s32.totalorder %s46_s17, %s28140_s2  ;;  %p28146_p1 = scmp.lt.s32.totalorder %s28140_s2, %s28140_s2 }
  0x40   :  { %p28147_p2 = por %p28146_p1, %p28145_p0 }
  0x42   :  { %p28148_p3 = pnand %p28147_p2, %p28141_p13 }
  0x44   :  { %28151 = shalt.err (!%p28148_p3)
}
  0x45   :  { %s28210_s1 = smov 128   ;;  %s28211_s25 = smov 8  }
  0x46   :  { %51 = dma.hbm_to_vmem [thread:$0]  %s34636_s3, 2304, %s46_s17, [#allocation7], %s28210_s1, %s28210_s1, %s28211_s25  }
  0x47   :  { %s28212_s29 = smov [#allocation11]   ;;  %s28213_s8 = smov [#allocation12]  }
  0x48   :  { %s67_s30 = sshll.u32 %s28212_s29, 4  ;;  %s80_s9 = sshll.u32 %s28213_s8, 4  ;;  %s68_s30 = int_to_ptr.vmem [resolvable:$true] %s67_s30  ;;  %s81_s9 = int_to_ptr.vmem [resolvable:$true] %s80_s9 }
  0x49   :  { %s28152_s12 = scalar_lea.hbm %s34638_s5, 4608 }
  0x4a   :  { %p28153_p4 = scmp.ne.s32.totalorder %s34638_s5, %s28152_s12  ;;  %p28156_p5 = scmp.lt.u32.totalorder %s28152_s12, %s34638_s5 }
  0x4c   :  { %p28158_p6 = pnand %p28156_p5, %p28153_p4 }
  0x4e   :  { %28161 = shalt.err (!%p28158_p6)
}
  0x4f   :  { %s28162_s3 = scalar_lea.vmem %s68_s30, 4608  ;;  %p28167_p8 = scmp.lt.s32.totalorder %s68_s30, %s68_s30 }
  0x50   :  { %p28163_p7 = scmp.ne.s32.totalorder %s68_s30, %s28162_s3  ;;  %p28168_p9 = scmp.lt.s32.totalorder %s28162_s3, %s28162_s3 }
  0x52   :  { %p28169_p10 = por %p28168_p9, %p28167_p8 }
  0x54   :  { %p28170_p11 = pnand %p28169_p10, %p28163_p7 }
  0x56   :  { %28173 = shalt.err (!%p28170_p11)
}
  0x57   :  { %73 = dma.hbm_to_vmem [thread:$0]  %s34638_s5, 4608, %s68_s30, [#allocation10], %s28210_s1, %s28210_s1, %s28211_s25  }
  0x58   :  { %s28174_s19 = scalar_lea.hbm %s34639_s6, 16 }
  0x59   :  { %p28175_p12 = scmp.ne.s32.totalorder %s34639_s6, %s28174_s19  ;;  %p28178_p13 = scmp.lt.u32.totalorder %s28174_s19, %s34639_s6 }
  0x5b   :  { %p28180_p0 = pnand %p28178_p13, %p28175_p12 }
  0x5d   :  { %28183 = shalt.err (!%p28180_p0)
}
  0x5e   :  { %s28184_s24 = scalar_lea.vmem %s81_s9, 16  ;;  %s28188_s2 = scalar_lea.vmem %s81_s9, 32 }
  0x5f   :  { %p28185_p1 = scmp.ne.s32.totalorder %s81_s9, %s28184_s24  ;;  %p28189_p2 = scmp.lt.s32.totalorder %s81_s9, %s81_s9 }
  0x60   :  { %p28190_p3 = scmp.lt.s32.totalorder %s28188_s2, %s28184_s24 }
  0x62   :  { %p28191_p4 = por %p28190_p3, %p28189_p2 }
  0x64   :  { %p28192_p5 = pnand %p28191_p4, %p28185_p1 }
  0x66   :  { %28195 = shalt.err (!%p28192_p5)
}
  0x67   :  { %83 = dma.hbm_to_vmem [thread:$0]  %s34639_s6, 16, %s81_s9, [#allocation13]  }
  0x68   :  { %28196 = dma.done.wait [#allocation5], 576  }
  0x69   :  { %28197 = vsyncadd [#allocation5], 4294966720 }
  0x6a   :  { %28198 = dma.done.wait [#allocation7], 2320  }
  0x6b   :  { %28199 = vsyncadd [#allocation7], 4294964976 }
  0x6c   :  { %28200 = dma.done.wait [#allocation10], 4624  }
  0x6d   :  { %28201 = vsyncadd [#allocation10], 4294962672 }
  0x6e   :  { %28202 = dma.done.wait [#allocation13], 16  }
  0x6f   :  { %28203 = vsyncadd [#allocation13], 4294967280  ;;  %vm426_vm0 = vcmask 1043456   ;;  %vm233_vm1 = vcmask 31744   ;;  %v232_v0 = vld [vmem:[#allocation4 + $0x4] sm:$0xf] }
  0x70   :  { %v28327_v1 = vld [vmem:[#allocation4 + $0x10] sm:$0xf]  ;;  %v167_v2 = vld [vmem:[%s34633_s0 + $0x1] sm:$0xff]  ;;  %23688 = vmatprep.subr.msk.mxu1 %vm426_vm0, %v232_v0  ;;  %v20097_v3 = vld [vmem:[%s34633_s0 + $0x19] sm:$0xff]  ;;  %vm6502_vm2 = vcmask 130048   ;;  %vm6506_vm3 = vcmask 122880  }
  0x71   :  { %24080 = vmatprep.subr.msk.mxu0 %vm426_vm0, %v28327_v1  ;;  %v168_v4 = vld [vmem:[%s34633_s0 + $0x9] sm:$0xff]  ;;  %v166_v5 = vld [vmem:[#allocation4] sm:$0xf]  ;;  %23689 = vmatpush3.msk.msra.mxu1 %vm426_vm0, %v232_v0  ;;  %v3591_v7 = vld [vmem:[#allocation4 + $0x14] sm:$0xf]  ;;  %vm13092_vm4 = vcmask 261120  }
  0x72   :  { %23690 = vmatprep.mubr.msk.f32.mxu1 %vm233_vm1, %v167_v2  ;;  %v20098_v6 = vld [vmem:[%s34633_s0 + $0x21] sm:$0xff]  ;;  %24081 = vmatpush3.msk.msra.mxu0 %vm426_vm0, %v28327_v1  ;;  %v20099_v8 = vld [vmem:[%s34633_s0 + $0x31] sm:$0xff]  ;;  %v20100_v9 = vld [vmem:[%s34633_s0 + $0x39] sm:$0xff]  ;;  %vm13096_vm5 = vcmask 253952   ;;  %vm19700_vm6 = vcmask 523264  }
  0x73   :  { %24082 = vmatprep.mubr.msk.f32.mxu0 %vm233_vm1, %v20097_v3  ;;  %23691 = vmatmul.mubr.msk.f32.vlgmr.msra.gmra.mrb[0].mxu1 %vm233_vm1, %v168_v4  ;;  %v20101_v10 = vld [vmem:[%s34633_s0 + $0x49] sm:$0xff]  ;;  %v20102_v11 = vld [vmem:[%s34633_s0 + $0x51] sm:$0xff]  ;;  %v20103_v12 = vld [vmem:[%s34633_s0 + $0x61] sm:$0xff] }
  0x74   :  { %23786 = vmatprep.subr.msk.mxu1 %vm426_vm0, %v166_v5  ;;  %24083 = vmatmul.mubr.msk.f32.vlgmr.msra.gmra.mrb[0].mxu0 %vm233_vm1, %v20098_v6  ;;  %v20104_v13 = vld [vmem:[%s34633_s0 + $0x69] sm:$0xff]  ;;  %v28383_v14 = vld [vmem:[#allocation4 + $0x18] sm:$0xf]  ;;  %v20106_v16 = vld [vmem:[%s34633_s0 + $0x81] sm:$0xff] }
  0x75   :  { %24178 = vmatprep.subr.msk.mxu0 %vm426_vm0, %v3591_v7  ;;  %23787 = vmatpush3.msk.msra.mxu1 %vm426_vm0, %v166_v5  ;;  %v20105_v15 = vld [vmem:[%s34633_s0 + $0x79] sm:$0xff]  ;;  %v20107_v17 = vld [vmem:[%s34633_s0 + $0x91] sm:$0xff]  ;;  %v20109_v19 = vld [vmem:[%s34633_s0 + $0xa9] sm:$0xff] }
  0x76   :  { %24179 = vmatpush3.msk.msra.mxu0 %vm426_vm0, %v3591_v7  ;;  %23693 = vmatprep.mubr.msk.f32.mxu1 %vm233_vm1, %v20097_v3  ;;  %v20108_v18 = vld [vmem:[%s34633_s0 + $0x99] sm:$0xff]  ;;  %v20110_v20 = vld [vmem:[%s34633_s0 + $0xb1] sm:$0xff]  ;;  %v20111_v21 = vld [vmem:[%s34633_s0 + $0xc1] sm:$0xff] }
  0x77   :  { %24085 = vmatprep.mubr.msk.f32.mxu0 %vm233_vm1, %v20099_v8  ;;  %23694 = vmatmul.mubr.msk.f32.gmra.mrb[2].mxu1 %vm233_vm1, %v20098_v6  ;;  %v20112_v22 = vld [vmem:[%s34633_s0 + $0xc9] sm:$0xff]  ;;  %v20113_v23 = vld [vmem:[%s34633_s0 + $0xd9] sm:$0xff]  ;;  %v20114_v24 = vld [vmem:[%s34633_s0 + $0xe1] sm:$0xff] }
  0x78   :  { %24086 = vmatmul.mubr.msk.f32.gmra.mrb[2].mxu0 %vm233_vm1, %v20100_v9  ;;  %23696 = vmatprep.mubr.msk.f32.mxu1 %vm233_vm1, %v20099_v8  ;;  %v20115_v25 = vld [vmem:[%s34633_s0 + $0xf1] sm:$0xff]  ;;  %v28440_v26 = vld [vmem:[#allocation4 + $0x8] sm:$0xf]  ;;  %v20116_v27 = vld [vmem:[%s34633_s0 + $0xf9] sm:$0xff] }
  0x79   :  { %24088 = vmatprep.mubr.msk.f32.mxu0 %vm233_vm1, %v20101_v10  ;;  %24276 = vmatprep.subr.msk.mxu0 %vm426_vm0, %v28383_v14  ;;  %v20117_v28 = vld [vmem:[%s34633_s0 + $0x109] sm:$0xff]  ;;  %v20118_v29 = vld [vmem:[%s34633_s0 + $0x111] sm:$0xff]  ;;  %v20119_v30 = vld [vmem:[%s34633_s0 + $0x121] sm:$0xff] }
  0x7a   :  { %23884 = vmatprep.subr.msk.mxu1 %vm426_vm0, %v28440_v26  ;;  %v20120_v31 = vld [vmem:[%s34633_s0 + $0x129] sm:$0xff]  ;;  %v20121_v32 = vld [vmem:[%s34633_s0 + $0x139] sm:$0xff]  ;;  %v20122_v33 = vld [vmem:[%s34633_s0 + $0x141] sm:$0xff] }
  0x7b   :  { %23697 = vmatmul.mubr.msk.f32.gmra.mrb[4].mxu1 %vm233_vm1, %v20100_v9  ;;  %v20123_v34 = vld [vmem:[%s34633_s0 + $0x151] sm:$0xff]  ;;  %v20124_v35 = vld [vmem:[%s34633_s0 + $0x159] sm:$0xff]  ;;  %v20125_v36 = vld [vmem:[%s34633_s0 + $0x169] sm:$0xff] }
  0x7c   :  { %24089 = vmatmul.mubr.msk.f32.gmra.mrb[4].mxu0 %vm233_vm1, %v20102_v11  ;;  %23699 = vmatprep.mubr.msk.f32.mxu1 %vm233_vm1, %v20101_v10  ;;  %v20126_v37 = vld [vmem:[%s34633_s0 + $0x171] sm:$0xff]  ;;  %v20127_v38 = vld [vmem:[%s34633_s0 + $0x181] sm:$0xff]  ;;  %v20128_v39 = vld [vmem:[%s34633_s0 + $0x189] sm:$0xff] }
  0x7d   :  { %24091 = vmatprep.mubr.msk.f32.mxu0 %vm233_vm1, %v20103_v12  ;;  %v199_v40 = vld [vmem:[%s34633_s0 + $0x1b1] sm:$0xff]  ;;  %v28517_v41 = vld [vmem:[%s34633_s0 + $0x1a] sm:$0xff]  ;;  %v28530_v43 = vld [vmem:[%s34633_s0 + $0x22] sm:$0xff] }
  0x7e   :  { %v200_v42 = vld [vmem:[%s34633_s0 + $0x1b9] sm:$0xff]  ;;  %v201_v44 = vld [vmem:[%s34633_s0 + $0x1c9] sm:$0xff]  ;;  %v202_v46 = vld [vmem:[%s34633_s0 + $0x1d1] sm:$0xff] }
  0x7f   :  { %23700 = vmatmul.mubr.msk.f32.gmra.mrb[6].mxu1 %vm233_vm1, %v20102_v11  ;;  %v28538_v45 = vld [vmem:[%s34633_s0 + $0x32] sm:$0xff]  ;;  %v28547_v47 = vld [vmem:[#allocation4 + $0x1c] sm:$0xf]  ;;  %v203_v49 = vld [vmem:[%s34633_s0 + $0x1e1] sm:$0xff] }
  0x80   :  { %24092 = vmatmul.mubr.msk.f32.gmra.mrb[6].mxu0 %vm233_vm1, %v20104_v13  ;;  %23702 = vmatprep.mubr.msk.f32.mxu1 %vm233_vm1, %v20103_v12  ;;  %v28556_v48 = vld [vmem:[%s34633_s0 + $0x3a] sm:$0xff]  ;;  %v28564_v50 = vld [vmem:[%s34633_s0 + $0x4a] sm:$0xff]  ;;  %v28580_v52 = vld [vmem:[%s34633_s0 + $0x52] sm:$0xff] }
  0x81   :  { %24094 = vmatprep.mubr.msk.f32.mxu0 %vm233_vm1, %v20105_v15  ;;  %v204_v51 = vld [vmem:[%s34633_s0 + $0x1e9] sm:$0xff]  ;;  %v205_v53 = vld [vmem:[%s34633_s0 + $0x1f9] sm:$0xff]  ;;  %v206_v55 = vld [vmem:[%s34633_s0 + $0x201] sm:$0xff] }
  0x82   :  { %v28588_v54 = vld [vmem:[%s34633_s0 + $0x62] sm:$0xff]  ;;  %v28602_v56 = vld [vmem:[%s34633_s0 + $0x6a] sm:$0xff]  ;;  %v28610_v58 = vld [vmem:[%s34633_s0 + $0x7a] sm:$0xff] }
  0x83   :  { %23703 = vmatmul.mubr.msk.f32.gmra.mrb[8].mxu1 %vm233_vm1, %v20104_v13  ;;  %v207_v57 = vld [vmem:[%s34633_s0 + $0x211] sm:$0xff]  ;;  %v208_v59 = vld [vmem:[%s34633_s0 + $0x219] sm:$0xff]  ;;  %v28624_v60 = vld [vmem:[%s34633_s0 + $0x82] sm:$0xff] }
  0x84   :  { %24095 = vmatmul.mubr.msk.f32.gmra.mrb[8].mxu0 %vm233_vm1, %v20106_v16  ;;  %23705 = vmatprep.mubr.msk.f32.mxu1 %vm233_vm1, %v20105_v15  ;;  %v209_v61 = vld [vmem:[%s34633_s0 + $0x229] sm:$0xff]  ;;  %v28632_v62 = vld [vmem:[%s34633_s0 + $0x92] sm:$0xff]  ;;  %v28646_v0 = vld [vmem:[%s34633_s0 + $0x9a] sm:$0xff] }
  0x85   :  { %24097 = vmatprep.mubr.msk.f32.mxu0 %vm233_vm1, %v20107_v17  ;;  %v210_v63 = vld [vmem:[%s34633_s0 + $0x231] sm:$0xff]  ;;  %v211_v2 = vld [vmem:[%s34633_s0 + $0x241] sm:$0xff]  ;;  %v212_v4 = vld [vmem:[%s34633_s0 + $0x249] sm:$0xff] }
  0x86   :  { %v28654_v3 = vld [vmem:[%s34633_s0 + $0xaa] sm:$0xff]  ;;  %v28668_v5 = vld [vmem:[%s34633_s0 + $0xb2] sm:$0xff]  ;;  %v28676_v7 = vld [vmem:[%s34633_s0 + $0xc2] sm:$0xff] }
  0x87   :  { %23706 = vmatmul.mubr.msk.f32.gmra.mrb[10].mxu1 %vm233_vm1, %v20106_v16  ;;  %v213_v6 = vld [vmem:[%s34633_s0 + $0x259] sm:$0xff]  ;;  %v214_v8 = vld [vmem:[%s34633_s0 + $0x261] sm:$0xff]  ;;  %v28690_v9 = vld [vmem:[%s34633_s0 + $0xca] sm:$0xff] }
  0x88   :  { %24098 = vmatmul.mubr.msk.f32.gmra.mrb[10].mxu0 %vm233_vm1, %v20108_v18  ;;  %23708 = vmatprep.mubr.msk.f32.mxu1 %vm233_vm1, %v20107_v17  ;;  %v215_v10 = vld [vmem:[%s34633_s0 + $0x271] sm:$0xff]  ;;  %v28698_v11 = vld [vmem:[%s34633_s0 + $0xda] sm:$0xff]  ;;  %v28712_v13 = vld [vmem:[%s34633_s0 + $0xe2] sm:$0xff] }
  0x89   :  { %24100 = vmatprep.mubr.msk.f32.mxu0 %vm233_vm1, %v20109_v19  ;;  %v216_v12 = vld [vmem:[%s34633_s0 + $0x279] sm:$0xff]  ;;  %v218_v16 = vld [vmem:[%s34633_s0 + $0x291] sm:$0xff] }
  0x8a   :  { %v28720_v15 = vld [vmem:[%s34633_s0 + $0xf2] sm:$0xff]  ;;  %v28734_v17 = vld [vmem:[%s34633_s0 + $0xfa] sm:$0xff] }
  0x8b   :  { %23709 = vmatmul.mubr.msk.f32.gmra.mrb[12].mxu1 %vm233_vm1, %v20108_v18  ;;  %v219_v18 = vld [vmem:[%s34633_s0 + $0x2a1] sm:$0xff] }
  0x8c   :  { %24101 = vmatmul.mubr.msk.f32.gmra.mrb[12].mxu0 %vm233_vm1, %v20110_v20  ;;  %23711 = vmatprep.mubr.msk.f32.mxu1 %vm233_vm1, %v20109_v19  ;;  %v28742_v19 = vld [vmem:[%s34633_s0 + $0x10a] sm:$0xff] }
  0x8d   :  { %24103 = vmatprep.mubr.msk.f32.mxu0 %vm233_vm1, %v20111_v21 }
  0x8f   :  { %23712 = vmatmul.mubr.msk.f32.gmra.mrb[14].mxu1 %vm233_vm1, %v20110_v20  ;;  %v220_v20 = vld [vmem:[%s34633_s0 + $0x2a9] sm:$0xff] }
  0x90   :  { %24104 = vmatmul.mubr.msk.f32.gmra.mrb[14].mxu0 %vm233_vm1, %v20112_v22  ;;  %23714 = vmatprep.mubr.msk.f32.mxu1 %vm233_vm1, %v20111_v21  ;;  %v28756_v21 = vld [vmem:[%s34633_s0 + $0x112] sm:$0xff] }
  0x91   :  { %24106 = vmatprep.mubr.msk.f32.mxu0 %vm233_vm1, %v20113_v23 }
  0x93   :  { %23715 = vmatmul.mubr.msk.f32.gmra.mrb[16].mxu1 %vm233_vm1, %v20112_v22  ;;  %v221_v22 = vld [vmem:[%s34633_s0 + $0x2b9] sm:$0xff] }
  0x94   :  { %24107 = vmatmul.mubr.msk.f32.gmra.mrb[16].mxu0 %vm233_vm1, %v20114_v24  ;;  %23717 = vmatprep.mubr.msk.f32.mxu1 %vm233_vm1, %v20113_v23  ;;  %v28764_v23 = vld [vmem:[%s34633_s0 + $0x122] sm:$0xff] }
  0x95   :  { %24109 = vmatprep.mubr.msk.f32.mxu0 %vm233_vm1, %v20115_v25 }
  0x97   :  { %23718 = vmatmul.mubr.msk.f32.gmra.mrb[18].mxu1 %vm233_vm1, %v20114_v24  ;;  %v222_v24 = vld [vmem:[%s34633_s0 + $0x2c1] sm:$0xff] }
  0x98   :  { %24110 = vmatmul.mubr.msk.f32.gmra.mrb[18].mxu0 %vm233_vm1, %v20116_v27  ;;  %23720 = vmatprep.mubr.msk.f32.mxu1 %vm233_vm1, %v20115_v25  ;;  %v28778_v25 = vld [vmem:[%s34633_s0 + $0x12a] sm:$0xff] }
  0x99   :  { %24112 = vmatprep.mubr.msk.f32.mxu0 %vm233_vm1, %v20117_v28 }
  0x9b   :  { %23721 = vmatmul.mubr.msk.f32.gmra.mrb[20].mxu1 %vm233_vm1, %v20116_v27  ;;  %v223_v27 = vld [vmem:[%s34633_s0 + $0x2d1] sm:$0xff] }
  0x9c   :  { %24113 = vmatmul.mubr.msk.f32.gmra.mrb[20].mxu0 %vm233_vm1, %v20118_v29  ;;  %23723 = vmatprep.mubr.msk.f32.mxu1 %vm233_vm1, %v20117_v28  ;;  %v28786_v28 = vld [vmem:[%s34633_s0 + $0x13a] sm:$0xff] }
  0x9d   :  { %24115 = vmatprep.mubr.msk.f32.mxu0 %vm233_vm1, %v20119_v30 }
  0x9f   :  { %23724 = vmatmul.mubr.msk.f32.gmra.mrb[22].mxu1 %vm233_vm1, %v20118_v29  ;;  %v224_v29 = vld [vmem:[%s34633_s0 + $0x2d9] sm:$0xff] }
  0xa0   :  { %24116 = vmatmul.mubr.msk.f32.gmra.mrb[22].mxu0 %vm233_vm1, %v20120_v31  ;;  %23726 = vmatprep.mubr.msk.f32.mxu1 %vm233_vm1, %v20119_v30  ;;  %v28800_v30 = vld [vmem:[%s34633_s0 + $0x142] sm:$0xff] }
  0xa1   :  { %24118 = vmatprep.mubr.msk.f32.mxu0 %vm233_vm1, %v20121_v32 }
  0xa3   :  { %23727 = vmatmul.mubr.msk.f32.gmra.mrb[24].mxu1 %vm233_vm1, %v20120_v31  ;;  %v225_v31 = vld [vmem:[%s34633_s0 + $0x2e9] sm:$0xff] }
  0xa4   :  { %24119 = vmatmul.mubr.msk.f32.gmra.mrb[24].mxu0 %vm233_vm1, %v20122_v33  ;;  %23729 = vmatprep.mubr.msk.f32.mxu1 %vm233_vm1, %v20121_v32  ;;  %v28808_v32 = vld [vmem:[%s34633_s0 + $0x152] sm:$0xff] }
  0xa5   :  { %24121 = vmatprep.mubr.msk.f32.mxu0 %vm233_vm1, %v20123_v34 }
  0xa7   :  { %23730 = vmatmul.mubr.msk.f32.gmra.mrb[26].mxu1 %vm233_vm1, %v20122_v33  ;;  %v226_v33 = vld [vmem:[%s34633_s0 + $0x2f1] sm:$0xff] }
  0xa8   :  { %24122 = vmatmul.mubr.msk.f32.gmra.mrb[26].mxu0 %vm233_vm1, %v20124_v35  ;;  %23732 = vmatprep.mubr.msk.f32.mxu1 %vm233_vm1, %v20123_v34  ;;  %v28822_v34 = vld [vmem:[%s34633_s0 + $0x15a] sm:$0xff] }
  0xa9   :  { %24124 = vmatprep.mubr.msk.f32.mxu0 %vm233_vm1, %v20125_v36 }
  0xab   :  { %23733 = vmatmul.mubr.msk.f32.gmra.mrb[28].mxu1 %vm233_vm1, %v20124_v35  ;;  %v227_v35 = vld [vmem:[%s34633_s0 + $0x301] sm:$0xff] }
  0xac   :  { %24125 = vmatmul.mubr.msk.f32.gmra.mrb[28].mxu0 %vm233_vm1, %v20126_v37  ;;  %23735 = vmatprep.mubr.msk.f32.mxu1 %vm233_vm1, %v20125_v36  ;;  %v28830_v36 = vld [vmem:[%s34633_s0 + $0x16a] sm:$0xff] }
  0xad   :  { %24127 = vmatprep.mubr.msk.f32.mxu0 %vm233_vm1, %v20127_v38  ;;  %v28844_v38 = vld [vmem:[%s34633_s0 + $0x172] sm:$0xff] }
  0xae   :  { %34834 = vst [vmem:[#allocation18_spill] sm:$0xff] %v28844_v38 }
  0xaf   :  { %23736 = vmatmul.mubr.msk.f32.gmra.mrb[30].mxu1 %vm233_vm1, %v20126_v37  ;;  %v228_v37 = vld [vmem:[%s34633_s0 + $0x309] sm:$0xff] }
  0xb0   :  { %24128 = vmatmul.mubr.msk.f32.gmra.mrb[30].mxu0 %vm233_vm1, %v20128_v39  ;;  %23738 = vmatprep.mubr.msk.f32.mxu1 %vm233_vm1, %v199_v40  ;;  %v229_v39 = vld [vmem:[%s34633_s0 + $0x319] sm:$0xff]  ;;  %v20256_v40 = vld [vmem:[%s34633_s0 + $0x182] sm:$0xff] }
  0xb1   :  { %24180 = vmatprep.mubr.msk.f32.mxu0 %vm233_vm1, %v28517_v41 }
  0xb3   :  { %23739 = vmatmul.mubr.msk.f32.gmra.mrb[32].mxu1 %vm233_vm1, %v200_v42  ;;  %v230_v42 = vld [vmem:[%s34633_s0 + $0x321] sm:$0xff] }
  0xb4   :  { %24181 = vmatmul.mubr.msk.f32.vlgmr.msra.gmra.mrb[0].mxu0 %vm233_vm1, %v28530_v43  ;;  %23741 = vmatprep.mubr.msk.f32.mxu1 %vm233_vm1, %v201_v44  ;;  %v20257_v44 = vld [vmem:[%s34633_s0 + $0x18a] sm:$0xff] }
  0xb5   :  { %24277 = vmatpush3.msk.msra.mxu0 %vm426_vm0, %v28383_v14  ;;  %24183 = vmatprep.mubr.msk.f32.mxu0 %vm233_vm1, %v28538_v45  ;;  %v217_v14 = vld [vmem:[%s34633_s0 + $0x289] sm:$0xff] }
  0xb6   :  { %24374 = vmatprep.subr.msk.mxu0 %vm426_vm0, %v28547_v47 }
  0xb7   :  { %23742 = vmatmul.mubr.msk.f32.gmra.mrb[34].mxu1 %vm233_vm1, %v202_v46  ;;  %v102_v46 = vld [vmem:[%s34633_s0] sm:$0xff] }
  0xb8   :  { %24184 = vmatmul.mubr.msk.f32.gmra.mrb[2].mxu0 %vm233_vm1, %v28556_v48  ;;  %23744 = vmatprep.mubr.msk.f32.mxu1 %vm233_vm1, %v203_v49  ;;  %v28869_v49 = vld [vmem:[%s34633_s0 + $0x1ca] sm:$0xff] }
  0xb9   :  { %24186 = vmatprep.mubr.msk.f32.mxu0 %vm233_vm1, %v28564_v50  ;;  %34835 = vst [vmem:[#allocation19_spill] sm:$0xff] %v28869_v49 }
  0xbb   :  { %23745 = vmatmul.mubr.msk.f32.gmra.mrb[36].mxu1 %vm233_vm1, %v204_v51  ;;  %v103_v51 = vld [vmem:[%s34633_s0 + $0x8] sm:$0xff] }
  0xbc   :  { %24187 = vmatmul.mubr.msk.f32.gmra.mrb[4].mxu0 %vm233_vm1, %v28580_v52  ;;  %23747 = vmatprep.mubr.msk.f32.mxu1 %vm233_vm1, %v205_v53  ;;  %v28882_v53 = vld [vmem:[%s34633_s0 + $0x1d2] sm:$0xff] }
  0xbd   :  { %24189 = vmatprep.mubr.msk.f32.mxu0 %vm233_vm1, %v28588_v54  ;;  %34836 = vst [vmem:[#allocation20_spill] sm:$0xff] %v28882_v53 }
  0xbf   :  { %23748 = vmatmul.mubr.msk.f32.gmra.mrb[38].mxu1 %vm233_vm1, %v206_v55  ;;  %v104_v55 = vld [vmem:[%s34633_s0 + $0x18] sm:$0xff] }
  0xc0   :  { %24190 = vmatmul.mubr.msk.f32.gmra.mrb[6].mxu0 %vm233_vm1, %v28602_v56  ;;  %23750 = vmatprep.mubr.msk.f32.mxu1 %vm233_vm1, %v207_v57  ;;  %v28890_v57 = vld [vmem:[%s34633_s0 + $0x1e2] sm:$0xff] }
  0xc1   :  { %24192 = vmatprep.mubr.msk.f32.mxu0 %vm233_vm1, %v28610_v58  ;;  %34837 = vst [vmem:[#allocation21_spill] sm:$0xff] %v28890_v57 }
  0xc3   :  { %23751 = vmatmul.mubr.msk.f32.gmra.mrb[40].mxu1 %vm233_vm1, %v208_v59  ;;  %v28893_v59 = vld [vmem:[#allocation4 + $0xc] sm:$0xf] }
  0xc4   :  { %24193 = vmatmul.mubr.msk.f32.gmra.mrb[8].mxu0 %vm233_vm1, %v28624_v60  ;;  %23753 = vmatprep.mubr.msk.f32.mxu1 %vm233_vm1, %v209_v61  ;;  %v105_v61 = vld [vmem:[%s34633_s0 + $0x20] sm:$0xff] }
  0xc5   :  { %24195 = vmatprep.mubr.msk.f32.mxu0 %vm233_vm1, %v28632_v62 }
  0xc7   :  { %23754 = vmatmul.mubr.msk.f32.gmra.mrb[42].mxu1 %vm233_vm1, %v210_v63  ;;  %v28908_v63 = vld [vmem:[%s34633_s0 + $0x1ea] sm:$0xff] }
  0xc8   :  { %24196 = vmatmul.mubr.msk.f32.gmra.mrb[10].mxu0 %vm233_vm1, %v28646_v0  ;;  %23756 = vmatprep.mubr.msk.f32.mxu1 %vm233_vm1, %v211_v2  ;;  %34838 = vst [vmem:[#allocation22_spill] sm:$0xff] %v28908_v63  ;;  %v28913_v2 = vld [vmem:[%s34633_s0 + $0x30] sm:$0xff] }
  0xc9   :  { %24198 = vmatprep.mubr.msk.f32.mxu0 %vm233_vm1, %v28654_v3 }
  0xcb   :  { %23757 = vmatmul.mubr.msk.f32.gmra.mrb[44].mxu1 %vm233_vm1, %v212_v4  ;;  %v28930_v4 = vld [vmem:[%s34633_s0 + $0x38] sm:$0xff] }
  0xcc   :  { %24199 = vmatmul.mubr.msk.f32.gmra.mrb[12].mxu0 %vm233_vm1, %v28668_v5  ;;  %23759 = vmatprep.mubr.msk.f32.mxu1 %vm233_vm1, %v213_v6  ;;  %v28937_v6 = vld [vmem:[%s34633_s0 + $0x202] sm:$0xff] }
  0xcd   :  { %24201 = vmatprep.mubr.msk.f32.mxu0 %vm233_vm1, %v28676_v7  ;;  %34840 = vst [vmem:[#allocation24_spill] sm:$0xff] %v28937_v6 }
  0xcf   :  { %23760 = vmatmul.mubr.msk.f32.gmra.mrb[46].mxu1 %vm233_vm1, %v214_v8  ;;  %v28942_v8 = vld [vmem:[%s34633_s0 + $0x48] sm:$0xff] }
  0xd0   :  { %24202 = vmatmul.mubr.msk.f32.gmra.mrb[14].mxu0 %vm233_vm1, %v28690_v9  ;;  %23762 = vmatprep.mubr.msk.f32.mxu1 %vm233_vm1, %v215_v10  ;;  %v28947_v10 = vld [vmem:[%s34633_s0 + $0x212] sm:$0xff] }
  0xd1   :  { %24204 = vmatprep.mubr.msk.f32.mxu0 %vm233_vm1, %v28698_v11  ;;  %34841 = vst [vmem:[#allocation25_spill] sm:$0xff] %v28947_v10 }
  0xd3   :  { %23763 = vmatmul.mubr.msk.f32.gmra.mrb[48].mxu1 %vm233_vm1, %v216_v12  ;;  %v28958_v12 = vld [vmem:[%s34633_s0 + $0x50] sm:$0xff] }
  0xd4   :  { %24205 = vmatmul.mubr.msk.f32.gmra.mrb[16].mxu0 %vm233_vm1, %v28712_v13  ;;  %23765 = vmatprep.mubr.msk.f32.mxu1 %vm233_vm1, %v217_v14  ;;  %v28965_v14 = vld [vmem:[%s34633_s0 + $0x21a] sm:$0xff] }
  0xd5   :  { %24207 = vmatprep.mubr.msk.f32.mxu0 %vm233_vm1, %v28720_v15  ;;  %34842 = vst [vmem:[#allocation26_spill] sm:$0xff] %v28965_v14 }
  0xd7   :  { %23766 = vmatmul.mubr.msk.f32.gmra.mrb[50].mxu1 %vm233_vm1, %v218_v16  ;;  %v28970_v16 = vld [vmem:[%s34633_s0 + $0x60] sm:$0xff] }
  0xd8   :  { %24208 = vmatmul.mubr.msk.f32.gmra.mrb[18].mxu0 %vm233_vm1, %v28734_v17  ;;  %23768 = vmatprep.mubr.msk.f32.mxu1 %vm233_vm1, %v219_v18  ;;  %v28975_v18 = vld [vmem:[%s34633_s0 + $0x22a] sm:$0xff] }
  0xd9   :  { %24210 = vmatprep.mubr.msk.f32.mxu0 %vm233_vm1, %v28742_v19  ;;  %34843 = vst [vmem:[#allocation27_spill] sm:$0xff] %v28975_v18 }
  0xdb   :  { %23769 = vmatmul.mubr.msk.f32.gmra.mrb[52].mxu1 %vm233_vm1, %v220_v20  ;;  %v28986_v20 = vld [vmem:[%s34633_s0 + $0x68] sm:$0xff] }
  0xdc   :  { %24211 = vmatmul.mubr.msk.f32.gmra.mrb[20].mxu0 %vm233_vm1, %v28756_v21  ;;  %23771 = vmatprep.mubr.msk.f32.mxu1 %vm233_vm1, %v221_v22  ;;  %v28993_v22 = vld [vmem:[%s34633_s0 + $0x232] sm:$0xff] }
  0xdd   :  { %24213 = vmatprep.mubr.msk.f32.mxu0 %vm233_vm1, %v28764_v23  ;;  %34844 = vst [vmem:[#allocation28_spill] sm:$0xff] %v28993_v22 }
  0xdf   :  { %23772 = vmatmul.mubr.msk.f32.gmra.mrb[54].mxu1 %vm233_vm1, %v222_v24  ;;  %v28998_v24 = vld [vmem:[%s34633_s0 + $0x78] sm:$0xff] }
  0xe0   :  { %24214 = vmatmul.mubr.msk.f32.gmra.mrb[22].mxu0 %vm233_vm1, %v28778_v25  ;;  %23774 = vmatprep.mubr.msk.f32.mxu1 %vm233_vm1, %v223_v27  ;;  %v29003_v27 = vld [vmem:[%s34633_s0 + $0x242] sm:$0xff] }
  0xe1   :  { %24216 = vmatprep.mubr.msk.f32.mxu0 %vm233_vm1, %v28786_v28  ;;  %34845 = vst [vmem:[#allocation29_spill] sm:$0xff] %v29003_v27 }
  0xe3   :  { %23775 = vmatmul.mubr.msk.f32.gmra.mrb[56].mxu1 %vm233_vm1, %v224_v29  ;;  %v29014_v29 = vld [vmem:[%s34633_s0 + $0x80] sm:$0xff] }
  0xe4   :  { %24217 = vmatmul.mubr.msk.f32.gmra.mrb[24].mxu0 %vm233_vm1, %v28800_v30  ;;  %23777 = vmatprep.mubr.msk.f32.mxu1 %vm233_vm1, %v225_v31  ;;  %v29021_v31 = vld [vmem:[%s34633_s0 + $0x24a] sm:$0xff] }
  0xe5   :  { %24219 = vmatprep.mubr.msk.f32.mxu0 %vm233_vm1, %v28808_v32  ;;  %34846 = vst [vmem:[#allocation30_spill] sm:$0xff] %v29021_v31 }
  0xe7   :  { %23778 = vmatmul.mubr.msk.f32.gmra.mrb[58].mxu1 %vm233_vm1, %v226_v33  ;;  %v29026_v33 = vld [vmem:[%s34633_s0 + $0x90] sm:$0xff] }
  0xe8   :  { %24220 = vmatmul.mubr.msk.f32.gmra.mrb[26].mxu0 %vm233_vm1, %v28822_v34  ;;  %23780 = vmatprep.mubr.msk.f32.mxu1 %vm233_vm1, %v227_v35  ;;  %v29031_v35 = vld [vmem:[%s34633_s0 + $0x25a] sm:$0xff] }
  0xe9   :  { %24222 = vmatprep.mubr.msk.f32.mxu0 %vm233_vm1, %v28830_v36  ;;  %34847 = vst [vmem:[#allocation31_spill] sm:$0xff] %v29031_v35 }
  0xeb   :  { %23781 = vmatmul.mubr.msk.f32.gmra.mrb[60].mxu1 %vm233_vm1, %v228_v37  ;;  %v29042_v37 = vld [vmem:[%s34633_s0 + $0x98] sm:$0xff] }
  0xec   :  { %24223 = vmatmul.mubr.msk.f32.gmra.mrb[28].mxu0 %vm233_vm1, %v28844_v38  ;;  %23783 = vmatprep.mubr.msk.f32.mxu1 %vm233_vm1, %v229_v39  ;;  %v29049_v39 = vld [vmem:[%s34633_s0 + $0x262] sm:$0xff]  ;;  %v134_v38 = vld [vmem:[%s34633_s0 + $0x1b0] sm:$0xff] }
  0xed   :  { %24225 = vmatprep.mubr.msk.f32.mxu0 %vm233_vm1, %v20256_v40  ;;  %34848 = vst [vmem:[#allocation32_spill] sm:$0xff] %v29049_v39  ;;  %v29054_v40 = vld [vmem:[%s34633_s0 + $0xa8] sm:$0xff] }
  0xef   :  { %23784 = vmatmul.mubr.msk.f32.gmra.mrb[62].mxu1 %vm233_vm1, %v230_v42  ;;  %v29059_v42 = vld [vmem:[%s34633_s0 + $0x272] sm:$0xff] }
  0xf0   :  { %24226 = vmatmul.mubr.msk.f32.gmra.mrb[30].mxu0 %vm233_vm1, %v20257_v44  ;;  %23788 = vmatprep.mubr.msk.f32.mxu1 %vm233_vm1, %v102_v46  ;;  %34849 = vst [vmem:[#allocation33_spill] sm:$0xff] %v29059_v42  ;;  %v29070_v44 = vld [vmem:[%s34633_s0 + $0xb0] sm:$0xff]  ;;  %v29077_v46 = vld [vmem:[%s34633_s0 + $0x27a] sm:$0xff] }
  0xf1   :  { %24228 = vmatprep.mubr.msk.f32.mxu0 %vm233_vm1, %v28869_v49  ;;  %34850 = vst [vmem:[#allocation34_spill] sm:$0xff] %v29077_v46  ;;  %v20289_v49 = vld [vmem:[%s34633_s0 + $0x33a] sm:$0xff] }
  0xf3   :  { %23789 = vmatmul.mubr.msk.f32.vlgmr.msra.gmra.mrb[0].mxu1 %vm233_vm1, %v103_v51  ;;  %v29082_v51 = vld [vmem:[%s34633_s0 + $0xc0] sm:$0xff] }
  0xf4   :  { %24229 = vmatmul.mubr.msk.f32.gmra.mrb[32].mxu0 %vm233_vm1, %v28882_v53  ;;  %23885 = vmatpush3.msk.msra.mxu1 %vm426_vm0, %v28440_v26  ;;  %v28918_v26 = vld [vmem:[%s34633_s0 + $0x1fa] sm:$0xff]  ;;  %v20288_v53 = vld [vmem:[%s34633_s0 + $0x332] sm:$0xff] }
  0xf5   :  { %23791 = vmatprep.mubr.msk.f32.mxu1 %vm233_vm1, %v104_v55  ;;  %24231 = vmatprep.mubr.msk.f32.mxu0 %vm233_vm1, %v28890_v57  ;;  %34839 = vst [vmem:[#allocation23_spill] sm:$0xff] %v28918_v26  ;;  %v29087_v55 = vld [vmem:[%s34633_s0 + $0x28a] sm:$0xff]  ;;  %v29273_v57 = vld [vmem:[%s34633_s0 + $0x322] sm:$0xff] }
  0xf6   :  { %23982 = vmatprep.subr.msk.mxu1 %vm426_vm0, %v28893_v59  ;;  %34851 = vst [vmem:[#allocation35_spill] sm:$0xff] %v29087_v55  ;;  %34864 = vst [vmem:[#allocation48_spill] sm:$0xff] %v29273_v57 }
  0xf7   :  { %23792 = vmatmul.mubr.msk.f32.gmra.mrb[2].mxu1 %vm233_vm1, %v105_v61  ;;  %v29098_v61 = vld [vmem:[%s34633_s0 + $0xc8] sm:$0xff] }
  0xf8   :  { %24232 = vmatmul.mubr.msk.f32.gmra.mrb[34].mxu0 %vm233_vm1, %v28908_v63  ;;  %23794 = vmatprep.mubr.msk.f32.mxu1 %vm233_vm1, %v28913_v2  ;;  %v29255_v63 = vld [vmem:[%s34633_s0 + $0x31a] sm:$0xff] }
  0xf9   :  { %24234 = vmatprep.mubr.msk.f32.mxu0 %vm233_vm1, %v28918_v26  ;;  %v29245_v26 = vld [vmem:[%s34633_s0 + $0x30a] sm:$0xff]  ;;  %34863 = vst [vmem:[#allocation47_spill] sm:$0xff] %v29255_v63 }
  0xfa   :  { %34862 = vst [vmem:[#allocation46_spill] sm:$0xff] %v29245_v26 }
  0xfb   :  { %23795 = vmatmul.mubr.msk.f32.gmra.mrb[4].mxu1 %vm233_vm1, %v28930_v4 }
  0xfc   :  { %24235 = vmatmul.mubr.msk.f32.gmra.mrb[36].mxu0 %vm233_vm1, %v28937_v6  ;;  %23797 = vmatprep.mubr.msk.f32.mxu1 %vm233_vm1, %v28942_v8  ;;  %v29227_v6 = vld [vmem:[%s34633_s0 + $0x302] sm:$0xff] }
  0xfd   :  { %24237 = vmatprep.mubr.msk.f32.mxu0 %vm233_vm1, %v28947_v10  ;;  %v29217_v10 = vld [vmem:[%s34633_s0 + $0x2f2] sm:$0xff]  ;;  %34861 = vst [vmem:[#allocation45_spill] sm:$0xff] %v29227_v6 }
  0xfe   :  { %34860 = vst [vmem:[#allocation44_spill] sm:$0xff] %v29217_v10 }
  0xff   :  { %23798 = vmatmul.mubr.msk.f32.gmra.mrb[6].mxu1 %vm233_vm1, %v28958_v12 }
 0x100   :  { %24238 = vmatmul.mubr.msk.f32.gmra.mrb[38].mxu0 %vm233_vm1, %v28965_v14  ;;  %23800 = vmatprep.mubr.msk.f32.mxu1 %vm233_vm1, %v28970_v16  ;;  %v29199_v14 = vld [vmem:[%s34633_s0 + $0x2ea] sm:$0xff] }
 0x101   :  { %24240 = vmatprep.mubr.msk.f32.mxu0 %vm233_vm1, %v28975_v18  ;;  %v29189_v18 = vld [vmem:[%s34633_s0 + $0x2da] sm:$0xff]  ;;  %34859 = vst [vmem:[#allocation43_spill] sm:$0xff] %v29199_v14 }
 0x102   :  { %34858 = vst [vmem:[#allocation42_spill] sm:$0xff] %v29189_v18 }
 0x103   :  { %23801 = vmatmul.mubr.msk.f32.gmra.mrb[8].mxu1 %vm233_vm1, %v28986_v20 }
 0x104   :  { %24241 = vmatmul.mubr.msk.f32.gmra.mrb[40].mxu0 %vm233_vm1, %v28993_v22  ;;  %23803 = vmatprep.mubr.msk.f32.mxu1 %vm233_vm1, %v28998_v24  ;;  %v29171_v22 = vld [vmem:[%s34633_s0 + $0x2d2] sm:$0xff] }
 0x105   :  { %24243 = vmatprep.mubr.msk.f32.mxu0 %vm233_vm1, %v29003_v27  ;;  %v29161_v27 = vld [vmem:[%s34633_s0 + $0x2c2] sm:$0xff]  ;;  %34857 = vst [vmem:[#allocation41_spill] sm:$0xff] %v29171_v22 }
 0x106   :  { %34856 = vst [vmem:[#allocation40_spill] sm:$0xff] %v29161_v27 }
 0x107   :  { %23804 = vmatmul.mubr.msk.f32.gmra.mrb[10].mxu1 %vm233_vm1, %v29014_v29 }
 0x108   :  { %24244 = vmatmul.mubr.msk.f32.gmra.mrb[42].mxu0 %vm233_vm1, %v29021_v31  ;;  %23806 = vmatprep.mubr.msk.f32.mxu1 %vm233_vm1, %v29026_v33  ;;  %v29143_v31 = vld [vmem:[%s34633_s0 + $0x2ba] sm:$0xff] }
 0x109   :  { %24246 = vmatprep.mubr.msk.f32.mxu0 %vm233_vm1, %v29031_v35  ;;  %v29133_v35 = vld [vmem:[%s34633_s0 + $0x2aa] sm:$0xff]  ;;  %34855 = vst [vmem:[#allocation39_spill] sm:$0xff] %v29143_v31 }
 0x10a   :  { %34854 = vst [vmem:[#allocation38_spill] sm:$0xff] %v29133_v35 }
 0x10b   :  { %23807 = vmatmul.mubr.msk.f32.gmra.mrb[12].mxu1 %vm233_vm1, %v29042_v37 }
 0x10c   :  { %24247 = vmatmul.mubr.msk.f32.gmra.mrb[44].mxu0 %vm233_vm1, %v29049_v39  ;;  %23809 = vmatprep.mubr.msk.f32.mxu1 %vm233_vm1, %v29054_v40  ;;  %v29115_v39 = vld [vmem:[%s34633_s0 + $0x2a2] sm:$0xff] }
 0x10d   :  { %24249 = vmatprep.mubr.msk.f32.mxu0 %vm233_vm1, %v29059_v42  ;;  %v29105_v42 = vld [vmem:[%s34633_s0 + $0x292] sm:$0xff]  ;;  %34853 = vst [vmem:[#allocation37_spill] sm:$0xff] %v29115_v39 }
 0x10e   :  { %34852 = vst [vmem:[#allocation36_spill] sm:$0xff] %v29105_v42 }
 0x10f   :  { %23810 = vmatmul.mubr.msk.f32.gmra.mrb[14].mxu1 %vm233_vm1, %v29070_v44 }
 0x110   :  { %24250 = vmatmul.mubr.msk.f32.gmra.mrb[46].mxu0 %vm233_vm1, %v29077_v46  ;;  %23812 = vmatprep.mubr.msk.f32.mxu1 %vm233_vm1, %v29082_v51  ;;  %v29110_v46 = vld [vmem:[%s34633_s0 + $0xd8] sm:$0xff] }
 0x111   :  { %24252 = vmatprep.mubr.msk.f32.mxu0 %vm233_vm1, %v29087_v55  ;;  %v29126_v55 = vld [vmem:[%s34633_s0 + $0xe0] sm:$0xff] }
 0x113   :  { %23813 = vmatmul.mubr.msk.f32.gmra.mrb[16].mxu1 %vm233_vm1, %v29098_v61 }
 0x114   :  { %24253 = vmatmul.mubr.msk.f32.gmra.mrb[48].mxu0 %vm233_vm1, %v29105_v42  ;;  %23815 = vmatprep.mubr.msk.f32.mxu1 %vm233_vm1, %v29110_v46  ;;  %v29138_v42 = vld [vmem:[%s34633_s0 + $0xf0] sm:$0xff] }
 0x115   :  { %24255 = vmatprep.mubr.msk.f32.mxu0 %vm233_vm1, %v29115_v39  ;;  %v29154_v39 = vld [vmem:[%s34633_s0 + $0xf8] sm:$0xff] }
 0x117   :  { %23816 = vmatmul.mubr.msk.f32.gmra.mrb[18].mxu1 %vm233_vm1, %v29126_v55 }
 0x118   :  { %24256 = vmatmul.mubr.msk.f32.gmra.mrb[50].mxu0 %vm233_vm1, %v29133_v35  ;;  %23818 = vmatprep.mubr.msk.f32.mxu1 %vm233_vm1, %v29138_v42  ;;  %v29166_v35 = vld [vmem:[%s34633_s0 + $0x108] sm:$0xff] }
 0x119   :  { %24258 = vmatprep.mubr.msk.f32.mxu0 %vm233_vm1, %v29143_v31  ;;  %v29182_v31 = vld [vmem:[%s34633_s0 + $0x110] sm:$0xff] }
 0x11b   :  { %23819 = vmatmul.mubr.msk.f32.gmra.mrb[20].mxu1 %vm233_vm1, %v29154_v39 }
 0x11c   :  { %24259 = vmatmul.mubr.msk.f32.gmra.mrb[52].mxu0 %vm233_vm1, %v29161_v27  ;;  %23821 = vmatprep.mubr.msk.f32.mxu1 %vm233_vm1, %v29166_v35  ;;  %v29194_v27 = vld [vmem:[%s34633_s0 + $0x120] sm:$0xff] }
 0x11d   :  { %24261 = vmatprep.mubr.msk.f32.mxu0 %vm233_vm1, %v29171_v22  ;;  %v29210_v22 = vld [vmem:[%s34633_s0 + $0x128] sm:$0xff] }
 0x11f   :  { %23822 = vmatmul.mubr.msk.f32.gmra.mrb[22].mxu1 %vm233_vm1, %v29182_v31 }
 0x120   :  { %24262 = vmatmul.mubr.msk.f32.gmra.mrb[54].mxu0 %vm233_vm1, %v29189_v18  ;;  %23824 = vmatprep.mubr.msk.f32.mxu1 %vm233_vm1, %v29194_v27  ;;  %v29222_v18 = vld [vmem:[%s34633_s0 + $0x138] sm:$0xff] }
 0x121   :  { %24264 = vmatprep.mubr.msk.f32.mxu0 %vm233_vm1, %v29199_v14  ;;  %v29238_v14 = vld [vmem:[%s34633_s0 + $0x140] sm:$0xff] }
 0x123   :  { %23825 = vmatmul.mubr.msk.f32.gmra.mrb[24].mxu1 %vm233_vm1, %v29210_v22 }
 0x124   :  { %24265 = vmatmul.mubr.msk.f32.gmra.mrb[56].mxu0 %vm233_vm1, %v29217_v10  ;;  %23827 = vmatprep.mubr.msk.f32.mxu1 %vm233_vm1, %v29222_v18  ;;  %v29250_v10 = vld [vmem:[%s34633_s0 + $0x150] sm:$0xff] }
 0x125   :  { %24267 = vmatprep.mubr.msk.f32.mxu0 %vm233_vm1, %v29227_v6  ;;  %v29266_v6 = vld [vmem:[%s34633_s0 + $0x158] sm:$0xff] }
 0x127   :  { %23828 = vmatmul.mubr.msk.f32.gmra.mrb[26].mxu1 %vm233_vm1, %v29238_v14 }
 0x128   :  { %24268 = vmatmul.mubr.msk.f32.gmra.mrb[58].mxu0 %vm233_vm1, %v29245_v26  ;;  %23830 = vmatprep.mubr.msk.f32.mxu1 %vm233_vm1, %v29250_v10  ;;  %v29278_v26 = vld [vmem:[%s34633_s0 + $0x168] sm:$0xff] }
 0x129   :  { %24270 = vmatprep.mubr.msk.f32.mxu0 %vm233_vm1, %v29255_v63  ;;  %v29292_v63 = vld [vmem:[%s34633_s0 + $0x170] sm:$0xff] }
 0x12b   :  { %23831 = vmatmul.mubr.msk.f32.gmra.mrb[28].mxu1 %vm233_vm1, %v29266_v6 }
 0x12c   :  { %24271 = vmatmul.mubr.msk.f32.gmra.mrb[60].mxu0 %vm233_vm1, %v29273_v57  ;;  %23833 = vmatprep.mubr.msk.f32.mxu1 %vm233_vm1, %v29278_v26  ;;  %v135_v57 = vld [vmem:[%s34633_s0 + $0x1b8] sm:$0xff] }
 0x12d   :  { %24273 = vmatprep.mubr.msk.f32.mxu0 %vm233_vm1, %v20288_v53  ;;  %v29313_v53 = vld [vmem:[%s34633_s0 + $0x1c8] sm:$0xff] }
 0x12e   :  { %34865 = vst [vmem:[#allocation49_spill] sm:$0xff] %v29313_v53 }
 0x12f   :  { %23834 = vmatmul.mubr.msk.f32.gmra.mrb[30].mxu1 %vm233_vm1, %v29292_v63 }
 0x130   :  { %24274 = vmatmul.mubr.msk.f32.gmra.mrb[62].mxu0 %vm233_vm1, %v20289_v49  ;;  %23836 = vmatprep.mubr.msk.f32.mxu1 %vm233_vm1, %v134_v38  ;;  %v29323_v38 = vld [vmem:[%s34633_s0 + $0x1d0] sm:$0xff]  ;;  %v29325_v49 = vld [vmem:[#allocation4 + $0x20] sm:$0xf] }
 0x131   :  { %24278 = vmatprep.mubr.msk.f32.mxu0 %vm233_vm1, %v28913_v2  ;;  %34866 = vst [vmem:[#allocation50_spill] sm:$0xff] %v29323_v38  ;;  %v29354_v2 = vld [vmem:[%s34633_s0 + $0x1f8] sm:$0xff] }
 0x133   :  { %23837 = vmatmul.mubr.msk.f32.gmra.mrb[32].mxu1 %vm233_vm1, %v135_v57  ;;  %v29334_v57 = vld [vmem:[%s34633_s0 + $0x1e0] sm:$0xff] }
 0x134   :  { %24279 = vmatmul.mubr.msk.f32.vlgmr.msra.gmra.mrb[0].mxu0 %vm233_vm1, %v28930_v4  ;;  %23839 = vmatprep.mubr.msk.f32.mxu1 %vm233_vm1, %v29313_v53  ;;  %v29365_v4 = vld [vmem:[%s34633_s0 + $0x200] sm:$0xff] }
 0x135   :  { %24375 = vmatpush3.msk.msra.mxu0 %vm426_vm0, %v28547_v47  ;;  %24281 = vmatprep.mubr.msk.f32.mxu0 %vm233_vm1, %v28942_v8  ;;  %v29347_v47 = vld [vmem:[%s34633_s0 + $0x1e8] sm:$0xff]  ;;  %v29372_v8 = vld [vmem:[%s34633_s0 + $0x210] sm:$0xff]  ;;  %v20386_v53 = vld [vmem:[%s34633_s0 + $0x1a0] sm:$0xff] }
 0x136   :  { %24472 = vmatprep.subr.msk.mxu0 %vm426_vm0, %v29325_v49 }
 0x137   :  { %23840 = vmatmul.mubr.msk.f32.gmra.mrb[34].mxu1 %vm233_vm1, %v29323_v38  ;;  %v29594_v38 = vld [vmem:[%s34633_s0 + $0x320] sm:$0xff] }
 0x138   :  { %24282 = vmatmul.mubr.msk.f32.gmra.mrb[2].mxu0 %vm233_vm1, %v28958_v12  ;;  %23842 = vmatprep.mubr.msk.f32.mxu1 %vm233_vm1, %v29334_v57  ;;  %v29383_v12 = vld [vmem:[%s34633_s0 + $0x218] sm:$0xff] }
 0x139   :  { %24284 = vmatprep.mubr.msk.f32.mxu0 %vm233_vm1, %v28970_v16  ;;  %v29390_v16 = vld [vmem:[%s34633_s0 + $0x228] sm:$0xff] }
 0x13b   :  { %23843 = vmatmul.mubr.msk.f32.gmra.mrb[36].mxu1 %vm233_vm1, %v29347_v47 }
 0x13c   :  { %24285 = vmatmul.mubr.msk.f32.gmra.mrb[4].mxu0 %vm233_vm1, %v28986_v20  ;;  %23845 = vmatprep.mubr.msk.f32.mxu1 %vm233_vm1, %v29354_v2  ;;  %v29401_v20 = vld [vmem:[%s34633_s0 + $0x230] sm:$0xff] }
 0x13d   :  { %24287 = vmatprep.mubr.msk.f32.mxu0 %vm233_vm1, %v28998_v24  ;;  %v29408_v24 = vld [vmem:[%s34633_s0 + $0x240] sm:$0xff] }
 0x13f   :  { %23846 = vmatmul.mubr.msk.f32.gmra.mrb[38].mxu1 %vm233_vm1, %v29365_v4 }
 0x140   :  { %24288 = vmatmul.mubr.msk.f32.gmra.mrb[6].mxu0 %vm233_vm1, %v29014_v29  ;;  %23848 = vmatprep.mubr.msk.f32.mxu1 %vm233_vm1, %v29372_v8  ;;  %v29419_v29 = vld [vmem:[%s34633_s0 + $0x248] sm:$0xff] }
 0x141   :  { %24290 = vmatprep.mubr.msk.f32.mxu0 %vm233_vm1, %v29026_v33  ;;  %v29426_v33 = vld [vmem:[%s34633_s0 + $0x258] sm:$0xff] }
 0x143   :  { %23849 = vmatmul.mubr.msk.f32.gmra.mrb[40].mxu1 %vm233_vm1, %v29383_v12 }
 0x144   :  { %24291 = vmatmul.mubr.msk.f32.gmra.mrb[8].mxu0 %vm233_vm1, %v29042_v37  ;;  %23851 = vmatprep.mubr.msk.f32.mxu1 %vm233_vm1, %v29390_v16  ;;  %v29437_v37 = vld [vmem:[%s34633_s0 + $0x260] sm:$0xff] }
 0x145   :  { %24293 = vmatprep.mubr.msk.f32.mxu0 %vm233_vm1, %v29054_v40  ;;  %v29444_v40 = vld [vmem:[%s34633_s0 + $0x270] sm:$0xff] }
 0x147   :  { %23852 = vmatmul.mubr.msk.f32.gmra.mrb[42].mxu1 %vm233_vm1, %v29401_v20 }
 0x148   :  { %24294 = vmatmul.mubr.msk.f32.gmra.mrb[10].mxu0 %vm233_vm1, %v29070_v44  ;;  %23854 = vmatprep.mubr.msk.f32.mxu1 %vm233_vm1, %v29408_v24  ;;  %v29455_v44 = vld [vmem:[%s34633_s0 + $0x278] sm:$0xff] }
 0x149   :  { %24296 = vmatprep.mubr.msk.f32.mxu0 %vm233_vm1, %v29082_v51  ;;  %v29473_v51 = vld [vmem:[%s34633_s0 + $0x290] sm:$0xff] }
 0x14b   :  { %23855 = vmatmul.mubr.msk.f32.gmra.mrb[44].mxu1 %vm233_vm1, %v29419_v29 }
 0x14c   :  { %24297 = vmatmul.mubr.msk.f32.gmra.mrb[12].mxu0 %vm233_vm1, %v29098_v61  ;;  %23857 = vmatprep.mubr.msk.f32.mxu1 %vm233_vm1, %v29426_v33  ;;  %v20385_v61 = vld [vmem:[%s34633_s0 + $0x198] sm:$0xff] }
 0x14d   :  { %24299 = vmatprep.mubr.msk.f32.mxu0 %vm233_vm1, %v29110_v46  ;;  %v29462_v46 = vld [vmem:[%s34633_s0 + $0x288] sm:$0xff] }
 0x14f   :  { %23858 = vmatmul.mubr.msk.f32.gmra.mrb[46].mxu1 %vm233_vm1, %v29437_v37 }
 0x150   :  { %24300 = vmatmul.mubr.msk.f32.gmra.mrb[14].mxu0 %vm233_vm1, %v29126_v55  ;;  %23860 = vmatprep.mubr.msk.f32.mxu1 %vm233_vm1, %v29444_v40  ;;  %v29575_v55 = vld [vmem:[%s34633_s0 + $0x188] sm:$0xff] }
 0x151   :  { %24302 = vmatprep.mubr.msk.f32.mxu0 %vm233_vm1, %v29138_v42  ;;  %v29480_v42 = vld [vmem:[%s34633_s0 + $0x2a0] sm:$0xff]  ;;  %34868 = vst [vmem:[#allocation52_spill] sm:$0xff] %v29575_v55 }
 0x153   :  { %23861 = vmatmul.mubr.msk.f32.gmra.mrb[48].mxu1 %vm233_vm1, %v29455_v44 }
 0x154   :  { %24303 = vmatmul.mubr.msk.f32.gmra.mrb[16].mxu0 %vm233_vm1, %v29154_v39  ;;  %23863 = vmatprep.mubr.msk.f32.mxu1 %vm233_vm1, %v29462_v46  ;;  %v29491_v39 = vld [vmem:[%s34633_s0 + $0x2a8] sm:$0xff] }
 0x155   :  { %24305 = vmatprep.mubr.msk.f32.mxu0 %vm233_vm1, %v29166_v35  ;;  %v29498_v35 = vld [vmem:[%s34633_s0 + $0x2b8] sm:$0xff] }
 0x157   :  { %23864 = vmatmul.mubr.msk.f32.gmra.mrb[50].mxu1 %vm233_vm1, %v29473_v51 }
 0x158   :  { %24306 = vmatmul.mubr.msk.f32.gmra.mrb[18].mxu0 %vm233_vm1, %v29182_v31  ;;  %23866 = vmatprep.mubr.msk.f32.mxu1 %vm233_vm1, %v29480_v42  ;;  %v29509_v31 = vld [vmem:[%s34633_s0 + $0x2c0] sm:$0xff] }
 0x159   :  { %24308 = vmatprep.mubr.msk.f32.mxu0 %vm233_vm1, %v29194_v27  ;;  %v29516_v27 = vld [vmem:[%s34633_s0 + $0x2d0] sm:$0xff] }
 0x15b   :  { %23867 = vmatmul.mubr.msk.f32.gmra.mrb[52].mxu1 %vm233_vm1, %v29491_v39 }
 0x15c   :  { %24309 = vmatmul.mubr.msk.f32.gmra.mrb[20].mxu0 %vm233_vm1, %v29210_v22  ;;  %23869 = vmatprep.mubr.msk.f32.mxu1 %vm233_vm1, %v29498_v35  ;;  %v29527_v22 = vld [vmem:[%s34633_s0 + $0x2d8] sm:$0xff] }
 0x15d   :  { %24311 = vmatprep.mubr.msk.f32.mxu0 %vm233_vm1, %v29222_v18  ;;  %v29534_v18 = vld [vmem:[%s34633_s0 + $0x2e8] sm:$0xff] }
 0x15f   :  { %23870 = vmatmul.mubr.msk.f32.gmra.mrb[54].mxu1 %vm233_vm1, %v29509_v31 }
 0x160   :  { %24312 = vmatmul.mubr.msk.f32.gmra.mrb[22].mxu0 %vm233_vm1, %v29238_v14  ;;  %23872 = vmatprep.mubr.msk.f32.mxu1 %vm233_vm1, %v29516_v27  ;;  %v29545_v14 = vld [vmem:[%s34633_s0 + $0x2f0] sm:$0xff] }
 0x161   :  { %24314 = vmatprep.mubr.msk.f32.mxu0 %vm233_vm1, %v29250_v10  ;;  %v29552_v10 = vld [vmem:[%s34633_s0 + $0x300] sm:$0xff] }
 0x163   :  { %23873 = vmatmul.mubr.msk.f32.gmra.mrb[56].mxu1 %vm233_vm1, %v29527_v22 }
 0x164   :  { %24315 = vmatmul.mubr.msk.f32.gmra.mrb[24].mxu0 %vm233_vm1, %v29266_v6  ;;  %23875 = vmatprep.mubr.msk.f32.mxu1 %vm233_vm1, %v29534_v18  ;;  %v29557_v6 = vld [vmem:[%s34633_s0 + $0x180] sm:$0xff] }
 0x165   :  { %24317 = vmatprep.mubr.msk.f32.mxu0 %vm233_vm1, %v29278_v26  ;;  %34867 = vst [vmem:[#allocation51_spill] sm:$0xff] %v29557_v6  ;;  %v29568_v26 = vld [vmem:[%s34633_s0 + $0x308] sm:$0xff] }
 0x167   :  { %23876 = vmatmul.mubr.msk.f32.gmra.mrb[58].mxu1 %vm233_vm1, %v29545_v14 }
 0x168   :  { %24318 = vmatmul.mubr.msk.f32.gmra.mrb[26].mxu0 %vm233_vm1, %v29292_v63  ;;  %23878 = vmatprep.mubr.msk.f32.mxu1 %vm233_vm1, %v29552_v10  ;;  %v29580_v63 = vld [vmem:[%s34633_s0 + $0x318] sm:$0xff] }
 0x169   :  { %24320 = vmatprep.mubr.msk.f32.mxu0 %vm233_vm1, %v29557_v6  ;;  %v1395_v6 = vld [vmem:[%s34633_s0 + $0x2] sm:$0xff] }
 0x16b   :  { %23879 = vmatmul.mubr.msk.f32.gmra.mrb[60].mxu1 %vm233_vm1, %v29568_v26 }
 0x16c   :  { %24321 = vmatmul.mubr.msk.f32.gmra.mrb[28].mxu0 %vm233_vm1, %v29575_v55  ;;  %23881 = vmatprep.mubr.msk.f32.mxu1 %vm233_vm1, %v29580_v63  ;;  %v1396_v55 = vld [vmem:[%s34633_s0 + $0xa] sm:$0xff] }
 0x16d   :  { %24323 = vmatprep.mubr.msk.f32.mxu0 %vm233_vm1, %v20385_v61  ;;  %v20499_v61 = vld [vmem:[%s34633_s0 + $0xe1] sm:$0xff] }
 0x16f   :  { %23882 = vmatmul.mubr.msk.f32.gmra.mrb[62].mxu1 %vm233_vm1, %v29594_v38 }
 0x170   :  { %24324 = vmatmul.mubr.msk.f32.gmra.mrb[30].mxu0 %vm233_vm1, %v20386_v53  ;;  %23886 = vmatprep.mubr.msk.f32.mxu1 %vm233_vm1, %v1395_v6  ;;  %v20497_v53 = vld [vmem:[%s34633_s0 + $0xc9] sm:$0xff]  ;;  %v34881_v6 = vld [vmem:[#allocation30_spill] sm:$0xff] }
 0x171   :  { %24326 = vmatprep.mubr.msk.f32.mxu0 %vm233_vm1, %v29334_v57 }
 0x173   :  { %23887 = vmatmul.mubr.msk.f32.vlgmr.msra.gmra.mrb[0].mxu1 %vm233_vm1, %v1396_v55  ;;  %v34882_v55 = vld [vmem:[#allocation31_spill] sm:$0xff] }
 0x174   :  { %24327 = vmatmul.mubr.msk.f32.gmra.mrb[32].mxu0 %vm233_vm1, %v29347_v47  ;;  %23983 = vmatpush3.msk.msra.mxu1 %vm426_vm0, %v28893_v59  ;;  %v34880_v59 = vld [vmem:[#allocation29_spill] sm:$0xff] }
 0x175   :  { %23889 = vmatprep.mubr.msk.f32.mxu1 %vm233_vm1, %v28517_v41  ;;  %24329 = vmatprep.mubr.msk.f32.mxu0 %vm233_vm1, %v29354_v2  ;;  %v29735_v41 = vld [vmem:[%s34633_s0 + $0x338] sm:$0xff] }
 0x176   :  { %26514 = vmatprep.subr.msk.mxu1 %vm426_vm0, %v28327_v1  ;;  %v29722_v1 = vld [vmem:[%s34633_s0 + $0x330] sm:$0xff] }
 0x177   :  { %23890 = vmatmul.mubr.msk.f32.gmra.mrb[2].mxu1 %vm233_vm1, %v28530_v43  ;;  %v20417_v43 = vld [vmem:[%s34633_s0 + $0x348] sm:$0xff] }
 0x178   :  { %24330 = vmatmul.mubr.msk.f32.gmra.mrb[34].mxu0 %vm233_vm1, %v29365_v4  ;;  %23892 = vmatprep.mubr.msk.f32.mxu1 %vm233_vm1, %v28538_v45  ;;  %v20418_v45 = vld [vmem:[%s34633_s0 + $0x350] sm:$0xff] }
 0x179   :  { %24332 = vmatprep.mubr.msk.f32.mxu0 %vm233_vm1, %v29372_v8 }
 0x17b   :  { %23893 = vmatmul.mubr.msk.f32.gmra.mrb[4].mxu1 %vm233_vm1, %v28556_v48  ;;  %v1427_v48 = vld [vmem:[%s34633_s0 + $0x1b2] sm:$0xff] }
 0x17c   :  { %24333 = vmatmul.mubr.msk.f32.gmra.mrb[36].mxu0 %vm233_vm1, %v29383_v12  ;;  %23895 = vmatprep.mubr.msk.f32.mxu1 %vm233_vm1, %v28564_v50  ;;  %v20484_v50 = vld [vmem:[%s34633_s0 + $0x31] sm:$0xff] }
 0x17d   :  { %24335 = vmatprep.mubr.msk.f32.mxu0 %vm233_vm1, %v29390_v16 }
 0x17f   :  { %23896 = vmatmul.mubr.msk.f32.gmra.mrb[6].mxu1 %vm233_vm1, %v28580_v52  ;;  %v34869_v52 = vld [vmem:[#allocation18_spill] sm:$0xff] }
 0x180   :  { %24336 = vmatmul.mubr.msk.f32.gmra.mrb[38].mxu0 %vm233_vm1, %v29401_v20  ;;  %23898 = vmatprep.mubr.msk.f32.mxu1 %vm233_vm1, %v28588_v54  ;;  %v1428_v54 = vld [vmem:[%s34633_s0 + $0x1ba] sm:$0xff] }
 0x181   :  { %24338 = vmatprep.mubr.msk.f32.mxu0 %vm233_vm1, %v29408_v24 }
 0x183   :  { %23899 = vmatmul.mubr.msk.f32.gmra.mrb[8].mxu1 %vm233_vm1, %v28602_v56  ;;  %v20485_v56 = vld [vmem:[%s34633_s0 + $0x39] sm:$0xff] }
 0x184   :  { %24339 = vmatmul.mubr.msk.f32.gmra.mrb[40].mxu0 %vm233_vm1, %v29419_v29  ;;  %23901 = vmatprep.mubr.msk.f32.mxu1 %vm233_vm1, %v28610_v58  ;;  %v20486_v58 = vld [vmem:[%s34633_s0 + $0x49] sm:$0xff] }
 0x185   :  { %24341 = vmatprep.mubr.msk.f32.mxu0 %vm233_vm1, %v29426_v33 }
 0x187   :  { %23902 = vmatmul.mubr.msk.f32.gmra.mrb[10].mxu1 %vm233_vm1, %v28624_v60  ;;  %v34870_v60 = vld [vmem:[#allocation19_spill] sm:$0xff] }
 0x188   :  { %24342 = vmatmul.mubr.msk.f32.gmra.mrb[42].mxu0 %vm233_vm1, %v29437_v37  ;;  %23904 = vmatprep.mubr.msk.f32.mxu1 %vm233_vm1, %v28632_v62  ;;  %v20487_v62 = vld [vmem:[%s34633_s0 + $0x51] sm:$0xff] }
 0x189   :  { %24344 = vmatprep.mubr.msk.f32.mxu0 %vm233_vm1, %v29444_v40 }
 0x18b   :  { %23905 = vmatmul.mubr.msk.f32.gmra.mrb[12].mxu1 %vm233_vm1, %v28646_v0  ;;  %v20488_v0 = vld [vmem:[%s34633_s0 + $0x61] sm:$0xff] }
 0x18c   :  { %24345 = vmatmul.mubr.msk.f32.gmra.mrb[44].mxu0 %vm233_vm1, %v29455_v44  ;;  %23907 = vmatprep.mubr.msk.f32.mxu1 %vm233_vm1, %v28654_v3  ;;  %v34871_v3 = vld [vmem:[#allocation20_spill] sm:$0xff] }
 0x18d   :  { %24347 = vmatprep.mubr.msk.f32.mxu0 %vm233_vm1, %v29462_v46 }
 0x18f   :  { %23908 = vmatmul.mubr.msk.f32.gmra.mrb[14].mxu1 %vm233_vm1, %v28668_v5  ;;  %v34872_v5 = vld [vmem:[#allocation21_spill] sm:$0xff] }
 0x190   :  { %24348 = vmatmul.mubr.msk.f32.gmra.mrb[46].mxu0 %vm233_vm1, %v29473_v51  ;;  %23910 = vmatprep.mubr.msk.f32.mxu1 %vm233_vm1, %v28676_v7  ;;  %v20489_v7 = vld [vmem:[%s34633_s0 + $0x69] sm:$0xff] }
 0x191   :  { %24350 = vmatprep.mubr.msk.f32.mxu0 %vm233_vm1, %v29480_v42 }
 0x193   :  { %23911 = vmatmul.mubr.msk.f32.gmra.mrb[16].mxu1 %vm233_vm1, %v28690_v9  ;;  %v20490_v9 = vld [vmem:[%s34633_s0 + $0x79] sm:$0xff] }
 0x194   :  { %24351 = vmatmul.mubr.msk.f32.gmra.mrb[48].mxu0 %vm233_vm1, %v29491_v39  ;;  %23913 = vmatprep.mubr.msk.f32.mxu1 %vm233_vm1, %v28698_v11  ;;  %v34873_v11 = vld [vmem:[#allocation22_spill] sm:$0xff] }
 0x195   :  { %24353 = vmatprep.mubr.msk.f32.mxu0 %vm233_vm1, %v29498_v35 }
 0x197   :  { %23914 = vmatmul.mubr.msk.f32.gmra.mrb[18].mxu1 %vm233_vm1, %v28712_v13  ;;  %v34874_v13 = vld [vmem:[#allocation23_spill] sm:$0xff] }
 0x198   :  { %24354 = vmatmul.mubr.msk.f32.gmra.mrb[50].mxu0 %vm233_vm1, %v29509_v31  ;;  %23916 = vmatprep.mubr.msk.f32.mxu1 %vm233_vm1, %v28720_v15  ;;  %v20491_v15 = vld [vmem:[%s34633_s0 + $0x81] sm:$0xff] }
 0x199   :  { %24356 = vmatprep.mubr.msk.f32.mxu0 %vm233_vm1, %v29516_v27 }
 0x19b   :  { %23917 = vmatmul.mubr.msk.f32.gmra.mrb[20].mxu1 %vm233_vm1, %v28734_v17  ;;  %v20492_v17 = vld [vmem:[%s34633_s0 + $0x91] sm:$0xff] }
 0x19c   :  { %24357 = vmatmul.mubr.msk.f32.gmra.mrb[52].mxu0 %vm233_vm1, %v29527_v22  ;;  %23919 = vmatprep.mubr.msk.f32.mxu1 %vm233_vm1, %v28742_v19  ;;  %v34875_v19 = vld [vmem:[#allocation24_spill] sm:$0xff] }
 0x19d   :  { %24359 = vmatprep.mubr.msk.f32.mxu0 %vm233_vm1, %v29534_v18 }
 0x19f   :  { %23920 = vmatmul.mubr.msk.f32.gmra.mrb[22].mxu1 %vm233_vm1, %v28756_v21  ;;  %v34876_v21 = vld [vmem:[#allocation25_spill] sm:$0xff] }
 0x1a0   :  { %24360 = vmatmul.mubr.msk.f32.gmra.mrb[54].mxu0 %vm233_vm1, %v29545_v14  ;;  %23922 = vmatprep.mubr.msk.f32.mxu1 %vm233_vm1, %v28764_v23  ;;  %v20493_v23 = vld [vmem:[%s34633_s0 + $0x99] sm:$0xff] }
 0x1a1   :  { %24362 = vmatprep.mubr.msk.f32.mxu0 %vm233_vm1, %v29552_v10 }
 0x1a3   :  { %23923 = vmatmul.mubr.msk.f32.gmra.mrb[24].mxu1 %vm233_vm1, %v28778_v25  ;;  %v20494_v25 = vld [vmem:[%s34633_s0 + $0xa9] sm:$0xff] }
 0x1a4   :  { %24363 = vmatmul.mubr.msk.f32.gmra.mrb[56].mxu0 %vm233_vm1, %v29568_v26  ;;  %23925 = vmatprep.mubr.msk.f32.mxu1 %vm233_vm1, %v28786_v28  ;;  %v34877_v28 = vld [vmem:[#allocation26_spill] sm:$0xff] }
 0x1a5   :  { %24365 = vmatprep.mubr.msk.f32.mxu0 %vm233_vm1, %v29580_v63 }
 0x1a7   :  { %23926 = vmatmul.mubr.msk.f32.gmra.mrb[26].mxu1 %vm233_vm1, %v28800_v30  ;;  %v34878_v30 = vld [vmem:[#allocation27_spill] sm:$0xff] }
 0x1a8   :  { %24366 = vmatmul.mubr.msk.f32.gmra.mrb[58].mxu0 %vm233_vm1, %v29594_v38  ;;  %23928 = vmatprep.mubr.msk.f32.mxu1 %vm233_vm1, %v28808_v32  ;;  %v20495_v32 = vld [vmem:[%s34633_s0 + $0xb1] sm:$0xff] }
 0x1a9   :  { %24368 = vmatprep.mubr.msk.f32.mxu0 %vm233_vm1, %v29722_v1 }
 0x1ab   :  { %23929 = vmatmul.mubr.msk.f32.gmra.mrb[28].mxu1 %vm233_vm1, %v28822_v34  ;;  %v20496_v34 = vld [vmem:[%s34633_s0 + $0xc1] sm:$0xff] }
 0x1ac   :  { %24369 = vmatmul.mubr.msk.f32.gmra.mrb[60].mxu0 %vm233_vm1, %v29735_v41  ;;  %23931 = vmatprep.mubr.msk.f32.mxu1 %vm233_vm1, %v28830_v36  ;;  %v34879_v36 = vld [vmem:[#allocation28_spill] sm:$0xff] }
 0x1ad   :  { %24371 = vmatprep.mubr.msk.f32.mxu0 %vm233_vm1, %v20417_v43  ;;  %v20500_v43 = vld [vmem:[%s34633_s0 + $0xf1] sm:$0xff] }
 0x1af   :  { %23932 = vmatmul.mubr.msk.f32.gmra.mrb[30].mxu1 %vm233_vm1, %v34869_v52  ;;  %v20502_v52 = vld [vmem:[%s34633_s0 + $0x109] sm:$0xff] }
 0x1b0   :  { %24372 = vmatmul.mubr.msk.f32.gmra.mrb[62].mxu0 %vm233_vm1, %v20418_v45  ;;  %23934 = vmatprep.mubr.msk.f32.mxu1 %vm233_vm1, %v1427_v48  ;;  %v34883_v45 = vld [vmem:[#allocation32_spill] sm:$0xff]  ;;  %v34884_v48 = vld [vmem:[#allocation33_spill] sm:$0xff] }
 0x1b1   :  { %24376 = vmatprep.mubr.msk.f32.mxu0 %vm233_vm1, %v20484_v50  ;;  %v20501_v50 = vld [vmem:[%s34633_s0 + $0xf9] sm:$0xff] }
 0x1b3   :  { %23935 = vmatmul.mubr.msk.f32.gmra.mrb[32].mxu1 %vm233_vm1, %v1428_v54  ;;  %v34885_v54 = vld [vmem:[#allocation34_spill] sm:$0xff] }
 0x1b4   :  { %24377 = vmatmul.mubr.msk.f32.vlgmr.msra.gmra.mrb[0].mxu0 %vm233_vm1, %v20485_v56  ;;  %23937 = vmatprep.mubr.msk.f32.mxu1 %vm233_vm1, %v34870_v60  ;;  %v34886_v56 = vld [vmem:[#allocation35_spill] sm:$0xff] }
 0x1b5   :  { %24473 = vmatpush3.msk.msra.mxu0 %vm426_vm0, %v29325_v49  ;;  %24379 = vmatprep.mubr.msk.f32.mxu0 %vm233_vm1, %v20486_v58  ;;  %v20498_v49 = vld [vmem:[%s34633_s0 + $0xd9] sm:$0xff]  ;;  %v20503_v58 = vld [vmem:[%s34633_s0 + $0x111] sm:$0xff]  ;;  %v20504_v60 = vld [vmem:[%s34633_s0 + $0x121] sm:$0xff] }
 0x1b7   :  { %23938 = vmatmul.mubr.msk.f32.gmra.mrb[34].mxu1 %vm233_vm1, %v34871_v3  ;;  %v20505_v3 = vld [vmem:[%s34633_s0 + $0x129] sm:$0xff] }
 0x1b8   :  { %24380 = vmatmul.mubr.msk.f32.gmra.mrb[2].mxu0 %vm233_vm1, %v20487_v62  ;;  %23940 = vmatprep.mubr.msk.f32.mxu1 %vm233_vm1, %v34872_v5  ;;  %v34887_v62 = vld [vmem:[#allocation36_spill] sm:$0xff]  ;;  %v20506_v5 = vld [vmem:[%s34633_s0 + $0x139] sm:$0xff] }
 0x1b9   :  { %24382 = vmatprep.mubr.msk.f32.mxu0 %vm233_vm1, %v20488_v0  ;;  %v34888_v0 = vld [vmem:[#allocation37_spill] sm:$0xff] }
 0x1bb   :  { %23941 = vmatmul.mubr.msk.f32.gmra.mrb[36].mxu1 %vm233_vm1, %v34873_v11  ;;  %v20507_v11 = vld [vmem:[%s34633_s0 + $0x141] sm:$0xff] }
 0x1bc   :  { %24383 = vmatmul.mubr.msk.f32.gmra.mrb[4].mxu0 %vm233_vm1, %v20489_v7  ;;  %23943 = vmatprep.mubr.msk.f32.mxu1 %vm233_vm1, %v34874_v13  ;;  %v34889_v7 = vld [vmem:[#allocation38_spill] sm:$0xff]  ;;  %v20508_v13 = vld [vmem:[%s34633_s0 + $0x151] sm:$0xff] }
 0x1bd   :  { %24385 = vmatprep.mubr.msk.f32.mxu0 %vm233_vm1, %v20490_v9  ;;  %v34890_v9 = vld [vmem:[#allocation39_spill] sm:$0xff] }
 0x1bf   :  { %23944 = vmatmul.mubr.msk.f32.gmra.mrb[38].mxu1 %vm233_vm1, %v34875_v19  ;;  %v20509_v19 = vld [vmem:[%s34633_s0 + $0x159] sm:$0xff] }
 0x1c0   :  { %24386 = vmatmul.mubr.msk.f32.gmra.mrb[6].mxu0 %vm233_vm1, %v20491_v15  ;;  %23946 = vmatprep.mubr.msk.f32.mxu1 %vm233_vm1, %v34876_v21  ;;  %v34891_v15 = vld [vmem:[#allocation40_spill] sm:$0xff] }
 0x1c1   :  { %24388 = vmatprep.mubr.msk.f32.mxu0 %vm233_vm1, %v20492_v17  ;;  %v34892_v17 = vld [vmem:[#allocation41_spill] sm:$0xff]  ;;  %v20510_v21 = vld [vmem:[%s34633_s0 + $0x169] sm:$0xff] }
 0x1c3   :  { %23947 = vmatmul.mubr.msk.f32.gmra.mrb[40].mxu1 %vm233_vm1, %v34877_v28  ;;  %v20511_v28 = vld [vmem:[%s34633_s0 + $0x171] sm:$0xff] }
 0x1c4   :  { %24389 = vmatmul.mubr.msk.f32.gmra.mrb[8].mxu0 %vm233_vm1, %v20493_v23  ;;  %23949 = vmatprep.mubr.msk.f32.mxu1 %vm233_vm1, %v34878_v30  ;;  %v34893_v23 = vld [vmem:[#allocation42_spill] sm:$0xff] }
 0x1c5   :  { %24391 = vmatprep.mubr.msk.f32.mxu0 %vm233_vm1, %v20494_v25  ;;  %v34894_v25 = vld [vmem:[#allocation43_spill] sm:$0xff] }
 0x1c6   :  { %v20512_v30 = vld [vmem:[%s34633_s0 + $0x181] sm:$0xff] }
 0x1c7   :  { %23950 = vmatmul.mubr.msk.f32.gmra.mrb[42].mxu1 %vm233_vm1, %v34879_v36  ;;  %v20513_v36 = vld [vmem:[%s34633_s0 + $0x189] sm:$0xff] }
 0x1c8   :  { %24392 = vmatmul.mubr.msk.f32.gmra.mrb[10].mxu0 %vm233_vm1, %v20495_v32  ;;  %23952 = vmatprep.mubr.msk.f32.mxu1 %vm233_vm1, %v34880_v59  ;;  %v34895_v32 = vld [vmem:[#allocation44_spill] sm:$0xff]  ;;  %v20514_v59 = vld [vmem:[%s34633_s0 + $0x199] sm:$0xff] }
 0x1c9   :  { %24394 = vmatprep.mubr.msk.f32.mxu0 %vm233_vm1, %v20496_v34  ;;  %v34896_v34 = vld [vmem:[#allocation45_spill] sm:$0xff] }
 0x1cb   :  { %23953 = vmatmul.mubr.msk.f32.gmra.mrb[44].mxu1 %vm233_vm1, %v34881_v6  ;;  %v20515_v6 = vld [vmem:[%s34633_s0 + $0x1a1] sm:$0xff] }
 0x1cc   :  { %24395 = vmatmul.mubr.msk.f32.gmra.mrb[12].mxu0 %vm233_vm1, %v20497_v53  ;;  %23955 = vmatprep.mubr.msk.f32.mxu1 %vm233_vm1, %v34882_v55  ;;  %v34897_v53 = vld [vmem:[#allocation46_spill] sm:$0xff] }
 0x1cd   :  { %24397 = vmatprep.mubr.msk.f32.mxu0 %vm233_vm1, %v20498_v49  ;;  %v34898_v49 = vld [vmem:[#allocation47_spill] sm:$0xff]  ;;  %v19968_v55 = vld [vmem:[%s34633_s0 + $0x18] sm:$0xff] }
 0x1cf   :  { %23956 = vmatmul.mubr.msk.f32.gmra.mrb[46].mxu1 %vm233_vm1, %v34883_v45  ;;  %v19969_v45 = vld [vmem:[%s34633_s0 + $0x20] sm:$0xff] }
 0x1d0   :  { %24398 = vmatmul.mubr.msk.f32.gmra.mrb[14].mxu0 %vm233_vm1, %v20499_v61  ;;  %23958 = vmatprep.mubr.msk.f32.mxu1 %vm233_vm1, %v34884_v48  ;;  %v29954_v61 = vld [vmem:[%s34633_s0 + $0x1e1] sm:$0xff]  ;;  %v29968_v48 = vld [vmem:[%s34633_s0 + $0x1e9] sm:$0xff] }
 0x1d1   :  { %24400 = vmatprep.mubr.msk.f32.mxu0 %vm233_vm1, %v20500_v43  ;;  %v34899_v43 = vld [vmem:[#allocation48_spill] sm:$0xff] }
 0x1d3   :  { %23959 = vmatmul.mubr.msk.f32.gmra.mrb[48].mxu1 %vm233_vm1, %v34885_v54  ;;  %v28063_v54 = vld [vmem:[#allocation4 + $0x10] sm:$0xf] }
 0x1d4   :  { %24401 = vmatmul.mubr.msk.f32.gmra.mrb[16].mxu0 %vm233_vm1, %v20501_v50  ;;  %23961 = vmatprep.mubr.msk.f32.mxu1 %vm233_vm1, %v34886_v56  ;;  %v19970_v50 = vld [vmem:[%s34633_s0 + $0x30] sm:$0xff]  ;;  %v19971_v56 = vld [vmem:[%s34633_s0 + $0x38] sm:$0xff] }
 0x1d5   :  { %24403 = vmatprep.mubr.msk.f32.mxu0 %vm233_vm1, %v20502_v52  ;;  %v29976_v52 = vld [vmem:[%s34633_s0 + $0x1f9] sm:$0xff] }
 0x1d7   :  { %23962 = vmatmul.mubr.msk.f32.gmra.mrb[50].mxu1 %vm233_vm1, %v34887_v62  ;;  %v29999_v62 = vld [vmem:[%s34633_s0 + $0x211] sm:$0xff] }
 0x1d8   :  { %24404 = vmatmul.mubr.msk.f32.gmra.mrb[18].mxu0 %vm233_vm1, %v20503_v58  ;;  %23964 = vmatprep.mubr.msk.f32.mxu1 %vm233_vm1, %v34888_v0  ;;  %v29991_v58 = vld [vmem:[%s34633_s0 + $0x201] sm:$0xff]  ;;  %v19973_v0 = vld [vmem:[%s34633_s0 + $0x50] sm:$0xff] }
 0x1d9   :  { %24406 = vmatprep.mubr.msk.f32.mxu0 %vm233_vm1, %v20504_v60  ;;  %v19972_v60 = vld [vmem:[%s34633_s0 + $0x48] sm:$0xff] }
 0x1db   :  { %23965 = vmatmul.mubr.msk.f32.gmra.mrb[52].mxu1 %vm233_vm1, %v34889_v7  ;;  %v30021_v7 = vld [vmem:[%s34633_s0 + $0x229] sm:$0xff] }
 0x1dc   :  { %24407 = vmatmul.mubr.msk.f32.gmra.mrb[20].mxu0 %vm233_vm1, %v20505_v3  ;;  %23967 = vmatprep.mubr.msk.f32.mxu1 %vm233_vm1, %v34890_v9  ;;  %v30013_v3 = vld [vmem:[%s34633_s0 + $0x219] sm:$0xff]  ;;  %v19975_v9 = vld [vmem:[%s34633_s0 + $0x68] sm:$0xff] }
 0x1dd   :  { %24409 = vmatprep.mubr.msk.f32.mxu0 %vm233_vm1, %v20506_v5  ;;  %v19974_v5 = vld [vmem:[%s34633_s0 + $0x60] sm:$0xff] }
 0x1df   :  { %23968 = vmatmul.mubr.msk.f32.gmra.mrb[54].mxu1 %vm233_vm1, %v34891_v15  ;;  %v30043_v15 = vld [vmem:[%s34633_s0 + $0x241] sm:$0xff] }
 0x1e0   :  { %24410 = vmatmul.mubr.msk.f32.gmra.mrb[22].mxu0 %vm233_vm1, %v20507_v11  ;;  %23970 = vmatprep.mubr.msk.f32.mxu1 %vm233_vm1, %v34892_v17  ;;  %v30035_v11 = vld [vmem:[%s34633_s0 + $0x231] sm:$0xff]  ;;  %v19977_v17 = vld [vmem:[%s34633_s0 + $0x80] sm:$0xff] }
 0x1e1   :  { %24412 = vmatprep.mubr.msk.f32.mxu0 %vm233_vm1, %v20508_v13  ;;  %v19976_v13 = vld [vmem:[%s34633_s0 + $0x78] sm:$0xff] }
 0x1e3   :  { %23971 = vmatmul.mubr.msk.f32.gmra.mrb[56].mxu1 %vm233_vm1, %v34893_v23  ;;  %v30065_v23 = vld [vmem:[%s34633_s0 + $0x259] sm:$0xff] }
 0x1e4   :  { %24413 = vmatmul.mubr.msk.f32.gmra.mrb[24].mxu0 %vm233_vm1, %v20509_v19  ;;  %23973 = vmatprep.mubr.msk.f32.mxu1 %vm233_vm1, %v34894_v25  ;;  %v30057_v19 = vld [vmem:[%s34633_s0 + $0x249] sm:$0xff]  ;;  %v19979_v25 = vld [vmem:[%s34633_s0 + $0x98] sm:$0xff] }
 0x1e5   :  { %24415 = vmatprep.mubr.msk.f32.mxu0 %vm233_vm1, %v20510_v21  ;;  %v19978_v21 = vld [vmem:[%s34633_s0 + $0x90] sm:$0xff] }
 0x1e7   :  { %23974 = vmatmul.mubr.msk.f32.gmra.mrb[58].mxu1 %vm233_vm1, %v34895_v32  ;;  %v30087_v32 = vld [vmem:[%s34633_s0 + $0x271] sm:$0xff] }
 0x1e8   :  { %24416 = vmatmul.mubr.msk.f32.gmra.mrb[26].mxu0 %vm233_vm1, %v20511_v28  ;;  %23976 = vmatprep.mubr.msk.f32.mxu1 %vm233_vm1, %v34896_v34  ;;  %v30079_v28 = vld [vmem:[%s34633_s0 + $0x261] sm:$0xff]  ;;  %v19981_v34 = vld [vmem:[%s34633_s0 + $0xb0] sm:$0xff] }
 0x1e9   :  { %24418 = vmatprep.mubr.msk.f32.mxu0 %vm233_vm1, %v20512_v30  ;;  %v19980_v30 = vld [vmem:[%s34633_s0 + $0xa8] sm:$0xff] }
 0x1eb   :  { %23977 = vmatmul.mubr.msk.f32.gmra.mrb[60].mxu1 %vm233_vm1, %v34897_v53  ;;  %v30109_v53 = vld [vmem:[%s34633_s0 + $0x289] sm:$0xff] }
 0x1ec   :  { %24419 = vmatmul.mubr.msk.f32.gmra.mrb[28].mxu0 %vm233_vm1, %v20513_v36  ;;  %23979 = vmatprep.mubr.msk.f32.mxu1 %vm233_vm1, %v34898_v49  ;;  %v30101_v36 = vld [vmem:[%s34633_s0 + $0x279] sm:$0xff]  ;;  %v19983_v49 = vld [vmem:[%s34633_s0 + $0xc8] sm:$0xff] }
 0x1ed   :  { %24421 = vmatprep.mubr.msk.f32.mxu0 %vm233_vm1, %v20514_v59  ;;  %v19982_v59 = vld [vmem:[%s34633_s0 + $0xc0] sm:$0xff] }
 0x1ef   :  { %23980 = vmatmul.mubr.msk.f32.gmra.mrb[62].mxu1 %vm233_vm1, %v34899_v43  ;;  %v30131_v43 = vld [vmem:[%s34633_s0 + $0x2a1] sm:$0xff] }
 0x1f0   :  { %24422 = vmatmul.mubr.msk.f32.gmra.mrb[30].mxu0 %vm233_vm1, %v20515_v6  ;;  %23984 = vmatprep.mubr.msk.f32.mxu1 %vm233_vm1, %v19968_v55  ;;  %v30123_v6 = vld [vmem:[%s34633_s0 + $0x291] sm:$0xff] }
 0x1f1   :  { %24424 = vmatprep.mubr.msk.f32.mxu0 %vm233_vm1, %v29954_v61  ;;  %v19984_v55 = vld [vmem:[%s34633_s0 + $0xd8] sm:$0xff] }
 0x1f3   :  { %23985 = vmatmul.mubr.msk.f32.vlgmr.msra.gmra.mrb[0].mxu1 %vm233_vm1, %v19969_v45  ;;  %v19985_v45 = vld [vmem:[%s34633_s0 + $0xe0] sm:$0xff] }
 0x1f4   :  { %24425 = vmatmul.mubr.msk.f32.gmra.mrb[32].mxu0 %vm233_vm1, %v29968_v48  ;;  %26515 = vmatpush3.msk.msra.mxu1 %vm426_vm0, %v28063_v54  ;;  %v19986_v54 = vld [vmem:[%s34633_s0 + $0xf0] sm:$0xff] }
 0x1f5   :  { %23987 = vmatprep.mubr.msk.f32.mxu1 %vm233_vm1, %v19970_v50  ;;  %24427 = vmatprep.mubr.msk.f32.mxu0 %vm233_vm1, %v29976_v52  ;;  %v30145_v50 = vld [vmem:[%s34633_s0 + $0x2a9] sm:$0xff] }
 0x1f7   :  { %23988 = vmatmul.mubr.msk.f32.gmra.mrb[2].mxu1 %vm233_vm1, %v19971_v56  ;;  %v30153_v56 = vld [vmem:[%s34633_s0 + $0x2b9] sm:$0xff] }
 0x1f8   :  { %24428 = vmatmul.mubr.msk.f32.gmra.mrb[34].mxu0 %vm233_vm1, %v29991_v58  ;;  %23990 = vmatprep.mubr.msk.f32.mxu1 %vm233_vm1, %v19972_v60  ;;  %v19987_v60 = vld [vmem:[%s34633_s0 + $0xf8] sm:$0xff] }
 0x1f9   :  { %24430 = vmatprep.mubr.msk.f32.mxu0 %vm233_vm1, %v29999_v62 }
 0x1fb   :  { %23991 = vmatmul.mubr.msk.f32.gmra.mrb[4].mxu1 %vm233_vm1, %v19973_v0  ;;  %v30167_v0 = vld [vmem:[%s34633_s0 + $0x2c1] sm:$0xff] }
 0x1fc   :  { %24431 = vmatmul.mubr.msk.f32.gmra.mrb[36].mxu0 %vm233_vm1, %v30013_v3  ;;  %23993 = vmatprep.mubr.msk.f32.mxu1 %vm233_vm1, %v19974_v5  ;;  %v19988_v5 = vld [vmem:[%s34633_s0 + $0x108] sm:$0xff] }
 0x1fd   :  { %24433 = vmatprep.mubr.msk.f32.mxu0 %vm233_vm1, %v30021_v7 }
 0x1ff   :  { %23994 = vmatmul.mubr.msk.f32.gmra.mrb[6].mxu1 %vm233_vm1, %v19975_v9  ;;  %v30175_v9 = vld [vmem:[%s34633_s0 + $0x2d1] sm:$0xff] }
 0x200   :  { %24434 = vmatmul.mubr.msk.f32.gmra.mrb[38].mxu0 %vm233_vm1, %v30035_v11  ;;  %23996 = vmatprep.mubr.msk.f32.mxu1 %vm233_vm1, %v19976_v13  ;;  %v19989_v13 = vld [vmem:[%s34633_s0 + $0x110] sm:$0xff] }
 0x201   :  { %24436 = vmatprep.mubr.msk.f32.mxu0 %vm233_vm1, %v30043_v15 }
 0x203   :  { %23997 = vmatmul.mubr.msk.f32.gmra.mrb[8].mxu1 %vm233_vm1, %v19977_v17  ;;  %v30189_v17 = vld [vmem:[%s34633_s0 + $0x2d9] sm:$0xff] }
 0x204   :  { %24437 = vmatmul.mubr.msk.f32.gmra.mrb[40].mxu0 %vm233_vm1, %v30057_v19  ;;  %23999 = vmatprep.mubr.msk.f32.mxu1 %vm233_vm1, %v19978_v21  ;;  %v19990_v21 = vld [vmem:[%s34633_s0 + $0x120] sm:$0xff] }
 0x205   :  { %24439 = vmatprep.mubr.msk.f32.mxu0 %vm233_vm1, %v30065_v23 }
 0x207   :  { %24000 = vmatmul.mubr.msk.f32.gmra.mrb[10].mxu1 %vm233_vm1, %v19979_v25  ;;  %v30197_v25 = vld [vmem:[%s34633_s0 + $0x2e9] sm:$0xff] }
 0x208   :  { %24440 = vmatmul.mubr.msk.f32.gmra.mrb[42].mxu0 %vm233_vm1, %v30079_v28  ;;  %24002 = vmatprep.mubr.msk.f32.mxu1 %vm233_vm1, %v19980_v30  ;;  %v19991_v30 = vld [vmem:[%s34633_s0 + $0x128] sm:$0xff] }
 0x209   :  { %24442 = vmatprep.mubr.msk.f32.mxu0 %vm233_vm1, %v30087_v32 }
 0x20b   :  { %24003 = vmatmul.mubr.msk.f32.gmra.mrb[12].mxu1 %vm233_vm1, %v19981_v34  ;;  %v30211_v34 = vld [vmem:[%s34633_s0 + $0x2f1] sm:$0xff] }
 0x20c   :  { %24443 = vmatmul.mubr.msk.f32.gmra.mrb[44].mxu0 %vm233_vm1, %v30101_v36  ;;  %24005 = vmatprep.mubr.msk.f32.mxu1 %vm233_vm1, %v19982_v59  ;;  %v19992_v59 = vld [vmem:[%s34633_s0 + $0x138] sm:$0xff] }
 0x20d   :  { %24445 = vmatprep.mubr.msk.f32.mxu0 %vm233_vm1, %v30109_v53 }
 0x20f   :  { %24006 = vmatmul.mubr.msk.f32.gmra.mrb[14].mxu1 %vm233_vm1, %v19983_v49  ;;  %v30219_v49 = vld [vmem:[%s34633_s0 + $0x301] sm:$0xff] }
 0x210   :  { %24446 = vmatmul.mubr.msk.f32.gmra.mrb[46].mxu0 %vm233_vm1, %v30123_v6  ;;  %24008 = vmatprep.mubr.msk.f32.mxu1 %vm233_vm1, %v19984_v55  ;;  %v19993_v55 = vld [vmem:[%s34633_s0 + $0x140] sm:$0xff] }
 0x211   :  { %24448 = vmatprep.mubr.msk.f32.mxu0 %vm233_vm1, %v30131_v43 }
 0x213   :  { %24009 = vmatmul.mubr.msk.f32.gmra.mrb[16].mxu1 %vm233_vm1, %v19985_v45  ;;  %v30233_v45 = vld [vmem:[%s34633_s0 + $0x309] sm:$0xff] }
 0x214   :  { %24449 = vmatmul.mubr.msk.f32.gmra.mrb[48].mxu0 %vm233_vm1, %v30145_v50  ;;  %24011 = vmatprep.mubr.msk.f32.mxu1 %vm233_vm1, %v19986_v54  ;;  %v19994_v54 = vld [vmem:[%s34633_s0 + $0x150] sm:$0xff] }
 0x215   :  { %24451 = vmatprep.mubr.msk.f32.mxu0 %vm233_vm1, %v30153_v56 }
 0x217   :  { %24012 = vmatmul.mubr.msk.f32.gmra.mrb[18].mxu1 %vm233_vm1, %v19987_v60  ;;  %v30241_v60 = vld [vmem:[%s34633_s0 + $0x319] sm:$0xff] }
 0x218   :  { %24452 = vmatmul.mubr.msk.f32.gmra.mrb[50].mxu0 %vm233_vm1, %v30167_v0  ;;  %24014 = vmatprep.mubr.msk.f32.mxu1 %vm233_vm1, %v19988_v5  ;;  %v19995_v5 = vld [vmem:[%s34633_s0 + $0x158] sm:$0xff] }
 0x219   :  { %24454 = vmatprep.mubr.msk.f32.mxu0 %vm233_vm1, %v30175_v9 }
 0x21b   :  { %24015 = vmatmul.mubr.msk.f32.gmra.mrb[20].mxu1 %vm233_vm1, %v19989_v13  ;;  %v30255_v13 = vld [vmem:[%s34633_s0 + $0x321] sm:$0xff] }
 0x21c   :  { %24455 = vmatmul.mubr.msk.f32.gmra.mrb[52].mxu0 %vm233_vm1, %v30189_v17  ;;  %24017 = vmatprep.mubr.msk.f32.mxu1 %vm233_vm1, %v19990_v21  ;;  %34900 = vst [vmem:[#allocation18_spill] sm:$0xff] %v30255_v13  ;;  %v19996_v21 = vld [vmem:[%s34633_s0 + $0x168] sm:$0xff] }
 0x21d   :  { %24457 = vmatprep.mubr.msk.f32.mxu0 %vm233_vm1, %v30197_v25 }
 0x21f   :  { %24018 = vmatmul.mubr.msk.f32.gmra.mrb[22].mxu1 %vm233_vm1, %v19991_v30  ;;  %v30263_v30 = vld [vmem:[%s34633_s0 + $0x331] sm:$0xff] }
 0x220   :  { %24458 = vmatmul.mubr.msk.f32.gmra.mrb[54].mxu0 %vm233_vm1, %v30211_v34  ;;  %24020 = vmatprep.mubr.msk.f32.mxu1 %vm233_vm1, %v19992_v59  ;;  %34901 = vst [vmem:[#allocation19_spill] sm:$0xff] %v30263_v30  ;;  %v19997_v59 = vld [vmem:[%s34633_s0 + $0x170] sm:$0xff] }
 0x221   :  { %24460 = vmatprep.mubr.msk.f32.mxu0 %vm233_vm1, %v30219_v49 }
 0x223   :  { %24021 = vmatmul.mubr.msk.f32.gmra.mrb[24].mxu1 %vm233_vm1, %v19993_v55  ;;  %v30277_v55 = vld [vmem:[%s34633_s0 + $0x339] sm:$0xff] }
 0x224   :  { %24461 = vmatmul.mubr.msk.f32.gmra.mrb[56].mxu0 %vm233_vm1, %v30233_v45  ;;  %24023 = vmatprep.mubr.msk.f32.mxu1 %vm233_vm1, %v19994_v54  ;;  %34902 = vst [vmem:[#allocation20_spill] sm:$0xff] %v30277_v55  ;;  %v20546_v54 = vld [vmem:[%s34633_s0 + $0x349] sm:$0xff] }
 0x225   :  { %24463 = vmatprep.mubr.msk.f32.mxu0 %vm233_vm1, %v30241_v60 }
 0x227   :  { %24024 = vmatmul.mubr.msk.f32.gmra.mrb[26].mxu1 %vm233_vm1, %v19995_v5  ;;  %v34903_v5 = vld [vmem:[#allocation51_spill] sm:$0xff] }
 0x228   :  { %24464 = vmatmul.mubr.msk.f32.gmra.mrb[58].mxu0 %vm233_vm1, %v30255_v13  ;;  %24026 = vmatprep.mubr.msk.f32.mxu1 %vm233_vm1, %v19996_v21  ;;  %v20547_v21 = vld [vmem:[%s34633_s0 + $0x351] sm:$0xff] }
 0x229   :  { %24466 = vmatprep.mubr.msk.f32.mxu0 %vm233_vm1, %v30263_v30  ;;  %v20613_v30 = vld [vmem:[%s34633_s0 + $0x32] sm:$0xff]  ;;  %v34904_v13 = vld [vmem:[#allocation52_spill] sm:$0xff] }
 0x22b   :  { %24027 = vmatmul.mubr.msk.f32.gmra.mrb[28].mxu1 %vm233_vm1, %v19997_v59  ;;  %v34905_v59 = vld [vmem:[#allocation49_spill] sm:$0xff] }
 0x22c   :  { %24467 = vmatmul.mubr.msk.f32.gmra.mrb[60].mxu0 %vm233_vm1, %v30277_v55  ;;  %24029 = vmatprep.mubr.msk.f32.mxu1 %vm233_vm1, %v34903_v5  ;;  %v20615_v5 = vld [vmem:[%s34633_s0 + $0x4a] sm:$0xff]  ;;  %v34906_v55 = vld [vmem:[#allocation50_spill] sm:$0xff] }
 0x22d   :  { %24469 = vmatprep.mubr.msk.f32.mxu0 %vm233_vm1, %v20546_v54  ;;  %v20614_v54 = vld [vmem:[%s34633_s0 + $0x3a] sm:$0xff] }
 0x22f   :  { %24030 = vmatmul.mubr.msk.f32.gmra.mrb[30].mxu1 %vm233_vm1, %v34904_v13  ;;  %v20616_v13 = vld [vmem:[%s34633_s0 + $0x52] sm:$0xff] }
 0x230   :  { %24470 = vmatmul.mubr.msk.f32.gmra.mrb[62].mxu0 %vm233_vm1, %v20547_v21  ;;  %24032 = vmatprep.mubr.msk.f32.mxu1 %vm233_vm1, %v34905_v59  ;;  %v6844_v21 = vld [vmem:[#allocation8 + $0x10] sm:$0xff] }
 0x231   :  { %24474 = vmatprep.mubr.msk.f32.mxu0 %vm233_vm1, %v20613_v30  ;;  %v20617_v30 = vld [vmem:[%s34633_s0 + $0x62] sm:$0xff]  ;;  %v20632_v59 = vld [vmem:[%s34633_s0 + $0x112] sm:$0xff] }
 0x233   :  { %24033 = vmatmul.mubr.msk.f32.gmra.mrb[32].mxu1 %vm233_vm1, %v34906_v55  ;;  %v20619_v55 = vld [vmem:[%s34633_s0 + $0x7a] sm:$0xff] }
 0x234   :  { %24475 = vmatmul.mubr.msk.f32.vlgmr.msra.gmra.mrb[0].mxu0 %vm233_vm1, %v20614_v54  ;;  %24035 = vmatprep.mubr.msk.f32.mxu1 %vm233_vm1, %v29334_v57  ;;  %v20618_v57 = vld [vmem:[%s34633_s0 + $0x6a] sm:$0xff]  ;;  %v20633_v54 = vld [vmem:[%s34633_s0 + $0x122] sm:$0xff] }
 0x235   :  { %24477 = vmatprep.mubr.msk.f32.mxu0 %vm233_vm1, %v20615_v5  ;;  %v20645_v5 = vld [vmem:[%s34633_s0 + $0x1e2] sm:$0xff] }
 0x237   :  { %24036 = vmatmul.mubr.msk.f32.gmra.mrb[34].mxu1 %vm233_vm1, %v29347_v47  ;;  %v20620_v47 = vld [vmem:[%s34633_s0 + $0x82] sm:$0xff] }
 0x238   :  { %24478 = vmatmul.mubr.msk.f32.gmra.mrb[2].mxu0 %vm233_vm1, %v20616_v13  ;;  %24038 = vmatprep.mubr.msk.f32.mxu1 %vm233_vm1, %v29354_v2  ;;  %v20621_v2 = vld [vmem:[%s34633_s0 + $0x92] sm:$0xff]  ;;  %v20647_v13 = vld [vmem:[%s34633_s0 + $0x1fa] sm:$0xff] }
 0x239   :  { %24480 = vmatprep.mubr.msk.f32.mxu0 %vm233_vm1, %v20617_v30  ;;  %v20649_v30 = vld [vmem:[%s34633_s0 + $0x212] sm:$0xff] }
 0x23b   :  { %24039 = vmatmul.mubr.msk.f32.gmra.mrb[36].mxu1 %vm233_vm1, %v29365_v4  ;;  %v20622_v4 = vld [vmem:[%s34633_s0 + $0x9a] sm:$0xff] }
 0x23c   :  { %24481 = vmatmul.mubr.msk.f32.gmra.mrb[4].mxu0 %vm233_vm1, %v20618_v57  ;;  %24041 = vmatprep.mubr.msk.f32.mxu1 %vm233_vm1, %v29372_v8  ;;  %v20623_v8 = vld [vmem:[%s34633_s0 + $0xaa] sm:$0xff] }
 0x23d   :  { %24483 = vmatprep.mubr.msk.f32.mxu0 %vm233_vm1, %v20619_v55  ;;  %v20651_v57 = vld [vmem:[%s34633_s0 + $0x22a] sm:$0xff]  ;;  %v20663_v55 = vld [vmem:[%s34633_s0 + $0x2ba] sm:$0xff] }
 0x23f   :  { %24042 = vmatmul.mubr.msk.f32.gmra.mrb[38].mxu1 %vm233_vm1, %v29383_v12  ;;  %v20624_v12 = vld [vmem:[%s34633_s0 + $0xb2] sm:$0xff] }
 0x240   :  { %24484 = vmatmul.mubr.msk.f32.gmra.mrb[6].mxu0 %vm233_vm1, %v20620_v47  ;;  %24044 = vmatprep.mubr.msk.f32.mxu1 %vm233_vm1, %v29390_v16  ;;  %v20625_v16 = vld [vmem:[%s34633_s0 + $0xc2] sm:$0xff] }
 0x241   :  { %24486 = vmatprep.mubr.msk.f32.mxu0 %vm233_vm1, %v20621_v2  ;;  %v6777_v47 = vld [vmem:[#allocation8] sm:$0xff]  ;;  %v20668_v2 = vld [vmem:[%s34633_s0 + $0x2f2] sm:$0xff] }
 0x243   :  { %24045 = vmatmul.mubr.msk.f32.gmra.mrb[40].mxu1 %vm233_vm1, %v29401_v20  ;;  %v20626_v20 = vld [vmem:[%s34633_s0 + $0xca] sm:$0xff] }
 0x244   :  { %24487 = vmatmul.mubr.msk.f32.gmra.mrb[8].mxu0 %vm233_vm1, %v20622_v4  ;;  %24047 = vmatprep.mubr.msk.f32.mxu1 %vm233_vm1, %v29408_v24  ;;  %v20627_v24 = vld [vmem:[%s34633_s0 + $0xda] sm:$0xff]  ;;  %v20669_v4 = vld [vmem:[%s34633_s0 + $0x302] sm:$0xff] }
 0x245   :  { %24489 = vmatprep.mubr.msk.f32.mxu0 %vm233_vm1, %v20623_v8  ;;  %v34907_v8 = vld [vmem:[#allocation18_spill] sm:$0xff] }
 0x247   :  { %24048 = vmatmul.mubr.msk.f32.gmra.mrb[42].mxu1 %vm233_vm1, %v29419_v29  ;;  %v20628_v29 = vld [vmem:[%s34633_s0 + $0xe2] sm:$0xff] }
 0x248   :  { %24490 = vmatmul.mubr.msk.f32.gmra.mrb[10].mxu0 %vm233_vm1, %v20624_v12  ;;  %24050 = vmatprep.mubr.msk.f32.mxu1 %vm233_vm1, %v29426_v33  ;;  %v20629_v33 = vld [vmem:[%s34633_s0 + $0xf2] sm:$0xff] }
 0x249   :  { %24492 = vmatprep.mubr.msk.f32.mxu0 %vm233_vm1, %v20625_v16  ;;  %v34909_v16 = vld [vmem:[#allocation20_spill] sm:$0xff] }
 0x24b   :  { %24051 = vmatmul.mubr.msk.f32.gmra.mrb[44].mxu1 %vm233_vm1, %v29437_v37  ;;  %v20630_v37 = vld [vmem:[%s34633_s0 + $0xfa] sm:$0xff] }
 0x24c   :  { %24493 = vmatmul.mubr.msk.f32.gmra.mrb[12].mxu0 %vm233_vm1, %v20626_v20  ;;  %24053 = vmatprep.mubr.msk.f32.mxu1 %vm233_vm1, %v29444_v40  ;;  %v20631_v40 = vld [vmem:[%s34633_s0 + $0x10a] sm:$0xff] }
 0x24d   :  { %24495 = vmatprep.mubr.msk.f32.mxu0 %vm233_vm1, %v20627_v24 }
 0x24f   :  { %24054 = vmatmul.mubr.msk.f32.gmra.mrb[46].mxu1 %vm233_vm1, %v29455_v44  ;;  %v6845_v44 = vld [vmem:[#allocation8 + $0x18] sm:$0xff] }
 0x250   :  { %24496 = vmatmul.mubr.msk.f32.gmra.mrb[14].mxu0 %vm233_vm1, %v20628_v29  ;;  %24056 = vmatprep.mubr.msk.f32.mxu1 %vm233_vm1, %v29462_v46  ;;  %v26406_v46 = vpack.c.bf16 %v6845_v44, %v6844_v21 }
 0x251   :  { %24498 = vmatprep.mubr.msk.f32.mxu0 %vm233_vm1, %v20629_v33 }
 0x252   :  { %26407 = vmatprep.subr.bf16.mxu1 %v26406_v46 }
 0x253   :  { %24057 = vmatmul.mubr.msk.f32.gmra.mrb[48].mxu1 %vm233_vm1, %v29473_v51  ;;  %v20634_v51 = vld [vmem:[%s34633_s0 + $0x12a] sm:$0xff] }
 0x254   :  { %24499 = vmatmul.mubr.msk.f32.gmra.mrb[16].mxu0 %vm233_vm1, %v20630_v37  ;;  %24059 = vmatprep.mubr.msk.f32.mxu1 %vm233_vm1, %v29480_v42  ;;  %v20635_v42 = vld [vmem:[%s34633_s0 + $0x13a] sm:$0xff] }
 0x255   :  { %24501 = vmatprep.mubr.msk.f32.mxu0 %vm233_vm1, %v20631_v40 }
 0x257   :  { %24060 = vmatmul.mubr.msk.f32.gmra.mrb[50].mxu1 %vm233_vm1, %v29491_v39  ;;  %v20636_v39 = vld [vmem:[%s34633_s0 + $0x142] sm:$0xff] }
 0x258   :  { %24502 = vmatmul.mubr.msk.f32.gmra.mrb[18].mxu0 %vm233_vm1, %v20632_v59  ;;  %24062 = vmatprep.mubr.msk.f32.mxu1 %vm233_vm1, %v29498_v35  ;;  %v20637_v35 = vld [vmem:[%s34633_s0 + $0x152] sm:$0xff] }
 0x259   :  { %24504 = vmatprep.mubr.msk.f32.mxu0 %vm233_vm1, %v20633_v54 }
 0x25b   :  { %24063 = vmatmul.mubr.msk.f32.gmra.mrb[52].mxu1 %vm233_vm1, %v29509_v31  ;;  %v20638_v31 = vld [vmem:[%s34633_s0 + $0x15a] sm:$0xff] }
 0x25c   :  { %24505 = vmatmul.mubr.msk.f32.gmra.mrb[20].mxu0 %vm233_vm1, %v20634_v51  ;;  %24065 = vmatprep.mubr.msk.f32.mxu1 %vm233_vm1, %v29516_v27  ;;  %v20639_v27 = vld [vmem:[%s34633_s0 + $0x16a] sm:$0xff] }
 0x25d   :  { %24507 = vmatprep.mubr.msk.f32.mxu0 %vm233_vm1, %v20635_v42 }
 0x25f   :  { %24066 = vmatmul.mubr.msk.f32.gmra.mrb[54].mxu1 %vm233_vm1, %v29527_v22  ;;  %v20640_v22 = vld [vmem:[%s34633_s0 + $0x172] sm:$0xff] }
 0x260   :  { %24508 = vmatmul.mubr.msk.f32.gmra.mrb[22].mxu0 %vm233_vm1, %v20636_v39  ;;  %24068 = vmatprep.mubr.msk.f32.mxu1 %vm233_vm1, %v29534_v18  ;;  %v20641_v18 = vld [vmem:[%s34633_s0 + $0x182] sm:$0xff] }
 0x261   :  { %24510 = vmatprep.mubr.msk.f32.mxu0 %vm233_vm1, %v20637_v35 }
 0x263   :  { %24069 = vmatmul.mubr.msk.f32.gmra.mrb[56].mxu1 %vm233_vm1, %v29545_v14  ;;  %v20642_v14 = vld [vmem:[%s34633_s0 + $0x18a] sm:$0xff] }
 0x264   :  { %24511 = vmatmul.mubr.msk.f32.gmra.mrb[24].mxu0 %vm233_vm1, %v20638_v31  ;;  %24071 = vmatprep.mubr.msk.f32.mxu1 %vm233_vm1, %v29552_v10  ;;  %v20643_v10 = vld [vmem:[%s34633_s0 + $0x19a] sm:$0xff] }
 0x265   :  { %24513 = vmatprep.mubr.msk.f32.mxu0 %vm233_vm1, %v20639_v27 }
 0x267   :  { %24072 = vmatmul.mubr.msk.f32.gmra.mrb[58].mxu1 %vm233_vm1, %v29568_v26  ;;  %v20644_v26 = vld [vmem:[%s34633_s0 + $0x1a2] sm:$0xff] }
 0x268   :  { %24514 = vmatmul.mubr.msk.f32.gmra.mrb[26].mxu0 %vm233_vm1, %v20640_v22  ;;  %24074 = vmatprep.mubr.msk.f32.mxu1 %vm233_vm1, %v29580_v63  ;;  %v20129_v63 = vld [vmem:[%s34633_s0 + $0x1c9] sm:$0xff] }
 0x269   :  { %24516 = vmatprep.mubr.msk.f32.mxu0 %vm233_vm1, %v20641_v18 }
 0x26b   :  { %24075 = vmatmul.mubr.msk.f32.gmra.mrb[60].mxu1 %vm233_vm1, %v29594_v38  ;;  %v20130_v38 = vld [vmem:[%s34633_s0 + $0x1d1] sm:$0xff] }
 0x26c   :  { %24517 = vmatmul.mubr.msk.f32.gmra.mrb[28].mxu0 %vm233_vm1, %v20642_v14  ;;  %24077 = vmatprep.mubr.msk.f32.mxu1 %vm233_vm1, %v29722_v1  ;;  %v20646_v1 = vld [vmem:[%s34633_s0 + $0x1ea] sm:$0xff] }
 0x26d   :  { %24519 = vmatprep.mubr.msk.f32.mxu0 %vm233_vm1, %v20643_v10 }
 0x26f   :  { %24078 = vmatmul.mubr.msk.f32.gmra.mrb[62].mxu1 %vm233_vm1, %v29735_v41  ;;  %v20648_v41 = vld [vmem:[%s34633_s0 + $0x202] sm:$0xff] }
 0x270   :  { %24520 = vmatmul.mubr.msk.f32.gmra.mrb[30].mxu0 %vm233_vm1, %v20644_v26  ;;  %24130 = vmatprep.mubr.msk.f32.mxu1 %vm233_vm1, %v20129_v63 }
 0x271   :  { %24522 = vmatprep.mubr.msk.f32.mxu0 %vm233_vm1, %v20645_v5 }
 0x273   :  { %24131 = vmatmul.mubr.msk.f32.vlgmr.msra.gmra.mrb[32].mxu1 %vm233_vm1, %v20130_v38 }
 0x274   :  { %24523 = vmatmul.mubr.msk.f32.gmra.mrb[32].mxu0 %vm233_vm1, %v20646_v1  ;;  %24133 = vmatprep.mubr.msk.f32.mxu1 %vm233_vm1, %v29954_v61  ;;  %v20650_v61 = vld [vmem:[%s34633_s0 + $0x21a] sm:$0xff] }
 0x275   :  { %24525 = vmatprep.mubr.msk.f32.mxu0 %vm233_vm1, %v20647_v13  ;;  %26409 = vmatpush3.bf16.msra.mxu1 %v26406_v46 }
 0x277   :  { %24134 = vmatmul.mubr.msk.f32.gmra.mrb[34].mxu1 %vm233_vm1, %v29968_v48  ;;  %v20652_v48 = vld [vmem:[%s34633_s0 + $0x232] sm:$0xff] }
 0x278   :  { %24526 = vmatmul.mubr.msk.f32.gmra.mrb[34].mxu0 %vm233_vm1, %v20648_v41  ;;  %24136 = vmatprep.mubr.msk.f32.mxu1 %vm233_vm1, %v29976_v52  ;;  %v20653_v52 = vld [vmem:[%s34633_s0 + $0x242] sm:$0xff] }
 0x279   :  { %24528 = vmatprep.mubr.msk.f32.mxu0 %vm233_vm1, %v20649_v30 }
 0x27b   :  { %24137 = vmatmul.mubr.msk.f32.gmra.mrb[36].mxu1 %vm233_vm1, %v29991_v58  ;;  %v20654_v58 = vld [vmem:[%s34633_s0 + $0x24a] sm:$0xff] }
 0x27c   :  { %24529 = vmatmul.mubr.msk.f32.gmra.mrb[36].mxu0 %vm233_vm1, %v20650_v61  ;;  %24139 = vmatprep.mubr.msk.f32.mxu1 %vm233_vm1, %v29999_v62  ;;  %v20655_v62 = vld [vmem:[%s34633_s0 + $0x25a] sm:$0xff] }
 0x27d   :  { %24531 = vmatprep.mubr.msk.f32.mxu0 %vm233_vm1, %v20651_v57 }
 0x27f   :  { %24140 = vmatmul.mubr.msk.f32.gmra.mrb[38].mxu1 %vm233_vm1, %v30013_v3  ;;  %v20656_v3 = vld [vmem:[%s34633_s0 + $0x262] sm:$0xff] }
 0x280   :  { %24532 = vmatmul.mubr.msk.f32.gmra.mrb[38].mxu0 %vm233_vm1, %v20652_v48  ;;  %24142 = vmatprep.mubr.msk.f32.mxu1 %vm233_vm1, %v30021_v7  ;;  %v20657_v7 = vld [vmem:[%s34633_s0 + $0x272] sm:$0xff] }
 0x281   :  { %24534 = vmatprep.mubr.msk.f32.mxu0 %vm233_vm1, %v20653_v52 }
 0x283   :  { %24143 = vmatmul.mubr.msk.f32.gmra.mrb[40].mxu1 %vm233_vm1, %v30035_v11  ;;  %v30571_v11 = vld [vmem:[%s34633_s0 + $0x27a] sm:$0xff] }
 0x284   :  { %24535 = vmatmul.mubr.msk.f32.gmra.mrb[40].mxu0 %vm233_vm1, %v20654_v58  ;;  %24145 = vmatprep.mubr.msk.f32.mxu1 %vm233_vm1, %v30043_v15  ;;  %v30576_v15 = vld [vmem:[%s34633_s0 + $0x28a] sm:$0xff] }
 0x285   :  { %24537 = vmatprep.mubr.msk.f32.mxu0 %vm233_vm1, %v20655_v62  ;;  %v31026_v62 = vld [vmem:[#allocation6] ss:$0 sm:$0xff] }
 0x287   :  { %24146 = vmatmul.mubr.msk.f32.gmra.mrb[42].mxu1 %vm233_vm1, %v30057_v19  ;;  %v34679_v19 = vmov 0.0  }
 0x288   :  { %24538 = vmatmul.mubr.msk.f32.gmra.mrb[42].mxu0 %vm233_vm1, %v20656_v3  ;;  %24148 = vmatprep.mubr.msk.f32.mxu1 %vm233_vm1, %v30065_v23  ;;  %6510 = vst.msk [vmem:[#allocation2 + $0x30] sm:$0xff] %vm6502_vm2, %v34679_v19  ;;  %6503 = vst.msk [vmem:[#allocation2] sm:$0xff] %vm6502_vm2, %v34679_v19  ;;  %v20660_v23 = vld [vmem:[%s34633_s0 + $0x292] sm:$0xff] }
 0x289   :  { %24540 = vmatprep.mubr.msk.f32.mxu0 %vm233_vm1, %v20657_v7  ;;  %6504 = vst.msk [vmem:[#allocation2 + $0x8] sm:$0xff] %vm6502_vm2, %v34679_v19  ;;  %6505 = vst.msk [vmem:[#allocation2 + $0x10] sm:$0xff] %vm6502_vm2, %v34679_v19 }
 0x28a   :  { %6508 = vst.msk [vmem:[#allocation2 + $0x20] sm:$0xff] %vm6502_vm2, %v34679_v19  ;;  %6509 = vst.msk [vmem:[#allocation2 + $0x28] sm:$0xff] %vm6502_vm2, %v34679_v19 }
 0x28b   :  { %24149 = vmatmul.mubr.msk.f32.gmra.mrb[44].mxu1 %vm233_vm1, %v30079_v28  ;;  %6512 = vst.msk [vmem:[#allocation2 + $0x40] sm:$0xff] %vm6502_vm2, %v34679_v19  ;;  %6513 = vst.msk [vmem:[#allocation2 + $0x48] sm:$0xff] %vm6502_vm2, %v34679_v19  ;;  %v20661_v28 = vld [vmem:[%s34633_s0 + $0x2a2] sm:$0xff] }
 0x28c   :  { %6514 = vst.msk [vmem:[#allocation2 + $0x50] sm:$0xff] %vm6502_vm2, %v34679_v19  ;;  %6516 = vst.msk [vmem:[#allocation2 + $0x60] sm:$0xff] %vm6502_vm2, %v34679_v19  ;;  %24541 = vmatmul.mubr.msk.f32.gmra.mrb[44].mxu0 %vm233_vm1, %v30571_v11  ;;  %24151 = vmatprep.mubr.msk.f32.mxu1 %vm233_vm1, %v30087_v32  ;;  %v20662_v32 = vld [vmem:[%s34633_s0 + $0x2aa] sm:$0xff] }
 0x28d   :  { %6517 = vst.msk [vmem:[#allocation2 + $0x68] sm:$0xff] %vm6502_vm2, %v34679_v19  ;;  %6518 = vst.msk [vmem:[#allocation2 + $0x70] sm:$0xff] %vm6502_vm2, %v34679_v19  ;;  %24543 = vmatprep.mubr.msk.f32.mxu0 %vm233_vm1, %v30576_v15 }
 0x28e   :  { %6520 = vst.msk [vmem:[#allocation2 + $0x80] sm:$0xff] %vm6502_vm2, %v34679_v19  ;;  %6521 = vst.msk [vmem:[#allocation2 + $0x88] sm:$0xff] %vm6502_vm2, %v34679_v19 }
 0x28f   :  { %6522 = vst.msk [vmem:[#allocation2 + $0x90] sm:$0xff] %vm6502_vm2, %v34679_v19  ;;  %6524 = vst.msk [vmem:[#allocation2 + $0xa0] sm:$0xff] %vm6502_vm2, %v34679_v19  ;;  %24152 = vmatmul.mubr.msk.f32.gmra.mrb[46].mxu1 %vm233_vm1, %v30101_v36  ;;  %v20664_v36 = vld [vmem:[%s34633_s0 + $0x2c2] sm:$0xff] }
 0x290   :  { %6525 = vst.msk [vmem:[#allocation2 + $0xa8] sm:$0xff] %vm6502_vm2, %v34679_v19  ;;  %6526 = vst.msk [vmem:[#allocation2 + $0xb0] sm:$0xff] %vm6502_vm2, %v34679_v19  ;;  %24544 = vmatmul.mubr.msk.f32.gmra.mrb[46].mxu0 %vm233_vm1, %v20660_v23  ;;  %24154 = vmatprep.mubr.msk.f32.mxu1 %vm233_vm1, %v30109_v53  ;;  %v20665_v53 = vld [vmem:[%s34633_s0 + $0x2d2] sm:$0xff]  ;;  %v6779_v12 = vld [vmem:[#allocation2 + $0x8] sm:$0xff] }
 0x291   :  { %6528 = vst.msk [vmem:[#allocation2 + $0xc0] sm:$0xff] %vm6502_vm2, %v34679_v19  ;;  %6529 = vst.msk [vmem:[#allocation2 + $0xc8] sm:$0xff] %vm6502_vm2, %v34679_v19  ;;  %24546 = vmatprep.mubr.msk.f32.mxu0 %vm233_vm1, %v20661_v28  ;;  %v6780_v20 = vld [vmem:[#allocation2 + $0x10] sm:$0xff] }
 0x292   :  { %6530 = vst.msk [vmem:[#allocation2 + $0xd0] sm:$0xff] %vm6502_vm2, %v34679_v19  ;;  %6532 = vst.msk [vmem:[#allocation2 + $0xe0] sm:$0xff] %vm6502_vm2, %v34679_v19 }
 0x293   :  { %6533 = vst.msk [vmem:[#allocation2 + $0xe8] sm:$0xff] %vm6502_vm2, %v34679_v19  ;;  %6534 = vst.msk [vmem:[#allocation2 + $0xf0] sm:$0xff] %vm6502_vm2, %v34679_v19  ;;  %24155 = vmatmul.mubr.msk.f32.gmra.mrb[48].mxu1 %vm233_vm1, %v30123_v6  ;;  %v20666_v6 = vld [vmem:[%s34633_s0 + $0x2da] sm:$0xff] }
 0x294   :  { %6536 = vst.msk [vmem:[#allocation2 + $0x100] sm:$0xff] %vm6502_vm2, %v34679_v19  ;;  %6537 = vst.msk [vmem:[#allocation2 + $0x108] sm:$0xff] %vm6502_vm2, %v34679_v19  ;;  %24547 = vmatmul.mubr.msk.f32.gmra.mrb[48].mxu0 %vm233_vm1, %v20662_v32  ;;  %24157 = vmatprep.mubr.msk.f32.mxu1 %vm233_vm1, %v30131_v43  ;;  %v20667_v43 = vld [vmem:[%s34633_s0 + $0x2ea] sm:$0xff] }
 0x295   :  { %6538 = vst.msk [vmem:[#allocation2 + $0x110] sm:$0xff] %vm6502_vm2, %v34679_v19  ;;  %6540 = vst.msk [vmem:[#allocation2 + $0x120] sm:$0xff] %vm6502_vm2, %v34679_v19  ;;  %24549 = vmatprep.mubr.msk.f32.mxu0 %vm233_vm1, %v20663_v55 }
 0x296   :  { %6541 = vst.msk [vmem:[#allocation2 + $0x128] sm:$0xff] %vm6502_vm2, %v34679_v19  ;;  %6542 = vst.msk [vmem:[#allocation2 + $0x130] sm:$0xff] %vm6502_vm2, %v34679_v19 }
 0x297   :  { %6544 = vst.msk [vmem:[#allocation2 + $0x140] sm:$0xff] %vm6502_vm2, %v34679_v19  ;;  %6545 = vst.msk [vmem:[#allocation2 + $0x148] sm:$0xff] %vm6502_vm2, %v34679_v19  ;;  %24158 = vmatmul.mubr.msk.f32.gmra.mrb[50].mxu1 %vm233_vm1, %v30145_v50  ;;  %v6778_v50 = vld [vmem:[#allocation8 + $0x8] sm:$0xff] }
 0x298   :  { %6546 = vst.msk [vmem:[#allocation2 + $0x150] sm:$0xff] %vm6502_vm2, %v34679_v19  ;;  %6548 = vst.msk [vmem:[#allocation2 + $0x160] sm:$0xff] %vm6502_vm2, %v34679_v19  ;;  %24550 = vmatmul.mubr.msk.f32.gmra.mrb[50].mxu0 %vm233_vm1, %v20664_v36  ;;  %24160 = vmatprep.mubr.msk.f32.mxu1 %vm233_vm1, %v30153_v56  ;;  %v26410_v56 = vpack.c.bf16 %v6778_v50, %v6777_v47 }
 0x299   :  { %6549 = vst.msk [vmem:[#allocation2 + $0x168] sm:$0xff] %vm6502_vm2, %v34679_v19  ;;  %6550 = vst.msk [vmem:[#allocation2 + $0x170] sm:$0xff] %vm6502_vm2, %v34679_v19  ;;  %24552 = vmatprep.mubr.msk.f32.mxu0 %vm233_vm1, %v20665_v53 }
 0x29a   :  { %6552 = vst.msk [vmem:[#allocation2 + $0x180] sm:$0xff] %vm6502_vm2, %v34679_v19  ;;  %6553 = vst.msk [vmem:[#allocation2 + $0x188] sm:$0xff] %vm6502_vm2, %v34679_v19  ;;  %26411 = vmatprep.subr.bf16.mxu1 %v26410_v56 }
 0x29b   :  { %6554 = vst.msk [vmem:[#allocation2 + $0x190] sm:$0xff] %vm6502_vm2, %v34679_v19  ;;  %6556 = vst.msk [vmem:[#allocation2 + $0x1a0] sm:$0xff] %vm6502_vm2, %v34679_v19  ;;  %24161 = vmatmul.mubr.msk.f32.gmra.mrb[52].mxu1 %vm233_vm1, %v30167_v0  ;;  %v20670_v0 = vld [vmem:[%s34633_s0 + $0x30a] sm:$0xff] }
 0x29c   :  { %6557 = vst.msk [vmem:[#allocation2 + $0x1a8] sm:$0xff] %vm6502_vm2, %v34679_v19  ;;  %6558 = vst.msk [vmem:[#allocation2 + $0x1b0] sm:$0xff] %vm6502_vm2, %v34679_v19  ;;  %24553 = vmatmul.mubr.msk.f32.gmra.mrb[52].mxu0 %vm233_vm1, %v20666_v6  ;;  %24163 = vmatprep.mubr.msk.f32.mxu1 %vm233_vm1, %v30175_v9  ;;  %v20671_v9 = vld [vmem:[%s34633_s0 + $0x31a] sm:$0xff] }
 0x29d   :  { %6560 = vst.msk [vmem:[#allocation2 + $0x1c0] sm:$0xff] %vm6502_vm2, %v34679_v19  ;;  %6561 = vst.msk [vmem:[#allocation2 + $0x1c8] sm:$0xff] %vm6502_vm2, %v34679_v19  ;;  %24555 = vmatprep.mubr.msk.f32.mxu0 %vm233_vm1, %v20667_v43 }
 0x29e   :  { %6562 = vst.msk [vmem:[#allocation2 + $0x1d0] sm:$0xff] %vm6502_vm2, %v34679_v19  ;;  %6564 = vst.msk [vmem:[#allocation2 + $0x1e0] sm:$0xff] %vm6502_vm2, %v34679_v19 }
 0x29f   :  { %6565 = vst.msk [vmem:[#allocation2 + $0x1e8] sm:$0xff] %vm6502_vm2, %v34679_v19  ;;  %6566 = vst.msk [vmem:[#allocation2 + $0x1f0] sm:$0xff] %vm6502_vm2, %v34679_v19  ;;  %24164 = vmatmul.mubr.msk.f32.gmra.mrb[54].mxu1 %vm233_vm1, %v30189_v17  ;;  %v20672_v17 = vld [vmem:[%s34633_s0 + $0x322] sm:$0xff] }
 0x2a0   :  { %6568 = vst.msk [vmem:[#allocation2 + $0x200] sm:$0xff] %vm6502_vm2, %v34679_v19  ;;  %6569 = vst.msk [vmem:[#allocation2 + $0x208] sm:$0xff] %vm6502_vm2, %v34679_v19  ;;  %24556 = vmatmul.mubr.msk.f32.gmra.mrb[54].mxu0 %vm233_vm1, %v20668_v2  ;;  %24166 = vmatprep.mubr.msk.f32.mxu1 %vm233_vm1, %v30197_v25  ;;  %v20673_v25 = vld [vmem:[%s34633_s0 + $0x332] sm:$0xff] }
 0x2a1   :  { %6570 = vst.msk [vmem:[#allocation2 + $0x210] sm:$0xff] %vm6502_vm2, %v34679_v19  ;;  %6572 = vst.msk [vmem:[#allocation2 + $0x220] sm:$0xff] %vm6502_vm2, %v34679_v19  ;;  %24558 = vmatprep.mubr.msk.f32.mxu0 %vm233_vm1, %v20669_v4 }
 0x2a2   :  { %6573 = vst.msk [vmem:[#allocation2 + $0x228] sm:$0xff] %vm6502_vm2, %v34679_v19  ;;  %6574 = vst.msk [vmem:[#allocation2 + $0x230] sm:$0xff] %vm6502_vm2, %v34679_v19 }
 0x2a3   :  { %6576 = vst.msk [vmem:[#allocation2 + $0x240] sm:$0xff] %vm6502_vm2, %v34679_v19  ;;  %6577 = vst.msk [vmem:[#allocation2 + $0x248] sm:$0xff] %vm6502_vm2, %v34679_v19  ;;  %24167 = vmatmul.mubr.msk.f32.gmra.mrb[56].mxu1 %vm233_vm1, %v30211_v34  ;;  %v20674_v34 = vld [vmem:[%s34633_s0 + $0x33a] sm:$0xff] }
 0x2a4   :  { %6578 = vst.msk [vmem:[#allocation2 + $0x250] sm:$0xff] %vm6502_vm2, %v34679_v19  ;;  %6580 = vst.msk [vmem:[#allocation2 + $0x260] sm:$0xff] %vm6502_vm2, %v34679_v19  ;;  %24559 = vmatmul.mubr.msk.f32.gmra.mrb[56].mxu0 %vm233_vm1, %v20670_v0  ;;  %24169 = vmatprep.mubr.msk.f32.mxu1 %vm233_vm1, %v30219_v49  ;;  %v20675_v49 = vld [vmem:[%s34633_s0 + $0x34a] sm:$0xff] }
 0x2a5   :  { %6581 = vst.msk [vmem:[#allocation2 + $0x268] sm:$0xff] %vm6502_vm2, %v34679_v19  ;;  %6582 = vst.msk [vmem:[#allocation2 + $0x270] sm:$0xff] %vm6502_vm2, %v34679_v19  ;;  %24561 = vmatprep.mubr.msk.f32.mxu0 %vm233_vm1, %v20671_v9 }
 0x2a6   :  { %6584 = vst.msk [vmem:[#allocation2 + $0x280] sm:$0xff] %vm6502_vm2, %v34679_v19  ;;  %6585 = vst.msk [vmem:[#allocation2 + $0x288] sm:$0xff] %vm6502_vm2, %v34679_v19 }
 0x2a7   :  { %6586 = vst.msk [vmem:[#allocation2 + $0x290] sm:$0xff] %vm6502_vm2, %v34679_v19  ;;  %6588 = vst.msk [vmem:[#allocation2 + $0x2a0] sm:$0xff] %vm6502_vm2, %v34679_v19  ;;  %24170 = vmatmul.mubr.msk.f32.gmra.mrb[58].mxu1 %vm233_vm1, %v30233_v45  ;;  %v34908_v45 = vld [vmem:[#allocation19_spill] sm:$0xff] }
 0x2a8   :  { %6589 = vst.msk [vmem:[#allocation2 + $0x2a8] sm:$0xff] %vm6502_vm2, %v34679_v19  ;;  %6590 = vst.msk [vmem:[#allocation2 + $0x2b0] sm:$0xff] %vm6502_vm2, %v34679_v19  ;;  %24562 = vmatmul.mubr.msk.f32.gmra.mrb[58].mxu0 %vm233_vm1, %v20672_v17  ;;  %24172 = vmatprep.mubr.msk.f32.mxu1 %vm233_vm1, %v30241_v60  ;;  %v20676_v60 = vld [vmem:[%s34633_s0 + $0x352] sm:$0xff] }
 0x2a9   :  { %6592 = vst.msk [vmem:[#allocation2 + $0x2c0] sm:$0xff] %vm6502_vm2, %v34679_v19  ;;  %6593 = vst.msk [vmem:[#allocation2 + $0x2c8] sm:$0xff] %vm6502_vm2, %v34679_v19  ;;  %24564 = vmatprep.mubr.msk.f32.mxu0 %vm233_vm1, %v20673_v25 }
 0x2aa   :  { %6594 = vst.msk [vmem:[#allocation2 + $0x2d0] sm:$0xff] %vm6502_vm2, %v34679_v19  ;;  %6596 = vst.msk [vmem:[#allocation2 + $0x2e0] sm:$0xff] %vm6502_vm2, %v34679_v19 }
 0x2ab   :  { %6597 = vst.msk [vmem:[#allocation2 + $0x2e8] sm:$0xff] %vm6502_vm2, %v34679_v19  ;;  %6598 = vst.msk [vmem:[#allocation2 + $0x2f0] sm:$0xff] %vm6502_vm2, %v34679_v19  ;;  %24173 = vmatmul.mubr.msk.f32.gmra.mrb[60].mxu1 %vm233_vm1, %v34907_v8 }
 0x2ac   :  { %6600 = vst.msk [vmem:[#allocation2 + $0x300] sm:$0xff] %vm6502_vm2, %v34679_v19  ;;  %6601 = vst.msk [vmem:[#allocation2 + $0x308] sm:$0xff] %vm6502_vm2, %v34679_v19  ;;  %24565 = vmatmul.mubr.msk.f32.gmra.mrb[60].mxu0 %vm233_vm1, %v20674_v34  ;;  %24175 = vmatprep.mubr.msk.f32.mxu1 %vm233_vm1, %v34908_v45 }
 0x2ad   :  { %6602 = vst.msk [vmem:[#allocation2 + $0x310] sm:$0xff] %vm6502_vm2, %v34679_v19  ;;  %6604 = vst.msk [vmem:[#allocation2 + $0x320] sm:$0xff] %vm6502_vm2, %v34679_v19  ;;  %24567 = vmatprep.mubr.msk.f32.mxu0 %vm233_vm1, %v20675_v49 }
 0x2ae   :  { %6605 = vst.msk [vmem:[#allocation2 + $0x328] sm:$0xff] %vm6502_vm2, %v34679_v19  ;;  %6606 = vst.msk [vmem:[#allocation2 + $0x330] sm:$0xff] %vm6502_vm2, %v34679_v19 }
 0x2af   :  { %6608 = vst.msk [vmem:[#allocation2 + $0x340] sm:$0xff] %vm6502_vm2, %v34679_v19  ;;  %6609 = vst.msk [vmem:[#allocation2 + $0x348] sm:$0xff] %vm6502_vm2, %v34679_v19  ;;  %24176 = vmatmul.mubr.msk.f32.gmra.mrb[62].mxu1 %vm233_vm1, %v34909_v16 }
 0x2b0   :  { %6610 = vst.msk [vmem:[#allocation2 + $0x350] sm:$0xff] %vm6502_vm2, %v34679_v19  ;;  %6612 = vst.msk [vmem:[#allocation2 + $0x360] sm:$0xff] %vm6502_vm2, %v34679_v19  ;;  %24568 = vmatmul.mubr.msk.f32.gmra.mrb[62].mxu0 %vm233_vm1, %v20676_v60  ;;  %24574 = vmatprep.mubr.msk.f32.mxu1 %vm6502_vm2, %v6779_v12  ;;  %v8065_v60 = vld [vmem:[#allocation8 + $0x20] sm:$0xff]  ;;  %v8066_v12 = vld [vmem:[#allocation8 + $0x28] sm:$0xff] }
 0x2b1   :  { %6613 = vst.msk [vmem:[#allocation2 + $0x368] sm:$0xff] %vm6502_vm2, %v34679_v19  ;;  %6614 = vst.msk [vmem:[#allocation2 + $0x370] sm:$0xff] %vm6502_vm2, %v34679_v19 }
 0x2b2   :  { %6616 = vst.msk [vmem:[#allocation2 + $0x380] sm:$0xff] %vm6502_vm2, %v34679_v19  ;;  %6617 = vst.msk [vmem:[#allocation2 + $0x388] sm:$0xff] %vm6502_vm2, %v34679_v19 }
 0x2b3   :  { %6618 = vst.msk [vmem:[#allocation2 + $0x390] sm:$0xff] %vm6502_vm2, %v34679_v19  ;;  %6620 = vst.msk [vmem:[#allocation2 + $0x3a0] sm:$0xff] %vm6502_vm2, %v34679_v19  ;;  %24575 = vmatmul.mubr.msk.f32.vlgmr.msra.gmra.mrb[64].mxu1 %vm6502_vm2, %v6780_v20 }
 0x2b4   :  { %6621 = vst.msk [vmem:[#allocation2 + $0x3a8] sm:$0xff] %vm6502_vm2, %v34679_v19  ;;  %6622 = vst.msk [vmem:[#allocation2 + $0x3b0] sm:$0xff] %vm6502_vm2, %v34679_v19  ;;  %26413 = vmatpush3.bf16.msra.mxu1 %v26410_v56 }
 0x2b5   :  { %6624 = vst.msk [vmem:[#allocation2 + $0x3c0] sm:$0xff] %vm6502_vm2, %v34679_v19  ;;  %6625 = vst.msk [vmem:[#allocation2 + $0x3c8] sm:$0xff] %vm6502_vm2, %v34679_v19 }
 0x2b6   :  { %6626 = vst.msk [vmem:[#allocation2 + $0x3d0] sm:$0xff] %vm6502_vm2, %v34679_v19  ;;  %6628 = vst.msk [vmem:[#allocation2 + $0x3e0] sm:$0xff] %vm6502_vm2, %v34679_v19 }
 0x2b7   :  { %6629 = vst.msk [vmem:[#allocation2 + $0x3e8] sm:$0xff] %vm6502_vm2, %v34679_v19  ;;  %6630 = vst.msk [vmem:[#allocation2 + $0x3f0] sm:$0xff] %vm6502_vm2, %v34679_v19 }
 0x2b8   :  { %6632 = vst.msk [vmem:[#allocation2 + $0x400] sm:$0xff] %vm6502_vm2, %v34679_v19  ;;  %6633 = vst.msk [vmem:[#allocation2 + $0x408] sm:$0xff] %vm6502_vm2, %v34679_v19 }
 0x2b9   :  { %6634 = vst.msk [vmem:[#allocation2 + $0x410] sm:$0xff] %vm6502_vm2, %v34679_v19  ;;  %6636 = vst.msk [vmem:[#allocation2 + $0x420] sm:$0xff] %vm6502_vm2, %v34679_v19 }
 0x2ba   :  { %6637 = vst.msk [vmem:[#allocation2 + $0x428] sm:$0xff] %vm6502_vm2, %v34679_v19  ;;  %6638 = vst.msk [vmem:[#allocation2 + $0x430] sm:$0xff] %vm6502_vm2, %v34679_v19 }
 0x2bb   :  { %6640 = vst.msk [vmem:[#allocation2 + $0x440] sm:$0xff] %vm6502_vm2, %v34679_v19  ;;  %6641 = vst.msk [vmem:[#allocation2 + $0x448] sm:$0xff] %vm6502_vm2, %v34679_v19 }
 0x2bc   :  { %6642 = vst.msk [vmem:[#allocation2 + $0x450] sm:$0xff] %vm6502_vm2, %v34679_v19  ;;  %6644 = vst.msk [vmem:[#allocation2 + $0x460] sm:$0xff] %vm6502_vm2, %v34679_v19 }
 0x2bd   :  { %6645 = vst.msk [vmem:[#allocation2 + $0x468] sm:$0xff] %vm6502_vm2, %v34679_v19  ;;  %6646 = vst.msk [vmem:[#allocation2 + $0x470] sm:$0xff] %vm6502_vm2, %v34679_v19 }
 0x2be   :  { %6507 = vst.msk [vmem:[#allocation2 + $0x18] sm:$0x1] %vm6506_vm3, %v34679_v19  ;;  %6511 = vst.msk [vmem:[#allocation2 + $0x38] sm:$0x1] %vm6506_vm3, %v34679_v19 }
 0x2bf   :  { %6515 = vst.msk [vmem:[#allocation2 + $0x58] sm:$0x1] %vm6506_vm3, %v34679_v19  ;;  %6519 = vst.msk [vmem:[#allocation2 + $0x78] sm:$0x1] %vm6506_vm3, %v34679_v19 }
 0x2c0   :  { %6523 = vst.msk [vmem:[#allocation2 + $0x98] sm:$0x1] %vm6506_vm3, %v34679_v19  ;;  %6527 = vst.msk [vmem:[#allocation2 + $0xb8] sm:$0x1] %vm6506_vm3, %v34679_v19 }
 0x2c1   :  { %6531 = vst.msk [vmem:[#allocation2 + $0xd8] sm:$0x1] %vm6506_vm3, %v34679_v19  ;;  %6535 = vst.msk [vmem:[#allocation2 + $0xf8] sm:$0x1] %vm6506_vm3, %v34679_v19 }
 0x2c2   :  { %6539 = vst.msk [vmem:[#allocation2 + $0x118] sm:$0x1] %vm6506_vm3, %v34679_v19  ;;  %6543 = vst.msk [vmem:[#allocation2 + $0x138] sm:$0x1] %vm6506_vm3, %v34679_v19 }
 0x2c3   :  { %6547 = vst.msk [vmem:[#allocation2 + $0x158] sm:$0x1] %vm6506_vm3, %v34679_v19  ;;  %6551 = vst.msk [vmem:[#allocation2 + $0x178] sm:$0x1] %vm6506_vm3, %v34679_v19 }
 0x2c4   :  { %6555 = vst.msk [vmem:[#allocation2 + $0x198] sm:$0x1] %vm6506_vm3, %v34679_v19  ;;  %6559 = vst.msk [vmem:[#allocation2 + $0x1b8] sm:$0x1] %vm6506_vm3, %v34679_v19 }
 0x2c5   :  { %6563 = vst.msk [vmem:[#allocation2 + $0x1d8] sm:$0x1] %vm6506_vm3, %v34679_v19  ;;  %6567 = vst.msk [vmem:[#allocation2 + $0x1f8] sm:$0x1] %vm6506_vm3, %v34679_v19 }
 0x2c6   :  { %6571 = vst.msk [vmem:[#allocation2 + $0x218] sm:$0x1] %vm6506_vm3, %v34679_v19  ;;  %6575 = vst.msk [vmem:[#allocation2 + $0x238] sm:$0x1] %vm6506_vm3, %v34679_v19  ;;  %v23986_v24 = vpop.f32.mrb[0].mxu1 }
 0x2c7   :  { %6579 = vst.msk [vmem:[#allocation2 + $0x258] sm:$0x1] %vm6506_vm3, %v34679_v19  ;;  %6583 = vst.msk [vmem:[#allocation2 + $0x278] sm:$0x1] %vm6506_vm3, %v34679_v19  ;;  %v2433_v29 = vpop.f32.mrb[1].mxu1 }
 0x2c8   :  { %6587 = vst.msk [vmem:[#allocation2 + $0x298] sm:$0x1] %vm6506_vm3, %v34679_v19  ;;  %6591 = vst.msk [vmem:[#allocation2 + $0x2b8] sm:$0x1] %vm6506_vm3, %v34679_v19 }
 0x2c9   :  { %6595 = vst.msk [vmem:[#allocation2 + $0x2d8] sm:$0x1] %vm6506_vm3, %v34679_v19  ;;  %6599 = vst.msk [vmem:[#allocation2 + $0x2f8] sm:$0x1] %vm6506_vm3, %v34679_v19 }
 0x2ca   :  { %6603 = vst.msk [vmem:[#allocation2 + $0x318] sm:$0x1] %vm6506_vm3, %v34679_v19  ;;  %6607 = vst.msk [vmem:[#allocation2 + $0x338] sm:$0x1] %vm6506_vm3, %v34679_v19  ;;  %v23989_v33 = vpop.f32.mrb[2].mxu1 }
 0x2cb   :  { %6611 = vst.msk [vmem:[#allocation2 + $0x358] sm:$0x1] %vm6506_vm3, %v34679_v19  ;;  %6615 = vst.msk [vmem:[#allocation2 + $0x378] sm:$0x1] %vm6506_vm3, %v34679_v19  ;;  %v2443_v37 = vpop.f32.mrb[3].mxu1 }
 0x2cc   :  { %6619 = vst.msk [vmem:[#allocation2 + $0x398] sm:$0x1] %vm6506_vm3, %v34679_v19  ;;  %6623 = vst.msk [vmem:[#allocation2 + $0x3b8] sm:$0x1] %vm6506_vm3, %v34679_v19 }
 0x2cd   :  { %6627 = vst.msk [vmem:[#allocation2 + $0x3d8] sm:$0x1] %vm6506_vm3, %v34679_v19  ;;  %6631 = vst.msk [vmem:[#allocation2 + $0x3f8] sm:$0x1] %vm6506_vm3, %v34679_v19 }
 0x2ce   :  { %6635 = vst.msk [vmem:[#allocation2 + $0x418] sm:$0x1] %vm6506_vm3, %v34679_v19  ;;  %6639 = vst.msk [vmem:[#allocation2 + $0x438] sm:$0x1] %vm6506_vm3, %v34679_v19  ;;  %v23992_v40 = vpop.f32.mrb[4].mxu1 }
 0x2cf   :  { %6643 = vst.msk [vmem:[#allocation2 + $0x458] sm:$0x1] %vm6506_vm3, %v34679_v19  ;;  %6647 = vst.msk [vmem:[#allocation2 + $0x478] sm:$0x1] %vm6506_vm3, %v34679_v19  ;;  %v2453_v21 = vpop.f32.mrb[5].mxu1 }
 0x2d2   :  { %v23995_v44 = vpop.f32.mrb[6].mxu1 }
 0x2d3   :  { %v2463_v46 = vpop.f32.mrb[7].mxu1 }
 0x2d6   :  { %v30978_v59 = vpop.f32.mrb[8].mxu1 }
 0x2d7   :  { %v30980_v54 = vpop.f32.mrb[9].mxu1 }
 0x2da   :  { %v30982_v51 = vpop.f32.mrb[10].mxu1 }
 0x2db   :  { %v30984_v42 = vpop.f32.mrb[11].mxu1 }
 0x2de   :  { %v30986_v39 = vpop.f32.mrb[12].mxu1 }
 0x2df   :  { %v30988_v35 = vpop.f32.mrb[13].mxu1 }
 0x2e2   :  { %v30990_v31 = vpop.f32.mrb[14].mxu1 }
 0x2e3   :  { %v30992_v27 = vpop.f32.mrb[15].mxu1 }
 0x2e6   :  { %v30994_v22 = vpop.f32.mrb[16].mxu1 }
 0x2e7   :  { %v30996_v18 = vpop.f32.mrb[17].mxu1 }
 0x2ea   :  { %v30998_v14 = vpop.f32.mrb[18].mxu1 }
 0x2eb   :  { %v31000_v10 = vpop.f32.mrb[19].mxu1 }
 0x2ee   :  { %v31002_v26 = vpop.f32.mrb[20].mxu1 }
 0x2ef   :  { %v31004_v63 = vpop.f32.mrb[21].mxu1 }
 0x2f2   :  { %v31006_v5 = vpop.f32.mrb[22].mxu1 }
 0x2f3   :  { %v31008_v38 = vpop.f32.mrb[23].mxu1 }
 0x2f6   :  { %v31010_v1 = vpop.f32.mrb[24].mxu1 }
 0x2f7   :  { %v31012_v13 = vpop.f32.mrb[25].mxu1 }
 0x2fa   :  { %v31014_v41 = vpop.f32.mrb[26].mxu1 }
 0x2fb   :  { %v31016_v30 = vpop.f32.mrb[27].mxu1 }
 0x2fe   :  { %v31018_v61 = vpop.f32.mrb[28].mxu1 }
 0x2ff   :  { %v31020_v57 = vpop.f32.mrb[29].mxu1 }
 0x302   :  { %v31022_v48 = vpop.f32.mrb[30].mxu1 }
 0x303   :  { %v31024_v52 = vpop.f32.mrb[31].mxu1 }
 0x307   :  { %v24476_v58 = vpop.f32.mrb[0].mxu0 }
 0x308   :  { %v26516_v3 = vadd.f32 %v24476_v58, %v23986_v24  ;;  %v5984_v7 = vpop.f32.mrb[1].mxu0  ;;  %v31038_v24 = vpack.c.bf16 %v8066_v12, %v8065_v60 }
 0x309   :  { %v26517_v11 = vadd.f32 %v5984_v7, %v2433_v29 }
 0x30a   :  { %v6375_v15 = vadd.f32 %v26516_v3, %v31026_v62  ;;  %26415 = vmatprep.subr.bf16.mxu1 %v31038_v24 }
 0x30b   :  { %v6374_v23 = vadd.f32 %v26517_v11, %v31026_v62  ;;  %v24479_v28 = vpop.f32.mrb[2].mxu0 }
 0x30c   :  { %v6439_v32 = vmax.f32 %v6375_v15, 0.0  ;;  %v26518_v55 = vadd.f32 %v24479_v28, %v23989_v33  ;;  %v5994_v36 = vpop.f32.mrb[3].mxu0 }
 0x30d   :  { %v6438_v53 = vmax.f32 %v6374_v23, 0.0  ;;  %v26519_v6 = vadd.f32 %v5994_v36, %v2443_v37 }
 0x30e   :  { %6650 = vst.msk [vmem:[#allocation2 + $0x30] sm:$0xff] %vm6502_vm2, %v6439_v32  ;;  %v6377_v43 = vadd.f32 %v26518_v55, %v31026_v62 }
 0x30f   :  { %6649 = vst.msk [vmem:[#allocation2 + $0x28] sm:$0xff] %vm6502_vm2, %v6438_v53  ;;  %v6376_v47 = vadd.f32 %v26519_v6, %v31026_v62  ;;  %v24482_v50 = vpop.f32.mrb[4].mxu0 }
 0x310   :  { %v6441_v56 = vmax.f32 %v6377_v43, 0.0  ;;  %v26520_v2 = vadd.f32 %v24482_v50, %v23992_v40  ;;  %v6004_v4 = vpop.f32.mrb[5].mxu0 }
 0x311   :  { %v6440_v0 = vmax.f32 %v6376_v47, 0.0  ;;  %v26521_v9 = vadd.f32 %v6004_v4, %v2453_v21 }
 0x312   :  { %6652 = vst.msk [vmem:[#allocation2 + $0x50] sm:$0xff] %vm6502_vm2, %v6441_v56  ;;  %v6379_v17 = vadd.f32 %v26520_v2, %v31026_v62 }
 0x313   :  { %6651 = vst.msk [vmem:[#allocation2 + $0x48] sm:$0xff] %vm6502_vm2, %v6440_v0  ;;  %v6378_v25 = vadd.f32 %v26521_v9, %v31026_v62  ;;  %v24485_v34 = vpop.f32.mrb[6].mxu0 }
 0x314   :  { %v6443_v49 = vmax.f32 %v6379_v17, 0.0  ;;  %v26522_v8 = vadd.f32 %v24485_v34, %v23995_v44  ;;  %v6014_v45 = vpop.f32.mrb[7].mxu0 }
 0x315   :  { %v6442_v16 = vmax.f32 %v6378_v25, 0.0  ;;  %v26523_v20 = vadd.f32 %v6014_v45, %v2463_v46  ;;  %v6782_v21 = vld [vmem:[#allocation2 + $0x30] sm:$0xff] }
 0x316   :  { %6654 = vst.msk [vmem:[#allocation2 + $0x70] sm:$0xff] %vm6502_vm2, %v6443_v49  ;;  %v6381_v29 = vadd.f32 %v26522_v8, %v31026_v62  ;;  %v6781_v33 = vld [vmem:[#allocation2 + $0x28] sm:$0xff] }
 0x317   :  { %6653 = vst.msk [vmem:[#allocation2 + $0x68] sm:$0xff] %vm6502_vm2, %v6442_v16  ;;  %v6380_v37 = vadd.f32 %v26523_v20, %v31026_v62  ;;  %v24488_v40 = vpop.f32.mrb[8].mxu0  ;;  %24577 = vmatprep.mubr.msk.f32.mxu1 %vm6502_vm2, %v6781_v33  ;;  %v31495_v19 = vld [vmem:[#allocation2 + $0x29] sm:$0xff] }
 0x318   :  { %v6445_v44 = vmax.f32 %v6381_v29, 0.0  ;;  %v26524_v46 = vadd.f32 %v24488_v40, %v30978_v59  ;;  %v6024_v58 = vpop.f32.mrb[9].mxu0  ;;  %24578 = vmatmul.mubr.msk.f32.gmra.mrb[66].mxu1 %vm6502_vm2, %v6782_v21 }
 0x319   :  { %v6444_v3 = vmax.f32 %v6380_v37, 0.0  ;;  %v26525_v7 = vadd.f32 %v6024_v58, %v30980_v54  ;;  %v6784_v32 = vld [vmem:[#allocation2 + $0x50] sm:$0xff] }
 0x31a   :  { %6656 = vst.msk [vmem:[#allocation2 + $0x90] sm:$0xff] %vm6502_vm2, %v6445_v44  ;;  %v6383_v11 = vadd.f32 %v26524_v46, %v31026_v62  ;;  %v6783_v15 = vld [vmem:[#allocation2 + $0x48] sm:$0xff] }
 0x31b   :  { %6655 = vst.msk [vmem:[#allocation2 + $0x88] sm:$0xff] %vm6502_vm2, %v6444_v3  ;;  %v6382_v23 = vadd.f32 %v26525_v7, %v31026_v62  ;;  %v24491_v28 = vpop.f32.mrb[10].mxu0  ;;  %24580 = vmatprep.mubr.msk.f32.mxu1 %vm6502_vm2, %v6783_v15 }
 0x31c   :  { %v6447_v59 = vmax.f32 %v6383_v11, 0.0  ;;  %v26526_v55 = vadd.f32 %v24491_v28, %v30982_v51  ;;  %v6034_v36 = vpop.f32.mrb[11].mxu0  ;;  %24581 = vmatmul.mubr.msk.f32.gmra.mrb[68].mxu1 %vm6502_vm2, %v6784_v32 }
 0x31d   :  { %v6446_v54 = vmax.f32 %v6382_v23, 0.0  ;;  %v26527_v53 = vadd.f32 %v6034_v36, %v30984_v42  ;;  %v6786_v56 = vld [vmem:[#allocation2 + $0x70] sm:$0xff] }
 0x31e   :  { %6658 = vst.msk [vmem:[#allocation2 + $0xb0] sm:$0xff] %vm6502_vm2, %v6447_v59  ;;  %v6385_v6 = vadd.f32 %v26526_v55, %v31026_v62  ;;  %v6785_v43 = vld [vmem:[#allocation2 + $0x68] sm:$0xff] }
 0x31f   :  { %6657 = vst.msk [vmem:[#allocation2 + $0xa8] sm:$0xff] %vm6502_vm2, %v6446_v54  ;;  %v6384_v47 = vadd.f32 %v26527_v53, %v31026_v62  ;;  %v24494_v50 = vpop.f32.mrb[12].mxu0  ;;  %24583 = vmatprep.mubr.msk.f32.mxu1 %vm6502_vm2, %v6785_v43 }
 0x320   :  { %v6449_v51 = vmax.f32 %v6385_v6, 0.0  ;;  %v26528_v2 = vadd.f32 %v24494_v50, %v30986_v39  ;;  %v6044_v4 = vpop.f32.mrb[13].mxu0  ;;  %24584 = vmatmul.mubr.msk.f32.gmra.mrb[70].mxu1 %vm6502_vm2, %v6786_v56 }
 0x321   :  { %v6448_v42 = vmax.f32 %v6384_v47, 0.0  ;;  %v26529_v0 = vadd.f32 %v6044_v4, %v30988_v35  ;;  %v6788_v49 = vld [vmem:[#allocation2 + $0x90] sm:$0xff] }
 0x322   :  { %6660 = vst.msk [vmem:[#allocation2 + $0xd0] sm:$0xff] %vm6502_vm2, %v6449_v51  ;;  %v6387_v9 = vadd.f32 %v26528_v2, %v31026_v62  ;;  %v6787_v17 = vld [vmem:[#allocation2 + $0x88] sm:$0xff] }
 0x323   :  { %6659 = vst.msk [vmem:[#allocation2 + $0xc8] sm:$0xff] %vm6502_vm2, %v6448_v42  ;;  %v6386_v25 = vadd.f32 %v26529_v0, %v31026_v62  ;;  %v24497_v34 = vpop.f32.mrb[14].mxu0  ;;  %24586 = vmatprep.mubr.msk.f32.mxu1 %vm6502_vm2, %v6787_v17 }
 0x324   :  { %v6451_v39 = vmax.f32 %v6387_v9, 0.0  ;;  %v26530_v8 = vadd.f32 %v24497_v34, %v30990_v31  ;;  %v6054_v45 = vpop.f32.mrb[15].mxu0  ;;  %24587 = vmatmul.mubr.msk.f32.gmra.mrb[72].mxu1 %vm6502_vm2, %v6788_v49 }
 0x325   :  { %v6450_v35 = vmax.f32 %v6386_v25, 0.0  ;;  %v26531_v60 = vadd.f32 %v6054_v45, %v30992_v27  ;;  %v6790_v33 = vld [vmem:[#allocation2 + $0xb0] sm:$0xff] }
 0x326   :  { %6662 = vst.msk [vmem:[#allocation2 + $0xf0] sm:$0xff] %vm6502_vm2, %v6451_v39  ;;  %v6389_v12 = vadd.f32 %v26530_v8, %v31026_v62  ;;  %v6789_v16 = vld [vmem:[#allocation2 + $0xa8] sm:$0xff] }
 0x327   :  { %6661 = vst.msk [vmem:[#allocation2 + $0xe8] sm:$0xff] %vm6502_vm2, %v6450_v35  ;;  %v6388_v20 = vadd.f32 %v26531_v60, %v31026_v62  ;;  %v24500_v29 = vpop.f32.mrb[16].mxu0  ;;  %24589 = vmatprep.mubr.msk.f32.mxu1 %vm6502_vm2, %v6789_v16 }
 0x328   :  { %v6453_v31 = vmax.f32 %v6389_v12, 0.0  ;;  %v26532_v37 = vadd.f32 %v24500_v29, %v30994_v22  ;;  %v6064_v40 = vpop.f32.mrb[17].mxu0  ;;  %24590 = vmatmul.mubr.msk.f32.gmra.mrb[74].mxu1 %vm6502_vm2, %v6790_v33 }
 0x329   :  { %v6452_v27 = vmax.f32 %v6388_v20, 0.0  ;;  %v26533_v21 = vadd.f32 %v6064_v40, %v30996_v18  ;;  %v6792_v7 = vld [vmem:[#allocation2 + $0xd0] sm:$0xff] }
 0x32a   :  { %6664 = vst.msk [vmem:[#allocation2 + $0x110] sm:$0xff] %vm6502_vm2, %v6453_v31  ;;  %v6391_v44 = vadd.f32 %v26532_v37, %v31026_v62  ;;  %v6791_v46 = vld [vmem:[#allocation2 + $0xc8] sm:$0xff] }
 0x32b   :  { %6663 = vst.msk [vmem:[#allocation2 + $0x108] sm:$0xff] %vm6502_vm2, %v6452_v27  ;;  %v6390_v58 = vadd.f32 %v26533_v21, %v31026_v62  ;;  %v24503_v3 = vpop.f32.mrb[18].mxu0  ;;  %24592 = vmatprep.mubr.msk.f32.mxu1 %vm6502_vm2, %v6791_v46 }
 0x32c   :  { %v6455_v22 = vmax.f32 %v6391_v44, 0.0  ;;  %v26534_v11 = vadd.f32 %v24503_v3, %v30998_v14  ;;  %v6074_v15 = vpop.f32.mrb[19].mxu0  ;;  %24593 = vmatmul.mubr.msk.f32.gmra.mrb[76].mxu1 %vm6502_vm2, %v6792_v7 }
 0x32d   :  { %v6454_v18 = vmax.f32 %v6390_v58, 0.0  ;;  %v26535_v23 = vadd.f32 %v6074_v15, %v31000_v10  ;;  %v6794_v36 = vld [vmem:[#allocation2 + $0xf0] sm:$0xff] }
 0x32e   :  { %6666 = vst.msk [vmem:[#allocation2 + $0x130] sm:$0xff] %vm6502_vm2, %v6455_v22  ;;  %v6393_v28 = vadd.f32 %v26534_v11, %v31026_v62  ;;  %v6793_v32 = vld [vmem:[#allocation2 + $0xe8] sm:$0xff] }
 0x32f   :  { %6665 = vst.msk [vmem:[#allocation2 + $0x128] sm:$0xff] %vm6502_vm2, %v6454_v18  ;;  %v6392_v59 = vadd.f32 %v26535_v23, %v31026_v62  ;;  %v24506_v55 = vpop.f32.mrb[20].mxu0  ;;  %24595 = vmatprep.mubr.msk.f32.mxu1 %vm6502_vm2, %v6793_v32 }
 0x330   :  { %v6457_v14 = vmax.f32 %v6393_v28, 0.0  ;;  %v26536_v54 = vadd.f32 %v24506_v55, %v31002_v26  ;;  %v6084_v53 = vpop.f32.mrb[21].mxu0  ;;  %24596 = vmatmul.mubr.msk.f32.gmra.mrb[78].mxu1 %vm6502_vm2, %v6794_v36 }
 0x331   :  { %v6456_v10 = vmax.f32 %v6392_v59, 0.0  ;;  %v26537_v6 = vadd.f32 %v6084_v53, %v31004_v63  ;;  %v6796_v51 = vld [vmem:[#allocation2 + $0x110] sm:$0xff] }
 0x332   :  { %6668 = vst.msk [vmem:[#allocation2 + $0x150] sm:$0xff] %vm6502_vm2, %v6457_v14  ;;  %v6395_v43 = vadd.f32 %v26536_v54, %v31026_v62  ;;  %v6795_v47 = vld [vmem:[#allocation2 + $0x108] sm:$0xff] }
 0x333   :  { %6667 = vst.msk [vmem:[#allocation2 + $0x148] sm:$0xff] %vm6502_vm2, %v6456_v10  ;;  %v6394_v50 = vadd.f32 %v26537_v6, %v31026_v62  ;;  %v24509_v56 = vpop.f32.mrb[22].mxu0  ;;  %24598 = vmatprep.mubr.msk.f32.mxu1 %vm6502_vm2, %v6795_v47 }
 0x334   :  { %v6459_v26 = vmax.f32 %v6395_v43, 0.0  ;;  %v26538_v2 = vadd.f32 %v24509_v56, %v31006_v5  ;;  %v6094_v4 = vpop.f32.mrb[23].mxu0  ;;  %24599 = vmatmul.mubr.msk.f32.gmra.mrb[80].mxu1 %vm6502_vm2, %v6796_v51 }
 0x335   :  { %v6458_v63 = vmax.f32 %v6394_v50, 0.0  ;;  %v26539_v42 = vadd.f32 %v6094_v4, %v31008_v38  ;;  %v6798_v34 = vld [vmem:[#allocation2 + $0x130] sm:$0xff] }
 0x336   :  { %6670 = vst.msk [vmem:[#allocation2 + $0x170] sm:$0xff] %vm6502_vm2, %v6459_v26  ;;  %v6397_v0 = vadd.f32 %v26538_v2, %v31026_v62  ;;  %v6797_v9 = vld [vmem:[#allocation2 + $0x128] sm:$0xff] }
 0x337   :  { %6669 = vst.msk [vmem:[#allocation2 + $0x168] sm:$0xff] %vm6502_vm2, %v6458_v63  ;;  %v6396_v17 = vadd.f32 %v26539_v42, %v31026_v62  ;;  %v24512_v25 = vpop.f32.mrb[24].mxu0  ;;  %24601 = vmatprep.mubr.msk.f32.mxu1 %vm6502_vm2, %v6797_v9 }
 0x338   :  { %v6461_v5 = vmax.f32 %v6397_v0, 0.0  ;;  %v26540_v49 = vadd.f32 %v24512_v25, %v31010_v1  ;;  %v6104_v39 = vpop.f32.mrb[25].mxu0  ;;  %24602 = vmatmul.mubr.msk.f32.gmra.mrb[82].mxu1 %vm6502_vm2, %v6798_v34 }
 0x339   :  { %v6460_v38 = vmax.f32 %v6396_v17, 0.0  ;;  %v26541_v8 = vadd.f32 %v6104_v39, %v31012_v13  ;;  %v6800_v16 = vld [vmem:[#allocation2 + $0x150] sm:$0xff] }
 0x33a   :  { %6672 = vst.msk [vmem:[#allocation2 + $0x190] sm:$0xff] %vm6502_vm2, %v6461_v5  ;;  %v6399_v45 = vadd.f32 %v26540_v49, %v31026_v62  ;;  %v6799_v35 = vld [vmem:[#allocation2 + $0x148] sm:$0xff] }
 0x33b   :  { %6671 = vst.msk [vmem:[#allocation2 + $0x188] sm:$0xff] %vm6502_vm2, %v6460_v38  ;;  %v6398_v60 = vadd.f32 %v26541_v8, %v31026_v62  ;;  %v24515_v12 = vpop.f32.mrb[26].mxu0  ;;  %24604 = vmatprep.mubr.msk.f32.mxu1 %vm6502_vm2, %v6799_v35  ;;  %v6811_v49 = vld [vmem:[#allocation2 + $0x248] sm:$0xff] }
 0x33c   :  { %v6463_v1 = vmax.f32 %v6399_v45, 0.0  ;;  %v26542_v20 = vadd.f32 %v24515_v12, %v31014_v41  ;;  %v6114_v29 = vpop.f32.mrb[27].mxu0  ;;  %24605 = vmatmul.mubr.msk.f32.gmra.mrb[84].mxu1 %vm6502_vm2, %v6800_v16 }
 0x33d   :  { %v6462_v13 = vmax.f32 %v6398_v60, 0.0  ;;  %v26543_v33 = vadd.f32 %v6114_v29, %v31016_v30  ;;  %v6802_v21 = vld [vmem:[#allocation2 + $0x170] sm:$0xff] }
 0x33e   :  { %6674 = vst.msk [vmem:[#allocation2 + $0x1b0] sm:$0xff] %vm6502_vm2, %v6463_v1  ;;  %v6401_v31 = vadd.f32 %v26542_v20, %v31026_v62  ;;  %v6801_v37 = vld [vmem:[#allocation2 + $0x168] sm:$0xff]  ;;  %v6812_v20 = vld [vmem:[#allocation2 + $0x250] sm:$0xff] }
 0x33f   :  { %6673 = vst.msk [vmem:[#allocation2 + $0x1a8] sm:$0xff] %vm6502_vm2, %v6462_v13  ;;  %v6400_v40 = vadd.f32 %v26543_v33, %v31026_v62  ;;  %v24518_v27 = vpop.f32.mrb[28].mxu0  ;;  %24607 = vmatprep.mubr.msk.f32.mxu1 %vm6502_vm2, %v6801_v37 }
 0x340   :  { %v6465_v41 = vmax.f32 %v6401_v31, 0.0  ;;  %v26544_v44 = vadd.f32 %v24518_v27, %v31018_v61  ;;  %v6124_v46 = vpop.f32.mrb[29].mxu0  ;;  %24608 = vmatmul.mubr.msk.f32.gmra.mrb[86].mxu1 %vm6502_vm2, %v6802_v21 }
 0x341   :  { %v6464_v30 = vmax.f32 %v6400_v40, 0.0  ;;  %v26545_v58 = vadd.f32 %v6124_v46, %v31020_v57  ;;  %v6804_v15 = vld [vmem:[#allocation2 + $0x190] sm:$0xff] }
 0x342   :  { %6676 = vst.msk [vmem:[#allocation2 + $0x1d0] sm:$0xff] %vm6502_vm2, %v6465_v41  ;;  %v6403_v3 = vadd.f32 %v26544_v44, %v31026_v62  ;;  %v6803_v7 = vld [vmem:[#allocation2 + $0x188] sm:$0xff] }
 0x343   :  { %6675 = vst.msk [vmem:[#allocation2 + $0x1c8] sm:$0xff] %vm6502_vm2, %v6464_v30  ;;  %v6402_v22 = vadd.f32 %v26545_v58, %v31026_v62  ;;  %v24521_v11 = vpop.f32.mrb[30].mxu0  ;;  %24610 = vmatprep.mubr.msk.f32.mxu1 %vm6502_vm2, %v6803_v7 }
 0x344   :  { %v6467_v61 = vmax.f32 %v6403_v3, 0.0  ;;  %v26546_v18 = vadd.f32 %v24521_v11, %v31022_v48  ;;  %v6134_v23 = vpop.f32.mrb[31].mxu0  ;;  %24611 = vmatmul.mubr.msk.f32.gmra.mrb[88].mxu1 %vm6502_vm2, %v6804_v15 }
 0x345   :  { %v6466_v57 = vmax.f32 %v6402_v22, 0.0  ;;  %v26547_v28 = vadd.f32 %v6134_v23, %v31024_v52  ;;  %v6806_v54 = vld [vmem:[#allocation2 + $0x1b0] sm:$0xff] }
 0x346   :  { %6678 = vst.msk [vmem:[#allocation2 + $0x1f0] sm:$0xff] %vm6502_vm2, %v6467_v61  ;;  %v6405_v32 = vadd.f32 %v26546_v18, %v31026_v62  ;;  %v24132_v59 = vpop.f32.mrb[32].mxu1  ;;  %v6805_v55 = vld [vmem:[#allocation2 + $0x1a8] sm:$0xff] }
 0x347   :  { %6677 = vst.msk [vmem:[#allocation2 + $0x1e8] sm:$0xff] %vm6502_vm2, %v6466_v57  ;;  %v6404_v36 = vadd.f32 %v26547_v28, %v31026_v62  ;;  %v24524_v14 = vpop.f32.mrb[32].mxu0  ;;  %24613 = vmatprep.mubr.msk.f32.mxu1 %vm6502_vm2, %v6805_v55  ;;  %v3303_v48 = vpop.f32.mrb[33].mxu1 }
 0x348   :  { %v6469_v53 = vmax.f32 %v6405_v32, 0.0  ;;  %v26548_v10 = vadd.f32 %v24524_v14, %v24132_v59  ;;  %v6144_v6 = vpop.f32.mrb[33].mxu0  ;;  %24614 = vmatmul.mubr.msk.f32.gmra.mrb[90].mxu1 %vm6502_vm2, %v6806_v54 }
 0x349   :  { %v6468_v52 = vmax.f32 %v6404_v36, 0.0  ;;  %v26549_v43 = vadd.f32 %v6144_v6, %v3303_v48  ;;  %v6808_v4 = vld [vmem:[#allocation2 + $0x1d0] sm:$0xff] }
 0x34a   :  { %6680 = vst.msk [vmem:[#allocation2 + $0x210] sm:$0xff] %vm6502_vm2, %v6469_v53  ;;  %v6407_v47 = vadd.f32 %v26548_v10, %v31026_v62  ;;  %v24135_v50 = vpop.f32.mrb[34].mxu1  ;;  %v6807_v56 = vld [vmem:[#allocation2 + $0x1c8] sm:$0xff] }
 0x34b   :  { %6679 = vst.msk [vmem:[#allocation2 + $0x208] sm:$0xff] %vm6502_vm2, %v6468_v52  ;;  %v6406_v51 = vadd.f32 %v26549_v43, %v31026_v62  ;;  %v24527_v26 = vpop.f32.mrb[34].mxu0  ;;  %24616 = vmatprep.mubr.msk.f32.mxu1 %vm6502_vm2, %v6807_v56  ;;  %v3313_v2 = vpop.f32.mrb[35].mxu1 }
 0x34c   :  { %v6471_v63 = vmax.f32 %v6407_v47, 0.0  ;;  %v26550_v42 = vadd.f32 %v24527_v26, %v24135_v50  ;;  %v6154_v0 = vpop.f32.mrb[35].mxu0  ;;  %24617 = vmatmul.mubr.msk.f32.gmra.mrb[92].mxu1 %vm6502_vm2, %v6808_v4 }
 0x34d   :  { %v6470_v9 = vmax.f32 %v6406_v51, 0.0  ;;  %v26551_v17 = vadd.f32 %v6154_v0, %v3313_v2  ;;  %v6810_v45 = vld [vmem:[#allocation2 + $0x1f0] sm:$0xff] }
 0x34e   :  { %6682 = vst.msk [vmem:[#allocation2 + $0x270] sm:$0xff] %vm6502_vm2, %v6471_v63  ;;  %v6409_v25 = vadd.f32 %v26550_v42, %v31026_v62  ;;  %v24138_v34 = vpop.f32.mrb[36].mxu1  ;;  %v6809_v5 = vld [vmem:[#allocation2 + $0x1e8] sm:$0xff] }
 0x34f   :  { %6681 = vst.msk [vmem:[#allocation2 + $0x268] sm:$0xff] %vm6502_vm2, %v6470_v9  ;;  %v6408_v39 = vadd.f32 %v26551_v17, %v31026_v62  ;;  %v24530_v38 = vpop.f32.mrb[36].mxu0  ;;  %24619 = vmatprep.mubr.msk.f32.mxu1 %vm6502_vm2, %v6809_v5  ;;  %v3323_v8 = vpop.f32.mrb[37].mxu1 }
 0x350   :  { %v6473_v35 = vmax.f32 %v6409_v25, 0.0  ;;  %v26552_v60 = vadd.f32 %v24530_v38, %v24138_v34  ;;  %v6164_v12 = vpop.f32.mrb[37].mxu0  ;;  %24620 = vmatmul.mubr.msk.f32.gmra.mrb[94].mxu1 %vm6502_vm2, %v6810_v45 }
 0x351   :  { %v6472_v16 = vmax.f32 %v6408_v39, 0.0  ;;  %v26553_v1 = vadd.f32 %v6164_v12, %v3323_v8  ;;  %24622 = vmatprep.mubr.msk.f32.mxu1 %vm6502_vm2, %v6811_v49 }
 0x352   :  { %6684 = vst.msk [vmem:[#allocation2 + $0x290] sm:$0xff] %vm6502_vm2, %v6473_v35  ;;  %v6411_v29 = vadd.f32 %v26552_v60, %v31026_v62  ;;  %v24141_v13 = vpop.f32.mrb[38].mxu1 }
 0x353   :  { %6683 = vst.msk [vmem:[#allocation2 + $0x288] sm:$0xff] %vm6502_vm2, %v6472_v16  ;;  %v6410_v33 = vadd.f32 %v26553_v1, %v31026_v62  ;;  %v24533_v31 = vpop.f32.mrb[38].mxu0  ;;  %v3333_v37 = vpop.f32.mrb[39].mxu1 }
 0x354   :  { %v6475_v40 = vmax.f32 %v6411_v29, 0.0  ;;  %v26554_v27 = vadd.f32 %v24533_v31, %v24141_v13  ;;  %v6174_v21 = vpop.f32.mrb[39].mxu0  ;;  %24623 = vmatmul.mubr.msk.f32.gmra.mrb[96].mxu1 %vm6502_vm2, %v6812_v20 }
 0x355   :  { %v6474_v41 = vmax.f32 %v6410_v33, 0.0  ;;  %v26555_v44 = vadd.f32 %v6174_v21, %v3333_v37  ;;  %v6814_v11 = vld [vmem:[#allocation2 + $0x270] sm:$0xff] }
 0x356   :  { %6686 = vst.msk [vmem:[#allocation2 + $0x2b0] sm:$0xff] %vm6502_vm2, %v6475_v40  ;;  %v6413_v46 = vadd.f32 %v26554_v27, %v31026_v62  ;;  %v24144_v30 = vpop.f32.mrb[40].mxu1  ;;  %v6813_v58 = vld [vmem:[#allocation2 + $0x268] sm:$0xff] }
 0x357   :  { %6685 = vst.msk [vmem:[#allocation2 + $0x2a8] sm:$0xff] %vm6502_vm2, %v6474_v41  ;;  %v6412_v3 = vadd.f32 %v26555_v44, %v31026_v62  ;;  %v24536_v7 = vpop.f32.mrb[40].mxu0  ;;  %24625 = vmatprep.mubr.msk.f32.mxu1 %vm6502_vm2, %v6813_v58  ;;  %v3343_v22 = vpop.f32.mrb[41].mxu1 }
 0x358   :  { %v6477_v15 = vmax.f32 %v6413_v46, 0.0  ;;  %v26556_v61 = vadd.f32 %v24536_v7, %v24144_v30  ;;  %v6184_v18 = vpop.f32.mrb[41].mxu0  ;;  %24626 = vmatmul.mubr.msk.f32.gmra.mrb[98].mxu1 %vm6502_vm2, %v6814_v11 }
 0x359   :  { %v6476_v23 = vmax.f32 %v6412_v3, 0.0  ;;  %v26557_v57 = vadd.f32 %v6184_v18, %v3343_v22  ;;  %v6816_v48 = vld [vmem:[#allocation2 + $0x290] sm:$0xff] }
 0x35a   :  { %6688 = vst.msk [vmem:[#allocation2 + $0x2d0] sm:$0xff] %vm6502_vm2, %v6477_v15  ;;  %v6415_v28 = vadd.f32 %v26556_v61, %v31026_v62  ;;  %v24147_v32 = vpop.f32.mrb[42].mxu1  ;;  %v6815_v59 = vld [vmem:[#allocation2 + $0x288] sm:$0xff] }
 0x35b   :  { %6687 = vst.msk [vmem:[#allocation2 + $0x2c8] sm:$0xff] %vm6502_vm2, %v6476_v23  ;;  %v6414_v55 = vadd.f32 %v26557_v57, %v31026_v62  ;;  %v24539_v36 = vpop.f32.mrb[42].mxu0  ;;  %24628 = vmatprep.mubr.msk.f32.mxu1 %vm6502_vm2, %v6815_v59  ;;  %v3353_v14 = vpop.f32.mrb[43].mxu1 }
 0x35c   :  { %v6479_v54 = vmax.f32 %v6415_v28, 0.0  ;;  %v26558_v53 = vadd.f32 %v24539_v36, %v24147_v32  ;;  %v6194_v10 = vpop.f32.mrb[43].mxu0  ;;  %24629 = vmatmul.mubr.msk.f32.gmra.mrb[100].mxu1 %vm6502_vm2, %v6816_v48 }
 0x35d   :  { %v6478_v6 = vmax.f32 %v6414_v55, 0.0  ;;  %v26559_v52 = vadd.f32 %v6194_v10, %v3353_v14  ;;  %v6818_v2 = vld [vmem:[#allocation2 + $0x2b0] sm:$0xff] }
 0x35e   :  { %6690 = vst.msk [vmem:[#allocation2 + $0x2f0] sm:$0xff] %vm6502_vm2, %v6479_v54  ;;  %v6417_v43 = vadd.f32 %v26558_v53, %v31026_v62  ;;  %v24150_v47 = vpop.f32.mrb[44].mxu1  ;;  %v6817_v50 = vld [vmem:[#allocation2 + $0x2a8] sm:$0xff] }
 0x35f   :  { %6689 = vst.msk [vmem:[#allocation2 + $0x2e8] sm:$0xff] %vm6502_vm2, %v6478_v6  ;;  %v6416_v56 = vadd.f32 %v26559_v52, %v31026_v62  ;;  %v24542_v51 = vpop.f32.mrb[44].mxu0  ;;  %24631 = vmatprep.mubr.msk.f32.mxu1 %vm6502_vm2, %v6817_v50  ;;  %v3363_v26 = vpop.f32.mrb[45].mxu1 }
 0x360   :  { %v6481_v4 = vmax.f32 %v6417_v43, 0.0  ;;  %v26560_v63 = vadd.f32 %v24542_v51, %v24150_v47  ;;  %v6204_v42 = vpop.f32.mrb[45].mxu0  ;;  %24632 = vmatmul.mubr.msk.f32.gmra.mrb[102].mxu1 %vm6502_vm2, %v6818_v2 }
 0x361   :  { %v6480_v0 = vmax.f32 %v6416_v56, 0.0  ;;  %v26561_v9 = vadd.f32 %v6204_v42, %v3363_v26  ;;  %v6820_v38 = vld [vmem:[#allocation2 + $0x2d0] sm:$0xff] }
 0x362   :  { %6692 = vst.msk [vmem:[#allocation2 + $0x310] sm:$0xff] %vm6502_vm2, %v6481_v4  ;;  %v6419_v17 = vadd.f32 %v26560_v63, %v31026_v62  ;;  %v24153_v25 = vpop.f32.mrb[46].mxu1  ;;  %v6819_v34 = vld [vmem:[#allocation2 + $0x2c8] sm:$0xff] }
 0x363   :  { %6691 = vst.msk [vmem:[#allocation2 + $0x308] sm:$0xff] %vm6502_vm2, %v6480_v0  ;;  %v6418_v5 = vadd.f32 %v26561_v9, %v31026_v62  ;;  %v24545_v49 = vpop.f32.mrb[46].mxu0  ;;  %24634 = vmatprep.mubr.msk.f32.mxu1 %vm6502_vm2, %v6819_v34  ;;  %v3373_v39 = vpop.f32.mrb[47].mxu1 }
 0x364   :  { %v6483_v8 = vmax.f32 %v6419_v17, 0.0  ;;  %v26562_v45 = vadd.f32 %v24545_v49, %v24153_v25  ;;  %v6214_v35 = vpop.f32.mrb[47].mxu0  ;;  %24635 = vmatmul.mubr.msk.f32.gmra.mrb[104].mxu1 %vm6502_vm2, %v6820_v38 }
 0x365   :  { %v6482_v60 = vmax.f32 %v6418_v5, 0.0  ;;  %v26563_v12 = vadd.f32 %v6214_v35, %v3373_v39  ;;  %v6822_v31 = vld [vmem:[#allocation2 + $0x2f0] sm:$0xff] }
 0x366   :  { %6694 = vst.msk [vmem:[#allocation2 + $0x330] sm:$0xff] %vm6502_vm2, %v6483_v8  ;;  %v6421_v16 = vadd.f32 %v26562_v45, %v31026_v62  ;;  %v24156_v1 = vpop.f32.mrb[48].mxu1  ;;  %v6821_v20 = vld [vmem:[#allocation2 + $0x2e8] sm:$0xff] }
 0x367   :  { %6693 = vst.msk [vmem:[#allocation2 + $0x328] sm:$0xff] %vm6502_vm2, %v6482_v60  ;;  %v6420_v29 = vadd.f32 %v26563_v12, %v31026_v62  ;;  %v24548_v13 = vpop.f32.mrb[48].mxu0  ;;  %24637 = vmatprep.mubr.msk.f32.mxu1 %vm6502_vm2, %v6821_v20  ;;  %v3383_v33 = vpop.f32.mrb[49].mxu1 }
 0x368   :  { %v6485_v37 = vmax.f32 %v6421_v16, 0.0  ;;  %v26564_v40 = vadd.f32 %v24548_v13, %v24156_v1  ;;  %v6224_v27 = vpop.f32.mrb[49].mxu0  ;;  %24638 = vmatmul.mubr.msk.f32.gmra.mrb[106].mxu1 %vm6502_vm2, %v6822_v31 }
 0x369   :  { %v6484_v21 = vmax.f32 %v6420_v29, 0.0  ;;  %v26565_v41 = vadd.f32 %v6224_v27, %v3383_v33  ;;  %v6824_v22 = vld [vmem:[#allocation2 + $0x310] sm:$0xff] }
 0x36a   :  { %6696 = vst.msk [vmem:[#allocation2 + $0x350] sm:$0xff] %vm6502_vm2, %v6485_v37  ;;  %v6423_v44 = vadd.f32 %v26564_v40, %v31026_v62  ;;  %v24159_v46 = vpop.f32.mrb[50].mxu1  ;;  %v6823_v30 = vld [vmem:[#allocation2 + $0x308] sm:$0xff] }
 0x36b   :  { %6695 = vst.msk [vmem:[#allocation2 + $0x348] sm:$0xff] %vm6502_vm2, %v6484_v21  ;;  %v6422_v58 = vadd.f32 %v26565_v41, %v31026_v62  ;;  %v24551_v3 = vpop.f32.mrb[50].mxu0  ;;  %24640 = vmatprep.mubr.msk.f32.mxu1 %vm6502_vm2, %v6823_v30  ;;  %v3393_v7 = vpop.f32.mrb[51].mxu1 }
 0x36c   :  { %v6487_v11 = vmax.f32 %v6423_v44, 0.0  ;;  %v26566_v15 = vadd.f32 %v24551_v3, %v24159_v46  ;;  %v6234_v61 = vpop.f32.mrb[51].mxu0  ;;  %24641 = vmatmul.mubr.msk.f32.gmra.mrb[108].mxu1 %vm6502_vm2, %v6824_v22 }
 0x36d   :  { %v6486_v18 = vmax.f32 %v6422_v58, 0.0  ;;  %v26567_v23 = vadd.f32 %v6234_v61, %v3393_v7  ;;  %v6826_v14 = vld [vmem:[#allocation2 + $0x330] sm:$0xff] }
 0x36e   :  { %6698 = vst.msk [vmem:[#allocation2 + $0x370] sm:$0xff] %vm6502_vm2, %v6487_v11  ;;  %v6425_v57 = vadd.f32 %v26566_v15, %v31026_v62  ;;  %v24162_v28 = vpop.f32.mrb[52].mxu1  ;;  %v6825_v32 = vld [vmem:[#allocation2 + $0x328] sm:$0xff] }
 0x36f   :  { %6697 = vst.msk [vmem:[#allocation2 + $0x368] sm:$0xff] %vm6502_vm2, %v6486_v18  ;;  %v6424_v59 = vadd.f32 %v26567_v23, %v31026_v62  ;;  %v24554_v55 = vpop.f32.mrb[52].mxu0  ;;  %24643 = vmatprep.mubr.msk.f32.mxu1 %vm6502_vm2, %v6825_v32  ;;  %v3403_v36 = vpop.f32.mrb[53].mxu1 }
 0x370   :  { %v6489_v48 = vmax.f32 %v6425_v57, 0.0  ;;  %v26568_v54 = vadd.f32 %v24554_v55, %v24162_v28  ;;  %v6244_v53 = vpop.f32.mrb[53].mxu0  ;;  %24644 = vmatmul.mubr.msk.f32.gmra.mrb[110].mxu1 %vm6502_vm2, %v6826_v14 }
 0x371   :  { %v6488_v10 = vmax.f32 %v6424_v59, 0.0  ;;  %v26569_v6 = vadd.f32 %v6244_v53, %v3403_v36  ;;  %v6828_v26 = vld [vmem:[#allocation2 + $0x350] sm:$0xff] }
 0x372   :  { %6700 = vst.msk [vmem:[#allocation2 + $0x390] sm:$0xff] %vm6502_vm2, %v6489_v48  ;;  %v6427_v52 = vadd.f32 %v26568_v54, %v31026_v62  ;;  %v24165_v43 = vpop.f32.mrb[54].mxu1  ;;  %v6827_v47 = vld [vmem:[#allocation2 + $0x348] sm:$0xff] }
 0x373   :  { %6699 = vst.msk [vmem:[#allocation2 + $0x388] sm:$0xff] %vm6502_vm2, %v6488_v10  ;;  %v6426_v50 = vadd.f32 %v26569_v6, %v31026_v62  ;;  %v24557_v56 = vpop.f32.mrb[54].mxu0  ;;  %24646 = vmatprep.mubr.msk.f32.mxu1 %vm6502_vm2, %v6827_v47  ;;  %v3413_v51 = vpop.f32.mrb[55].mxu1 }
 0x374   :  { %v6491_v2 = vmax.f32 %v6427_v52, 0.0  ;;  %v26570_v4 = vadd.f32 %v24557_v56, %v24165_v43  ;;  %v6254_v63 = vpop.f32.mrb[55].mxu0  ;;  %24647 = vmatmul.mubr.msk.f32.gmra.mrb[112].mxu1 %vm6502_vm2, %v6828_v26 }
 0x375   :  { %v6490_v42 = vmax.f32 %v6426_v50, 0.0  ;;  %v26571_v0 = vadd.f32 %v6254_v63, %v3413_v51  ;;  %v6830_v39 = vld [vmem:[#allocation2 + $0x370] sm:$0xff] }
 0x376   :  { %6702 = vst.msk [vmem:[#allocation2 + $0x3b0] sm:$0xff] %vm6502_vm2, %v6491_v2  ;;  %v6429_v9 = vadd.f32 %v26570_v4, %v31026_v62  ;;  %v24168_v17 = vpop.f32.mrb[56].mxu1  ;;  %v6829_v25 = vld [vmem:[#allocation2 + $0x368] sm:$0xff] }
 0x377   :  { %6701 = vst.msk [vmem:[#allocation2 + $0x3a8] sm:$0xff] %vm6502_vm2, %v6490_v42  ;;  %v6428_v34 = vadd.f32 %v26571_v0, %v31026_v62  ;;  %v24560_v5 = vpop.f32.mrb[56].mxu0  ;;  %24649 = vmatprep.mubr.msk.f32.mxu1 %vm6502_vm2, %v6829_v25  ;;  %v3423_v49 = vpop.f32.mrb[57].mxu1  ;;  %v6713_v4 = vld [vmem:[#allocation2 + $0x7] sm:$0xff]  ;;  %v6714_v63 = vld [vmem:[#allocation2 + $0xf] sm:$0xff] }
 0x378   :  { %v6493_v38 = vmax.f32 %v6429_v9, 0.0  ;;  %v26572_v8 = vadd.f32 %v24560_v5, %v24168_v17  ;;  %v6264_v45 = vpop.f32.mrb[57].mxu0  ;;  %24650 = vmatmul.mubr.msk.f32.gmra.mrb[114].mxu1 %vm6502_vm2, %v6830_v39  ;;  %v31247_v42 = vld [vmem:[#allocation2 + $0x27] sm:$0xff]  ;;  %v8773_v0 = vld [vmem:[#allocation8 + $0x30] sm:$0xff]  ;;  %v8774_v9 = vld [vmem:[#allocation8 + $0x38] sm:$0xff] }
 0x379   :  { %v6492_v35 = vmax.f32 %v6428_v34, 0.0  ;;  %v26573_v60 = vadd.f32 %v6264_v45, %v3423_v49  ;;  %v6832_v33 = vld [vmem:[#allocation2 + $0x390] sm:$0xff]  ;;  %v31252_v17 = vpack.c.bf16 %v8774_v9, %v8773_v0  ;;  %v31259_v34 = vld [vmem:[#allocation2 + $0x47] sm:$0xff] }
 0x37a   :  { %6704 = vst.msk [vmem:[#allocation2 + $0x3d0] sm:$0xff] %vm6502_vm2, %v6493_v38  ;;  %v6431_v12 = vadd.f32 %v26572_v8, %v31026_v62  ;;  %v24171_v16 = vpop.f32.mrb[58].mxu1  ;;  %v6831_v1 = vld [vmem:[#allocation2 + $0x388] sm:$0xff] }
 0x37b   :  { %6703 = vst.msk [vmem:[#allocation2 + $0x3c8] sm:$0xff] %vm6502_vm2, %v6492_v35  ;;  %v6430_v20 = vadd.f32 %v26573_v60, %v31026_v62  ;;  %v24563_v29 = vpop.f32.mrb[58].mxu0  ;;  %24652 = vmatprep.mubr.msk.f32.mxu1 %vm6502_vm2, %v6831_v1  ;;  %v3433_v13 = vpop.f32.mrb[59].mxu1  ;;  %v31254_v25 = vld [vmem:[#allocation2 + $0x2f] sm:$0xff]  ;;  %v31275_v39 = vld [vmem:[#allocation2 + $0x87] sm:$0xff] }
 0x37c   :  { %v6495_v31 = vmax.f32 %v6431_v12, 0.0  ;;  %v26574_v37 = vadd.f32 %v24563_v29, %v24171_v16  ;;  %v6274_v40 = vpop.f32.mrb[59].mxu0  ;;  %24653 = vmatmul.mubr.msk.f32.gmra.mrb[116].mxu1 %vm6502_vm2, %v6832_v33  ;;  %v31263_v5 = vld [vmem:[#allocation2 + $0x4f] sm:$0xff]  ;;  %v31283_v8 = vld [vmem:[#allocation2 + $0xa7] sm:$0xff] }
 0x37d   :  { %v6494_v27 = vmax.f32 %v6430_v20, 0.0  ;;  %v26575_v21 = vadd.f32 %v6274_v40, %v3433_v13  ;;  %v6834_v7 = vld [vmem:[#allocation2 + $0x3b0] sm:$0xff]  ;;  %v31291_v35 = vld [vmem:[#allocation2 + $0xc7] sm:$0xff] }
 0x37e   :  { %6706 = vst.msk [vmem:[#allocation2 + $0x3f0] sm:$0xff] %vm6502_vm2, %v6495_v31  ;;  %v6433_v41 = vadd.f32 %v26574_v37, %v31026_v62  ;;  %v24174_v44 = vpop.f32.mrb[60].mxu1  ;;  %v6833_v46 = vld [vmem:[#allocation2 + $0x3a8] sm:$0xff] }
 0x37f   :  { %6705 = vst.msk [vmem:[#allocation2 + $0x3e8] sm:$0xff] %vm6502_vm2, %v6494_v27  ;;  %v6432_v30 = vadd.f32 %v26575_v21, %v31026_v62  ;;  %v24566_v58 = vpop.f32.mrb[60].mxu0  ;;  %24655 = vmatprep.mubr.msk.f32.mxu1 %vm6502_vm2, %v6833_v46  ;;  %v3443_v3 = vpop.f32.mrb[61].mxu1  ;;  %v31271_v49 = vld [vmem:[#allocation2 + $0x6f] sm:$0xff]  ;;  %v31299_v12 = vld [vmem:[#allocation2 + $0xe7] sm:$0xff] }
 0x380   :  { %v6497_v22 = vmax.f32 %v6433_v41, 0.0  ;;  %v26576_v11 = vadd.f32 %v24566_v58, %v24174_v44  ;;  %v6284_v15 = vpop.f32.mrb[61].mxu0  ;;  %24656 = vmatmul.mubr.msk.f32.gmra.mrb[118].mxu1 %vm6502_vm2, %v6834_v7  ;;  %v31279_v38 = vld [vmem:[#allocation2 + $0x8f] sm:$0xff]  ;;  %v31307_v1 = vld [vmem:[#allocation2 + $0x107] sm:$0xff] }
 0x381   :  { %v6496_v61 = vmax.f32 %v6432_v30, 0.0  ;;  %v26577_v18 = vadd.f32 %v6284_v15, %v3443_v3  ;;  %v6836_v36 = vld [vmem:[#allocation2 + $0x3d0] sm:$0xff]  ;;  %v31315_v29 = vld [vmem:[#allocation2 + $0x127] sm:$0xff] }
 0x382   :  { %6708 = vst.msk [vmem:[#allocation2 + $0x410] sm:$0xff] %vm6502_vm2, %v6497_v22  ;;  %v6435_v23 = vadd.f32 %v26576_v11, %v31026_v62  ;;  %v24177_v57 = vpop.f32.mrb[62].mxu1  ;;  %v6835_v28 = vld [vmem:[#allocation2 + $0x3c8] sm:$0xff] }
 0x383   :  { %6707 = vst.msk [vmem:[#allocation2 + $0x408] sm:$0xff] %vm6502_vm2, %v6496_v61  ;;  %v6434_v32 = vadd.f32 %v26577_v18, %v31026_v62  ;;  %v24569_v59 = vpop.f32.mrb[62].mxu0  ;;  %24658 = vmatprep.mubr.msk.f32.mxu1 %vm6502_vm2, %v6835_v28  ;;  %v3453_v55 = vpop.f32.mrb[63].mxu1  ;;  %v31287_v45 = vld [vmem:[#allocation2 + $0xaf] sm:$0xff]  ;;  %v31323_v33 = vld [vmem:[#allocation2 + $0x147] sm:$0xff] }
 0x384   :  { %v6499_v14 = vmax.f32 %v6435_v23, 0.0  ;;  %v26578_v48 = vadd.f32 %v24569_v59, %v24177_v57  ;;  %v6294_v54 = vpop.f32.mrb[63].mxu0  ;;  %24659 = vmatmul.mubr.msk.f32.gmra.mrb[120].mxu1 %vm6502_vm2, %v6836_v36  ;;  %v31295_v60 = vld [vmem:[#allocation2 + $0xcf] sm:$0xff]  ;;  %v31331_v37 = vld [vmem:[#allocation2 + $0x167] sm:$0xff] }
 0x385   :  { %v6498_v53 = vmax.f32 %v6434_v32, 0.0  ;;  %v26579_v10 = vadd.f32 %v6294_v54, %v3453_v55  ;;  %v6838_v47 = vld [vmem:[#allocation2 + $0x3f0] sm:$0xff]  ;;  %v31339_v27 = vld [vmem:[#allocation2 + $0x187] sm:$0xff] }
 0x386   :  { %6710 = vst.msk [vmem:[#allocation2 + $0x430] sm:$0xff] %vm6502_vm2, %v6499_v14  ;;  %v6437_v6 = vadd.f32 %v26578_v48, %v31026_v62  ;;  %v6837_v52 = vld [vmem:[#allocation2 + $0x3e8] sm:$0xff] }
 0x387   :  { %6709 = vst.msk [vmem:[#allocation2 + $0x428] sm:$0xff] %vm6502_vm2, %v6498_v53  ;;  %v6436_v43 = vadd.f32 %v26579_v10, %v31026_v62  ;;  %24661 = vmatprep.mubr.msk.f32.mxu1 %vm6502_vm2, %v6837_v52  ;;  %v31303_v16 = vld [vmem:[#allocation2 + $0xef] sm:$0xff]  ;;  %v31347_v41 = vld [vmem:[#allocation2 + $0x1a7] sm:$0xff] }
 0x388   :  { %v6501_v50 = vmax.f32 %v6437_v6, 0.0  ;;  %24662 = vmatmul.mubr.msk.f32.gmra.mrb[122].mxu1 %vm6502_vm2, %v6838_v47  ;;  %v31311_v20 = vld [vmem:[#allocation2 + $0x10f] sm:$0xff]  ;;  %v31355_v46 = vld [vmem:[#allocation2 + $0x1c7] sm:$0xff] }
 0x389   :  { %v6500_v56 = vmax.f32 %v6436_v43, 0.0  ;;  %v6840_v26 = vld [vmem:[#allocation2 + $0x410] sm:$0xff]  ;;  %v31363_v58 = vld [vmem:[#allocation2 + $0x1e7] sm:$0xff] }
 0x38a   :  { %6712 = vst.msk [vmem:[#allocation2 + $0x450] sm:$0xff] %vm6502_vm2, %v6501_v50  ;;  %v6839_v51 = vld [vmem:[#allocation2 + $0x408] sm:$0xff] }
 0x38b   :  { %6711 = vst.msk [vmem:[#allocation2 + $0x448] sm:$0xff] %vm6502_vm2, %v6500_v56  ;;  %24664 = vmatprep.mubr.msk.f32.mxu1 %vm6502_vm2, %v6839_v51  ;;  %v31319_v13 = vld [vmem:[#allocation2 + $0x12f] sm:$0xff]  ;;  %v6745_v3 = vld [vmem:[#allocation2 + $0x247] sm:$0xff] }
 0x38c   :  { %24665 = vmatmul.mubr.msk.f32.gmra.mrb[124].mxu1 %vm6502_vm2, %v6840_v26  ;;  %v31327_v31 = vld [vmem:[#allocation2 + $0x14f] sm:$0xff]  ;;  %v31373_v11 = vld [vmem:[#allocation2 + $0x267] sm:$0xff] }
 0x38d   :  { %v6842_v62 = vld [vmem:[#allocation2 + $0x430] sm:$0xff]  ;;  %v31381_v61 = vld [vmem:[#allocation2 + $0x287] sm:$0xff] }
 0x38e   :  { %v6841_v2 = vld [vmem:[#allocation2 + $0x428] sm:$0xff] }
 0x38f   :  { %24667 = vmatprep.mubr.msk.f32.mxu1 %vm6502_vm2, %v6841_v2  ;;  %v31335_v40 = vld [vmem:[#allocation2 + $0x16f] sm:$0xff]  ;;  %v31389_v23 = vld [vmem:[#allocation2 + $0x2a7] sm:$0xff] }
 0x390   :  { %24668 = vmatmul.mubr.msk.f32.gmra.mrb[126].mxu1 %vm6502_vm2, %v6842_v62  ;;  %v31343_v21 = vld [vmem:[#allocation2 + $0x18f] sm:$0xff]  ;;  %v31397_v28 = vld [vmem:[#allocation2 + $0x2c7] sm:$0xff] }
 0x391   :  { %24674 = vmatprep.mubr.msk.f32.mxu1 %vm6502_vm2, %v6713_v4  ;;  %v31351_v44 = vld [vmem:[#allocation2 + $0x1af] sm:$0xff]  ;;  %v31405_v59 = vld [vmem:[#allocation2 + $0x2e7] sm:$0xff] }
 0x392   :  { %v31359_v30 = vld [vmem:[#allocation2 + $0x1cf] sm:$0xff]  ;;  %v31413_v36 = vld [vmem:[#allocation2 + $0x307] sm:$0xff] }
 0x393   :  { %v31367_v7 = vld [vmem:[#allocation2 + $0x1ef] sm:$0xff]  ;;  %v31421_v48 = vld [vmem:[#allocation2 + $0x327] sm:$0xff] }
 0x394   :  { %24675 = vmatmul.mubr.msk.f32.vlgmr.msra.gmra.mrb[64].mxu1 %vm6502_vm2, %v6714_v63  ;;  %v6746_v22 = vld [vmem:[#allocation2 + $0x24f] sm:$0xff]  ;;  %v31429_v53 = vld [vmem:[#allocation2 + $0x347] sm:$0xff] }
 0x395   :  { %24677 = vmatprep.mubr.msk.f32.mxu1 %vm6502_vm2, %v31247_v42  ;;  %26417 = vmatpush3.bf16.msra.mxu1 %v31038_v24  ;;  %v31267_v24 = vld [vmem:[#allocation2 + $0x67] sm:$0xff]  ;;  %v31377_v15 = vld [vmem:[#allocation2 + $0x26f] sm:$0xff] }
 0x396   :  { %26419 = vmatprep.subr.bf16.mxu1 %v31252_v17  ;;  %v31385_v18 = vld [vmem:[#allocation2 + $0x28f] sm:$0xff]  ;;  %v31437_v6 = vld [vmem:[#allocation2 + $0x367] sm:$0xff] }
 0x397   :  { %v31393_v57 = vld [vmem:[#allocation2 + $0x2af] sm:$0xff]  ;;  %v31445_v43 = vld [vmem:[#allocation2 + $0x387] sm:$0xff] }
 0x398   :  { %24678 = vmatmul.mubr.msk.f32.gmra.mrb[66].mxu1 %vm6502_vm2, %v31254_v25  ;;  %v31401_v32 = vld [vmem:[#allocation2 + $0x2cf] sm:$0xff]  ;;  %v31453_v50 = vld [vmem:[#allocation2 + $0x3a7] sm:$0xff] }
 0x399   :  { %24680 = vmatprep.mubr.msk.f32.mxu1 %vm6502_vm2, %v31259_v34  ;;  %v31409_v55 = vld [vmem:[#allocation2 + $0x2ef] sm:$0xff]  ;;  %v31461_v51 = vld [vmem:[#allocation2 + $0x3c7] sm:$0xff] }
 0x39a   :  { %v31417_v14 = vld [vmem:[#allocation2 + $0x30f] sm:$0xff]  ;;  %v31469_v2 = vld [vmem:[#allocation2 + $0x3e7] sm:$0xff] }
 0x39b   :  { %v31425_v54 = vld [vmem:[#allocation2 + $0x32f] sm:$0xff]  ;;  %v31477_v62 = vld [vmem:[#allocation2 + $0x407] sm:$0xff] }
 0x39c   :  { %24681 = vmatmul.mubr.msk.f32.gmra.mrb[68].mxu1 %vm6502_vm2, %v31263_v5  ;;  %v31433_v10 = vld [vmem:[#allocation2 + $0x34f] sm:$0xff]  ;;  %34911 = vst [vmem:[#allocation22_spill] sm:$0xff] %v31477_v62  ;;  %v31485_v0 = vld [vmem:[#allocation2 + $0x427] sm:$0xff] }
 0x39d   :  { %24683 = vmatprep.mubr.msk.f32.mxu1 %vm6502_vm2, %v31267_v24  ;;  %v31441_v52 = vld [vmem:[#allocation2 + $0x36f] sm:$0xff]  ;;  %34913 = vst [vmem:[#allocation24_spill] sm:$0xff] %v31485_v0 }
 0x39e   :  { %v31449_v47 = vld [vmem:[#allocation2 + $0x38f] sm:$0xff] }
 0x39f   :  { %v31457_v56 = vld [vmem:[#allocation2 + $0x3af] sm:$0xff] }
 0x3a0   :  { %24684 = vmatmul.mubr.msk.f32.gmra.mrb[70].mxu1 %vm6502_vm2, %v31271_v49  ;;  %v31465_v26 = vld [vmem:[#allocation2 + $0x3cf] sm:$0xff] }
 0x3a1   :  { %24686 = vmatprep.mubr.msk.f32.mxu1 %vm6502_vm2, %v31275_v39  ;;  %v31473_v4 = vld [vmem:[#allocation2 + $0x3ef] sm:$0xff] }
 0x3a2   :  { %34910 = vst [vmem:[#allocation21_spill] sm:$0xff] %v31473_v4  ;;  %v31481_v63 = vld [vmem:[#allocation2 + $0x40f] sm:$0xff] }
 0x3a3   :  { %34912 = vst [vmem:[#allocation23_spill] sm:$0xff] %v31481_v63  ;;  %v8000_v9 = vld [vmem:[#allocation2 + $0x9] sm:$0xff] }
 0x3a4   :  { %24687 = vmatmul.mubr.msk.f32.gmra.mrb[72].mxu1 %vm6502_vm2, %v31279_v38 }
 0x3a5   :  { %24689 = vmatprep.mubr.msk.f32.mxu1 %vm6502_vm2, %v31283_v8 }
 0x3a8   :  { %24690 = vmatmul.mubr.msk.f32.gmra.mrb[74].mxu1 %vm6502_vm2, %v31287_v45 }
 0x3a9   :  { %24692 = vmatprep.mubr.msk.f32.mxu1 %vm6502_vm2, %v31291_v35 }
 0x3ac   :  { %24693 = vmatmul.mubr.msk.f32.gmra.mrb[76].mxu1 %vm6502_vm2, %v31295_v60 }
 0x3ad   :  { %24695 = vmatprep.mubr.msk.f32.mxu1 %vm6502_vm2, %v31299_v12 }
 0x3b0   :  { %24696 = vmatmul.mubr.msk.f32.gmra.mrb[78].mxu1 %vm6502_vm2, %v31303_v16 }
 0x3b1   :  { %24698 = vmatprep.mubr.msk.f32.mxu1 %vm6502_vm2, %v31307_v1 }
 0x3b4   :  { %24699 = vmatmul.mubr.msk.f32.gmra.mrb[80].mxu1 %vm6502_vm2, %v31311_v20 }
 0x3b5   :  { %24701 = vmatprep.mubr.msk.f32.mxu1 %vm6502_vm2, %v31315_v29 }
 0x3b8   :  { %24702 = vmatmul.mubr.msk.f32.gmra.mrb[82].mxu1 %vm6502_vm2, %v31319_v13 }
 0x3b9   :  { %24704 = vmatprep.mubr.msk.f32.mxu1 %vm6502_vm2, %v31323_v33 }
 0x3bc   :  { %24705 = vmatmul.mubr.msk.f32.gmra.mrb[84].mxu1 %vm6502_vm2, %v31327_v31 }
 0x3bd   :  { %24707 = vmatprep.mubr.msk.f32.mxu1 %vm6502_vm2, %v31331_v37 }
 0x3c0   :  { %24708 = vmatmul.mubr.msk.f32.gmra.mrb[86].mxu1 %vm6502_vm2, %v31335_v40 }
 0x3c1   :  { %24710 = vmatprep.mubr.msk.f32.mxu1 %vm6502_vm2, %v31339_v27 }
 0x3c4   :  { %24711 = vmatmul.mubr.msk.f32.gmra.mrb[88].mxu1 %vm6502_vm2, %v31343_v21 }
 0x3c5   :  { %24713 = vmatprep.mubr.msk.f32.mxu1 %vm6502_vm2, %v31347_v41 }
 0x3c8   :  { %24714 = vmatmul.mubr.msk.f32.gmra.mrb[90].mxu1 %vm6502_vm2, %v31351_v44 }
 0x3c9   :  { %24716 = vmatprep.mubr.msk.f32.mxu1 %vm6502_vm2, %v31355_v46 }
 0x3cc   :  { %24717 = vmatmul.mubr.msk.f32.gmra.mrb[92].mxu1 %vm6502_vm2, %v31359_v30 }
 0x3cd   :  { %24719 = vmatprep.mubr.msk.f32.mxu1 %vm6502_vm2, %v31363_v58 }
 0x3d0   :  { %24720 = vmatmul.mubr.msk.f32.gmra.mrb[94].mxu1 %vm6502_vm2, %v31367_v7 }
 0x3d1   :  { %24722 = vmatprep.mubr.msk.f32.mxu1 %vm6502_vm2, %v6745_v3  ;;  %v31489_v3 = vld [vmem:[#allocation2 + $0x42f] sm:$0xff] }
 0x3d4   :  { %24723 = vmatmul.mubr.msk.f32.gmra.mrb[96].mxu1 %vm6502_vm2, %v6746_v22  ;;  %v8001_v22 = vld [vmem:[#allocation2 + $0x11] sm:$0xff] }
 0x3d5   :  { %24725 = vmatprep.mubr.msk.f32.mxu1 %vm6502_vm2, %v31373_v11 }
 0x3d8   :  { %24726 = vmatmul.mubr.msk.f32.gmra.mrb[98].mxu1 %vm6502_vm2, %v31377_v15 }
 0x3d9   :  { %24728 = vmatprep.mubr.msk.f32.mxu1 %vm6502_vm2, %v31381_v61 }
 0x3dc   :  { %24729 = vmatmul.mubr.msk.f32.gmra.mrb[100].mxu1 %vm6502_vm2, %v31385_v18 }
 0x3dd   :  { %24731 = vmatprep.mubr.msk.f32.mxu1 %vm6502_vm2, %v31389_v23 }
 0x3e0   :  { %24732 = vmatmul.mubr.msk.f32.gmra.mrb[102].mxu1 %vm6502_vm2, %v31393_v57 }
 0x3e1   :  { %24734 = vmatprep.mubr.msk.f32.mxu1 %vm6502_vm2, %v31397_v28 }
 0x3e4   :  { %24735 = vmatmul.mubr.msk.f32.gmra.mrb[104].mxu1 %vm6502_vm2, %v31401_v32 }
 0x3e5   :  { %24737 = vmatprep.mubr.msk.f32.mxu1 %vm6502_vm2, %v31405_v59 }
 0x3e8   :  { %24738 = vmatmul.mubr.msk.f32.gmra.mrb[106].mxu1 %vm6502_vm2, %v31409_v55 }
 0x3e9   :  { %24740 = vmatprep.mubr.msk.f32.mxu1 %vm6502_vm2, %v31413_v36 }
 0x3ec   :  { %24741 = vmatmul.mubr.msk.f32.gmra.mrb[108].mxu1 %vm6502_vm2, %v31417_v14 }
 0x3ed   :  { %24743 = vmatprep.mubr.msk.f32.mxu1 %vm6502_vm2, %v31421_v48 }
 0x3f0   :  { %24744 = vmatmul.mubr.msk.f32.gmra.mrb[110].mxu1 %vm6502_vm2, %v31425_v54 }
 0x3f1   :  { %24746 = vmatprep.mubr.msk.f32.mxu1 %vm6502_vm2, %v31429_v53 }
 0x3f4   :  { %24747 = vmatmul.mubr.msk.f32.gmra.mrb[112].mxu1 %vm6502_vm2, %v31433_v10 }
 0x3f5   :  { %24749 = vmatprep.mubr.msk.f32.mxu1 %vm6502_vm2, %v31437_v6 }
 0x3f8   :  { %24750 = vmatmul.mubr.msk.f32.gmra.mrb[114].mxu1 %vm6502_vm2, %v31441_v52 }
 0x3f9   :  { %24752 = vmatprep.mubr.msk.f32.mxu1 %vm6502_vm2, %v31445_v43 }
 0x3fc   :  { %24753 = vmatmul.mubr.msk.f32.gmra.mrb[116].mxu1 %vm6502_vm2, %v31449_v47 }
 0x3fd   :  { %24755 = vmatprep.mubr.msk.f32.mxu1 %vm6502_vm2, %v31453_v50 }
 0x400   :  { %24756 = vmatmul.mubr.msk.f32.gmra.mrb[118].mxu1 %vm6502_vm2, %v31457_v56 }
 0x401   :  { %24758 = vmatprep.mubr.msk.f32.mxu1 %vm6502_vm2, %v31461_v51 }
 0x404   :  { %24759 = vmatmul.mubr.msk.f32.gmra.mrb[120].mxu1 %vm6502_vm2, %v31465_v26 }
 0x405   :  { %24761 = vmatprep.mubr.msk.f32.mxu1 %vm6502_vm2, %v31469_v2 }
 0x408   :  { %24762 = vmatmul.mubr.msk.f32.gmra.mrb[122].mxu1 %vm6502_vm2, %v31473_v4  ;;  %v31502_v4 = vld [vmem:[#allocation2 + $0x31] sm:$0xff] }
 0x409   :  { %24764 = vmatprep.mubr.msk.f32.mxu1 %vm6502_vm2, %v31477_v62  ;;  %v9481_v62 = vld [vmem:[#allocation8 + $0x40] sm:$0xff]  ;;  %34914 = vst [vmem:[#allocation25_spill] sm:$0xff] %v31502_v4 }
 0x40c   :  { %24765 = vmatmul.mubr.msk.f32.gmra.mrb[124].mxu1 %vm6502_vm2, %v31481_v63  ;;  %v9482_v63 = vld [vmem:[#allocation8 + $0x48] sm:$0xff] }
 0x40d   :  { %24767 = vmatprep.mubr.msk.f32.mxu1 %vm6502_vm2, %v31485_v0  ;;  %v31500_v0 = vpack.c.bf16 %v9482_v63, %v9481_v62  ;;  %v31519_v62 = vld [vmem:[#allocation2 + $0x71] sm:$0xff]  ;;  %v31523_v63 = vld [vmem:[#allocation2 + $0x89] sm:$0xff] }
 0x40e   :  { %34918 = vst [vmem:[#allocation29_spill] sm:$0xff] %v31519_v62  ;;  %34919 = vst [vmem:[#allocation30_spill] sm:$0xff] %v31523_v63 }
 0x410   :  { %24768 = vmatmul.mubr.msk.f32.gmra.mrb[126].mxu1 %vm6502_vm2, %v31489_v3 }
 0x411   :  { %24774 = vmatprep.mubr.msk.f32.mxu1 %vm6502_vm2, %v8000_v9  ;;  %v31507_v9 = vld [vmem:[#allocation2 + $0x49] sm:$0xff] }
 0x412   :  { %34915 = vst [vmem:[#allocation26_spill] sm:$0xff] %v31507_v9 }
 0x414   :  { %24775 = vmatmul.mubr.msk.f32.vlgmr.msra.gmra.mrb[64].mxu1 %vm6502_vm2, %v8001_v22  ;;  %v31511_v22 = vld [vmem:[#allocation2 + $0x51] sm:$0xff] }
 0x415   :  { %24777 = vmatprep.mubr.msk.f32.mxu1 %vm6502_vm2, %v31495_v19  ;;  %26421 = vmatpush3.bf16.msra.mxu1 %v31252_v17  ;;  %34916 = vst [vmem:[#allocation27_spill] sm:$0xff] %v31511_v22  ;;  %v31515_v17 = vld [vmem:[#allocation2 + $0x69] sm:$0xff] }
 0x416   :  { %26423 = vmatprep.subr.bf16.mxu1 %v31500_v0  ;;  %34917 = vst [vmem:[#allocation28_spill] sm:$0xff] %v31515_v17 }
 0x418   :  { %24778 = vmatmul.mubr.msk.f32.gmra.mrb[66].mxu1 %vm6502_vm2, %v31502_v4  ;;  %v31615_v4 = vld [vmem:[#allocation2 + $0x1f1] sm:$0xff] }
 0x419   :  { %24780 = vmatprep.mubr.msk.f32.mxu1 %vm6502_vm2, %v31507_v9  ;;  %v31527_v9 = vld [vmem:[#allocation2 + $0x91] sm:$0xff]  ;;  %34942 = vst [vmem:[#allocation18_spill] sm:$0xff] %v31615_v4 }
 0x41a   :  { %34920 = vst [vmem:[#allocation31_spill] sm:$0xff] %v31527_v9 }
 0x41c   :  { %24781 = vmatmul.mubr.msk.f32.gmra.mrb[68].mxu1 %vm6502_vm2, %v31511_v22  ;;  %v31531_v22 = vld [vmem:[#allocation2 + $0xa9] sm:$0xff] }
 0x41d   :  { %24783 = vmatprep.mubr.msk.f32.mxu1 %vm6502_vm2, %v31515_v17  ;;  %34921 = vst [vmem:[#allocation32_spill] sm:$0xff] %v31531_v22  ;;  %v31535_v17 = vld [vmem:[#allocation2 + $0xb1] sm:$0xff] }
 0x41e   :  { %34922 = vst [vmem:[#allocation33_spill] sm:$0xff] %v31535_v17 }
 0x420   :  { %24784 = vmatmul.mubr.msk.f32.gmra.mrb[70].mxu1 %vm6502_vm2, %v31519_v62  ;;  %v31539_v62 = vld [vmem:[#allocation2 + $0xc9] sm:$0xff] }
 0x421   :  { %24786 = vmatprep.mubr.msk.f32.mxu1 %vm6502_vm2, %v31523_v63  ;;  %34923 = vst [vmem:[#allocation34_spill] sm:$0xff] %v31539_v62  ;;  %v31543_v63 = vld [vmem:[#allocation2 + $0xd1] sm:$0xff] }
 0x422   :  { %34924 = vst [vmem:[#allocation35_spill] sm:$0xff] %v31543_v63 }
 0x424   :  { %24787 = vmatmul.mubr.msk.f32.gmra.mrb[72].mxu1 %vm6502_vm2, %v31527_v9  ;;  %v31547_v9 = vld [vmem:[#allocation2 + $0xe9] sm:$0xff] }
 0x425   :  { %24789 = vmatprep.mubr.msk.f32.mxu1 %vm6502_vm2, %v31531_v22  ;;  %34925 = vst [vmem:[#allocation36_spill] sm:$0xff] %v31547_v9  ;;  %v31551_v22 = vld [vmem:[#allocation2 + $0xf1] sm:$0xff] }
 0x426   :  { %34926 = vst [vmem:[#allocation37_spill] sm:$0xff] %v31551_v22 }
 0x428   :  { %24790 = vmatmul.mubr.msk.f32.gmra.mrb[74].mxu1 %vm6502_vm2, %v31535_v17  ;;  %v31555_v17 = vld [vmem:[#allocation2 + $0x109] sm:$0xff] }
 0x429   :  { %24792 = vmatprep.mubr.msk.f32.mxu1 %vm6502_vm2, %v31539_v62  ;;  %34927 = vst [vmem:[#allocation38_spill] sm:$0xff] %v31555_v17  ;;  %v31559_v62 = vld [vmem:[#allocation2 + $0x111] sm:$0xff] }
 0x42a   :  { %34928 = vst [vmem:[#allocation39_spill] sm:$0xff] %v31559_v62 }
 0x42c   :  { %24793 = vmatmul.mubr.msk.f32.gmra.mrb[76].mxu1 %vm6502_vm2, %v31543_v63  ;;  %v31563_v63 = vld [vmem:[#allocation2 + $0x129] sm:$0xff] }
 0x42d   :  { %24795 = vmatprep.mubr.msk.f32.mxu1 %vm6502_vm2, %v31547_v9  ;;  %34929 = vst [vmem:[#allocation40_spill] sm:$0xff] %v31563_v63  ;;  %v31567_v9 = vld [vmem:[#allocation2 + $0x131] sm:$0xff] }
 0x42e   :  { %34930 = vst [vmem:[#allocation41_spill] sm:$0xff] %v31567_v9 }
 0x430   :  { %24796 = vmatmul.mubr.msk.f32.gmra.mrb[78].mxu1 %vm6502_vm2, %v31551_v22  ;;  %v31571_v22 = vld [vmem:[#allocation2 + $0x149] sm:$0xff] }
 0x431   :  { %24798 = vmatprep.mubr.msk.f32.mxu1 %vm6502_vm2, %v31555_v17  ;;  %34931 = vst [vmem:[#allocation42_spill] sm:$0xff] %v31571_v22  ;;  %v31575_v17 = vld [vmem:[#allocation2 + $0x151] sm:$0xff] }
 0x432   :  { %34932 = vst [vmem:[#allocation43_spill] sm:$0xff] %v31575_v17 }
 0x434   :  { %24799 = vmatmul.mubr.msk.f32.gmra.mrb[80].mxu1 %vm6502_vm2, %v31559_v62  ;;  %v31579_v62 = vld [vmem:[#allocation2 + $0x169] sm:$0xff] }
 0x435   :  { %24801 = vmatprep.mubr.msk.f32.mxu1 %vm6502_vm2, %v31563_v63  ;;  %34933 = vst [vmem:[#allocation44_spill] sm:$0xff] %v31579_v62  ;;  %v31583_v63 = vld [vmem:[#allocation2 + $0x171] sm:$0xff] }
 0x436   :  { %34934 = vst [vmem:[#allocation45_spill] sm:$0xff] %v31583_v63 }
 0x438   :  { %24802 = vmatmul.mubr.msk.f32.gmra.mrb[82].mxu1 %vm6502_vm2, %v31567_v9  ;;  %v31587_v9 = vld [vmem:[#allocation2 + $0x189] sm:$0xff] }
 0x439   :  { %24804 = vmatprep.mubr.msk.f32.mxu1 %vm6502_vm2, %v31571_v22  ;;  %34935 = vst [vmem:[#allocation46_spill] sm:$0xff] %v31587_v9  ;;  %v31591_v22 = vld [vmem:[#allocation2 + $0x191] sm:$0xff] }
 0x43a   :  { %34936 = vst [vmem:[#allocation47_spill] sm:$0xff] %v31591_v22 }
 0x43c   :  { %24805 = vmatmul.mubr.msk.f32.gmra.mrb[84].mxu1 %vm6502_vm2, %v31575_v17  ;;  %v31595_v17 = vld [vmem:[#allocation2 + $0x1a9] sm:$0xff] }
 0x43d   :  { %24807 = vmatprep.mubr.msk.f32.mxu1 %vm6502_vm2, %v31579_v62  ;;  %34937 = vst [vmem:[#allocation48_spill] sm:$0xff] %v31595_v17  ;;  %v31599_v62 = vld [vmem:[#allocation2 + $0x1b1] sm:$0xff] }
 0x43e   :  { %34938 = vst [vmem:[#allocation51_spill] sm:$0xff] %v31599_v62 }
 0x440   :  { %24808 = vmatmul.mubr.msk.f32.gmra.mrb[86].mxu1 %vm6502_vm2, %v31583_v63  ;;  %v31603_v63 = vld [vmem:[#allocation2 + $0x1c9] sm:$0xff] }
 0x441   :  { %24810 = vmatprep.mubr.msk.f32.mxu1 %vm6502_vm2, %v31587_v9  ;;  %34939 = vst [vmem:[#allocation52_spill] sm:$0xff] %v31603_v63  ;;  %v31607_v9 = vld [vmem:[#allocation2 + $0x1d1] sm:$0xff] }
 0x442   :  { %34940 = vst [vmem:[#allocation49_spill] sm:$0xff] %v31607_v9 }
 0x444   :  { %24811 = vmatmul.mubr.msk.f32.gmra.mrb[88].mxu1 %vm6502_vm2, %v31591_v22  ;;  %v31611_v22 = vld [vmem:[#allocation2 + $0x1e9] sm:$0xff] }
 0x445   :  { %24813 = vmatprep.mubr.msk.f32.mxu1 %vm6502_vm2, %v31595_v17  ;;  %34941 = vst [vmem:[#allocation50_spill] sm:$0xff] %v31611_v22  ;;  %v8032_v17 = vld [vmem:[#allocation2 + $0x249] sm:$0xff] }
 0x448   :  { %24814 = vmatmul.mubr.msk.f32.gmra.mrb[90].mxu1 %vm6502_vm2, %v31599_v62  ;;  %v8033_v62 = vld [vmem:[#allocation2 + $0x251] sm:$0xff] }
 0x449   :  { %24816 = vmatprep.mubr.msk.f32.mxu1 %vm6502_vm2, %v31603_v63  ;;  %v31621_v63 = vld [vmem:[#allocation2 + $0x269] sm:$0xff] }
 0x44c   :  { %24817 = vmatmul.mubr.msk.f32.gmra.mrb[92].mxu1 %vm6502_vm2, %v31607_v9  ;;  %v31625_v9 = vld [vmem:[#allocation2 + $0x271] sm:$0xff] }
 0x44d   :  { %24819 = vmatprep.mubr.msk.f32.mxu1 %vm6502_vm2, %v31611_v22  ;;  %34943 = vst [vmem:[#allocation19_spill] sm:$0xff] %v31625_v9  ;;  %v31629_v22 = vld [vmem:[#allocation2 + $0x289] sm:$0xff] }
 0x44e   :  { %34944 = vst [vmem:[#allocation20_spill] sm:$0xff] %v31629_v22 }
 0x450   :  { %24820 = vmatmul.mubr.msk.f32.gmra.mrb[94].mxu1 %vm6502_vm2, %v31615_v4  ;;  %v31633_v4 = vld [vmem:[#allocation2 + $0x291] sm:$0xff] }
 0x451   :  { %24822 = vmatprep.mubr.msk.f32.mxu1 %vm6502_vm2, %v8032_v17  ;;  %34945 = vst [vmem:[#allocation53_spill] sm:$0xff] %v31633_v4  ;;  %v31637_v17 = vld [vmem:[#allocation2 + $0x2a9] sm:$0xff] }
 0x452   :  { %34946 = vst [vmem:[#allocation54_spill] sm:$0xff] %v31637_v17 }
 0x454   :  { %24823 = vmatmul.mubr.msk.f32.gmra.mrb[96].mxu1 %vm6502_vm2, %v8033_v62  ;;  %v31641_v62 = vld [vmem:[#allocation2 + $0x2b1] sm:$0xff] }
 0x455   :  { %24825 = vmatprep.mubr.msk.f32.mxu1 %vm6502_vm2, %v31621_v63  ;;  %34947 = vst [vmem:[#allocation55_spill] sm:$0xff] %v31641_v62 }
 0x458   :  { %24826 = vmatmul.mubr.msk.f32.gmra.mrb[98].mxu1 %vm6502_vm2, %v31625_v9  ;;  %v31645_v9 = vld [vmem:[#allocation2 + $0x2c9] sm:$0xff] }
 0x459   :  { %24828 = vmatprep.mubr.msk.f32.mxu1 %vm6502_vm2, %v31629_v22  ;;  %34948 = vst [vmem:[#allocation56_spill] sm:$0xff] %v31645_v9  ;;  %v31649_v22 = vld [vmem:[#allocation2 + $0x2d1] sm:$0xff] }
 0x45a   :  { %34949 = vst [vmem:[#allocation57_spill] sm:$0xff] %v31649_v22 }
 0x45c   :  { %24829 = vmatmul.mubr.msk.f32.gmra.mrb[100].mxu1 %vm6502_vm2, %v31633_v4  ;;  %v31653_v4 = vld [vmem:[#allocation2 + $0x2e9] sm:$0xff] }
 0x45d   :  { %24831 = vmatprep.mubr.msk.f32.mxu1 %vm6502_vm2, %v31637_v17  ;;  %34950 = vst [vmem:[#allocation58_spill] sm:$0xff] %v31653_v4  ;;  %v31657_v17 = vld [vmem:[#allocation2 + $0x2f1] sm:$0xff] }
 0x45e   :  { %34951 = vst [vmem:[#allocation59_spill] sm:$0xff] %v31657_v17 }
 0x460   :  { %24832 = vmatmul.mubr.msk.f32.gmra.mrb[102].mxu1 %vm6502_vm2, %v31641_v62  ;;  %v31661_v62 = vld [vmem:[#allocation2 + $0x309] sm:$0xff] }
 0x461   :  { %24834 = vmatprep.mubr.msk.f32.mxu1 %vm6502_vm2, %v31645_v9  ;;  %34952 = vst [vmem:[#allocation60_spill] sm:$0xff] %v31661_v62  ;;  %v31665_v9 = vld [vmem:[#allocation2 + $0x311] sm:$0xff] }
 0x462   :  { %34953 = vst [vmem:[#allocation61_spill] sm:$0xff] %v31665_v9 }
 0x464   :  { %24835 = vmatmul.mubr.msk.f32.gmra.mrb[104].mxu1 %vm6502_vm2, %v31649_v22  ;;  %v31669_v22 = vld [vmem:[#allocation2 + $0x329] sm:$0xff] }
 0x465   :  { %24837 = vmatprep.mubr.msk.f32.mxu1 %vm6502_vm2, %v31653_v4  ;;  %34954 = vst [vmem:[#allocation62_spill] sm:$0xff] %v31669_v22  ;;  %v31673_v4 = vld [vmem:[#allocation2 + $0x331] sm:$0xff] }
 0x466   :  { %34955 = vst [vmem:[#allocation63_spill] sm:$0xff] %v31673_v4 }
 0x468   :  { %24838 = vmatmul.mubr.msk.f32.gmra.mrb[106].mxu1 %vm6502_vm2, %v31657_v17  ;;  %v31677_v17 = vld [vmem:[#allocation2 + $0x349] sm:$0xff] }
 0x469   :  { %24840 = vmatprep.mubr.msk.f32.mxu1 %vm6502_vm2, %v31661_v62  ;;  %34956 = vst [vmem:[#allocation64_spill] sm:$0xff] %v31677_v17  ;;  %v31681_v62 = vld [vmem:[#allocation2 + $0x351] sm:$0xff] }
 0x46a   :  { %34957 = vst [vmem:[#allocation65_spill] sm:$0xff] %v31681_v62 }
 0x46c   :  { %24841 = vmatmul.mubr.msk.f32.gmra.mrb[108].mxu1 %vm6502_vm2, %v31665_v9  ;;  %v31685_v9 = vld [vmem:[#allocation2 + $0x369] sm:$0xff] }
 0x46d   :  { %24843 = vmatprep.mubr.msk.f32.mxu1 %vm6502_vm2, %v31669_v22  ;;  %34958 = vst [vmem:[#allocation66_spill] sm:$0xff] %v31685_v9  ;;  %v31689_v22 = vld [vmem:[#allocation2 + $0x371] sm:$0xff] }
 0x46e   :  { %34959 = vst [vmem:[#allocation67_spill] sm:$0xff] %v31689_v22 }
 0x470   :  { %24844 = vmatmul.mubr.msk.f32.gmra.mrb[110].mxu1 %vm6502_vm2, %v31673_v4  ;;  %v31693_v4 = vld [vmem:[#allocation2 + $0x389] sm:$0xff] }
 0x471   :  { %24846 = vmatprep.mubr.msk.f32.mxu1 %vm6502_vm2, %v31677_v17  ;;  %34960 = vst [vmem:[#allocation68_spill] sm:$0xff] %v31693_v4  ;;  %v31697_v17 = vld [vmem:[#allocation2 + $0x391] sm:$0xff] }
 0x472   :  { %34961 = vst [vmem:[#allocation69_spill] sm:$0xff] %v31697_v17 }
 0x474   :  { %24847 = vmatmul.mubr.msk.f32.gmra.mrb[112].mxu1 %vm6502_vm2, %v31681_v62  ;;  %v31701_v62 = vld [vmem:[#allocation2 + $0x3a9] sm:$0xff] }
 0x475   :  { %24849 = vmatprep.mubr.msk.f32.mxu1 %vm6502_vm2, %v31685_v9  ;;  %34962 = vst [vmem:[#allocation70_spill] sm:$0xff] %v31701_v62  ;;  %v31705_v9 = vld [vmem:[#allocation2 + $0x3b1] sm:$0xff] }
 0x476   :  { %34963 = vst [vmem:[#allocation71_spill] sm:$0xff] %v31705_v9 }
 0x478   :  { %24850 = vmatmul.mubr.msk.f32.gmra.mrb[114].mxu1 %vm6502_vm2, %v31689_v22  ;;  %v31709_v22 = vld [vmem:[#allocation2 + $0x3c9] sm:$0xff] }
 0x479   :  { %24852 = vmatprep.mubr.msk.f32.mxu1 %vm6502_vm2, %v31693_v4  ;;  %34964 = vst [vmem:[#allocation72_spill] sm:$0xff] %v31709_v22  ;;  %v31713_v4 = vld [vmem:[#allocation2 + $0x3d1] sm:$0xff] }
 0x47a   :  { %34965 = vst [vmem:[#allocation73_spill] sm:$0xff] %v31713_v4 }
 0x47c   :  { %24853 = vmatmul.mubr.msk.f32.gmra.mrb[116].mxu1 %vm6502_vm2, %v31697_v17  ;;  %v31717_v17 = vld [vmem:[#allocation2 + $0x3e9] sm:$0xff] }
 0x47d   :  { %24855 = vmatprep.mubr.msk.f32.mxu1 %vm6502_vm2, %v31701_v62  ;;  %34966 = vst [vmem:[#allocation74_spill] sm:$0xff] %v31717_v17  ;;  %v31721_v62 = vld [vmem:[#allocation2 + $0x3f1] sm:$0xff] }
 0x47e   :  { %34967 = vst [vmem:[#allocation75_spill] sm:$0xff] %v31721_v62 }
 0x480   :  { %24856 = vmatmul.mubr.msk.f32.gmra.mrb[118].mxu1 %vm6502_vm2, %v31705_v9  ;;  %v31725_v9 = vld [vmem:[#allocation2 + $0x409] sm:$0xff] }
 0x481   :  { %24858 = vmatprep.mubr.msk.f32.mxu1 %vm6502_vm2, %v31709_v22  ;;  %34968 = vst [vmem:[#allocation76_spill] sm:$0xff] %v31725_v9  ;;  %v31729_v22 = vld [vmem:[#allocation2 + $0x411] sm:$0xff] }
 0x482   :  { %34969 = vst [vmem:[#allocation77_spill] sm:$0xff] %v31729_v22 }
 0x484   :  { %24859 = vmatmul.mubr.msk.f32.gmra.mrb[120].mxu1 %vm6502_vm2, %v31713_v4  ;;  %v31733_v4 = vld [vmem:[#allocation2 + $0x429] sm:$0xff] }
 0x485   :  { %24861 = vmatprep.mubr.msk.f32.mxu1 %vm6502_vm2, %v31717_v17  ;;  %v31737_v17 = vld [vmem:[#allocation2 + $0x431] sm:$0xff] }
 0x488   :  { %24862 = vmatmul.mubr.msk.f32.gmra.mrb[122].mxu1 %vm6502_vm2, %v31721_v62  ;;  %v10190_v62 = vld [vmem:[#allocation8 + $0x58] sm:$0xff] }
 0x489   :  { %24864 = vmatprep.mubr.msk.f32.mxu1 %vm6502_vm2, %v31725_v9  ;;  %v10189_v9 = vld [vmem:[#allocation8 + $0x50] sm:$0xff] }
 0x48c   :  { %24865 = vmatmul.mubr.msk.f32.gmra.mrb[124].mxu1 %vm6502_vm2, %v31729_v22  ;;  %v31748_v22 = vpack.c.bf16 %v10190_v62, %v10189_v9  ;;  %v32057_v9 = vld [vmem:[#allocation2 + $0x348] sm:$0xff] }
 0x48d   :  { %24867 = vmatprep.mubr.msk.f32.mxu1 %vm6502_vm2, %v31733_v4  ;;  %v32065_v62 = vld [vmem:[#allocation2 + $0x368] sm:$0xff] }
 0x490   :  { %24868 = vmatmul.mubr.msk.f32.gmra.mrb[126].mxu1 %vm6502_vm2, %v31737_v17 }
 0x491   :  { %24874 = vmatprep.mubr.msk.f32.mxu1 %vm6502_vm2, %v31247_v42  ;;  %v31805_v42 = vld [vmem:[#allocation2 + $0x207] sm:$0xff] }
 0x494   :  { %24875 = vmatmul.mubr.msk.f32.vlgmr.msra.gmra.mrb[64].mxu1 %vm6502_vm2, %v31254_v25  ;;  %v31809_v25 = vld [vmem:[#allocation2 + $0x20f] sm:$0xff] }
 0x495   :  { %24877 = vmatprep.mubr.msk.f32.mxu1 %vm6502_vm2, %v31259_v34  ;;  %26425 = vmatpush3.bf16.msra.mxu1 %v31500_v0  ;;  %v34970_v34 = vld [vmem:[#allocation21_spill] sm:$0xff]  ;;  %v32049_v0 = vld [vmem:[#allocation2 + $0x328] sm:$0xff] }
 0x496   :  { %26427 = vmatprep.subr.bf16.mxu1 %v31748_v22 }
 0x498   :  { %24878 = vmatmul.mubr.msk.f32.gmra.mrb[66].mxu1 %vm6502_vm2, %v31263_v5  ;;  %v34971_v5 = vld [vmem:[#allocation22_spill] sm:$0xff] }
 0x499   :  { %24880 = vmatprep.mubr.msk.f32.mxu1 %vm6502_vm2, %v31267_v24  ;;  %v34972_v24 = vld [vmem:[#allocation23_spill] sm:$0xff] }
 0x49c   :  { %24881 = vmatmul.mubr.msk.f32.gmra.mrb[68].mxu1 %vm6502_vm2, %v31271_v49  ;;  %v34973_v49 = vld [vmem:[#allocation24_spill] sm:$0xff] }
 0x49d   :  { %24883 = vmatprep.mubr.msk.f32.mxu1 %vm6502_vm2, %v31275_v39  ;;  %v31873_v39 = vld [vmem:[#allocation2 + $0x447] sm:$0xff] }
 0x4a0   :  { %24884 = vmatmul.mubr.msk.f32.gmra.mrb[70].mxu1 %vm6502_vm2, %v31279_v38  ;;  %v31877_v38 = vld [vmem:[#allocation2 + $0x44f] sm:$0xff] }
 0x4a1   :  { %24886 = vmatprep.mubr.msk.f32.mxu1 %vm6502_vm2, %v31283_v8  ;;  %v9416_v8 = vld [vmem:[#allocation2 + $0x28] sm:$0xff] }
 0x4a4   :  { %24887 = vmatmul.mubr.msk.f32.gmra.mrb[72].mxu1 %vm6502_vm2, %v31287_v45  ;;  %v9417_v45 = vld [vmem:[#allocation2 + $0x30] sm:$0xff] }
 0x4a5   :  { %24889 = vmatprep.mubr.msk.f32.mxu1 %vm6502_vm2, %v31291_v35  ;;  %v31883_v35 = vld [vmem:[#allocation2 + $0x48] sm:$0xff] }
 0x4a8   :  { %24890 = vmatmul.mubr.msk.f32.gmra.mrb[74].mxu1 %vm6502_vm2, %v31295_v60  ;;  %v10898_v60 = vld [vmem:[#allocation8 + $0x60] sm:$0xff] }
 0x4a9   :  { %24892 = vmatprep.mubr.msk.f32.mxu1 %vm6502_vm2, %v31299_v12  ;;  %v10899_v12 = vld [vmem:[#allocation8 + $0x68] sm:$0xff] }
 0x4ac   :  { %24893 = vmatmul.mubr.msk.f32.gmra.mrb[76].mxu1 %vm6502_vm2, %v31303_v16  ;;  %v31888_v16 = vpack.c.bf16 %v10899_v12, %v10898_v60  ;;  %v32093_v60 = vld [vmem:[#allocation2 + $0x3d0] sm:$0xff]  ;;  %v32097_v12 = vld [vmem:[#allocation2 + $0x3e8] sm:$0xff] }
 0x4ad   :  { %24895 = vmatprep.mubr.msk.f32.mxu1 %vm6502_vm2, %v31307_v1  ;;  %v31890_v1 = vld [vmem:[#allocation2 + $0x50] sm:$0xff]  ;;  %34978 = vst [vmem:[#allocation78_spill] sm:$0xff] %v32093_v60  ;;  %34979 = vst [vmem:[#allocation79_spill] sm:$0xff] %v32097_v12 }
 0x4b0   :  { %24896 = vmatmul.mubr.msk.f32.gmra.mrb[78].mxu1 %vm6502_vm2, %v31311_v20  ;;  %v31895_v20 = vld [vmem:[#allocation2 + $0x68] sm:$0xff] }
 0x4b1   :  { %24898 = vmatprep.mubr.msk.f32.mxu1 %vm6502_vm2, %v31315_v29  ;;  %v31899_v29 = vld [vmem:[#allocation2 + $0x70] sm:$0xff] }
 0x4b4   :  { %24899 = vmatmul.mubr.msk.f32.gmra.mrb[80].mxu1 %vm6502_vm2, %v31319_v13  ;;  %v31903_v13 = vld [vmem:[#allocation2 + $0x88] sm:$0xff] }
 0x4b5   :  { %24901 = vmatprep.mubr.msk.f32.mxu1 %vm6502_vm2, %v31323_v33  ;;  %v31907_v33 = vld [vmem:[#allocation2 + $0x90] sm:$0xff] }
 0x4b8   :  { %24902 = vmatmul.mubr.msk.f32.gmra.mrb[82].mxu1 %vm6502_vm2, %v31327_v31  ;;  %v31911_v31 = vld [vmem:[#allocation2 + $0xa8] sm:$0xff] }
 0x4b9   :  { %24904 = vmatprep.mubr.msk.f32.mxu1 %vm6502_vm2, %v31331_v37  ;;  %v31915_v37 = vld [vmem:[#allocation2 + $0xb0] sm:$0xff] }
 0x4bc   :  { %24905 = vmatmul.mubr.msk.f32.gmra.mrb[84].mxu1 %vm6502_vm2, %v31335_v40  ;;  %v31919_v40 = vld [vmem:[#allocation2 + $0xc8] sm:$0xff] }
 0x4bd   :  { %24907 = vmatprep.mubr.msk.f32.mxu1 %vm6502_vm2, %v31339_v27  ;;  %v31923_v27 = vld [vmem:[#allocation2 + $0xd0] sm:$0xff] }
 0x4c0   :  { %24908 = vmatmul.mubr.msk.f32.gmra.mrb[86].mxu1 %vm6502_vm2, %v31343_v21  ;;  %v31927_v21 = vld [vmem:[#allocation2 + $0xe8] sm:$0xff] }
 0x4c1   :  { %24910 = vmatprep.mubr.msk.f32.mxu1 %vm6502_vm2, %v31347_v41  ;;  %v31931_v41 = vld [vmem:[#allocation2 + $0xf0] sm:$0xff] }
 0x4c4   :  { %24911 = vmatmul.mubr.msk.f32.gmra.mrb[88].mxu1 %vm6502_vm2, %v31351_v44  ;;  %v31935_v44 = vld [vmem:[#allocation2 + $0x108] sm:$0xff] }
 0x4c5   :  { %24913 = vmatprep.mubr.msk.f32.mxu1 %vm6502_vm2, %v31355_v46  ;;  %v31939_v46 = vld [vmem:[#allocation2 + $0x110] sm:$0xff] }
 0x4c8   :  { %24914 = vmatmul.mubr.msk.f32.gmra.mrb[90].mxu1 %vm6502_vm2, %v31359_v30  ;;  %v31943_v30 = vld [vmem:[#allocation2 + $0x128] sm:$0xff] }
 0x4c9   :  { %24916 = vmatprep.mubr.msk.f32.mxu1 %vm6502_vm2, %v31363_v58  ;;  %v31947_v58 = vld [vmem:[#allocation2 + $0x130] sm:$0xff] }
 0x4cc   :  { %24917 = vmatmul.mubr.msk.f32.gmra.mrb[92].mxu1 %vm6502_vm2, %v31367_v7  ;;  %v31951_v7 = vld [vmem:[#allocation2 + $0x148] sm:$0xff] }
 0x4cd   :  { %24919 = vmatprep.mubr.msk.f32.mxu1 %vm6502_vm2, %v31805_v42 }
 0x4d0   :  { %24920 = vmatmul.mubr.msk.f32.gmra.mrb[94].mxu1 %vm6502_vm2, %v31809_v25 }
 0x4d1   :  { %24922 = vmatprep.mubr.msk.f32.mxu1 %vm6502_vm2, %v31373_v11  ;;  %v31955_v11 = vld [vmem:[#allocation2 + $0x150] sm:$0xff] }
 0x4d4   :  { %24923 = vmatmul.mubr.msk.f32.gmra.mrb[96].mxu1 %vm6502_vm2, %v31377_v15  ;;  %v31959_v15 = vld [vmem:[#allocation2 + $0x168] sm:$0xff] }
 0x4d5   :  { %24925 = vmatprep.mubr.msk.f32.mxu1 %vm6502_vm2, %v31381_v61  ;;  %v31963_v61 = vld [vmem:[#allocation2 + $0x170] sm:$0xff] }
 0x4d8   :  { %24926 = vmatmul.mubr.msk.f32.gmra.mrb[98].mxu1 %vm6502_vm2, %v31385_v18  ;;  %v31967_v18 = vld [vmem:[#allocation2 + $0x188] sm:$0xff] }
 0x4d9   :  { %24928 = vmatprep.mubr.msk.f32.mxu1 %vm6502_vm2, %v31389_v23  ;;  %v31971_v23 = vld [vmem:[#allocation2 + $0x190] sm:$0xff] }
 0x4dc   :  { %24929 = vmatmul.mubr.msk.f32.gmra.mrb[100].mxu1 %vm6502_vm2, %v31393_v57  ;;  %v31975_v57 = vld [vmem:[#allocation2 + $0x1a8] sm:$0xff] }
 0x4dd   :  { %24931 = vmatprep.mubr.msk.f32.mxu1 %vm6502_vm2, %v31397_v28  ;;  %v31979_v28 = vld [vmem:[#allocation2 + $0x1b0] sm:$0xff] }
 0x4e0   :  { %24932 = vmatmul.mubr.msk.f32.gmra.mrb[102].mxu1 %vm6502_vm2, %v31401_v32  ;;  %v31983_v32 = vld [vmem:[#allocation2 + $0x1c8] sm:$0xff] }
 0x4e1   :  { %24934 = vmatprep.mubr.msk.f32.mxu1 %vm6502_vm2, %v31405_v59  ;;  %v31987_v59 = vld [vmem:[#allocation2 + $0x1d0] sm:$0xff] }
 0x4e4   :  { %24935 = vmatmul.mubr.msk.f32.gmra.mrb[104].mxu1 %vm6502_vm2, %v31409_v55  ;;  %v31991_v55 = vld [vmem:[#allocation2 + $0x1e8] sm:$0xff] }
 0x4e5   :  { %24937 = vmatprep.mubr.msk.f32.mxu1 %vm6502_vm2, %v31413_v36  ;;  %v31995_v36 = vld [vmem:[#allocation2 + $0x1f0] sm:$0xff] }
 0x4e8   :  { %24938 = vmatmul.mubr.msk.f32.gmra.mrb[106].mxu1 %vm6502_vm2, %v31417_v14  ;;  %v31999_v14 = vld [vmem:[#allocation2 + $0x208] sm:$0xff] }
 0x4e9   :  { %24940 = vmatprep.mubr.msk.f32.mxu1 %vm6502_vm2, %v31421_v48  ;;  %v32003_v48 = vld [vmem:[#allocation2 + $0x210] sm:$0xff] }
 0x4ec   :  { %24941 = vmatmul.mubr.msk.f32.gmra.mrb[108].mxu1 %vm6502_vm2, %v31425_v54  ;;  %v9448_v54 = vld [vmem:[#allocation2 + $0x268] sm:$0xff] }
 0x4ed   :  { %24943 = vmatprep.mubr.msk.f32.mxu1 %vm6502_vm2, %v31429_v53  ;;  %v9449_v53 = vld [vmem:[#allocation2 + $0x270] sm:$0xff] }
 0x4f0   :  { %24944 = vmatmul.mubr.msk.f32.gmra.mrb[110].mxu1 %vm6502_vm2, %v31433_v10  ;;  %v32009_v10 = vld [vmem:[#allocation2 + $0x288] sm:$0xff] }
 0x4f1   :  { %24946 = vmatprep.mubr.msk.f32.mxu1 %vm6502_vm2, %v31437_v6  ;;  %v32013_v6 = vld [vmem:[#allocation2 + $0x290] sm:$0xff] }
 0x4f4   :  { %24947 = vmatmul.mubr.msk.f32.gmra.mrb[112].mxu1 %vm6502_vm2, %v31441_v52  ;;  %v32017_v52 = vld [vmem:[#allocation2 + $0x2a8] sm:$0xff] }
 0x4f5   :  { %24949 = vmatprep.mubr.msk.f32.mxu1 %vm6502_vm2, %v31445_v43  ;;  %v32021_v43 = vld [vmem:[#allocation2 + $0x2b0] sm:$0xff] }
 0x4f8   :  { %24950 = vmatmul.mubr.msk.f32.gmra.mrb[114].mxu1 %vm6502_vm2, %v31449_v47  ;;  %v32025_v47 = vld [vmem:[#allocation2 + $0x2c8] sm:$0xff] }
 0x4f9   :  { %24952 = vmatprep.mubr.msk.f32.mxu1 %vm6502_vm2, %v31453_v50  ;;  %v32029_v50 = vld [vmem:[#allocation2 + $0x2d0] sm:$0xff] }
 0x4fc   :  { %24953 = vmatmul.mubr.msk.f32.gmra.mrb[116].mxu1 %vm6502_vm2, %v31457_v56  ;;  %v32033_v56 = vld [vmem:[#allocation2 + $0x2e8] sm:$0xff] }
 0x4fd   :  { %24955 = vmatprep.mubr.msk.f32.mxu1 %vm6502_vm2, %v31461_v51  ;;  %v32037_v51 = vld [vmem:[#allocation2 + $0x2f0] sm:$0xff] }
 0x500   :  { %24956 = vmatmul.mubr.msk.f32.gmra.mrb[118].mxu1 %vm6502_vm2, %v31465_v26  ;;  %v32041_v26 = vld [vmem:[#allocation2 + $0x308] sm:$0xff] }
 0x501   :  { %24958 = vmatprep.mubr.msk.f32.mxu1 %vm6502_vm2, %v31469_v2  ;;  %v32045_v2 = vld [vmem:[#allocation2 + $0x310] sm:$0xff] }
 0x504   :  { %24959 = vmatmul.mubr.msk.f32.gmra.mrb[120].mxu1 %vm6502_vm2, %v34970_v34  ;;  %v32069_v34 = vld [vmem:[#allocation2 + $0x370] sm:$0xff] }
 0x505   :  { %24961 = vmatprep.mubr.msk.f32.mxu1 %vm6502_vm2, %v34971_v5  ;;  %v32073_v5 = vld [vmem:[#allocation2 + $0x388] sm:$0xff] }
 0x508   :  { %24962 = vmatmul.mubr.msk.f32.gmra.mrb[122].mxu1 %vm6502_vm2, %v34972_v24  ;;  %v32077_v24 = vld [vmem:[#allocation2 + $0x390] sm:$0xff] }
 0x509   :  { %24964 = vmatprep.mubr.msk.f32.mxu1 %vm6502_vm2, %v34973_v49  ;;  %34974 = vst [vmem:[#allocation21_spill] sm:$0xff] %v32077_v24  ;;  %v32081_v49 = vld [vmem:[#allocation2 + $0x3a8] sm:$0xff] }
 0x50a   :  { %34975 = vst [vmem:[#allocation22_spill] sm:$0xff] %v32081_v49 }
 0x50c   :  { %24965 = vmatmul.mubr.msk.f32.gmra.mrb[124].mxu1 %vm6502_vm2, %v31489_v3  ;;  %v32053_v3 = vld [vmem:[#allocation2 + $0x330] sm:$0xff] }
 0x50d   :  { %24967 = vmatprep.mubr.msk.f32.mxu1 %vm6502_vm2, %v31873_v39 }
 0x510   :  { %24968 = vmatmul.mubr.msk.f32.gmra.mrb[126].mxu1 %vm6502_vm2, %v31877_v38 }
 0x511   :  { %24974 = vmatprep.mubr.msk.f32.mxu1 %vm6502_vm2, %v9416_v8  ;;  %v32085_v8 = vld [vmem:[#allocation2 + $0x3b0] sm:$0xff] }
 0x512   :  { %34976 = vst [vmem:[#allocation23_spill] sm:$0xff] %v32085_v8 }
 0x514   :  { %24975 = vmatmul.mubr.msk.f32.vlgmr.msra.gmra.mrb[64].mxu1 %vm6502_vm2, %v9417_v45  ;;  %v32089_v45 = vld [vmem:[#allocation2 + $0x3c8] sm:$0xff] }
 0x515   :  { %24977 = vmatprep.mubr.msk.f32.mxu1 %vm6502_vm2, %v31883_v35  ;;  %26429 = vmatpush3.bf16.msra.mxu1 %v31748_v22  ;;  %v32061_v22 = vld [vmem:[#allocation2 + $0x350] sm:$0xff]  ;;  %34977 = vst [vmem:[#allocation24_spill] sm:$0xff] %v32089_v45 }
 0x516   :  { %26431 = vmatprep.subr.bf16.mxu1 %v31888_v16 }
 0x518   :  { %24978 = vmatmul.mubr.msk.f32.gmra.mrb[66].mxu1 %vm6502_vm2, %v31890_v1 }
 0x519   :  { %24980 = vmatprep.mubr.msk.f32.mxu1 %vm6502_vm2, %v31895_v20 }
 0x51c   :  { %24981 = vmatmul.mubr.msk.f32.gmra.mrb[68].mxu1 %vm6502_vm2, %v31899_v29 }
 0x51d   :  { %24983 = vmatprep.mubr.msk.f32.mxu1 %vm6502_vm2, %v31903_v13 }
 0x520   :  { %24984 = vmatmul.mubr.msk.f32.gmra.mrb[70].mxu1 %vm6502_vm2, %v31907_v33 }
 0x521   :  { %24986 = vmatprep.mubr.msk.f32.mxu1 %vm6502_vm2, %v31911_v31 }
 0x524   :  { %24987 = vmatmul.mubr.msk.f32.gmra.mrb[72].mxu1 %vm6502_vm2, %v31915_v37 }
 0x525   :  { %24989 = vmatprep.mubr.msk.f32.mxu1 %vm6502_vm2, %v31919_v40 }
 0x528   :  { %24990 = vmatmul.mubr.msk.f32.gmra.mrb[74].mxu1 %vm6502_vm2, %v31923_v27 }
 0x529   :  { %24992 = vmatprep.mubr.msk.f32.mxu1 %vm6502_vm2, %v31927_v21 }
 0x52c   :  { %24993 = vmatmul.mubr.msk.f32.gmra.mrb[76].mxu1 %vm6502_vm2, %v31931_v41 }
 0x52d   :  { %24995 = vmatprep.mubr.msk.f32.mxu1 %vm6502_vm2, %v31935_v44 }
 0x530   :  { %24996 = vmatmul.mubr.msk.f32.gmra.mrb[78].mxu1 %vm6502_vm2, %v31939_v46 }
 0x531   :  { %24998 = vmatprep.mubr.msk.f32.mxu1 %vm6502_vm2, %v31943_v30 }
 0x534   :  { %24999 = vmatmul.mubr.msk.f32.gmra.mrb[80].mxu1 %vm6502_vm2, %v31947_v58 }
 0x535   :  { %25001 = vmatprep.mubr.msk.f32.mxu1 %vm6502_vm2, %v31951_v7 }
 0x538   :  { %25002 = vmatmul.mubr.msk.f32.gmra.mrb[82].mxu1 %vm6502_vm2, %v31955_v11 }
 0x539   :  { %25004 = vmatprep.mubr.msk.f32.mxu1 %vm6502_vm2, %v31959_v15 }
 0x53c   :  { %25005 = vmatmul.mubr.msk.f32.gmra.mrb[84].mxu1 %vm6502_vm2, %v31963_v61 }
 0x53d   :  { %25007 = vmatprep.mubr.msk.f32.mxu1 %vm6502_vm2, %v31967_v18 }
 0x540   :  { %25008 = vmatmul.mubr.msk.f32.gmra.mrb[86].mxu1 %vm6502_vm2, %v31971_v23 }
 0x541   :  { %25010 = vmatprep.mubr.msk.f32.mxu1 %vm6502_vm2, %v31975_v57 }
 0x544   :  { %25011 = vmatmul.mubr.msk.f32.gmra.mrb[88].mxu1 %vm6502_vm2, %v31979_v28 }
 0x545   :  { %25013 = vmatprep.mubr.msk.f32.mxu1 %vm6502_vm2, %v31983_v32 }
 0x548   :  { %25014 = vmatmul.mubr.msk.f32.gmra.mrb[90].mxu1 %vm6502_vm2, %v31987_v59 }
 0x549   :  { %25016 = vmatprep.mubr.msk.f32.mxu1 %vm6502_vm2, %v31991_v55 }
 0x54c   :  { %25017 = vmatmul.mubr.msk.f32.gmra.mrb[92].mxu1 %vm6502_vm2, %v31995_v36 }
 0x54d   :  { %25019 = vmatprep.mubr.msk.f32.mxu1 %vm6502_vm2, %v31999_v14 }
 0x550   :  { %25020 = vmatmul.mubr.msk.f32.gmra.mrb[94].mxu1 %vm6502_vm2, %v32003_v48 }
 0x551   :  { %25022 = vmatprep.mubr.msk.f32.mxu1 %vm6502_vm2, %v9448_v54  ;;  %v32101_v54 = vld [vmem:[#allocation2 + $0x3f0] sm:$0xff] }
 0x552   :  { %34980 = vst [vmem:[#allocation80_spill] sm:$0xff] %v32101_v54 }
 0x554   :  { %25023 = vmatmul.mubr.msk.f32.gmra.mrb[96].mxu1 %vm6502_vm2, %v9449_v53  ;;  %v32105_v53 = vld [vmem:[#allocation2 + $0x408] sm:$0xff] }
 0x555   :  { %25025 = vmatprep.mubr.msk.f32.mxu1 %vm6502_vm2, %v32009_v10  ;;  %34981 = vst [vmem:[#allocation81_spill] sm:$0xff] %v32105_v53 }
 0x558   :  { %25026 = vmatmul.mubr.msk.f32.gmra.mrb[98].mxu1 %vm6502_vm2, %v32013_v6 }
 0x559   :  { %25028 = vmatprep.mubr.msk.f32.mxu1 %vm6502_vm2, %v32017_v52 }
 0x55c   :  { %25029 = vmatmul.mubr.msk.f32.gmra.mrb[100].mxu1 %vm6502_vm2, %v32021_v43 }
 0x55d   :  { %25031 = vmatprep.mubr.msk.f32.mxu1 %vm6502_vm2, %v32025_v47 }
 0x560   :  { %25032 = vmatmul.mubr.msk.f32.gmra.mrb[102].mxu1 %vm6502_vm2, %v32029_v50 }
 0x561   :  { %25034 = vmatprep.mubr.msk.f32.mxu1 %vm6502_vm2, %v32033_v56 }
 0x564   :  { %25035 = vmatmul.mubr.msk.f32.gmra.mrb[104].mxu1 %vm6502_vm2, %v32037_v51 }
 0x565   :  { %25037 = vmatprep.mubr.msk.f32.mxu1 %vm6502_vm2, %v32041_v26 }
 0x568   :  { %25038 = vmatmul.mubr.msk.f32.gmra.mrb[106].mxu1 %vm6502_vm2, %v32045_v2 }
 0x569   :  { %25040 = vmatprep.mubr.msk.f32.mxu1 %vm6502_vm2, %v32049_v0 }
 0x56c   :  { %25041 = vmatmul.mubr.msk.f32.gmra.mrb[108].mxu1 %vm6502_vm2, %v32053_v3 }
 0x56d   :  { %25043 = vmatprep.mubr.msk.f32.mxu1 %vm6502_vm2, %v32057_v9 }
 0x570   :  { %25044 = vmatmul.mubr.msk.f32.gmra.mrb[110].mxu1 %vm6502_vm2, %v32061_v22 }
 0x571   :  { %25046 = vmatprep.mubr.msk.f32.mxu1 %vm6502_vm2, %v32065_v62 }
 0x574   :  { %25047 = vmatmul.mubr.msk.f32.gmra.mrb[112].mxu1 %vm6502_vm2, %v32069_v34 }
 0x575   :  { %25049 = vmatprep.mubr.msk.f32.mxu1 %vm6502_vm2, %v32073_v5 }
 0x578   :  { %25050 = vmatmul.mubr.msk.f32.gmra.mrb[114].mxu1 %vm6502_vm2, %v32077_v24  ;;  %v34993_v24 = vld [vmem:[#allocation31_spill] sm:$0xff] }
 0x579   :  { %25052 = vmatprep.mubr.msk.f32.mxu1 %vm6502_vm2, %v32081_v49  ;;  %v34988_v49 = vld [vmem:[#allocation26_spill] sm:$0xff] }
 0x57c   :  { %25053 = vmatmul.mubr.msk.f32.gmra.mrb[116].mxu1 %vm6502_vm2, %v32085_v8  ;;  %v11607_v8 = vld [vmem:[#allocation8 + $0x78] sm:$0xff] }
 0x57d   :  { %25055 = vmatprep.mubr.msk.f32.mxu1 %vm6502_vm2, %v32089_v45  ;;  %v32109_v45 = vld [vmem:[#allocation2 + $0x410] sm:$0xff] }
 0x57e   :  { %34982 = vst [vmem:[#allocation82_spill] sm:$0xff] %v32109_v45 }
 0x580   :  { %25056 = vmatmul.mubr.msk.f32.gmra.mrb[118].mxu1 %vm6502_vm2, %v32093_v60  ;;  %v32113_v60 = vld [vmem:[#allocation2 + $0x428] sm:$0xff] }
 0x581   :  { %25058 = vmatprep.mubr.msk.f32.mxu1 %vm6502_vm2, %v32097_v12  ;;  %34983 = vst [vmem:[#allocation83_spill] sm:$0xff] %v32113_v60  ;;  %v32117_v12 = vld [vmem:[#allocation2 + $0x430] sm:$0xff] }
 0x582   :  { %34984 = vst [vmem:[#allocation84_spill] sm:$0xff] %v32117_v12 }
 0x584   :  { %25059 = vmatmul.mubr.msk.f32.gmra.mrb[120].mxu1 %vm6502_vm2, %v32101_v54  ;;  %v32121_v54 = vld [vmem:[#allocation2 + $0x448] sm:$0xff] }
 0x585   :  { %25061 = vmatprep.mubr.msk.f32.mxu1 %vm6502_vm2, %v32105_v53  ;;  %34985 = vst [vmem:[#allocation85_spill] sm:$0xff] %v32121_v54  ;;  %v32125_v53 = vld [vmem:[#allocation2 + $0x450] sm:$0xff] }
 0x586   :  { %34986 = vst [vmem:[#allocation86_spill] sm:$0xff] %v32125_v53 }
 0x588   :  { %25062 = vmatmul.mubr.msk.f32.gmra.mrb[122].mxu1 %vm6502_vm2, %v32109_v45  ;;  %v34987_v45 = vld [vmem:[#allocation25_spill] sm:$0xff] }
 0x589   :  { %25064 = vmatprep.mubr.msk.f32.mxu1 %vm6502_vm2, %v32113_v60  ;;  %v11606_v60 = vld [vmem:[#allocation8 + $0x70] sm:$0xff] }
 0x58c   :  { %25065 = vmatmul.mubr.msk.f32.gmra.mrb[124].mxu1 %vm6502_vm2, %v32117_v12  ;;  %v32136_v12 = vpack.c.bf16 %v11607_v8, %v11606_v60  ;;  %v34996_v8 = vld [vmem:[#allocation34_spill] sm:$0xff]  ;;  %v34997_v60 = vld [vmem:[#allocation35_spill] sm:$0xff] }
 0x58d   :  { %25067 = vmatprep.mubr.msk.f32.mxu1 %vm6502_vm2, %v32121_v54  ;;  %v34989_v54 = vld [vmem:[#allocation27_spill] sm:$0xff] }
 0x590   :  { %25068 = vmatmul.mubr.msk.f32.gmra.mrb[126].mxu1 %vm6502_vm2, %v32125_v53  ;;  %v34990_v53 = vld [vmem:[#allocation28_spill] sm:$0xff] }
 0x591   :  { %25074 = vmatprep.mubr.msk.f32.mxu1 %vm6502_vm2, %v31495_v19  ;;  %v34991_v19 = vld [vmem:[#allocation29_spill] sm:$0xff] }
 0x594   :  { %25075 = vmatmul.mubr.msk.f32.vlgmr.msra.gmra.mrb[64].mxu1 %vm6502_vm2, %v34987_v45  ;;  %v34992_v45 = vld [vmem:[#allocation30_spill] sm:$0xff] }
 0x595   :  { %25077 = vmatprep.mubr.msk.f32.mxu1 %vm6502_vm2, %v34988_v49  ;;  %26433 = vmatpush3.bf16.msra.mxu1 %v31888_v16  ;;  %v34994_v16 = vld [vmem:[#allocation32_spill] sm:$0xff]  ;;  %v34995_v49 = vld [vmem:[#allocation33_spill] sm:$0xff] }
 0x596   :  { %26435 = vmatprep.subr.bf16.mxu1 %v32136_v12 }
 0x598   :  { %25078 = vmatmul.mubr.msk.f32.gmra.mrb[66].mxu1 %vm6502_vm2, %v34989_v54  ;;  %v34998_v54 = vld [vmem:[#allocation36_spill] sm:$0xff] }
 0x599   :  { %25080 = vmatprep.mubr.msk.f32.mxu1 %vm6502_vm2, %v34990_v53  ;;  %v34999_v53 = vld [vmem:[#allocation37_spill] sm:$0xff] }
 0x59c   :  { %25081 = vmatmul.mubr.msk.f32.gmra.mrb[68].mxu1 %vm6502_vm2, %v34991_v19  ;;  %v35000_v19 = vld [vmem:[#allocation38_spill] sm:$0xff] }
 0x59d   :  { %25083 = vmatprep.mubr.msk.f32.mxu1 %vm6502_vm2, %v34992_v45  ;;  %v35002_v45 = vld [vmem:[#allocation40_spill] sm:$0xff] }
 0x5a0   :  { %25084 = vmatmul.mubr.msk.f32.gmra.mrb[70].mxu1 %vm6502_vm2, %v34993_v24  ;;  %v35001_v24 = vld [vmem:[#allocation39_spill] sm:$0xff] }
 0x5a1   :  { %25086 = vmatprep.mubr.msk.f32.mxu1 %vm6502_vm2, %v34994_v16  ;;  %v35003_v16 = vld [vmem:[#allocation41_spill] sm:$0xff] }
 0x5a4   :  { %25087 = vmatmul.mubr.msk.f32.gmra.mrb[72].mxu1 %vm6502_vm2, %v34995_v49  ;;  %v35004_v49 = vld [vmem:[#allocation42_spill] sm:$0xff] }
 0x5a5   :  { %25089 = vmatprep.mubr.msk.f32.mxu1 %vm6502_vm2, %v34996_v8  ;;  %v35005_v8 = vld [vmem:[#allocation43_spill] sm:$0xff] }
 0x5a8   :  { %25090 = vmatmul.mubr.msk.f32.gmra.mrb[74].mxu1 %vm6502_vm2, %v34997_v60  ;;  %v35006_v60 = vld [vmem:[#allocation44_spill] sm:$0xff] }
 0x5a9   :  { %25092 = vmatprep.mubr.msk.f32.mxu1 %vm6502_vm2, %v34998_v54  ;;  %v35007_v54 = vld [vmem:[#allocation45_spill] sm:$0xff] }
 0x5ac   :  { %25093 = vmatmul.mubr.msk.f32.gmra.mrb[76].mxu1 %vm6502_vm2, %v34999_v53  ;;  %v35008_v53 = vld [vmem:[#allocation46_spill] sm:$0xff] }
 0x5ad   :  { %25095 = vmatprep.mubr.msk.f32.mxu1 %vm6502_vm2, %v35000_v19  ;;  %v35009_v19 = vld [vmem:[#allocation47_spill] sm:$0xff] }
 0x5b0   :  { %25096 = vmatmul.mubr.msk.f32.gmra.mrb[78].mxu1 %vm6502_vm2, %v35001_v24  ;;  %v35010_v24 = vld [vmem:[#allocation48_spill] sm:$0xff] }
 0x5b1   :  { %25098 = vmatprep.mubr.msk.f32.mxu1 %vm6502_vm2, %v35002_v45  ;;  %v35011_v45 = vld [vmem:[#allocation51_spill] sm:$0xff] }
 0x5b4   :  { %25099 = vmatmul.mubr.msk.f32.gmra.mrb[80].mxu1 %vm6502_vm2, %v35003_v16  ;;  %v35012_v16 = vld [vmem:[#allocation52_spill] sm:$0xff] }
 0x5b5   :  { %25101 = vmatprep.mubr.msk.f32.mxu1 %vm6502_vm2, %v35004_v49  ;;  %v35013_v49 = vld [vmem:[#allocation49_spill] sm:$0xff] }
 0x5b8   :  { %25102 = vmatmul.mubr.msk.f32.gmra.mrb[82].mxu1 %vm6502_vm2, %v35005_v8  ;;  %v35014_v8 = vld [vmem:[#allocation50_spill] sm:$0xff] }
 0x5b9   :  { %25104 = vmatprep.mubr.msk.f32.mxu1 %vm6502_vm2, %v35006_v60  ;;  %v35015_v60 = vld [vmem:[#allocation18_spill] sm:$0xff] }
 0x5bc   :  { %25105 = vmatmul.mubr.msk.f32.gmra.mrb[84].mxu1 %vm6502_vm2, %v35007_v54  ;;  %v32193_v54 = vld [vmem:[#allocation2 + $0x209] sm:$0xff] }
 0x5bd   :  { %25107 = vmatprep.mubr.msk.f32.mxu1 %vm6502_vm2, %v35008_v53  ;;  %v32197_v53 = vld [vmem:[#allocation2 + $0x211] sm:$0xff] }
 0x5c0   :  { %25108 = vmatmul.mubr.msk.f32.gmra.mrb[86].mxu1 %vm6502_vm2, %v35009_v19  ;;  %v35016_v19 = vld [vmem:[#allocation19_spill] sm:$0xff] }
 0x5c1   :  { %25110 = vmatprep.mubr.msk.f32.mxu1 %vm6502_vm2, %v35010_v24  ;;  %v35017_v24 = vld [vmem:[#allocation20_spill] sm:$0xff] }
 0x5c4   :  { %25111 = vmatmul.mubr.msk.f32.gmra.mrb[88].mxu1 %vm6502_vm2, %v35011_v45  ;;  %v35018_v45 = vld [vmem:[#allocation53_spill] sm:$0xff] }
 0x5c5   :  { %25113 = vmatprep.mubr.msk.f32.mxu1 %vm6502_vm2, %v35012_v16  ;;  %v35019_v16 = vld [vmem:[#allocation54_spill] sm:$0xff] }
 0x5c8   :  { %25114 = vmatmul.mubr.msk.f32.gmra.mrb[90].mxu1 %vm6502_vm2, %v35013_v49  ;;  %v35020_v49 = vld [vmem:[#allocation55_spill] sm:$0xff] }
 0x5c9   :  { %25116 = vmatprep.mubr.msk.f32.mxu1 %vm6502_vm2, %v35014_v8  ;;  %v35021_v8 = vld [vmem:[#allocation56_spill] sm:$0xff] }
 0x5cc   :  { %25117 = vmatmul.mubr.msk.f32.gmra.mrb[92].mxu1 %vm6502_vm2, %v35015_v60  ;;  %v35022_v60 = vld [vmem:[#allocation57_spill] sm:$0xff] }
 0x5cd   :  { %25119 = vmatprep.mubr.msk.f32.mxu1 %vm6502_vm2, %v32193_v54 }
 0x5d0   :  { %25120 = vmatmul.mubr.msk.f32.gmra.mrb[94].mxu1 %vm6502_vm2, %v32197_v53 }
 0x5d1   :  { %25122 = vmatprep.mubr.msk.f32.mxu1 %vm6502_vm2, %v31621_v63  ;;  %v35023_v63 = vld [vmem:[#allocation58_spill] sm:$0xff] }
 0x5d4   :  { %25123 = vmatmul.mubr.msk.f32.gmra.mrb[96].mxu1 %vm6502_vm2, %v35016_v19  ;;  %v35024_v19 = vld [vmem:[#allocation59_spill] sm:$0xff] }
 0x5d5   :  { %25125 = vmatprep.mubr.msk.f32.mxu1 %vm6502_vm2, %v35017_v24  ;;  %v35025_v24 = vld [vmem:[#allocation60_spill] sm:$0xff] }
 0x5d8   :  { %25126 = vmatmul.mubr.msk.f32.gmra.mrb[98].mxu1 %vm6502_vm2, %v35018_v45  ;;  %v35026_v45 = vld [vmem:[#allocation61_spill] sm:$0xff] }
 0x5d9   :  { %25128 = vmatprep.mubr.msk.f32.mxu1 %vm6502_vm2, %v35019_v16  ;;  %v35027_v16 = vld [vmem:[#allocation62_spill] sm:$0xff] }
 0x5dc   :  { %25129 = vmatmul.mubr.msk.f32.gmra.mrb[100].mxu1 %vm6502_vm2, %v35020_v49  ;;  %v35028_v49 = vld [vmem:[#allocation63_spill] sm:$0xff] }
 0x5dd   :  { %25131 = vmatprep.mubr.msk.f32.mxu1 %vm6502_vm2, %v35021_v8  ;;  %v35029_v8 = vld [vmem:[#allocation64_spill] sm:$0xff] }
 0x5e0   :  { %25132 = vmatmul.mubr.msk.f32.gmra.mrb[102].mxu1 %vm6502_vm2, %v35022_v60  ;;  %v35030_v60 = vld [vmem:[#allocation65_spill] sm:$0xff] }
 0x5e1   :  { %25134 = vmatprep.mubr.msk.f32.mxu1 %vm6502_vm2, %v35023_v63  ;;  %v35031_v63 = vld [vmem:[#allocation66_spill] sm:$0xff] }
 0x5e4   :  { %25135 = vmatmul.mubr.msk.f32.gmra.mrb[104].mxu1 %vm6502_vm2, %v35024_v19  ;;  %v35032_v19 = vld [vmem:[#allocation67_spill] sm:$0xff] }
 0x5e5   :  { %25137 = vmatprep.mubr.msk.f32.mxu1 %vm6502_vm2, %v35025_v24  ;;  %v35033_v24 = vld [vmem:[#allocation68_spill] sm:$0xff] }
 0x5e8   :  { %25138 = vmatmul.mubr.msk.f32.gmra.mrb[106].mxu1 %vm6502_vm2, %v35026_v45  ;;  %v35034_v45 = vld [vmem:[#allocation69_spill] sm:$0xff] }
 0x5e9   :  { %25140 = vmatprep.mubr.msk.f32.mxu1 %vm6502_vm2, %v35027_v16  ;;  %v35035_v16 = vld [vmem:[#allocation70_spill] sm:$0xff] }
 0x5ec   :  { %25141 = vmatmul.mubr.msk.f32.gmra.mrb[108].mxu1 %vm6502_vm2, %v35028_v49  ;;  %v35036_v49 = vld [vmem:[#allocation71_spill] sm:$0xff] }
 0x5ed   :  { %25143 = vmatprep.mubr.msk.f32.mxu1 %vm6502_vm2, %v35029_v8  ;;  %v35037_v8 = vld [vmem:[#allocation72_spill] sm:$0xff] }
 0x5f0   :  { %25144 = vmatmul.mubr.msk.f32.gmra.mrb[110].mxu1 %vm6502_vm2, %v35030_v60  ;;  %v35038_v60 = vld [vmem:[#allocation73_spill] sm:$0xff] }
 0x5f1   :  { %25146 = vmatprep.mubr.msk.f32.mxu1 %vm6502_vm2, %v35031_v63  ;;  %v35039_v63 = vld [vmem:[#allocation74_spill] sm:$0xff] }
 0x5f4   :  { %25147 = vmatmul.mubr.msk.f32.gmra.mrb[112].mxu1 %vm6502_vm2, %v35032_v19  ;;  %v35040_v19 = vld [vmem:[#allocation75_spill] sm:$0xff] }
 0x5f5   :  { %25149 = vmatprep.mubr.msk.f32.mxu1 %vm6502_vm2, %v35033_v24  ;;  %v35041_v24 = vld [vmem:[#allocation76_spill] sm:$0xff] }
 0x5f8   :  { %25150 = vmatmul.mubr.msk.f32.gmra.mrb[114].mxu1 %vm6502_vm2, %v35034_v45  ;;  %v35042_v45 = vld [vmem:[#allocation77_spill] sm:$0xff] }
 0x5f9   :  { %25152 = vmatprep.mubr.msk.f32.mxu1 %vm6502_vm2, %v35035_v16  ;;  %v32261_v16 = vld [vmem:[#allocation2 + $0x449] sm:$0xff] }
 0x5fc   :  { %25153 = vmatmul.mubr.msk.f32.gmra.mrb[116].mxu1 %vm6502_vm2, %v35036_v49  ;;  %v32265_v49 = vld [vmem:[#allocation2 + $0x451] sm:$0xff] }
 0x5fd   :  { %25155 = vmatprep.mubr.msk.f32.mxu1 %vm6502_vm2, %v35037_v8  ;;  %35043 = vst [vmem:[#allocation25_spill] sm:$0xff] %v32265_v49  ;;  %v10833_v8 = vld [vmem:[#allocation2 + $0x47] sm:$0xff] }
 0x600   :  { %25156 = vmatmul.mubr.msk.f32.gmra.mrb[118].mxu1 %vm6502_vm2, %v35038_v60  ;;  %v10834_v60 = vld [vmem:[#allocation2 + $0x4f] sm:$0xff] }
 0x601   :  { %25158 = vmatprep.mubr.msk.f32.mxu1 %vm6502_vm2, %v35039_v63  ;;  %v12314_v63 = vld [vmem:[#allocation8 + $0x80] sm:$0xff] }
 0x604   :  { %25159 = vmatmul.mubr.msk.f32.gmra.mrb[120].mxu1 %vm6502_vm2, %v35040_v19  ;;  %v12315_v19 = vld [vmem:[#allocation8 + $0x88] sm:$0xff] }
 0x605   :  { %25161 = vmatprep.mubr.msk.f32.mxu1 %vm6502_vm2, %v35041_v24  ;;  %v10836_v24 = vld [vmem:[#allocation2 + $0x6f] sm:$0xff] }
 0x608   :  { %25162 = vmatmul.mubr.msk.f32.gmra.mrb[122].mxu1 %vm6502_vm2, %v35042_v45  ;;  %v10837_v45 = vld [vmem:[#allocation2 + $0x87] sm:$0xff] }
 0x609   :  { %25164 = vmatprep.mubr.msk.f32.mxu1 %vm6502_vm2, %v31733_v4  ;;  %v10835_v4 = vld [vmem:[#allocation2 + $0x67] sm:$0xff] }
 0x60c   :  { %25165 = vmatmul.mubr.msk.f32.gmra.mrb[124].mxu1 %vm6502_vm2, %v31737_v17  ;;  %v32273_v17 = vpack.c.bf16 %v12315_v19, %v12314_v63  ;;  %v10843_v63 = vld [vmem:[#allocation2 + $0xe7] sm:$0xff]  ;;  %v10844_v19 = vld [vmem:[#allocation2 + $0xef] sm:$0xff] }
 0x60d   :  { %25167 = vmatprep.mubr.msk.f32.mxu1 %vm6502_vm2, %v32261_v16 }
 0x610   :  { %25168 = vmatmul.mubr.msk.f32.gmra.mrb[126].mxu1 %vm6502_vm2, %v32265_v49  ;;  %v10840_v49 = vld [vmem:[#allocation2 + $0xaf] sm:$0xff] }
 0x611   :  { %25174 = vmatprep.mubr.msk.f32.mxu1 %vm6502_vm2, %v10833_v8  ;;  %v10838_v8 = vld [vmem:[#allocation2 + $0x8f] sm:$0xff] }
 0x614   :  { %25175 = vmatmul.mubr.msk.f32.vlgmr.msra.gmra.mrb[64].mxu1 %vm6502_vm2, %v10834_v60  ;;  %v10839_v60 = vld [vmem:[#allocation2 + $0xa7] sm:$0xff] }
 0x615   :  { %25177 = vmatprep.mubr.msk.f32.mxu1 %vm6502_vm2, %v10835_v4  ;;  %26437 = vmatpush3.bf16.msra.mxu1 %v32136_v12  ;;  %v10841_v12 = vld [vmem:[#allocation2 + $0xc7] sm:$0xff]  ;;  %v10842_v4 = vld [vmem:[#allocation2 + $0xcf] sm:$0xff] }
 0x616   :  { %26439 = vmatprep.subr.bf16.mxu1 %v32273_v17 }
 0x618   :  { %25178 = vmatmul.mubr.msk.f32.gmra.mrb[66].mxu1 %vm6502_vm2, %v10836_v24  ;;  %v10845_v24 = vld [vmem:[#allocation2 + $0x107] sm:$0xff] }
 0x619   :  { %25180 = vmatprep.mubr.msk.f32.mxu1 %vm6502_vm2, %v10837_v45  ;;  %v10846_v45 = vld [vmem:[#allocation2 + $0x10f] sm:$0xff] }
 0x61c   :  { %25181 = vmatmul.mubr.msk.f32.gmra.mrb[68].mxu1 %vm6502_vm2, %v10838_v8  ;;  %v10847_v8 = vld [vmem:[#allocation2 + $0x127] sm:$0xff] }
 0x61d   :  { %25183 = vmatprep.mubr.msk.f32.mxu1 %vm6502_vm2, %v10839_v60  ;;  %v10849_v60 = vld [vmem:[#allocation2 + $0x147] sm:$0xff] }
 0x620   :  { %25184 = vmatmul.mubr.msk.f32.gmra.mrb[70].mxu1 %vm6502_vm2, %v10840_v49  ;;  %v10848_v49 = vld [vmem:[#allocation2 + $0x12f] sm:$0xff] }
 0x621   :  { %25186 = vmatprep.mubr.msk.f32.mxu1 %vm6502_vm2, %v10841_v12  ;;  %v10850_v12 = vld [vmem:[#allocation2 + $0x14f] sm:$0xff] }
 0x624   :  { %25187 = vmatmul.mubr.msk.f32.gmra.mrb[72].mxu1 %vm6502_vm2, %v10842_v4  ;;  %v10851_v4 = vld [vmem:[#allocation2 + $0x167] sm:$0xff] }
 0x625   :  { %25189 = vmatprep.mubr.msk.f32.mxu1 %vm6502_vm2, %v10843_v63  ;;  %v10852_v63 = vld [vmem:[#allocation2 + $0x16f] sm:$0xff] }
 0x628   :  { %25190 = vmatmul.mubr.msk.f32.gmra.mrb[74].mxu1 %vm6502_vm2, %v10844_v19  ;;  %v10853_v19 = vld [vmem:[#allocation2 + $0x187] sm:$0xff] }
 0x629   :  { %25192 = vmatprep.mubr.msk.f32.mxu1 %vm6502_vm2, %v10845_v24  ;;  %v10854_v24 = vld [vmem:[#allocation2 + $0x18f] sm:$0xff] }
 0x62c   :  { %25193 = vmatmul.mubr.msk.f32.gmra.mrb[76].mxu1 %vm6502_vm2, %v10846_v45  ;;  %v10855_v45 = vld [vmem:[#allocation2 + $0x1a7] sm:$0xff] }
 0x62d   :  { %25195 = vmatprep.mubr.msk.f32.mxu1 %vm6502_vm2, %v10847_v8  ;;  %v10856_v8 = vld [vmem:[#allocation2 + $0x1af] sm:$0xff] }
 0x630   :  { %25196 = vmatmul.mubr.msk.f32.gmra.mrb[78].mxu1 %vm6502_vm2, %v10848_v49  ;;  %v10857_v49 = vld [vmem:[#allocation2 + $0x1c7] sm:$0xff] }
 0x631   :  { %25198 = vmatprep.mubr.msk.f32.mxu1 %vm6502_vm2, %v10849_v60  ;;  %v10858_v60 = vld [vmem:[#allocation2 + $0x1cf] sm:$0xff] }
 0x634   :  { %25199 = vmatmul.mubr.msk.f32.gmra.mrb[80].mxu1 %vm6502_vm2, %v10850_v12  ;;  %v10859_v12 = vld [vmem:[#allocation2 + $0x1e7] sm:$0xff] }
 0x635   :  { %25201 = vmatprep.mubr.msk.f32.mxu1 %vm6502_vm2, %v10851_v4  ;;  %v10860_v4 = vld [vmem:[#allocation2 + $0x1ef] sm:$0xff] }
 0x638   :  { %25202 = vmatmul.mubr.msk.f32.gmra.mrb[82].mxu1 %vm6502_vm2, %v10852_v63  ;;  %v10863_v63 = vld [vmem:[#allocation2 + $0x227] sm:$0xff] }
 0x639   :  { %25204 = vmatprep.mubr.msk.f32.mxu1 %vm6502_vm2, %v10853_v19  ;;  %v10864_v19 = vld [vmem:[#allocation2 + $0x22f] sm:$0xff] }
 0x63c   :  { %25205 = vmatmul.mubr.msk.f32.gmra.mrb[84].mxu1 %vm6502_vm2, %v10854_v24  ;;  %v10865_v24 = vld [vmem:[#allocation2 + $0x287] sm:$0xff] }
 0x63d   :  { %25207 = vmatprep.mubr.msk.f32.mxu1 %vm6502_vm2, %v10855_v45  ;;  %v10866_v45 = vld [vmem:[#allocation2 + $0x28f] sm:$0xff] }
 0x640   :  { %25208 = vmatmul.mubr.msk.f32.gmra.mrb[86].mxu1 %vm6502_vm2, %v10856_v8  ;;  %v10867_v8 = vld [vmem:[#allocation2 + $0x2a7] sm:$0xff] }
 0x641   :  { %25210 = vmatprep.mubr.msk.f32.mxu1 %vm6502_vm2, %v10857_v49  ;;  %v10868_v49 = vld [vmem:[#allocation2 + $0x2af] sm:$0xff] }
 0x644   :  { %25211 = vmatmul.mubr.msk.f32.gmra.mrb[88].mxu1 %vm6502_vm2, %v10858_v60  ;;  %v10871_v60 = vld [vmem:[#allocation2 + $0x2e7] sm:$0xff] }
 0x645   :  { %25213 = vmatprep.mubr.msk.f32.mxu1 %vm6502_vm2, %v10859_v12  ;;  %v10872_v12 = vld [vmem:[#allocation2 + $0x2ef] sm:$0xff] }
 0x648   :  { %25214 = vmatmul.mubr.msk.f32.gmra.mrb[90].mxu1 %vm6502_vm2, %v10860_v4  ;;  %v10873_v4 = vld [vmem:[#allocation2 + $0x307] sm:$0xff] }
 0x649   :  { %25216 = vmatprep.mubr.msk.f32.mxu1 %vm6502_vm2, %v31805_v42  ;;  %v10869_v42 = vld [vmem:[#allocation2 + $0x2c7] sm:$0xff] }
 0x64c   :  { %25217 = vmatmul.mubr.msk.f32.gmra.mrb[92].mxu1 %vm6502_vm2, %v31809_v25  ;;  %v10870_v25 = vld [vmem:[#allocation2 + $0x2cf] sm:$0xff] }
 0x64d   :  { %25219 = vmatprep.mubr.msk.f32.mxu1 %vm6502_vm2, %v10863_v63  ;;  %v10874_v63 = vld [vmem:[#allocation2 + $0x30f] sm:$0xff] }
 0x650   :  { %25220 = vmatmul.mubr.msk.f32.gmra.mrb[94].mxu1 %vm6502_vm2, %v10864_v19  ;;  %v10875_v19 = vld [vmem:[#allocation2 + $0x327] sm:$0xff] }
 0x651   :  { %25222 = vmatprep.mubr.msk.f32.mxu1 %vm6502_vm2, %v10865_v24  ;;  %v10876_v24 = vld [vmem:[#allocation2 + $0x32f] sm:$0xff] }
 0x654   :  { %25223 = vmatmul.mubr.msk.f32.gmra.mrb[96].mxu1 %vm6502_vm2, %v10866_v45  ;;  %v10877_v45 = vld [vmem:[#allocation2 + $0x347] sm:$0xff] }
 0x655   :  { %25225 = vmatprep.mubr.msk.f32.mxu1 %vm6502_vm2, %v10867_v8  ;;  %v10878_v8 = vld [vmem:[#allocation2 + $0x34f] sm:$0xff] }
 0x658   :  { %25226 = vmatmul.mubr.msk.f32.gmra.mrb[98].mxu1 %vm6502_vm2, %v10868_v49  ;;  %v10879_v49 = vld [vmem:[#allocation2 + $0x367] sm:$0xff] }
 0x659   :  { %25228 = vmatprep.mubr.msk.f32.mxu1 %vm6502_vm2, %v10869_v42  ;;  %v10880_v42 = vld [vmem:[#allocation2 + $0x36f] sm:$0xff] }
 0x65c   :  { %25229 = vmatmul.mubr.msk.f32.gmra.mrb[100].mxu1 %vm6502_vm2, %v10870_v25  ;;  %v10881_v25 = vld [vmem:[#allocation2 + $0x387] sm:$0xff] }
 0x65d   :  { %25231 = vmatprep.mubr.msk.f32.mxu1 %vm6502_vm2, %v10871_v60  ;;  %v10882_v60 = vld [vmem:[#allocation2 + $0x38f] sm:$0xff] }
 0x660   :  { %25232 = vmatmul.mubr.msk.f32.gmra.mrb[102].mxu1 %vm6502_vm2, %v10872_v12  ;;  %v10883_v12 = vld [vmem:[#allocation2 + $0x3a7] sm:$0xff] }
 0x661   :  { %25234 = vmatprep.mubr.msk.f32.mxu1 %vm6502_vm2, %v10873_v4  ;;  %v10884_v4 = vld [vmem:[#allocation2 + $0x3af] sm:$0xff] }
 0x664   :  { %25235 = vmatmul.mubr.msk.f32.gmra.mrb[104].mxu1 %vm6502_vm2, %v10874_v63  ;;  %v10885_v63 = vld [vmem:[#allocation2 + $0x3c7] sm:$0xff] }
 0x665   :  { %25237 = vmatprep.mubr.msk.f32.mxu1 %vm6502_vm2, %v10875_v19  ;;  %v10886_v19 = vld [vmem:[#allocation2 + $0x3cf] sm:$0xff] }
 0x668   :  { %25238 = vmatmul.mubr.msk.f32.gmra.mrb[106].mxu1 %vm6502_vm2, %v10876_v24  ;;  %v10887_v24 = vld [vmem:[#allocation2 + $0x3e7] sm:$0xff] }
 0x669   :  { %25240 = vmatprep.mubr.msk.f32.mxu1 %vm6502_vm2, %v10877_v45  ;;  %v10888_v45 = vld [vmem:[#allocation2 + $0x3ef] sm:$0xff] }
 0x66c   :  { %25241 = vmatmul.mubr.msk.f32.gmra.mrb[108].mxu1 %vm6502_vm2, %v10878_v8  ;;  %v10889_v8 = vld [vmem:[#allocation2 + $0x407] sm:$0xff] }
 0x66d   :  { %25243 = vmatprep.mubr.msk.f32.mxu1 %vm6502_vm2, %v10879_v49  ;;  %v10890_v49 = vld [vmem:[#allocation2 + $0x40f] sm:$0xff] }
 0x670   :  { %25244 = vmatmul.mubr.msk.f32.gmra.mrb[110].mxu1 %vm6502_vm2, %v10880_v42  ;;  %v10891_v42 = vld [vmem:[#allocation2 + $0x427] sm:$0xff] }
 0x671   :  { %25246 = vmatprep.mubr.msk.f32.mxu1 %vm6502_vm2, %v10881_v25  ;;  %v10892_v25 = vld [vmem:[#allocation2 + $0x42f] sm:$0xff] }
 0x674   :  { %25247 = vmatmul.mubr.msk.f32.gmra.mrb[112].mxu1 %vm6502_vm2, %v10882_v60  ;;  %v10895_v60 = vld [vmem:[#allocation2 + $0x467] sm:$0xff] }
 0x675   :  { %25249 = vmatprep.mubr.msk.f32.mxu1 %vm6502_vm2, %v10883_v12  ;;  %v10896_v12 = vld [vmem:[#allocation2 + $0x46f] sm:$0xff] }
 0x678   :  { %25250 = vmatmul.mubr.msk.f32.gmra.mrb[114].mxu1 %vm6502_vm2, %v10884_v4  ;;  %v12276_v4 = vld [vmem:[#allocation2 + $0x1f1] sm:$0xff] }
 0x679   :  { %25252 = vmatprep.mubr.msk.f32.mxu1 %vm6502_vm2, %v10885_v63  ;;  %v12279_v63 = vld [vmem:[#allocation2 + $0x229] sm:$0xff] }
 0x67c   :  { %25253 = vmatmul.mubr.msk.f32.gmra.mrb[116].mxu1 %vm6502_vm2, %v10886_v19  ;;  %v12280_v19 = vld [vmem:[#allocation2 + $0x231] sm:$0xff] }
 0x67d   :  { %25255 = vmatprep.mubr.msk.f32.mxu1 %vm6502_vm2, %v10887_v24  ;;  %v12281_v24 = vld [vmem:[#allocation2 + $0x289] sm:$0xff] }
 0x680   :  { %25256 = vmatmul.mubr.msk.f32.gmra.mrb[118].mxu1 %vm6502_vm2, %v10888_v45  ;;  %v12282_v45 = vld [vmem:[#allocation2 + $0x291] sm:$0xff] }
 0x681   :  { %25258 = vmatprep.mubr.msk.f32.mxu1 %vm6502_vm2, %v10889_v8  ;;  %v12283_v8 = vld [vmem:[#allocation2 + $0x2a9] sm:$0xff] }
 0x684   :  { %25259 = vmatmul.mubr.msk.f32.gmra.mrb[120].mxu1 %vm6502_vm2, %v10890_v49  ;;  %v12284_v49 = vld [vmem:[#allocation2 + $0x2b1] sm:$0xff] }
 0x685   :  { %25261 = vmatprep.mubr.msk.f32.mxu1 %vm6502_vm2, %v10891_v42  ;;  %v12287_v42 = vld [vmem:[#allocation2 + $0x2e9] sm:$0xff] }
 0x688   :  { %25262 = vmatmul.mubr.msk.f32.gmra.mrb[122].mxu1 %vm6502_vm2, %v10892_v25  ;;  %v12288_v25 = vld [vmem:[#allocation2 + $0x2f1] sm:$0xff] }
 0x689   :  { %25264 = vmatprep.mubr.msk.f32.mxu1 %vm6502_vm2, %v31873_v39  ;;  %v11571_v39 = vld [vmem:[#allocation2 + $0x228] sm:$0xff] }
 0x68c   :  { %25265 = vmatmul.mubr.msk.f32.gmra.mrb[124].mxu1 %vm6502_vm2, %v31877_v38  ;;  %v11572_v38 = vld [vmem:[#allocation2 + $0x230] sm:$0xff] }
 0x68d   :  { %25267 = vmatprep.mubr.msk.f32.mxu1 %vm6502_vm2, %v10895_v60  ;;  %v12289_v60 = vld [vmem:[#allocation2 + $0x309] sm:$0xff] }
 0x690   :  { %25268 = vmatmul.mubr.msk.f32.gmra.mrb[126].mxu1 %vm6502_vm2, %v10896_v12  ;;  %v12290_v12 = vld [vmem:[#allocation2 + $0x311] sm:$0xff] }
 0x691   :  { %25274 = vmatprep.mubr.msk.f32.mxu1 %vm6502_vm2, %v31883_v35  ;;  %v13436_v35 = vld [vmem:[#allocation11 + $0x20] sm:$0xff] }
 0x694   :  { %25275 = vmatmul.mubr.msk.f32.vlgmr.msra.gmra.mrb[64].mxu1 %vm6502_vm2, %v31890_v1  ;;  %v13437_v1 = vld [vmem:[#allocation11 + $0x28] sm:$0xff] }
 0x695   :  { %25277 = vmatprep.mubr.msk.f32.mxu1 %vm6502_vm2, %v31895_v20  ;;  %26441 = vmatpush3.bf16.msra.mxu1 %v32273_v17  ;;  %v26442_v20 = vpack.c.bf16 %v13437_v1, %v13436_v35  ;;  %v12275_v17 = vld [vmem:[#allocation2 + $0x1e9] sm:$0xff]  ;;  %v32513_v1 = vld [vmem:[#allocation2 + $0x351] sm:$0xff] }
 0x696   :  { %v12293_v35 = vld [vmem:[#allocation2 + $0x349] sm:$0xff] }
 0x697   :  { %26443 = vmatprep.subr.bf16.mxu0 %v26442_v20 }
 0x698   :  { %25278 = vmatmul.mubr.msk.f32.gmra.mrb[66].mxu1 %vm6502_vm2, %v31899_v29  ;;  %v35044_v29 = vld [vmem:[#allocation21_spill] sm:$0xff]  ;;  %26445 = vmatpush3.bf16.msra.mxu0 %v26442_v20  ;;  %v35057_v20 = vmov 0.0  }
 0x699   :  { %25280 = vmatprep.mubr.msk.f32.mxu1 %vm6502_vm2, %v31903_v13  ;;  %v35045_v13 = vld [vmem:[#allocation22_spill] sm:$0xff]  ;;  %13100 = vst.msk [vmem:[#allocation3 + $0x30] sm:$0xff] %vm13092_vm4, %v35057_v20  ;;  %13093 = vst.msk [vmem:[#allocation3] sm:$0xff] %vm13092_vm4, %v35057_v20 }
 0x69a   :  { %13094 = vst.msk [vmem:[#allocation3 + $0x8] sm:$0xff] %vm13092_vm4, %v35057_v20  ;;  %13095 = vst.msk [vmem:[#allocation3 + $0x10] sm:$0xff] %vm13092_vm4, %v35057_v20 }
 0x69b   :  { %13098 = vst.msk [vmem:[#allocation3 + $0x20] sm:$0xff] %vm13092_vm4, %v35057_v20  ;;  %13099 = vst.msk [vmem:[#allocation3 + $0x28] sm:$0xff] %vm13092_vm4, %v35057_v20 }
 0x69c   :  { %25281 = vmatmul.mubr.msk.f32.gmra.mrb[68].mxu1 %vm6502_vm2, %v31907_v33  ;;  %v35046_v33 = vld [vmem:[#allocation23_spill] sm:$0xff]  ;;  %13102 = vst.msk [vmem:[#allocation3 + $0x40] sm:$0xff] %vm13092_vm4, %v35057_v20  ;;  %13103 = vst.msk [vmem:[#allocation3 + $0x48] sm:$0xff] %vm13092_vm4, %v35057_v20 }
 0x69d   :  { %25283 = vmatprep.mubr.msk.f32.mxu1 %vm6502_vm2, %v31911_v31  ;;  %v35047_v31 = vld [vmem:[#allocation24_spill] sm:$0xff]  ;;  %13104 = vst.msk [vmem:[#allocation3 + $0x50] sm:$0xff] %vm13092_vm4, %v35057_v20  ;;  %13106 = vst.msk [vmem:[#allocation3 + $0x60] sm:$0xff] %vm13092_vm4, %v35057_v20 }
 0x69e   :  { %13107 = vst.msk [vmem:[#allocation3 + $0x68] sm:$0xff] %vm13092_vm4, %v35057_v20  ;;  %13108 = vst.msk [vmem:[#allocation3 + $0x70] sm:$0xff] %vm13092_vm4, %v35057_v20 }
 0x69f   :  { %13110 = vst.msk [vmem:[#allocation3 + $0x80] sm:$0xff] %vm13092_vm4, %v35057_v20  ;;  %13111 = vst.msk [vmem:[#allocation3 + $0x88] sm:$0xff] %vm13092_vm4, %v35057_v20 }
 0x6a0   :  { %25284 = vmatmul.mubr.msk.f32.gmra.mrb[70].mxu1 %vm6502_vm2, %v31915_v37  ;;  %v35048_v37 = vld [vmem:[#allocation78_spill] sm:$0xff]  ;;  %13112 = vst.msk [vmem:[#allocation3 + $0x90] sm:$0xff] %vm13092_vm4, %v35057_v20  ;;  %13114 = vst.msk [vmem:[#allocation3 + $0xa0] sm:$0xff] %vm13092_vm4, %v35057_v20 }
 0x6a1   :  { %25286 = vmatprep.mubr.msk.f32.mxu1 %vm6502_vm2, %v31919_v40  ;;  %v35049_v40 = vld [vmem:[#allocation79_spill] sm:$0xff]  ;;  %13115 = vst.msk [vmem:[#allocation3 + $0xa8] sm:$0xff] %vm13092_vm4, %v35057_v20  ;;  %13116 = vst.msk [vmem:[#allocation3 + $0xb0] sm:$0xff] %vm13092_vm4, %v35057_v20 }
 0x6a2   :  { %13118 = vst.msk [vmem:[#allocation3 + $0xc0] sm:$0xff] %vm13092_vm4, %v35057_v20  ;;  %13119 = vst.msk [vmem:[#allocation3 + $0xc8] sm:$0xff] %vm13092_vm4, %v35057_v20 }
 0x6a3   :  { %13120 = vst.msk [vmem:[#allocation3 + $0xd0] sm:$0xff] %vm13092_vm4, %v35057_v20  ;;  %13122 = vst.msk [vmem:[#allocation3 + $0xe0] sm:$0xff] %vm13092_vm4, %v35057_v20 }
 0x6a4   :  { %25287 = vmatmul.mubr.msk.f32.gmra.mrb[72].mxu1 %vm6502_vm2, %v31923_v27  ;;  %v35050_v27 = vld [vmem:[#allocation80_spill] sm:$0xff]  ;;  %13123 = vst.msk [vmem:[#allocation3 + $0xe8] sm:$0xff] %vm13092_vm4, %v35057_v20  ;;  %13124 = vst.msk [vmem:[#allocation3 + $0xf0] sm:$0xff] %vm13092_vm4, %v35057_v20 }
 0x6a5   :  { %25289 = vmatprep.mubr.msk.f32.mxu1 %vm6502_vm2, %v31927_v21  ;;  %v35051_v21 = vld [vmem:[#allocation81_spill] sm:$0xff]  ;;  %13126 = vst.msk [vmem:[#allocation3 + $0x100] sm:$0xff] %vm13092_vm4, %v35057_v20  ;;  %13127 = vst.msk [vmem:[#allocation3 + $0x108] sm:$0xff] %vm13092_vm4, %v35057_v20 }
 0x6a6   :  { %13128 = vst.msk [vmem:[#allocation3 + $0x110] sm:$0xff] %vm13092_vm4, %v35057_v20  ;;  %13130 = vst.msk [vmem:[#allocation3 + $0x120] sm:$0xff] %vm13092_vm4, %v35057_v20 }
 0x6a7   :  { %13131 = vst.msk [vmem:[#allocation3 + $0x128] sm:$0xff] %vm13092_vm4, %v35057_v20  ;;  %13132 = vst.msk [vmem:[#allocation3 + $0x130] sm:$0xff] %vm13092_vm4, %v35057_v20 }
 0x6a8   :  { %25290 = vmatmul.mubr.msk.f32.gmra.mrb[74].mxu1 %vm6502_vm2, %v31931_v41  ;;  %v35052_v41 = vld [vmem:[#allocation82_spill] sm:$0xff]  ;;  %13134 = vst.msk [vmem:[#allocation3 + $0x140] sm:$0xff] %vm13092_vm4, %v35057_v20  ;;  %13135 = vst.msk [vmem:[#allocation3 + $0x148] sm:$0xff] %vm13092_vm4, %v35057_v20 }
 0x6a9   :  { %25292 = vmatprep.mubr.msk.f32.mxu1 %vm6502_vm2, %v31935_v44  ;;  %v35053_v44 = vld [vmem:[#allocation83_spill] sm:$0xff]  ;;  %13136 = vst.msk [vmem:[#allocation3 + $0x150] sm:$0xff] %vm13092_vm4, %v35057_v20  ;;  %13138 = vst.msk [vmem:[#allocation3 + $0x160] sm:$0xff] %vm13092_vm4, %v35057_v20 }
 0x6aa   :  { %13139 = vst.msk [vmem:[#allocation3 + $0x168] sm:$0xff] %vm13092_vm4, %v35057_v20  ;;  %13140 = vst.msk [vmem:[#allocation3 + $0x170] sm:$0xff] %vm13092_vm4, %v35057_v20 }
 0x6ab   :  { %13142 = vst.msk [vmem:[#allocation3 + $0x180] sm:$0xff] %vm13092_vm4, %v35057_v20  ;;  %13143 = vst.msk [vmem:[#allocation3 + $0x188] sm:$0xff] %vm13092_vm4, %v35057_v20 }
 0x6ac   :  { %25293 = vmatmul.mubr.msk.f32.gmra.mrb[76].mxu1 %vm6502_vm2, %v31939_v46  ;;  %v35054_v46 = vld [vmem:[#allocation84_spill] sm:$0xff]  ;;  %13144 = vst.msk [vmem:[#allocation3 + $0x190] sm:$0xff] %vm13092_vm4, %v35057_v20  ;;  %13146 = vst.msk [vmem:[#allocation3 + $0x1a0] sm:$0xff] %vm13092_vm4, %v35057_v20 }
 0x6ad   :  { %25295 = vmatprep.mubr.msk.f32.mxu1 %vm6502_vm2, %v31943_v30  ;;  %v35055_v30 = vld [vmem:[#allocation85_spill] sm:$0xff]  ;;  %13147 = vst.msk [vmem:[#allocation3 + $0x1a8] sm:$0xff] %vm13092_vm4, %v35057_v20  ;;  %13148 = vst.msk [vmem:[#allocation3 + $0x1b0] sm:$0xff] %vm13092_vm4, %v35057_v20 }
 0x6ae   :  { %13150 = vst.msk [vmem:[#allocation3 + $0x1c0] sm:$0xff] %vm13092_vm4, %v35057_v20  ;;  %13151 = vst.msk [vmem:[#allocation3 + $0x1c8] sm:$0xff] %vm13092_vm4, %v35057_v20 }
 0x6af   :  { %13152 = vst.msk [vmem:[#allocation3 + $0x1d0] sm:$0xff] %vm13092_vm4, %v35057_v20  ;;  %13154 = vst.msk [vmem:[#allocation3 + $0x1e0] sm:$0xff] %vm13092_vm4, %v35057_v20 }
 0x6b0   :  { %25296 = vmatmul.mubr.msk.f32.gmra.mrb[78].mxu1 %vm6502_vm2, %v31947_v58  ;;  %v11603_v58 = vld [vmem:[#allocation2 + $0x468] sm:$0xff]  ;;  %13155 = vst.msk [vmem:[#allocation3 + $0x1e8] sm:$0xff] %vm13092_vm4, %v35057_v20  ;;  %13156 = vst.msk [vmem:[#allocation3 + $0x1f0] sm:$0xff] %vm13092_vm4, %v35057_v20 }
 0x6b1   :  { %25298 = vmatprep.mubr.msk.f32.mxu1 %vm6502_vm2, %v31951_v7  ;;  %v35056_v7 = vld [vmem:[#allocation86_spill] sm:$0xff]  ;;  %13158 = vst.msk [vmem:[#allocation3 + $0x200] sm:$0xff] %vm13092_vm4, %v35057_v20  ;;  %13159 = vst.msk [vmem:[#allocation3 + $0x208] sm:$0xff] %vm13092_vm4, %v35057_v20 }
 0x6b2   :  { %13160 = vst.msk [vmem:[#allocation3 + $0x210] sm:$0xff] %vm13092_vm4, %v35057_v20  ;;  %13162 = vst.msk [vmem:[#allocation3 + $0x220] sm:$0xff] %vm13092_vm4, %v35057_v20 }
 0x6b3   :  { %13163 = vst.msk [vmem:[#allocation3 + $0x228] sm:$0xff] %vm13092_vm4, %v35057_v20  ;;  %13164 = vst.msk [vmem:[#allocation3 + $0x230] sm:$0xff] %vm13092_vm4, %v35057_v20 }
 0x6b4   :  { %25299 = vmatmul.mubr.msk.f32.gmra.mrb[80].mxu1 %vm6502_vm2, %v31955_v11  ;;  %v11604_v11 = vld [vmem:[#allocation2 + $0x470] sm:$0xff]  ;;  %13166 = vst.msk [vmem:[#allocation3 + $0x240] sm:$0xff] %vm13092_vm4, %v35057_v20  ;;  %13167 = vst.msk [vmem:[#allocation3 + $0x248] sm:$0xff] %vm13092_vm4, %v35057_v20 }
 0x6b5   :  { %25301 = vmatprep.mubr.msk.f32.mxu1 %vm6502_vm2, %v31959_v15  ;;  %v12249_v15 = vld [vmem:[#allocation2 + $0x49] sm:$0xff]  ;;  %13168 = vst.msk [vmem:[#allocation3 + $0x250] sm:$0xff] %vm13092_vm4, %v35057_v20  ;;  %13170 = vst.msk [vmem:[#allocation3 + $0x260] sm:$0xff] %vm13092_vm4, %v35057_v20 }
 0x6b6   :  { %13171 = vst.msk [vmem:[#allocation3 + $0x268] sm:$0xff] %vm13092_vm4, %v35057_v20  ;;  %13172 = vst.msk [vmem:[#allocation3 + $0x270] sm:$0xff] %vm13092_vm4, %v35057_v20 }
 0x6b7   :  { %13174 = vst.msk [vmem:[#allocation3 + $0x280] sm:$0xff] %vm13092_vm4, %v35057_v20  ;;  %13175 = vst.msk [vmem:[#allocation3 + $0x288] sm:$0xff] %vm13092_vm4, %v35057_v20 }
 0x6b8   :  { %25302 = vmatmul.mubr.msk.f32.gmra.mrb[82].mxu1 %vm6502_vm2, %v31963_v61  ;;  %v13438_v61 = vld [vmem:[#allocation11 + $0x30] sm:$0xff]  ;;  %13176 = vst.msk [vmem:[#allocation3 + $0x290] sm:$0xff] %vm13092_vm4, %v35057_v20  ;;  %13178 = vst.msk [vmem:[#allocation3 + $0x2a0] sm:$0xff] %vm13092_vm4, %v35057_v20 }
 0x6b9   :  { %25304 = vmatprep.mubr.msk.f32.mxu1 %vm6502_vm2, %v31967_v18  ;;  %v13439_v18 = vld [vmem:[#allocation11 + $0x38] sm:$0xff]  ;;  %13179 = vst.msk [vmem:[#allocation3 + $0x2a8] sm:$0xff] %vm13092_vm4, %v35057_v20  ;;  %13180 = vst.msk [vmem:[#allocation3 + $0x2b0] sm:$0xff] %vm13092_vm4, %v35057_v20 }
 0x6ba   :  { %13182 = vst.msk [vmem:[#allocation3 + $0x2c0] sm:$0xff] %vm13092_vm4, %v35057_v20  ;;  %13183 = vst.msk [vmem:[#allocation3 + $0x2c8] sm:$0xff] %vm13092_vm4, %v35057_v20 }
 0x6bb   :  { %13184 = vst.msk [vmem:[#allocation3 + $0x2d0] sm:$0xff] %vm13092_vm4, %v35057_v20  ;;  %13186 = vst.msk [vmem:[#allocation3 + $0x2e0] sm:$0xff] %vm13092_vm4, %v35057_v20 }
 0x6bc   :  { %25305 = vmatmul.mubr.msk.f32.gmra.mrb[84].mxu1 %vm6502_vm2, %v31971_v23  ;;  %v26446_v23 = vpack.c.bf16 %v13439_v18, %v13438_v61  ;;  %13187 = vst.msk [vmem:[#allocation3 + $0x2e8] sm:$0xff] %vm13092_vm4, %v35057_v20  ;;  %13188 = vst.msk [vmem:[#allocation3 + $0x2f0] sm:$0xff] %vm13092_vm4, %v35057_v20  ;;  %v12306_v61 = vld [vmem:[#allocation2 + $0x411] sm:$0xff]  ;;  %v12307_v18 = vld [vmem:[#allocation2 + $0x429] sm:$0xff] }
 0x6bd   :  { %25307 = vmatprep.mubr.msk.f32.mxu1 %vm6502_vm2, %v31975_v57  ;;  %v12250_v57 = vld [vmem:[#allocation2 + $0x51] sm:$0xff]  ;;  %13190 = vst.msk [vmem:[#allocation3 + $0x300] sm:$0xff] %vm13092_vm4, %v35057_v20  ;;  %13191 = vst.msk [vmem:[#allocation3 + $0x308] sm:$0xff] %vm13092_vm4, %v35057_v20 }
 0x6be   :  { %26447 = vmatprep.subr.bf16.mxu0 %v26446_v23  ;;  %13192 = vst.msk [vmem:[#allocation3 + $0x310] sm:$0xff] %vm13092_vm4, %v35057_v20  ;;  %13194 = vst.msk [vmem:[#allocation3 + $0x320] sm:$0xff] %vm13092_vm4, %v35057_v20 }
 0x6bf   :  { %26449 = vmatpush3.bf16.msra.mxu0 %v26446_v23  ;;  %13195 = vst.msk [vmem:[#allocation3 + $0x328] sm:$0xff] %vm13092_vm4, %v35057_v20  ;;  %13196 = vst.msk [vmem:[#allocation3 + $0x330] sm:$0xff] %vm13092_vm4, %v35057_v20  ;;  %v12308_v23 = vld [vmem:[#allocation2 + $0x431] sm:$0xff] }
 0x6c0   :  { %25308 = vmatmul.mubr.msk.f32.gmra.mrb[86].mxu1 %vm6502_vm2, %v31979_v28  ;;  %v12251_v28 = vld [vmem:[#allocation2 + $0x69] sm:$0xff]  ;;  %13198 = vst.msk [vmem:[#allocation3 + $0x340] sm:$0xff] %vm13092_vm4, %v35057_v20  ;;  %13199 = vst.msk [vmem:[#allocation3 + $0x348] sm:$0xff] %vm13092_vm4, %v35057_v20 }
 0x6c1   :  { %25310 = vmatprep.mubr.msk.f32.mxu1 %vm6502_vm2, %v31983_v32  ;;  %v12252_v32 = vld [vmem:[#allocation2 + $0x71] sm:$0xff]  ;;  %13200 = vst.msk [vmem:[#allocation3 + $0x350] sm:$0xff] %vm13092_vm4, %v35057_v20  ;;  %13202 = vst.msk [vmem:[#allocation3 + $0x360] sm:$0xff] %vm13092_vm4, %v35057_v20 }
 0x6c2   :  { %13203 = vst.msk [vmem:[#allocation3 + $0x368] sm:$0xff] %vm13092_vm4, %v35057_v20  ;;  %13204 = vst.msk [vmem:[#allocation3 + $0x370] sm:$0xff] %vm13092_vm4, %v35057_v20 }
 0x6c3   :  { %13206 = vst.msk [vmem:[#allocation3 + $0x380] sm:$0xff] %vm13092_vm4, %v35057_v20  ;;  %13207 = vst.msk [vmem:[#allocation3 + $0x388] sm:$0xff] %vm13092_vm4, %v35057_v20 }
 0x6c4   :  { %25311 = vmatmul.mubr.msk.f32.gmra.mrb[88].mxu1 %vm6502_vm2, %v31987_v59  ;;  %v12253_v59 = vld [vmem:[#allocation2 + $0x89] sm:$0xff]  ;;  %13208 = vst.msk [vmem:[#allocation3 + $0x390] sm:$0xff] %vm13092_vm4, %v35057_v20  ;;  %13210 = vst.msk [vmem:[#allocation3 + $0x3a0] sm:$0xff] %vm13092_vm4, %v35057_v20 }
 0x6c5   :  { %25313 = vmatprep.mubr.msk.f32.mxu1 %vm6502_vm2, %v31991_v55  ;;  %v12254_v55 = vld [vmem:[#allocation2 + $0x91] sm:$0xff]  ;;  %13211 = vst.msk [vmem:[#allocation3 + $0x3a8] sm:$0xff] %vm13092_vm4, %v35057_v20  ;;  %13212 = vst.msk [vmem:[#allocation3 + $0x3b0] sm:$0xff] %vm13092_vm4, %v35057_v20 }
 0x6c6   :  { %13214 = vst.msk [vmem:[#allocation3 + $0x3c0] sm:$0xff] %vm13092_vm4, %v35057_v20  ;;  %13215 = vst.msk [vmem:[#allocation3 + $0x3c8] sm:$0xff] %vm13092_vm4, %v35057_v20 }
 0x6c7   :  { %13216 = vst.msk [vmem:[#allocation3 + $0x3d0] sm:$0xff] %vm13092_vm4, %v35057_v20  ;;  %13218 = vst.msk [vmem:[#allocation3 + $0x3e0] sm:$0xff] %vm13092_vm4, %v35057_v20 }
 0x6c8   :  { %25314 = vmatmul.mubr.msk.f32.gmra.mrb[90].mxu1 %vm6502_vm2, %v31995_v36  ;;  %v12255_v36 = vld [vmem:[#allocation2 + $0xa9] sm:$0xff]  ;;  %13219 = vst.msk [vmem:[#allocation3 + $0x3e8] sm:$0xff] %vm13092_vm4, %v35057_v20  ;;  %13220 = vst.msk [vmem:[#allocation3 + $0x3f0] sm:$0xff] %vm13092_vm4, %v35057_v20 }
 0x6c9   :  { %25316 = vmatprep.mubr.msk.f32.mxu1 %vm6502_vm2, %v31999_v14  ;;  %v12256_v14 = vld [vmem:[#allocation2 + $0xb1] sm:$0xff]  ;;  %13222 = vst.msk [vmem:[#allocation3 + $0x400] sm:$0xff] %vm13092_vm4, %v35057_v20  ;;  %13223 = vst.msk [vmem:[#allocation3 + $0x408] sm:$0xff] %vm13092_vm4, %v35057_v20 }
 0x6ca   :  { %13224 = vst.msk [vmem:[#allocation3 + $0x410] sm:$0xff] %vm13092_vm4, %v35057_v20  ;;  %13226 = vst.msk [vmem:[#allocation3 + $0x420] sm:$0xff] %vm13092_vm4, %v35057_v20 }
 0x6cb   :  { %13227 = vst.msk [vmem:[#allocation3 + $0x428] sm:$0xff] %vm13092_vm4, %v35057_v20  ;;  %13228 = vst.msk [vmem:[#allocation3 + $0x430] sm:$0xff] %vm13092_vm4, %v35057_v20 }
 0x6cc   :  { %25317 = vmatmul.mubr.msk.f32.gmra.mrb[92].mxu1 %vm6502_vm2, %v32003_v48  ;;  %v12257_v48 = vld [vmem:[#allocation2 + $0xc9] sm:$0xff]  ;;  %13230 = vst.msk [vmem:[#allocation3 + $0x440] sm:$0xff] %vm13092_vm4, %v35057_v20  ;;  %13231 = vst.msk [vmem:[#allocation3 + $0x448] sm:$0xff] %vm13092_vm4, %v35057_v20 }
 0x6cd   :  { %25319 = vmatprep.mubr.msk.f32.mxu1 %vm6502_vm2, %v11571_v39  ;;  %v12291_v39 = vld [vmem:[#allocation2 + $0x329] sm:$0xff]  ;;  %13232 = vst.msk [vmem:[#allocation3 + $0x450] sm:$0xff] %vm13092_vm4, %v35057_v20  ;;  %13234 = vst.msk [vmem:[#allocation3 + $0x460] sm:$0xff] %vm13092_vm4, %v35057_v20 }
 0x6ce   :  { %13235 = vst.msk [vmem:[#allocation3 + $0x468] sm:$0xff] %vm13092_vm4, %v35057_v20  ;;  %13236 = vst.msk [vmem:[#allocation3 + $0x470] sm:$0xff] %vm13092_vm4, %v35057_v20 }
 0x6cf   :  { %13097 = vst.msk [vmem:[#allocation3 + $0x18] sm:$0x1] %vm13096_vm5, %v35057_v20  ;;  %13101 = vst.msk [vmem:[#allocation3 + $0x38] sm:$0x1] %vm13096_vm5, %v35057_v20 }
 0x6d0   :  { %25320 = vmatmul.mubr.msk.f32.gmra.mrb[94].mxu1 %vm6502_vm2, %v11572_v38  ;;  %v12292_v38 = vld [vmem:[#allocation2 + $0x331] sm:$0xff]  ;;  %13105 = vst.msk [vmem:[#allocation3 + $0x58] sm:$0x1] %vm13096_vm5, %v35057_v20  ;;  %13109 = vst.msk [vmem:[#allocation3 + $0x78] sm:$0x1] %vm13096_vm5, %v35057_v20 }
 0x6d1   :  { %25322 = vmatprep.mubr.msk.f32.mxu1 %vm6502_vm2, %v32009_v10  ;;  %v12258_v10 = vld [vmem:[#allocation2 + $0xd1] sm:$0xff]  ;;  %13113 = vst.msk [vmem:[#allocation3 + $0x98] sm:$0x1] %vm13096_vm5, %v35057_v20  ;;  %13117 = vst.msk [vmem:[#allocation3 + $0xb8] sm:$0x1] %vm13096_vm5, %v35057_v20 }
 0x6d2   :  { %13121 = vst.msk [vmem:[#allocation3 + $0xd8] sm:$0x1] %vm13096_vm5, %v35057_v20  ;;  %13125 = vst.msk [vmem:[#allocation3 + $0xf8] sm:$0x1] %vm13096_vm5, %v35057_v20 }
 0x6d3   :  { %13129 = vst.msk [vmem:[#allocation3 + $0x118] sm:$0x1] %vm13096_vm5, %v35057_v20  ;;  %13133 = vst.msk [vmem:[#allocation3 + $0x138] sm:$0x1] %vm13096_vm5, %v35057_v20 }
 0x6d4   :  { %25323 = vmatmul.mubr.msk.f32.gmra.mrb[96].mxu1 %vm6502_vm2, %v32013_v6  ;;  %v12259_v6 = vld [vmem:[#allocation2 + $0xe9] sm:$0xff]  ;;  %13137 = vst.msk [vmem:[#allocation3 + $0x158] sm:$0x1] %vm13096_vm5, %v35057_v20  ;;  %13141 = vst.msk [vmem:[#allocation3 + $0x178] sm:$0x1] %vm13096_vm5, %v35057_v20 }
 0x6d5   :  { %25325 = vmatprep.mubr.msk.f32.mxu1 %vm6502_vm2, %v32017_v52  ;;  %v12260_v52 = vld [vmem:[#allocation2 + $0xf1] sm:$0xff]  ;;  %13145 = vst.msk [vmem:[#allocation3 + $0x198] sm:$0x1] %vm13096_vm5, %v35057_v20  ;;  %13149 = vst.msk [vmem:[#allocation3 + $0x1b8] sm:$0x1] %vm13096_vm5, %v35057_v20 }
 0x6d6   :  { %13153 = vst.msk [vmem:[#allocation3 + $0x1d8] sm:$0x1] %vm13096_vm5, %v35057_v20  ;;  %13157 = vst.msk [vmem:[#allocation3 + $0x1f8] sm:$0x1] %vm13096_vm5, %v35057_v20 }
 0x6d7   :  { %13161 = vst.msk [vmem:[#allocation3 + $0x218] sm:$0x1] %vm13096_vm5, %v35057_v20  ;;  %13165 = vst.msk [vmem:[#allocation3 + $0x238] sm:$0x1] %vm13096_vm5, %v35057_v20 }
 0x6d8   :  { %25326 = vmatmul.mubr.msk.f32.gmra.mrb[98].mxu1 %vm6502_vm2, %v32021_v43  ;;  %v12261_v43 = vld [vmem:[#allocation2 + $0x109] sm:$0xff]  ;;  %13169 = vst.msk [vmem:[#allocation3 + $0x258] sm:$0x1] %vm13096_vm5, %v35057_v20  ;;  %13173 = vst.msk [vmem:[#allocation3 + $0x278] sm:$0x1] %vm13096_vm5, %v35057_v20 }
 0x6d9   :  { %25328 = vmatprep.mubr.msk.f32.mxu1 %vm6502_vm2, %v32025_v47  ;;  %v12262_v47 = vld [vmem:[#allocation2 + $0x111] sm:$0xff]  ;;  %13177 = vst.msk [vmem:[#allocation3 + $0x298] sm:$0x1] %vm13096_vm5, %v35057_v20  ;;  %13181 = vst.msk [vmem:[#allocation3 + $0x2b8] sm:$0x1] %vm13096_vm5, %v35057_v20 }
 0x6da   :  { %13185 = vst.msk [vmem:[#allocation3 + $0x2d8] sm:$0x1] %vm13096_vm5, %v35057_v20  ;;  %13189 = vst.msk [vmem:[#allocation3 + $0x2f8] sm:$0x1] %vm13096_vm5, %v35057_v20 }
 0x6db   :  { %13193 = vst.msk [vmem:[#allocation3 + $0x318] sm:$0x1] %vm13096_vm5, %v35057_v20  ;;  %13197 = vst.msk [vmem:[#allocation3 + $0x338] sm:$0x1] %vm13096_vm5, %v35057_v20 }
 0x6dc   :  { %25329 = vmatmul.mubr.msk.f32.gmra.mrb[100].mxu1 %vm6502_vm2, %v32029_v50  ;;  %v12263_v50 = vld [vmem:[#allocation2 + $0x129] sm:$0xff]  ;;  %13201 = vst.msk [vmem:[#allocation3 + $0x358] sm:$0x1] %vm13096_vm5, %v35057_v20  ;;  %13205 = vst.msk [vmem:[#allocation3 + $0x378] sm:$0x1] %vm13096_vm5, %v35057_v20 }
 0x6dd   :  { %25331 = vmatprep.mubr.msk.f32.mxu1 %vm6502_vm2, %v32033_v56  ;;  %v12264_v56 = vld [vmem:[#allocation2 + $0x131] sm:$0xff]  ;;  %13209 = vst.msk [vmem:[#allocation3 + $0x398] sm:$0x1] %vm13096_vm5, %v35057_v20  ;;  %13213 = vst.msk [vmem:[#allocation3 + $0x3b8] sm:$0x1] %vm13096_vm5, %v35057_v20 }
 0x6de   :  { %13217 = vst.msk [vmem:[#allocation3 + $0x3d8] sm:$0x1] %vm13096_vm5, %v35057_v20  ;;  %13221 = vst.msk [vmem:[#allocation3 + $0x3f8] sm:$0x1] %vm13096_vm5, %v35057_v20 }
 0x6df   :  { %13225 = vst.msk [vmem:[#allocation3 + $0x418] sm:$0x1] %vm13096_vm5, %v35057_v20  ;;  %13229 = vst.msk [vmem:[#allocation3 + $0x438] sm:$0x1] %vm13096_vm5, %v35057_v20 }
 0x6e0   :  { %25332 = vmatmul.mubr.msk.f32.gmra.mrb[102].mxu1 %vm6502_vm2, %v32037_v51  ;;  %v12265_v51 = vld [vmem:[#allocation2 + $0x149] sm:$0xff]  ;;  %13233 = vst.msk [vmem:[#allocation3 + $0x458] sm:$0x1] %vm13096_vm5, %v35057_v20  ;;  %13237 = vst.msk [vmem:[#allocation3 + $0x478] sm:$0x1] %vm13096_vm5, %v35057_v20 }
 0x6e1   :  { %25334 = vmatprep.mubr.msk.f32.mxu1 %vm6502_vm2, %v32041_v26  ;;  %v12266_v26 = vld [vmem:[#allocation2 + $0x151] sm:$0xff] }
 0x6e4   :  { %25335 = vmatmul.mubr.msk.f32.gmra.mrb[104].mxu1 %vm6502_vm2, %v32045_v2  ;;  %v12267_v2 = vld [vmem:[#allocation2 + $0x169] sm:$0xff] }
 0x6e5   :  { %25337 = vmatprep.mubr.msk.f32.mxu1 %vm6502_vm2, %v32049_v0  ;;  %v12268_v0 = vld [vmem:[#allocation2 + $0x171] sm:$0xff] }
 0x6e8   :  { %25338 = vmatmul.mubr.msk.f32.gmra.mrb[106].mxu1 %vm6502_vm2, %v32053_v3  ;;  %v12269_v3 = vld [vmem:[#allocation2 + $0x189] sm:$0xff] }
 0x6e9   :  { %25340 = vmatprep.mubr.msk.f32.mxu1 %vm6502_vm2, %v32057_v9  ;;  %v12270_v9 = vld [vmem:[#allocation2 + $0x191] sm:$0xff] }
 0x6ec   :  { %25341 = vmatmul.mubr.msk.f32.gmra.mrb[108].mxu1 %vm6502_vm2, %v32061_v22  ;;  %v12271_v22 = vld [vmem:[#allocation2 + $0x1a9] sm:$0xff] }
 0x6ed   :  { %25343 = vmatprep.mubr.msk.f32.mxu1 %vm6502_vm2, %v32065_v62  ;;  %v12272_v62 = vld [vmem:[#allocation2 + $0x1b1] sm:$0xff] }
 0x6f0   :  { %25344 = vmatmul.mubr.msk.f32.gmra.mrb[110].mxu1 %vm6502_vm2, %v32069_v34  ;;  %v12273_v34 = vld [vmem:[#allocation2 + $0x1c9] sm:$0xff] }
 0x6f1   :  { %25346 = vmatprep.mubr.msk.f32.mxu1 %vm6502_vm2, %v32073_v5  ;;  %v12274_v5 = vld [vmem:[#allocation2 + $0x1d1] sm:$0xff] }
 0x6f4   :  { %25347 = vmatmul.mubr.msk.f32.gmra.mrb[112].mxu1 %vm6502_vm2, %v35044_v29  ;;  %v12295_v29 = vld [vmem:[#allocation2 + $0x369] sm:$0xff] }
 0x6f5   :  { %25349 = vmatprep.mubr.msk.f32.mxu1 %vm6502_vm2, %v35045_v13  ;;  %v12296_v13 = vld [vmem:[#allocation2 + $0x371] sm:$0xff] }
 0x6f8   :  { %25350 = vmatmul.mubr.msk.f32.gmra.mrb[114].mxu1 %vm6502_vm2, %v35046_v33  ;;  %v12297_v33 = vld [vmem:[#allocation2 + $0x389] sm:$0xff] }
 0x6f9   :  { %25352 = vmatprep.mubr.msk.f32.mxu1 %vm6502_vm2, %v35047_v31  ;;  %v12298_v31 = vld [vmem:[#allocation2 + $0x391] sm:$0xff] }
 0x6fc   :  { %25353 = vmatmul.mubr.msk.f32.gmra.mrb[116].mxu1 %vm6502_vm2, %v35048_v37  ;;  %v12299_v37 = vld [vmem:[#allocation2 + $0x3a9] sm:$0xff] }
 0x6fd   :  { %25355 = vmatprep.mubr.msk.f32.mxu1 %vm6502_vm2, %v35049_v40  ;;  %v13371_v40 = vld [vmem:[#allocation3 + $0x8] sm:$0xff] }
 0x6fe   :  { %25478 = vmatprep.mubr.msk.f32.mxu0 %vm13092_vm4, %v13371_v40 }
 0x700   :  { %25356 = vmatmul.mubr.msk.f32.gmra.mrb[118].mxu1 %vm6502_vm2, %v35050_v27  ;;  %v13372_v27 = vld [vmem:[#allocation3 + $0x10] sm:$0xff] }
 0x701   :  { %25358 = vmatprep.mubr.msk.f32.mxu1 %vm6502_vm2, %v35051_v21  ;;  %v13367_v21 = vld [vmem:[#allocation11] sm:$0xff]  ;;  %25479 = vmatmul.mubr.msk.f32.vlgmr.msra.gmra.mrb[64].mxu0 %vm13092_vm4, %v13372_v27 }
 0x704   :  { %25359 = vmatmul.mubr.msk.f32.gmra.mrb[120].mxu1 %vm6502_vm2, %v35052_v41  ;;  %v13368_v41 = vld [vmem:[#allocation11 + $0x8] sm:$0xff] }
 0x705   :  { %25361 = vmatprep.mubr.msk.f32.mxu1 %vm6502_vm2, %v35053_v44  ;;  %v12300_v44 = vld [vmem:[#allocation2 + $0x3b1] sm:$0xff] }
 0x708   :  { %25362 = vmatmul.mubr.msk.f32.gmra.mrb[122].mxu1 %vm6502_vm2, %v35054_v46  ;;  %v26450_v46 = vpack.c.bf16 %v13368_v41, %v13367_v21 }
 0x709   :  { %25364 = vmatprep.mubr.msk.f32.mxu1 %vm6502_vm2, %v35055_v30  ;;  %v12301_v30 = vld [vmem:[#allocation2 + $0x3c9] sm:$0xff] }
 0x70a   :  { %26451 = vmatprep.subr.bf16.mxu0 %v26450_v46 }
 0x70b   :  { %26453 = vmatpush3.bf16.msra.mxu0 %v26450_v46 }
 0x70c   :  { %25365 = vmatmul.mubr.msk.f32.gmra.mrb[124].mxu1 %vm6502_vm2, %v35056_v7  ;;  %v12303_v7 = vld [vmem:[#allocation2 + $0x3e9] sm:$0xff] }
 0x70d   :  { %25367 = vmatprep.mubr.msk.f32.mxu1 %vm6502_vm2, %v11603_v58  ;;  %v12302_v58 = vld [vmem:[#allocation2 + $0x3d1] sm:$0xff] }
 0x710   :  { %25368 = vmatmul.mubr.msk.f32.gmra.mrb[126].mxu1 %vm6502_vm2, %v11604_v11  ;;  %v12304_v11 = vld [vmem:[#allocation2 + $0x3f1] sm:$0xff] }
 0x711   :  { %25374 = vmatprep.mubr.msk.f32.mxu1 %vm6502_vm2, %v12249_v15  ;;  %v12305_v15 = vld [vmem:[#allocation2 + $0x409] sm:$0xff] }
 0x714   :  { %25375 = vmatmul.mubr.msk.f32.vlgmr.msra.gmra.mrb[64].mxu1 %vm6502_vm2, %v12250_v57  ;;  %v12311_v57 = vld [vmem:[#allocation2 + $0x469] sm:$0xff] }
 0x715   :  { %25377 = vmatprep.mubr.msk.f32.mxu1 %vm6502_vm2, %v12251_v28  ;;  %v35058_v28 = vld [vmem:[#allocation25_spill] sm:$0xff] }
 0x718   :  { %25378 = vmatmul.mubr.msk.f32.gmra.mrb[66].mxu1 %vm6502_vm2, %v12252_v32  ;;  %v12312_v32 = vld [vmem:[#allocation2 + $0x471] sm:$0xff] }
 0x719   :  { %25380 = vmatprep.mubr.msk.f32.mxu1 %vm6502_vm2, %v12253_v59  ;;  %v13369_v59 = vld [vmem:[#allocation11 + $0x10] sm:$0xff] }
 0x71c   :  { %25381 = vmatmul.mubr.msk.f32.gmra.mrb[68].mxu1 %vm6502_vm2, %v12254_v55  ;;  %v13370_v55 = vld [vmem:[#allocation11 + $0x18] sm:$0xff] }
 0x71d   :  { %25383 = vmatprep.mubr.msk.f32.mxu1 %vm6502_vm2, %v12255_v36  ;;  %v26454_v36 = vpack.c.bf16 %v13370_v55, %v13369_v59 }
 0x71f   :  { %26455 = vmatprep.subr.bf16.mxu0 %v26454_v36 }
 0x720   :  { %25384 = vmatmul.mubr.msk.f32.gmra.mrb[70].mxu1 %vm6502_vm2, %v12256_v14  ;;  %26457 = vmatpush3.bf16.msra.mxu0 %v26454_v36  ;;  %v32827_v14 = vld [vmem:[#allocation9] ss:$0 sm:$0xff] }
 0x721   :  { %25386 = vmatprep.mubr.msk.f32.mxu1 %vm6502_vm2, %v12257_v48 }
 0x724   :  { %25387 = vmatmul.mubr.msk.f32.gmra.mrb[72].mxu1 %vm6502_vm2, %v12258_v10 }
 0x725   :  { %25389 = vmatprep.mubr.msk.f32.mxu1 %vm6502_vm2, %v12259_v6 }
 0x728   :  { %25390 = vmatmul.mubr.msk.f32.gmra.mrb[74].mxu1 %vm6502_vm2, %v12260_v52 }
 0x729   :  { %25392 = vmatprep.mubr.msk.f32.mxu1 %vm6502_vm2, %v12261_v43 }
 0x72c   :  { %25393 = vmatmul.mubr.msk.f32.gmra.mrb[76].mxu1 %vm6502_vm2, %v12262_v47 }
 0x72d   :  { %25395 = vmatprep.mubr.msk.f32.mxu1 %vm6502_vm2, %v12263_v50 }
 0x730   :  { %25396 = vmatmul.mubr.msk.f32.gmra.mrb[78].mxu1 %vm6502_vm2, %v12264_v56 }
 0x731   :  { %25398 = vmatprep.mubr.msk.f32.mxu1 %vm6502_vm2, %v12265_v51 }
 0x734   :  { %25399 = vmatmul.mubr.msk.f32.gmra.mrb[80].mxu1 %vm6502_vm2, %v12266_v26 }
 0x735   :  { %25401 = vmatprep.mubr.msk.f32.mxu1 %vm6502_vm2, %v12267_v2 }
 0x738   :  { %25402 = vmatmul.mubr.msk.f32.gmra.mrb[82].mxu1 %vm6502_vm2, %v12268_v0 }
 0x739   :  { %25404 = vmatprep.mubr.msk.f32.mxu1 %vm6502_vm2, %v12269_v3 }
 0x73c   :  { %25405 = vmatmul.mubr.msk.f32.gmra.mrb[84].mxu1 %vm6502_vm2, %v12270_v9 }
 0x73d   :  { %25407 = vmatprep.mubr.msk.f32.mxu1 %vm6502_vm2, %v12271_v22 }
 0x740   :  { %25408 = vmatmul.mubr.msk.f32.gmra.mrb[86].mxu1 %vm6502_vm2, %v12272_v62 }
 0x741   :  { %25410 = vmatprep.mubr.msk.f32.mxu1 %vm6502_vm2, %v12273_v34  ;;  %v14659_v34 = vld [vmem:[#allocation11 + $0x40] sm:$0xff] }
 0x744   :  { %25411 = vmatmul.mubr.msk.f32.gmra.mrb[88].mxu1 %vm6502_vm2, %v12274_v5  ;;  %v14660_v5 = vld [vmem:[#allocation11 + $0x48] sm:$0xff] }
 0x745   :  { %25413 = vmatprep.mubr.msk.f32.mxu1 %vm6502_vm2, %v12275_v17 }
 0x748   :  { %25414 = vmatmul.mubr.msk.f32.gmra.mrb[90].mxu1 %vm6502_vm2, %v12276_v4 }
 0x749   :  { %25416 = vmatprep.mubr.msk.f32.mxu1 %vm6502_vm2, %v32193_v54  ;;  %v12285_v54 = vld [vmem:[#allocation2 + $0x2c9] sm:$0xff] }
 0x74c   :  { %25417 = vmatmul.mubr.msk.f32.gmra.mrb[92].mxu1 %vm6502_vm2, %v32197_v53  ;;  %v12286_v53 = vld [vmem:[#allocation2 + $0x2d1] sm:$0xff] }
 0x74d   :  { %25419 = vmatprep.mubr.msk.f32.mxu1 %vm6502_vm2, %v12279_v63  ;;  %v32839_v63 = vpack.c.bf16 %v14660_v5, %v14659_v34 }
 0x74f   :  { %26459 = vmatprep.subr.bf16.mxu0 %v32839_v63 }
 0x750   :  { %25420 = vmatmul.mubr.msk.f32.gmra.mrb[94].mxu1 %vm6502_vm2, %v12280_v19 }
 0x751   :  { %25422 = vmatprep.mubr.msk.f32.mxu1 %vm6502_vm2, %v12281_v24 }
 0x754   :  { %25423 = vmatmul.mubr.msk.f32.gmra.mrb[96].mxu1 %vm6502_vm2, %v12282_v45 }
 0x755   :  { %25425 = vmatprep.mubr.msk.f32.mxu1 %vm6502_vm2, %v12283_v8 }
 0x758   :  { %25426 = vmatmul.mubr.msk.f32.gmra.mrb[98].mxu1 %vm6502_vm2, %v12284_v49 }
 0x759   :  { %25428 = vmatprep.mubr.msk.f32.mxu1 %vm6502_vm2, %v12285_v54 }
 0x75c   :  { %25429 = vmatmul.mubr.msk.f32.gmra.mrb[100].mxu1 %vm6502_vm2, %v12286_v53 }
 0x75d   :  { %25431 = vmatprep.mubr.msk.f32.mxu1 %vm6502_vm2, %v12287_v42 }
 0x760   :  { %25432 = vmatmul.mubr.msk.f32.gmra.mrb[102].mxu1 %vm6502_vm2, %v12288_v25 }
 0x761   :  { %25434 = vmatprep.mubr.msk.f32.mxu1 %vm6502_vm2, %v12289_v60 }
 0x764   :  { %25435 = vmatmul.mubr.msk.f32.gmra.mrb[104].mxu1 %vm6502_vm2, %v12290_v12 }
 0x765   :  { %25437 = vmatprep.mubr.msk.f32.mxu1 %vm6502_vm2, %v12291_v39 }
 0x768   :  { %25438 = vmatmul.mubr.msk.f32.gmra.mrb[106].mxu1 %vm6502_vm2, %v12292_v38 }
 0x769   :  { %25440 = vmatprep.mubr.msk.f32.mxu1 %vm6502_vm2, %v12293_v35 }
 0x76c   :  { %25441 = vmatmul.mubr.msk.f32.gmra.mrb[108].mxu1 %vm6502_vm2, %v32513_v1 }
 0x76d   :  { %25443 = vmatprep.mubr.msk.f32.mxu1 %vm6502_vm2, %v12295_v29 }
 0x770   :  { %25444 = vmatmul.mubr.msk.f32.gmra.mrb[110].mxu1 %vm6502_vm2, %v12296_v13 }
 0x771   :  { %25446 = vmatprep.mubr.msk.f32.mxu1 %vm6502_vm2, %v12297_v33 }
 0x774   :  { %25447 = vmatmul.mubr.msk.f32.gmra.mrb[112].mxu1 %vm6502_vm2, %v12298_v31 }
 0x775   :  { %25449 = vmatprep.mubr.msk.f32.mxu1 %vm6502_vm2, %v12299_v37 }
 0x778   :  { %25450 = vmatmul.mubr.msk.f32.gmra.mrb[114].mxu1 %vm6502_vm2, %v12300_v44 }
 0x779   :  { %25452 = vmatprep.mubr.msk.f32.mxu1 %vm6502_vm2, %v12301_v30 }
 0x77c   :  { %25453 = vmatmul.mubr.msk.f32.gmra.mrb[116].mxu1 %vm6502_vm2, %v12302_v58 }
 0x77d   :  { %25455 = vmatprep.mubr.msk.f32.mxu1 %vm6502_vm2, %v12303_v7 }
 0x780   :  { %25456 = vmatmul.mubr.msk.f32.gmra.mrb[118].mxu1 %vm6502_vm2, %v12304_v11 }
 0x781   :  { %25458 = vmatprep.mubr.msk.f32.mxu1 %vm6502_vm2, %v12305_v15 }
 0x784   :  { %25459 = vmatmul.mubr.msk.f32.gmra.mrb[120].mxu1 %vm6502_vm2, %v12306_v61 }
 0x785   :  { %25461 = vmatprep.mubr.msk.f32.mxu1 %vm6502_vm2, %v12307_v18 }
 0x788   :  { %25462 = vmatmul.mubr.msk.f32.gmra.mrb[122].mxu1 %vm6502_vm2, %v12308_v23 }
 0x789   :  { %25464 = vmatprep.mubr.msk.f32.mxu1 %vm6502_vm2, %v32261_v16 }
 0x78c   :  { %25465 = vmatmul.mubr.msk.f32.gmra.mrb[124].mxu1 %vm6502_vm2, %v35058_v28 }
 0x78d   :  { %25467 = vmatprep.mubr.msk.f32.mxu1 %vm6502_vm2, %v12311_v57 }
 0x790   :  { %25468 = vmatmul.mubr.msk.f32.gmra.mrb[126].mxu1 %vm6502_vm2, %v12312_v32 }
 0x7e7   :  { %v25376_v48 = vpop.f32.mrb[64].mxu1 }
 0x7e8   :  { %v12965_v10 = vadd.f32 %v25376_v48, %v32827_v14  ;;  %v12574_v16 = vpop.f32.mrb[65].mxu1 }
 0x7e9   :  { %v12964_v6 = vadd.f32 %v32827_v14, %v12574_v16 }
 0x7ea   :  { %v13029_v52 = vmax.f32 %v12965_v10, 0.0 }
 0x7eb   :  { %v13028_v43 = vmax.f32 %v12964_v6, 0.0  ;;  %v25379_v47 = vpop.f32.mrb[66].mxu1 }
 0x7ec   :  { %13240 = vst.msk [vmem:[#allocation3 + $0x30] sm:$0xff] %vm13092_vm4, %v13029_v52  ;;  %v12967_v50 = vadd.f32 %v25379_v47, %v32827_v14  ;;  %v12584_v56 = vpop.f32.mrb[67].mxu1 }
 0x7ed   :  { %13239 = vst.msk [vmem:[#allocation3 + $0x28] sm:$0xff] %vm13092_vm4, %v13028_v43  ;;  %v12966_v51 = vadd.f32 %v32827_v14, %v12584_v56 }
 0x7ee   :  { %v13031_v26 = vmax.f32 %v12967_v50, 0.0 }
 0x7ef   :  { %v13030_v2 = vmax.f32 %v12966_v51, 0.0  ;;  %v25382_v0 = vpop.f32.mrb[68].mxu1 }
 0x7f0   :  { %13242 = vst.msk [vmem:[#allocation3 + $0x50] sm:$0xff] %vm13092_vm4, %v13031_v26  ;;  %v12969_v3 = vadd.f32 %v25382_v0, %v32827_v14  ;;  %v12594_v9 = vpop.f32.mrb[69].mxu1 }
 0x7f1   :  { %13241 = vst.msk [vmem:[#allocation3 + $0x48] sm:$0xff] %vm13092_vm4, %v13030_v2  ;;  %v12968_v22 = vadd.f32 %v32827_v14, %v12594_v9 }
 0x7f2   :  { %v13033_v62 = vmax.f32 %v12969_v3, 0.0 }
 0x7f3   :  { %v13032_v17 = vmax.f32 %v12968_v22, 0.0  ;;  %v25385_v4 = vpop.f32.mrb[70].mxu1  ;;  %v13374_v49 = vld [vmem:[#allocation3 + $0x30] sm:$0xff] }
 0x7f4   :  { %13244 = vst.msk [vmem:[#allocation3 + $0x70] sm:$0xff] %vm13092_vm4, %v13033_v62  ;;  %v12971_v19 = vadd.f32 %v25385_v4, %v32827_v14  ;;  %v12604_v24 = vpop.f32.mrb[71].mxu1  ;;  %v13373_v45 = vld [vmem:[#allocation3 + $0x28] sm:$0xff] }
 0x7f5   :  { %13243 = vst.msk [vmem:[#allocation3 + $0x68] sm:$0xff] %vm13092_vm4, %v13032_v17  ;;  %v12970_v8 = vadd.f32 %v32827_v14, %v12604_v24  ;;  %25481 = vmatprep.mubr.msk.f32.mxu0 %vm13092_vm4, %v13373_v45 }
 0x7f6   :  { %v13035_v54 = vmax.f32 %v12971_v19, 0.0  ;;  %25482 = vmatmul.mubr.msk.f32.gmra.mrb[66].mxu0 %vm13092_vm4, %v13374_v49 }
 0x7f7   :  { %v13034_v53 = vmax.f32 %v12970_v8, 0.0  ;;  %v25388_v42 = vpop.f32.mrb[72].mxu1  ;;  %v13376_v38 = vld [vmem:[#allocation3 + $0x50] sm:$0xff] }
 0x7f8   :  { %13246 = vst.msk [vmem:[#allocation3 + $0x90] sm:$0xff] %vm13092_vm4, %v13035_v54  ;;  %v12973_v25 = vadd.f32 %v25388_v42, %v32827_v14  ;;  %v12614_v60 = vpop.f32.mrb[73].mxu1  ;;  %v13375_v12 = vld [vmem:[#allocation3 + $0x48] sm:$0xff] }
 0x7f9   :  { %13245 = vst.msk [vmem:[#allocation3 + $0x88] sm:$0xff] %vm13092_vm4, %v13034_v53  ;;  %v12972_v39 = vadd.f32 %v32827_v14, %v12614_v60  ;;  %25484 = vmatprep.mubr.msk.f32.mxu0 %vm13092_vm4, %v13375_v12 }
 0x7fa   :  { %v13037_v35 = vmax.f32 %v12973_v25, 0.0  ;;  %25485 = vmatmul.mubr.msk.f32.gmra.mrb[68].mxu0 %vm13092_vm4, %v13376_v38 }
 0x7fb   :  { %v13036_v1 = vmax.f32 %v12972_v39, 0.0  ;;  %v25391_v20 = vpop.f32.mrb[74].mxu1  ;;  %v13378_v37 = vld [vmem:[#allocation3 + $0x70] sm:$0xff] }
 0x7fc   :  { %13248 = vst.msk [vmem:[#allocation3 + $0xb0] sm:$0xff] %vm13092_vm4, %v13037_v35  ;;  %v12975_v29 = vadd.f32 %v25391_v20, %v32827_v14  ;;  %v12624_v13 = vpop.f32.mrb[75].mxu1  ;;  %v13377_v33 = vld [vmem:[#allocation3 + $0x68] sm:$0xff] }
 0x7fd   :  { %13247 = vst.msk [vmem:[#allocation3 + $0xa8] sm:$0xff] %vm13092_vm4, %v13036_v1  ;;  %v12974_v31 = vadd.f32 %v32827_v14, %v12624_v13  ;;  %25487 = vmatprep.mubr.msk.f32.mxu0 %vm13092_vm4, %v13377_v33 }
 0x7fe   :  { %v13039_v40 = vmax.f32 %v12975_v29, 0.0  ;;  %25488 = vmatmul.mubr.msk.f32.gmra.mrb[70].mxu0 %vm13092_vm4, %v13378_v37 }
 0x7ff   :  { %v13038_v27 = vmax.f32 %v12974_v31, 0.0  ;;  %v25394_v21 = vpop.f32.mrb[76].mxu1  ;;  %v13380_v58 = vld [vmem:[#allocation3 + $0x90] sm:$0xff] }
 0x800   :  { %13250 = vst.msk [vmem:[#allocation3 + $0xd0] sm:$0xff] %vm13092_vm4, %v13039_v40  ;;  %v12977_v41 = vadd.f32 %v25394_v21, %v32827_v14  ;;  %v12634_v44 = vpop.f32.mrb[77].mxu1  ;;  %v13379_v46 = vld [vmem:[#allocation3 + $0x88] sm:$0xff] }
 0x801   :  { %13249 = vst.msk [vmem:[#allocation3 + $0xc8] sm:$0xff] %vm13092_vm4, %v13038_v27  ;;  %v12976_v30 = vadd.f32 %v32827_v14, %v12634_v44  ;;  %25490 = vmatprep.mubr.msk.f32.mxu0 %vm13092_vm4, %v13379_v46 }
 0x802   :  { %v13041_v7 = vmax.f32 %v12977_v41, 0.0  ;;  %25491 = vmatmul.mubr.msk.f32.gmra.mrb[72].mxu0 %vm13092_vm4, %v13380_v58 }
 0x803   :  { %v13040_v11 = vmax.f32 %v12976_v30, 0.0  ;;  %v25397_v15 = vpop.f32.mrb[78].mxu1  ;;  %v13382_v28 = vld [vmem:[#allocation3 + $0xb0] sm:$0xff] }
 0x804   :  { %13252 = vst.msk [vmem:[#allocation3 + $0xf0] sm:$0xff] %vm13092_vm4, %v13041_v7  ;;  %v12979_v61 = vadd.f32 %v25397_v15, %v32827_v14  ;;  %v12644_v18 = vpop.f32.mrb[79].mxu1  ;;  %v13381_v23 = vld [vmem:[#allocation3 + $0xa8] sm:$0xff] }
 0x805   :  { %13251 = vst.msk [vmem:[#allocation3 + $0xe8] sm:$0xff] %vm13092_vm4, %v13040_v11  ;;  %v12978_v57 = vadd.f32 %v32827_v14, %v12644_v18  ;;  %25493 = vmatprep.mubr.msk.f32.mxu0 %vm13092_vm4, %v13381_v23 }
 0x806   :  { %v13043_v32 = vmax.f32 %v12979_v61, 0.0  ;;  %25494 = vmatmul.mubr.msk.f32.gmra.mrb[74].mxu0 %vm13092_vm4, %v13382_v28 }
 0x807   :  { %v13042_v59 = vmax.f32 %v12978_v57, 0.0  ;;  %v25400_v55 = vpop.f32.mrb[80].mxu1  ;;  %v13384_v6 = vld [vmem:[#allocation3 + $0xd0] sm:$0xff] }
 0x808   :  { %13254 = vst.msk [vmem:[#allocation3 + $0x110] sm:$0xff] %vm13092_vm4, %v13043_v32  ;;  %v12981_v36 = vadd.f32 %v25400_v55, %v32827_v14  ;;  %v12654_v48 = vpop.f32.mrb[81].mxu1  ;;  %v13383_v10 = vld [vmem:[#allocation3 + $0xc8] sm:$0xff] }
 0x809   :  { %13253 = vst.msk [vmem:[#allocation3 + $0x108] sm:$0xff] %vm13092_vm4, %v13042_v59  ;;  %v12980_v16 = vadd.f32 %v32827_v14, %v12654_v48  ;;  %25496 = vmatprep.mubr.msk.f32.mxu0 %vm13092_vm4, %v13383_v10 }
 0x80a   :  { %v13045_v52 = vmax.f32 %v12981_v36, 0.0  ;;  %25497 = vmatmul.mubr.msk.f32.gmra.mrb[76].mxu0 %vm13092_vm4, %v13384_v6 }
 0x80b   :  { %v13044_v43 = vmax.f32 %v12980_v16, 0.0  ;;  %v25403_v47 = vpop.f32.mrb[82].mxu1  ;;  %v13386_v2 = vld [vmem:[#allocation3 + $0xf0] sm:$0xff] }
 0x80c   :  { %13256 = vst.msk [vmem:[#allocation3 + $0x130] sm:$0xff] %vm13092_vm4, %v13045_v52  ;;  %v12983_v50 = vadd.f32 %v25403_v47, %v32827_v14  ;;  %v12664_v56 = vpop.f32.mrb[83].mxu1  ;;  %v13385_v51 = vld [vmem:[#allocation3 + $0xe8] sm:$0xff] }
 0x80d   :  { %13255 = vst.msk [vmem:[#allocation3 + $0x128] sm:$0xff] %vm13092_vm4, %v13044_v43  ;;  %v12982_v26 = vadd.f32 %v32827_v14, %v12664_v56  ;;  %25499 = vmatprep.mubr.msk.f32.mxu0 %vm13092_vm4, %v13385_v51 }
 0x80e   :  { %v13047_v0 = vmax.f32 %v12983_v50, 0.0  ;;  %25500 = vmatmul.mubr.msk.f32.gmra.mrb[78].mxu0 %vm13092_vm4, %v13386_v2 }
 0x80f   :  { %v13046_v3 = vmax.f32 %v12982_v26, 0.0  ;;  %v25406_v9 = vpop.f32.mrb[84].mxu1  ;;  %v13388_v17 = vld [vmem:[#allocation3 + $0x110] sm:$0xff] }
 0x810   :  { %13258 = vst.msk [vmem:[#allocation3 + $0x150] sm:$0xff] %vm13092_vm4, %v13047_v0  ;;  %v12985_v22 = vadd.f32 %v25406_v9, %v32827_v14  ;;  %v12674_v62 = vpop.f32.mrb[85].mxu1  ;;  %v13387_v34 = vld [vmem:[#allocation3 + $0x108] sm:$0xff] }
 0x811   :  { %13257 = vst.msk [vmem:[#allocation3 + $0x148] sm:$0xff] %vm13092_vm4, %v13046_v3  ;;  %v12984_v5 = vadd.f32 %v32827_v14, %v12674_v62  ;;  %25502 = vmatprep.mubr.msk.f32.mxu0 %vm13092_vm4, %v13387_v34  ;;  %v13403_v0 = vld [vmem:[#allocation3 + $0x248] sm:$0xff] }
 0x812   :  { %v13049_v4 = vmax.f32 %v12985_v22, 0.0  ;;  %25503 = vmatmul.mubr.msk.f32.gmra.mrb[80].mxu0 %vm13092_vm4, %v13388_v17 }
 0x813   :  { %v13048_v19 = vmax.f32 %v12984_v5, 0.0  ;;  %v25409_v24 = vpop.f32.mrb[86].mxu1  ;;  %v13390_v53 = vld [vmem:[#allocation3 + $0x130] sm:$0xff] }
 0x814   :  { %13260 = vst.msk [vmem:[#allocation3 + $0x170] sm:$0xff] %vm13092_vm4, %v13049_v4  ;;  %v12987_v45 = vadd.f32 %v25409_v24, %v32827_v14  ;;  %v12684_v8 = vpop.f32.mrb[87].mxu1  ;;  %v13389_v49 = vld [vmem:[#allocation3 + $0x128] sm:$0xff]  ;;  %v13404_v5 = vld [vmem:[#allocation3 + $0x250] sm:$0xff] }
 0x815   :  { %13259 = vst.msk [vmem:[#allocation3 + $0x168] sm:$0xff] %vm13092_vm4, %v13048_v19  ;;  %v12986_v54 = vadd.f32 %v32827_v14, %v12684_v8  ;;  %25505 = vmatprep.mubr.msk.f32.mxu0 %vm13092_vm4, %v13389_v49 }
 0x816   :  { %v13051_v42 = vmax.f32 %v12987_v45, 0.0  ;;  %25506 = vmatmul.mubr.msk.f32.gmra.mrb[82].mxu0 %vm13092_vm4, %v13390_v53 }
 0x817   :  { %v13050_v25 = vmax.f32 %v12986_v54, 0.0  ;;  %v25412_v60 = vpop.f32.mrb[88].mxu1  ;;  %v13392_v1 = vld [vmem:[#allocation3 + $0x150] sm:$0xff] }
 0x818   :  { %13262 = vst.msk [vmem:[#allocation3 + $0x190] sm:$0xff] %vm13092_vm4, %v13051_v42  ;;  %v12989_v12 = vadd.f32 %v25412_v60, %v32827_v14  ;;  %v12694_v39 = vpop.f32.mrb[89].mxu1  ;;  %v13391_v38 = vld [vmem:[#allocation3 + $0x148] sm:$0xff] }
 0x819   :  { %13261 = vst.msk [vmem:[#allocation3 + $0x188] sm:$0xff] %vm13092_vm4, %v13050_v25  ;;  %v12988_v35 = vadd.f32 %v32827_v14, %v12694_v39  ;;  %25508 = vmatprep.mubr.msk.f32.mxu0 %vm13092_vm4, %v13391_v38 }
 0x81a   :  { %v13053_v20 = vmax.f32 %v12989_v12, 0.0  ;;  %25509 = vmatmul.mubr.msk.f32.gmra.mrb[84].mxu0 %vm13092_vm4, %v13392_v1 }
 0x81b   :  { %v13052_v29 = vmax.f32 %v12988_v35, 0.0  ;;  %v25415_v13 = vpop.f32.mrb[90].mxu1  ;;  %v13394_v27 = vld [vmem:[#allocation3 + $0x170] sm:$0xff] }
 0x81c   :  { %13264 = vst.msk [vmem:[#allocation3 + $0x1b0] sm:$0xff] %vm13092_vm4, %v13053_v20  ;;  %v12991_v33 = vadd.f32 %v25415_v13, %v32827_v14  ;;  %v12704_v31 = vpop.f32.mrb[91].mxu1  ;;  %v13393_v37 = vld [vmem:[#allocation3 + $0x168] sm:$0xff] }
 0x81d   :  { %13263 = vst.msk [vmem:[#allocation3 + $0x1a8] sm:$0xff] %vm13092_vm4, %v13052_v29  ;;  %v12990_v40 = vadd.f32 %v32827_v14, %v12704_v31  ;;  %25511 = vmatprep.mubr.msk.f32.mxu0 %vm13092_vm4, %v13393_v37 }
 0x81e   :  { %v13055_v21 = vmax.f32 %v12991_v33, 0.0  ;;  %25512 = vmatmul.mubr.msk.f32.gmra.mrb[86].mxu0 %vm13092_vm4, %v13394_v27 }
 0x81f   :  { %v13054_v41 = vmax.f32 %v12990_v40, 0.0  ;;  %v25418_v44 = vpop.f32.mrb[92].mxu1  ;;  %v13396_v11 = vld [vmem:[#allocation3 + $0x190] sm:$0xff] }
 0x820   :  { %13266 = vst.msk [vmem:[#allocation3 + $0x1d0] sm:$0xff] %vm13092_vm4, %v13055_v21  ;;  %v12993_v46 = vadd.f32 %v25418_v44, %v32827_v14  ;;  %v12714_v30 = vpop.f32.mrb[93].mxu1  ;;  %v13395_v58 = vld [vmem:[#allocation3 + $0x188] sm:$0xff] }
 0x821   :  { %13265 = vst.msk [vmem:[#allocation3 + $0x1c8] sm:$0xff] %vm13092_vm4, %v13054_v41  ;;  %v12992_v7 = vadd.f32 %v32827_v14, %v12714_v30  ;;  %25514 = vmatprep.mubr.msk.f32.mxu0 %vm13092_vm4, %v13395_v58 }
 0x822   :  { %v13057_v15 = vmax.f32 %v12993_v46, 0.0  ;;  %25515 = vmatmul.mubr.msk.f32.gmra.mrb[88].mxu0 %vm13092_vm4, %v13396_v11 }
 0x823   :  { %v13056_v61 = vmax.f32 %v12992_v7, 0.0  ;;  %v25421_v18 = vpop.f32.mrb[94].mxu1  ;;  %v13398_v59 = vld [vmem:[#allocation3 + $0x1b0] sm:$0xff] }
 0x824   :  { %13268 = vst.msk [vmem:[#allocation3 + $0x1f0] sm:$0xff] %vm13092_vm4, %v13057_v15  ;;  %v12995_v23 = vadd.f32 %v25421_v18, %v32827_v14  ;;  %v12724_v57 = vpop.f32.mrb[95].mxu1  ;;  %v13397_v28 = vld [vmem:[#allocation3 + $0x1a8] sm:$0xff] }
 0x825   :  { %13267 = vst.msk [vmem:[#allocation3 + $0x1e8] sm:$0xff] %vm13092_vm4, %v13056_v61  ;;  %v12994_v32 = vadd.f32 %v32827_v14, %v12724_v57  ;;  %25517 = vmatprep.mubr.msk.f32.mxu0 %vm13092_vm4, %v13397_v28 }
 0x826   :  { %v13059_v55 = vmax.f32 %v12995_v23, 0.0  ;;  %25518 = vmatmul.mubr.msk.f32.gmra.mrb[90].mxu0 %vm13092_vm4, %v13398_v59 }
 0x827   :  { %v13058_v36 = vmax.f32 %v12994_v32, 0.0  ;;  %v25424_v48 = vpop.f32.mrb[96].mxu1  ;;  %v13400_v43 = vld [vmem:[#allocation3 + $0x1d0] sm:$0xff] }
 0x828   :  { %13270 = vst.msk [vmem:[#allocation3 + $0x210] sm:$0xff] %vm13092_vm4, %v13059_v55  ;;  %v12997_v10 = vadd.f32 %v25424_v48, %v32827_v14  ;;  %v12734_v16 = vpop.f32.mrb[97].mxu1  ;;  %v13399_v6 = vld [vmem:[#allocation3 + $0x1c8] sm:$0xff] }
 0x829   :  { %13269 = vst.msk [vmem:[#allocation3 + $0x208] sm:$0xff] %vm13092_vm4, %v13058_v36  ;;  %v12996_v52 = vadd.f32 %v32827_v14, %v12734_v16  ;;  %25520 = vmatprep.mubr.msk.f32.mxu0 %vm13092_vm4, %v13399_v6 }
 0x82a   :  { %v13061_v47 = vmax.f32 %v12997_v10, 0.0  ;;  %25521 = vmatmul.mubr.msk.f32.gmra.mrb[92].mxu0 %vm13092_vm4, %v13400_v43 }
 0x82b   :  { %v13060_v50 = vmax.f32 %v12996_v52, 0.0  ;;  %v25427_v56 = vpop.f32.mrb[98].mxu1  ;;  %v13402_v9 = vld [vmem:[#allocation3 + $0x1f0] sm:$0xff] }
 0x82c   :  { %13272 = vst.msk [vmem:[#allocation3 + $0x270] sm:$0xff] %vm13092_vm4, %v13061_v47  ;;  %v12999_v51 = vadd.f32 %v25427_v56, %v32827_v14  ;;  %v12744_v26 = vpop.f32.mrb[99].mxu1  ;;  %v13401_v2 = vld [vmem:[#allocation3 + $0x1e8] sm:$0xff] }
 0x82d   :  { %13271 = vst.msk [vmem:[#allocation3 + $0x268] sm:$0xff] %vm13092_vm4, %v13060_v50  ;;  %v12998_v3 = vadd.f32 %v32827_v14, %v12744_v26  ;;  %25523 = vmatprep.mubr.msk.f32.mxu0 %vm13092_vm4, %v13401_v2 }
 0x82e   :  { %v13063_v22 = vmax.f32 %v12999_v51, 0.0  ;;  %25524 = vmatmul.mubr.msk.f32.gmra.mrb[94].mxu0 %vm13092_vm4, %v13402_v9 }
 0x82f   :  { %v13062_v62 = vmax.f32 %v12998_v3, 0.0  ;;  %v25430_v34 = vpop.f32.mrb[100].mxu1  ;;  %25526 = vmatprep.mubr.msk.f32.mxu0 %vm13092_vm4, %v13403_v0 }
 0x830   :  { %13274 = vst.msk [vmem:[#allocation3 + $0x290] sm:$0xff] %vm13092_vm4, %v13063_v22  ;;  %v13001_v17 = vadd.f32 %v25430_v34, %v32827_v14  ;;  %v12754_v4 = vpop.f32.mrb[101].mxu1 }
 0x831   :  { %13273 = vst.msk [vmem:[#allocation3 + $0x288] sm:$0xff] %vm13092_vm4, %v13062_v62  ;;  %v13000_v19 = vadd.f32 %v32827_v14, %v12754_v4 }
 0x832   :  { %v13065_v24 = vmax.f32 %v13001_v17, 0.0  ;;  %25527 = vmatmul.mubr.msk.f32.gmra.mrb[96].mxu0 %vm13092_vm4, %v13404_v5 }
 0x833   :  { %v13064_v45 = vmax.f32 %v13000_v19, 0.0  ;;  %v25433_v8 = vpop.f32.mrb[102].mxu1  ;;  %v13406_v25 = vld [vmem:[#allocation3 + $0x270] sm:$0xff] }
 0x834   :  { %13276 = vst.msk [vmem:[#allocation3 + $0x2b0] sm:$0xff] %vm13092_vm4, %v13065_v24  ;;  %v13003_v49 = vadd.f32 %v25433_v8, %v32827_v14  ;;  %v12764_v54 = vpop.f32.mrb[103].mxu1  ;;  %v13405_v53 = vld [vmem:[#allocation3 + $0x268] sm:$0xff] }
 0x835   :  { %13275 = vst.msk [vmem:[#allocation3 + $0x2a8] sm:$0xff] %vm13092_vm4, %v13064_v45  ;;  %v13002_v42 = vadd.f32 %v32827_v14, %v12764_v54  ;;  %25529 = vmatprep.mubr.msk.f32.mxu0 %vm13092_vm4, %v13405_v53 }
 0x836   :  { %v13067_v60 = vmax.f32 %v13003_v49, 0.0  ;;  %25530 = vmatmul.mubr.msk.f32.gmra.mrb[98].mxu0 %vm13092_vm4, %v13406_v25 }
 0x837   :  { %v13066_v12 = vmax.f32 %v13002_v42, 0.0  ;;  %v25436_v39 = vpop.f32.mrb[104].mxu1  ;;  %v13408_v29 = vld [vmem:[#allocation3 + $0x290] sm:$0xff] }
 0x838   :  { %13278 = vst.msk [vmem:[#allocation3 + $0x2d0] sm:$0xff] %vm13092_vm4, %v13067_v60  ;;  %v13005_v38 = vadd.f32 %v25436_v39, %v32827_v14  ;;  %v12774_v35 = vpop.f32.mrb[105].mxu1  ;;  %v13407_v1 = vld [vmem:[#allocation3 + $0x288] sm:$0xff] }
 0x839   :  { %13277 = vst.msk [vmem:[#allocation3 + $0x2c8] sm:$0xff] %vm13092_vm4, %v13066_v12  ;;  %v13004_v20 = vadd.f32 %v32827_v14, %v12774_v35  ;;  %25532 = vmatprep.mubr.msk.f32.mxu0 %vm13092_vm4, %v13407_v1 }
 0x83a   :  { %v13069_v13 = vmax.f32 %v13005_v38, 0.0  ;;  %25533 = vmatmul.mubr.msk.f32.gmra.mrb[100].mxu0 %vm13092_vm4, %v13408_v29 }
 0x83b   :  { %v13068_v33 = vmax.f32 %v13004_v20, 0.0  ;;  %v25439_v31 = vpop.f32.mrb[106].mxu1  ;;  %v13410_v41 = vld [vmem:[#allocation3 + $0x2b0] sm:$0xff] }
 0x83c   :  { %13280 = vst.msk [vmem:[#allocation3 + $0x2f0] sm:$0xff] %vm13092_vm4, %v13069_v13  ;;  %v13007_v37 = vadd.f32 %v25439_v31, %v32827_v14  ;;  %v12784_v40 = vpop.f32.mrb[107].mxu1  ;;  %v13409_v27 = vld [vmem:[#allocation3 + $0x2a8] sm:$0xff] }
 0x83d   :  { %13279 = vst.msk [vmem:[#allocation3 + $0x2e8] sm:$0xff] %vm13092_vm4, %v13068_v33  ;;  %v13006_v21 = vadd.f32 %v32827_v14, %v12784_v40  ;;  %25535 = vmatprep.mubr.msk.f32.mxu0 %vm13092_vm4, %v13409_v27 }
 0x83e   :  { %v13071_v44 = vmax.f32 %v13007_v37, 0.0  ;;  %25536 = vmatmul.mubr.msk.f32.gmra.mrb[102].mxu0 %vm13092_vm4, %v13410_v41 }
 0x83f   :  { %v13070_v46 = vmax.f32 %v13006_v21, 0.0  ;;  %v25442_v30 = vpop.f32.mrb[108].mxu1  ;;  %v13412_v61 = vld [vmem:[#allocation3 + $0x2d0] sm:$0xff] }
 0x840   :  { %13282 = vst.msk [vmem:[#allocation3 + $0x310] sm:$0xff] %vm13092_vm4, %v13071_v44  ;;  %v13009_v58 = vadd.f32 %v25442_v30, %v32827_v14  ;;  %v12794_v7 = vpop.f32.mrb[109].mxu1  ;;  %v13411_v11 = vld [vmem:[#allocation3 + $0x2c8] sm:$0xff] }
 0x841   :  { %13281 = vst.msk [vmem:[#allocation3 + $0x308] sm:$0xff] %vm13092_vm4, %v13070_v46  ;;  %v13008_v15 = vadd.f32 %v32827_v14, %v12794_v7  ;;  %25538 = vmatprep.mubr.msk.f32.mxu0 %vm13092_vm4, %v13411_v11 }
 0x842   :  { %v13073_v18 = vmax.f32 %v13009_v58, 0.0  ;;  %25539 = vmatmul.mubr.msk.f32.gmra.mrb[104].mxu0 %vm13092_vm4, %v13412_v61 }
 0x843   :  { %v13072_v23 = vmax.f32 %v13008_v15, 0.0  ;;  %v25445_v57 = vpop.f32.mrb[110].mxu1  ;;  %v13414_v36 = vld [vmem:[#allocation3 + $0x2f0] sm:$0xff] }
 0x844   :  { %13284 = vst.msk [vmem:[#allocation3 + $0x330] sm:$0xff] %vm13092_vm4, %v13073_v18  ;;  %v13011_v28 = vadd.f32 %v25445_v57, %v32827_v14  ;;  %v12804_v32 = vpop.f32.mrb[111].mxu1  ;;  %v13413_v59 = vld [vmem:[#allocation3 + $0x2e8] sm:$0xff] }
 0x845   :  { %13283 = vst.msk [vmem:[#allocation3 + $0x328] sm:$0xff] %vm13092_vm4, %v13072_v23  ;;  %v13010_v55 = vadd.f32 %v32827_v14, %v12804_v32  ;;  %25541 = vmatprep.mubr.msk.f32.mxu0 %vm13092_vm4, %v13413_v59 }
 0x846   :  { %v13075_v48 = vmax.f32 %v13011_v28, 0.0  ;;  %25542 = vmatmul.mubr.msk.f32.gmra.mrb[106].mxu0 %vm13092_vm4, %v13414_v36 }
 0x847   :  { %v13074_v10 = vmax.f32 %v13010_v55, 0.0  ;;  %v25448_v16 = vpop.f32.mrb[112].mxu1  ;;  %v13416_v50 = vld [vmem:[#allocation3 + $0x310] sm:$0xff] }
 0x848   :  { %13286 = vst.msk [vmem:[#allocation3 + $0x350] sm:$0xff] %vm13092_vm4, %v13075_v48  ;;  %v13013_v6 = vadd.f32 %v25448_v16, %v32827_v14  ;;  %v12814_v52 = vpop.f32.mrb[113].mxu1  ;;  %v13415_v43 = vld [vmem:[#allocation3 + $0x308] sm:$0xff] }
 0x849   :  { %13285 = vst.msk [vmem:[#allocation3 + $0x348] sm:$0xff] %vm13092_vm4, %v13074_v10  ;;  %v13012_v47 = vadd.f32 %v32827_v14, %v12814_v52  ;;  %25544 = vmatprep.mubr.msk.f32.mxu0 %vm13092_vm4, %v13415_v43 }
 0x84a   :  { %v13077_v56 = vmax.f32 %v13013_v6, 0.0  ;;  %25545 = vmatmul.mubr.msk.f32.gmra.mrb[108].mxu0 %vm13092_vm4, %v13416_v50  ;;  %v13303_v50 = vld [vmem:[#allocation3 + $0x7] sm:$0xff] }
 0x84b   :  { %v13076_v51 = vmax.f32 %v13012_v47, 0.0  ;;  %v25451_v26 = vpop.f32.mrb[114].mxu1  ;;  %v13418_v22 = vld [vmem:[#allocation3 + $0x330] sm:$0xff] }
 0x84c   :  { %13288 = vst.msk [vmem:[#allocation3 + $0x370] sm:$0xff] %vm13092_vm4, %v13077_v56  ;;  %v13015_v2 = vadd.f32 %v25451_v26, %v32827_v14  ;;  %v12824_v0 = vpop.f32.mrb[115].mxu1  ;;  %v13417_v3 = vld [vmem:[#allocation3 + $0x328] sm:$0xff] }
 0x84d   :  { %13287 = vst.msk [vmem:[#allocation3 + $0x368] sm:$0xff] %vm13092_vm4, %v13076_v51  ;;  %v13014_v9 = vadd.f32 %v32827_v14, %v12824_v0  ;;  %25547 = vmatprep.mubr.msk.f32.mxu0 %vm13092_vm4, %v13417_v3  ;;  %v14661_v56 = vld [vmem:[#allocation11 + $0x50] sm:$0xff]  ;;  %v14662_v51 = vld [vmem:[#allocation11 + $0x58] sm:$0xff]  ;;  %v15369_v3 = vld [vmem:[#allocation11 + $0x60] sm:$0xff] }
 0x84e   :  { %v13079_v62 = vmax.f32 %v13015_v2, 0.0  ;;  %25548 = vmatmul.mubr.msk.f32.gmra.mrb[110].mxu0 %vm13092_vm4, %v13418_v22  ;;  %v13304_v26 = vld [vmem:[#allocation3 + $0xf] sm:$0xff]  ;;  %v26462_v2 = vpack.c.bf16 %v14662_v51, %v14661_v56  ;;  %v33024_v0 = vld [vmem:[#allocation3 + $0x27] sm:$0xff] }
 0x84f   :  { %v13078_v34 = vmax.f32 %v13014_v9, 0.0  ;;  %v25454_v5 = vpop.f32.mrb[116].mxu1  ;;  %v13420_v45 = vld [vmem:[#allocation3 + $0x350] sm:$0xff]  ;;  %v15370_v9 = vld [vmem:[#allocation11 + $0x68] sm:$0xff] }
 0x850   :  { %13290 = vst.msk [vmem:[#allocation3 + $0x390] sm:$0xff] %vm13092_vm4, %v13079_v62  ;;  %v13017_v17 = vadd.f32 %v25454_v5, %v32827_v14  ;;  %v12834_v4 = vpop.f32.mrb[117].mxu1  ;;  %v13419_v19 = vld [vmem:[#allocation3 + $0x348] sm:$0xff]  ;;  %v33029_v22 = vpack.c.bf16 %v15370_v9, %v15369_v3 }
 0x851   :  { %13289 = vst.msk [vmem:[#allocation3 + $0x388] sm:$0xff] %vm13092_vm4, %v13078_v34  ;;  %v13016_v24 = vadd.f32 %v32827_v14, %v12834_v4  ;;  %25550 = vmatprep.mubr.msk.f32.mxu0 %vm13092_vm4, %v13419_v19  ;;  %v33031_v62 = vld [vmem:[#allocation3 + $0x2f] sm:$0xff]  ;;  %v33035_v34 = vld [vmem:[#allocation3 + $0x47] sm:$0xff] }
 0x852   :  { %v13081_v8 = vmax.f32 %v13017_v17, 0.0  ;;  %25551 = vmatmul.mubr.msk.f32.gmra.mrb[112].mxu0 %vm13092_vm4, %v13420_v45  ;;  %v33040_v5 = vld [vmem:[#allocation3 + $0x4f] sm:$0xff]  ;;  %v33052_v4 = vld [vmem:[#allocation3 + $0x87] sm:$0xff] }
 0x853   :  { %v13080_v49 = vmax.f32 %v13016_v24, 0.0  ;;  %v25457_v54 = vpop.f32.mrb[118].mxu1  ;;  %v13422_v12 = vld [vmem:[#allocation3 + $0x370] sm:$0xff]  ;;  %v33060_v24 = vld [vmem:[#allocation3 + $0xa7] sm:$0xff] }
 0x854   :  { %13292 = vst.msk [vmem:[#allocation3 + $0x3b0] sm:$0xff] %vm13092_vm4, %v13081_v8  ;;  %v13019_v53 = vadd.f32 %v25457_v54, %v32827_v14  ;;  %v12844_v42 = vpop.f32.mrb[119].mxu1  ;;  %v13421_v25 = vld [vmem:[#allocation3 + $0x368] sm:$0xff] }
 0x855   :  { %13291 = vst.msk [vmem:[#allocation3 + $0x3a8] sm:$0xff] %vm13092_vm4, %v13080_v49  ;;  %v13018_v60 = vadd.f32 %v32827_v14, %v12844_v42  ;;  %25553 = vmatprep.mubr.msk.f32.mxu0 %vm13092_vm4, %v13421_v25  ;;  %v33048_v17 = vld [vmem:[#allocation3 + $0x6f] sm:$0xff]  ;;  %v33068_v8 = vld [vmem:[#allocation3 + $0xc7] sm:$0xff] }
 0x856   :  { %v13083_v39 = vmax.f32 %v13019_v53, 0.0  ;;  %25554 = vmatmul.mubr.msk.f32.gmra.mrb[114].mxu0 %vm13092_vm4, %v13422_v12  ;;  %v33056_v19 = vld [vmem:[#allocation3 + $0x8f] sm:$0xff]  ;;  %v33076_v54 = vld [vmem:[#allocation3 + $0xe7] sm:$0xff] }
 0x857   :  { %v13082_v38 = vmax.f32 %v13018_v60, 0.0  ;;  %v25460_v35 = vpop.f32.mrb[120].mxu1  ;;  %v13424_v33 = vld [vmem:[#allocation3 + $0x390] sm:$0xff]  ;;  %v33084_v42 = vld [vmem:[#allocation3 + $0x107] sm:$0xff] }
 0x858   :  { %13294 = vst.msk [vmem:[#allocation3 + $0x3d0] sm:$0xff] %vm13092_vm4, %v13083_v39  ;;  %v13021_v1 = vadd.f32 %v25460_v35, %v32827_v14  ;;  %v12854_v20 = vpop.f32.mrb[121].mxu1  ;;  %v13423_v29 = vld [vmem:[#allocation3 + $0x388] sm:$0xff] }
 0x859   :  { %13293 = vst.msk [vmem:[#allocation3 + $0x3c8] sm:$0xff] %vm13092_vm4, %v13082_v38  ;;  %v13020_v13 = vadd.f32 %v32827_v14, %v12854_v20  ;;  %25556 = vmatprep.mubr.msk.f32.mxu0 %vm13092_vm4, %v13423_v29  ;;  %v33064_v45 = vld [vmem:[#allocation3 + $0xaf] sm:$0xff]  ;;  %v33092_v60 = vld [vmem:[#allocation3 + $0x127] sm:$0xff] }
 0x85a   :  { %v13085_v31 = vmax.f32 %v13021_v1, 0.0  ;;  %25557 = vmatmul.mubr.msk.f32.gmra.mrb[116].mxu0 %vm13092_vm4, %v13424_v33  ;;  %v33072_v49 = vld [vmem:[#allocation3 + $0xcf] sm:$0xff]  ;;  %v33100_v39 = vld [vmem:[#allocation3 + $0x147] sm:$0xff] }
 0x85b   :  { %v13084_v37 = vmax.f32 %v13020_v13, 0.0  ;;  %v25463_v40 = vpop.f32.mrb[122].mxu1  ;;  %v13426_v46 = vld [vmem:[#allocation3 + $0x3b0] sm:$0xff]  ;;  %v33108_v35 = vld [vmem:[#allocation3 + $0x167] sm:$0xff] }
 0x85c   :  { %13296 = vst.msk [vmem:[#allocation3 + $0x3f0] sm:$0xff] %vm13092_vm4, %v13085_v31  ;;  %v13023_v27 = vadd.f32 %v25463_v40, %v32827_v14  ;;  %v12864_v21 = vpop.f32.mrb[123].mxu1  ;;  %v13425_v41 = vld [vmem:[#allocation3 + $0x3a8] sm:$0xff] }
 0x85d   :  { %13295 = vst.msk [vmem:[#allocation3 + $0x3e8] sm:$0xff] %vm13092_vm4, %v13084_v37  ;;  %v13022_v44 = vadd.f32 %v32827_v14, %v12864_v21  ;;  %25559 = vmatprep.mubr.msk.f32.mxu0 %vm13092_vm4, %v13425_v41  ;;  %v33080_v53 = vld [vmem:[#allocation3 + $0xef] sm:$0xff]  ;;  %v33116_v20 = vld [vmem:[#allocation3 + $0x187] sm:$0xff] }
 0x85e   :  { %v13087_v30 = vmax.f32 %v13023_v27, 0.0  ;;  %25560 = vmatmul.mubr.msk.f32.gmra.mrb[118].mxu0 %vm13092_vm4, %v13426_v46  ;;  %v33088_v25 = vld [vmem:[#allocation3 + $0x10f] sm:$0xff]  ;;  %v33124_v13 = vld [vmem:[#allocation3 + $0x1a7] sm:$0xff] }
 0x85f   :  { %v13086_v58 = vmax.f32 %v13022_v44, 0.0  ;;  %v25466_v7 = vpop.f32.mrb[124].mxu1  ;;  %v13428_v23 = vld [vmem:[#allocation3 + $0x3d0] sm:$0xff]  ;;  %v33132_v31 = vld [vmem:[#allocation3 + $0x1c7] sm:$0xff] }
 0x860   :  { %13298 = vst.msk [vmem:[#allocation3 + $0x410] sm:$0xff] %vm13092_vm4, %v13087_v30  ;;  %v13025_v11 = vadd.f32 %v25466_v7, %v32827_v14  ;;  %v12874_v15 = vpop.f32.mrb[125].mxu1  ;;  %v13427_v61 = vld [vmem:[#allocation3 + $0x3c8] sm:$0xff] }
 0x861   :  { %13297 = vst.msk [vmem:[#allocation3 + $0x408] sm:$0xff] %vm13092_vm4, %v13086_v58  ;;  %v13024_v18 = vadd.f32 %v32827_v14, %v12874_v15  ;;  %25562 = vmatprep.mubr.msk.f32.mxu0 %vm13092_vm4, %v13427_v61  ;;  %v33096_v12 = vld [vmem:[#allocation3 + $0x12f] sm:$0xff]  ;;  %v33140_v40 = vld [vmem:[#allocation3 + $0x1e7] sm:$0xff] }
 0x862   :  { %v13089_v57 = vmax.f32 %v13025_v11, 0.0  ;;  %25563 = vmatmul.mubr.msk.f32.gmra.mrb[120].mxu0 %vm13092_vm4, %v13428_v23  ;;  %v33104_v38 = vld [vmem:[#allocation3 + $0x14f] sm:$0xff]  ;;  %v13335_v27 = vld [vmem:[#allocation3 + $0x247] sm:$0xff] }
 0x863   :  { %v13088_v28 = vmax.f32 %v13024_v18, 0.0  ;;  %v25469_v32 = vpop.f32.mrb[126].mxu1  ;;  %v13430_v10 = vld [vmem:[#allocation3 + $0x3f0] sm:$0xff]  ;;  %v33150_v44 = vld [vmem:[#allocation3 + $0x267] sm:$0xff] }
 0x864   :  { %13300 = vst.msk [vmem:[#allocation3 + $0x430] sm:$0xff] %vm13092_vm4, %v13089_v57  ;;  %v13027_v59 = vadd.f32 %v25469_v32, %v32827_v14  ;;  %v12884_v55 = vpop.f32.mrb[127].mxu1  ;;  %v13429_v36 = vld [vmem:[#allocation3 + $0x3e8] sm:$0xff] }
 0x865   :  { %13299 = vst.msk [vmem:[#allocation3 + $0x428] sm:$0xff] %vm13092_vm4, %v13088_v28  ;;  %v13026_v48 = vadd.f32 %v32827_v14, %v12884_v55  ;;  %25565 = vmatprep.mubr.msk.f32.mxu0 %vm13092_vm4, %v13429_v36  ;;  %v33112_v1 = vld [vmem:[#allocation3 + $0x16f] sm:$0xff]  ;;  %v33158_v30 = vld [vmem:[#allocation3 + $0x287] sm:$0xff] }
 0x866   :  { %v13091_v16 = vmax.f32 %v13027_v59, 0.0  ;;  %25566 = vmatmul.mubr.msk.f32.gmra.mrb[122].mxu0 %vm13092_vm4, %v13430_v10  ;;  %v33120_v29 = vld [vmem:[#allocation3 + $0x18f] sm:$0xff]  ;;  %v33166_v7 = vld [vmem:[#allocation3 + $0x2a7] sm:$0xff] }
 0x867   :  { %v13090_v6 = vmax.f32 %v13026_v48, 0.0  ;;  %v13432_v43 = vld [vmem:[#allocation3 + $0x410] sm:$0xff]  ;;  %v33174_v15 = vld [vmem:[#allocation3 + $0x2c7] sm:$0xff] }
 0x868   :  { %13302 = vst.msk [vmem:[#allocation3 + $0x450] sm:$0xff] %vm13092_vm4, %v13091_v16  ;;  %v13431_v52 = vld [vmem:[#allocation3 + $0x408] sm:$0xff] }
 0x869   :  { %13301 = vst.msk [vmem:[#allocation3 + $0x448] sm:$0xff] %vm13092_vm4, %v13090_v6  ;;  %25568 = vmatprep.mubr.msk.f32.mxu0 %vm13092_vm4, %v13431_v52  ;;  %v33128_v33 = vld [vmem:[#allocation3 + $0x1af] sm:$0xff]  ;;  %v33182_v18 = vld [vmem:[#allocation3 + $0x2e7] sm:$0xff] }
 0x86a   :  { %25569 = vmatmul.mubr.msk.f32.gmra.mrb[124].mxu0 %vm13092_vm4, %v13432_v43  ;;  %v33136_v37 = vld [vmem:[#allocation3 + $0x1cf] sm:$0xff]  ;;  %v33190_v57 = vld [vmem:[#allocation3 + $0x307] sm:$0xff] }
 0x86b   :  { %v13434_v14 = vld [vmem:[#allocation3 + $0x430] sm:$0xff]  ;;  %v33198_v32 = vld [vmem:[#allocation3 + $0x327] sm:$0xff] }
 0x86c   :  { %v13433_v47 = vld [vmem:[#allocation3 + $0x428] sm:$0xff] }
 0x86d   :  { %25571 = vmatprep.mubr.msk.f32.mxu0 %vm13092_vm4, %v13433_v47  ;;  %v33144_v21 = vld [vmem:[#allocation3 + $0x1ef] sm:$0xff]  ;;  %v33206_v55 = vld [vmem:[#allocation3 + $0x347] sm:$0xff] }
 0x86e   :  { %25572 = vmatmul.mubr.msk.f32.gmra.mrb[126].mxu0 %vm13092_vm4, %v13434_v14  ;;  %v13336_v41 = vld [vmem:[#allocation3 + $0x24f] sm:$0xff]  ;;  %v33214_v48 = vld [vmem:[#allocation3 + $0x367] sm:$0xff] }
 0x86f   :  { %25582 = vmatprep.mubr.msk.f32.mxu0 %vm13092_vm4, %v13303_v50  ;;  %v33154_v46 = vld [vmem:[#allocation3 + $0x26f] sm:$0xff]  ;;  %v33222_v16 = vld [vmem:[#allocation3 + $0x387] sm:$0xff] }
 0x870   :  { %v33162_v58 = vld [vmem:[#allocation3 + $0x28f] sm:$0xff]  ;;  %v33230_v52 = vld [vmem:[#allocation3 + $0x3a7] sm:$0xff] }
 0x871   :  { %v33170_v11 = vld [vmem:[#allocation3 + $0x2af] sm:$0xff]  ;;  %v33238_v47 = vld [vmem:[#allocation3 + $0x3c7] sm:$0xff] }
 0x872   :  { %25583 = vmatmul.mubr.msk.f32.vlgmr.msra.gmra.mrb[64].mxu0 %vm13092_vm4, %v13304_v26  ;;  %v33178_v61 = vld [vmem:[#allocation3 + $0x2cf] sm:$0xff]  ;;  %35059 = vst [vmem:[#allocation26_spill] sm:$0xff] %v33238_v47  ;;  %v33246_v14 = vld [vmem:[#allocation3 + $0x3e7] sm:$0xff] }
 0x873   :  { %25585 = vmatprep.mubr.msk.f32.mxu0 %vm13092_vm4, %v33024_v0  ;;  %26461 = vmatpush3.bf16.msra.mxu0 %v32839_v63  ;;  %v33044_v63 = vld [vmem:[#allocation3 + $0x67] sm:$0xff]  ;;  %v33186_v23 = vld [vmem:[#allocation3 + $0x2ef] sm:$0xff]  ;;  %35061 = vst [vmem:[#allocation28_spill] sm:$0xff] %v33246_v14 }
 0x874   :  { %26463 = vmatprep.subr.bf16.mxu0 %v26462_v2  ;;  %v33194_v28 = vld [vmem:[#allocation3 + $0x30f] sm:$0xff]  ;;  %v33254_v51 = vld [vmem:[#allocation3 + $0x407] sm:$0xff] }
 0x875   :  { %v33202_v59 = vld [vmem:[#allocation3 + $0x32f] sm:$0xff]  ;;  %35063 = vst [vmem:[#allocation30_spill] sm:$0xff] %v33254_v51 }
 0x876   :  { %25586 = vmatmul.mubr.msk.f32.gmra.mrb[66].mxu0 %vm13092_vm4, %v33031_v62  ;;  %v33210_v36 = vld [vmem:[#allocation3 + $0x34f] sm:$0xff] }
 0x877   :  { %25588 = vmatprep.mubr.msk.f32.mxu0 %vm13092_vm4, %v33035_v34  ;;  %26465 = vmatpush3.bf16.msra.mxu0 %v26462_v2  ;;  %v33218_v10 = vld [vmem:[#allocation3 + $0x36f] sm:$0xff]  ;;  %v33262_v2 = vld [vmem:[#allocation3 + $0x427] sm:$0xff] }
 0x878   :  { %26467 = vmatprep.subr.bf16.mxu0 %v33029_v22  ;;  %v33226_v6 = vld [vmem:[#allocation3 + $0x38f] sm:$0xff]  ;;  %35065 = vst [vmem:[#allocation32_spill] sm:$0xff] %v33262_v2 }
 0x879   :  { %v33234_v43 = vld [vmem:[#allocation3 + $0x3af] sm:$0xff] }
 0x87a   :  { %25589 = vmatmul.mubr.msk.f32.gmra.mrb[68].mxu0 %vm13092_vm4, %v33040_v5  ;;  %v33242_v50 = vld [vmem:[#allocation3 + $0x3cf] sm:$0xff] }
 0x87b   :  { %25591 = vmatprep.mubr.msk.f32.mxu0 %vm13092_vm4, %v33044_v63  ;;  %35060 = vst [vmem:[#allocation27_spill] sm:$0xff] %v33242_v50  ;;  %v33250_v56 = vld [vmem:[#allocation3 + $0x3ef] sm:$0xff] }
 0x87c   :  { %35062 = vst [vmem:[#allocation29_spill] sm:$0xff] %v33250_v56  ;;  %v33258_v26 = vld [vmem:[#allocation3 + $0x40f] sm:$0xff] }
 0x87d   :  { %35064 = vst [vmem:[#allocation31_spill] sm:$0xff] %v33258_v26  ;;  %v14594_v3 = vld [vmem:[#allocation3 + $0x9] sm:$0xff] }
 0x87e   :  { %25592 = vmatmul.mubr.msk.f32.gmra.mrb[70].mxu0 %vm13092_vm4, %v33048_v17  ;;  %v33266_v9 = vld [vmem:[#allocation3 + $0x42f] sm:$0xff] }
 0x87f   :  { %25594 = vmatprep.mubr.msk.f32.mxu0 %vm13092_vm4, %v33052_v4 }
 0x882   :  { %25595 = vmatmul.mubr.msk.f32.gmra.mrb[72].mxu0 %vm13092_vm4, %v33056_v19 }
 0x883   :  { %25597 = vmatprep.mubr.msk.f32.mxu0 %vm13092_vm4, %v33060_v24 }
 0x886   :  { %25598 = vmatmul.mubr.msk.f32.gmra.mrb[74].mxu0 %vm13092_vm4, %v33064_v45 }
 0x887   :  { %25600 = vmatprep.mubr.msk.f32.mxu0 %vm13092_vm4, %v33068_v8 }
 0x88a   :  { %25601 = vmatmul.mubr.msk.f32.gmra.mrb[76].mxu0 %vm13092_vm4, %v33072_v49 }
 0x88b   :  { %25603 = vmatprep.mubr.msk.f32.mxu0 %vm13092_vm4, %v33076_v54 }
 0x88e   :  { %25604 = vmatmul.mubr.msk.f32.gmra.mrb[78].mxu0 %vm13092_vm4, %v33080_v53 }
 0x88f   :  { %25606 = vmatprep.mubr.msk.f32.mxu0 %vm13092_vm4, %v33084_v42 }
 0x892   :  { %25607 = vmatmul.mubr.msk.f32.gmra.mrb[80].mxu0 %vm13092_vm4, %v33088_v25 }
 0x893   :  { %25609 = vmatprep.mubr.msk.f32.mxu0 %vm13092_vm4, %v33092_v60 }
 0x896   :  { %25610 = vmatmul.mubr.msk.f32.gmra.mrb[82].mxu0 %vm13092_vm4, %v33096_v12 }
 0x897   :  { %25612 = vmatprep.mubr.msk.f32.mxu0 %vm13092_vm4, %v33100_v39 }
 0x89a   :  { %25613 = vmatmul.mubr.msk.f32.gmra.mrb[84].mxu0 %vm13092_vm4, %v33104_v38 }
 0x89b   :  { %25615 = vmatprep.mubr.msk.f32.mxu0 %vm13092_vm4, %v33108_v35 }
 0x89e   :  { %25616 = vmatmul.mubr.msk.f32.gmra.mrb[86].mxu0 %vm13092_vm4, %v33112_v1 }
 0x89f   :  { %25618 = vmatprep.mubr.msk.f32.mxu0 %vm13092_vm4, %v33116_v20 }
 0x8a2   :  { %25619 = vmatmul.mubr.msk.f32.gmra.mrb[88].mxu0 %vm13092_vm4, %v33120_v29 }
 0x8a3   :  { %25621 = vmatprep.mubr.msk.f32.mxu0 %vm13092_vm4, %v33124_v13 }
 0x8a6   :  { %25622 = vmatmul.mubr.msk.f32.gmra.mrb[90].mxu0 %vm13092_vm4, %v33128_v33 }
 0x8a7   :  { %25624 = vmatprep.mubr.msk.f32.mxu0 %vm13092_vm4, %v33132_v31 }
 0x8aa   :  { %25625 = vmatmul.mubr.msk.f32.gmra.mrb[92].mxu0 %vm13092_vm4, %v33136_v37 }
 0x8ab   :  { %25627 = vmatprep.mubr.msk.f32.mxu0 %vm13092_vm4, %v33140_v40 }
 0x8ae   :  { %25628 = vmatmul.mubr.msk.f32.gmra.mrb[94].mxu0 %vm13092_vm4, %v33144_v21 }
 0x8af   :  { %25630 = vmatprep.mubr.msk.f32.mxu0 %vm13092_vm4, %v13335_v27  ;;  %v15371_v27 = vld [vmem:[#allocation11 + $0x70] sm:$0xff] }
 0x8b2   :  { %25631 = vmatmul.mubr.msk.f32.gmra.mrb[96].mxu0 %vm13092_vm4, %v13336_v41  ;;  %v15372_v41 = vld [vmem:[#allocation11 + $0x78] sm:$0xff] }
 0x8b3   :  { %25633 = vmatprep.mubr.msk.f32.mxu0 %vm13092_vm4, %v33150_v44 }
 0x8b6   :  { %25634 = vmatmul.mubr.msk.f32.gmra.mrb[98].mxu0 %vm13092_vm4, %v33154_v46 }
 0x8b7   :  { %25636 = vmatprep.mubr.msk.f32.mxu0 %vm13092_vm4, %v33158_v30 }
 0x8ba   :  { %25637 = vmatmul.mubr.msk.f32.gmra.mrb[100].mxu0 %vm13092_vm4, %v33162_v58 }
 0x8bb   :  { %25639 = vmatprep.mubr.msk.f32.mxu0 %vm13092_vm4, %v33166_v7 }
 0x8be   :  { %25640 = vmatmul.mubr.msk.f32.gmra.mrb[102].mxu0 %vm13092_vm4, %v33170_v11 }
 0x8bf   :  { %25642 = vmatprep.mubr.msk.f32.mxu0 %vm13092_vm4, %v33174_v15 }
 0x8c2   :  { %25643 = vmatmul.mubr.msk.f32.gmra.mrb[104].mxu0 %vm13092_vm4, %v33178_v61 }
 0x8c3   :  { %25645 = vmatprep.mubr.msk.f32.mxu0 %vm13092_vm4, %v33182_v18 }
 0x8c6   :  { %25646 = vmatmul.mubr.msk.f32.gmra.mrb[106].mxu0 %vm13092_vm4, %v33186_v23 }
 0x8c7   :  { %25648 = vmatprep.mubr.msk.f32.mxu0 %vm13092_vm4, %v33190_v57 }
 0x8ca   :  { %25649 = vmatmul.mubr.msk.f32.gmra.mrb[108].mxu0 %vm13092_vm4, %v33194_v28 }
 0x8cb   :  { %25651 = vmatprep.mubr.msk.f32.mxu0 %vm13092_vm4, %v33198_v32 }
 0x8ce   :  { %25652 = vmatmul.mubr.msk.f32.gmra.mrb[110].mxu0 %vm13092_vm4, %v33202_v59 }
 0x8cf   :  { %25654 = vmatprep.mubr.msk.f32.mxu0 %vm13092_vm4, %v33206_v55 }
 0x8d2   :  { %25655 = vmatmul.mubr.msk.f32.gmra.mrb[112].mxu0 %vm13092_vm4, %v33210_v36 }
 0x8d3   :  { %25657 = vmatprep.mubr.msk.f32.mxu0 %vm13092_vm4, %v33214_v48 }
 0x8d6   :  { %25658 = vmatmul.mubr.msk.f32.gmra.mrb[114].mxu0 %vm13092_vm4, %v33218_v10 }
 0x8d7   :  { %25660 = vmatprep.mubr.msk.f32.mxu0 %vm13092_vm4, %v33222_v16 }
 0x8da   :  { %25661 = vmatmul.mubr.msk.f32.gmra.mrb[116].mxu0 %vm13092_vm4, %v33226_v6 }
 0x8db   :  { %25663 = vmatprep.mubr.msk.f32.mxu0 %vm13092_vm4, %v33230_v52 }
 0x8de   :  { %25664 = vmatmul.mubr.msk.f32.gmra.mrb[118].mxu0 %vm13092_vm4, %v33234_v43 }
 0x8df   :  { %25666 = vmatprep.mubr.msk.f32.mxu0 %vm13092_vm4, %v33238_v47  ;;  %v33279_v47 = vld [vmem:[#allocation3 + $0x31] sm:$0xff] }
 0x8e2   :  { %25667 = vmatmul.mubr.msk.f32.gmra.mrb[120].mxu0 %vm13092_vm4, %v33242_v50  ;;  %v16080_v50 = vld [vmem:[#allocation11 + $0x88] sm:$0xff] }
 0x8e3   :  { %25669 = vmatprep.mubr.msk.f32.mxu0 %vm13092_vm4, %v33246_v14  ;;  %v16079_v14 = vld [vmem:[#allocation11 + $0x80] sm:$0xff] }
 0x8e6   :  { %25670 = vmatmul.mubr.msk.f32.gmra.mrb[122].mxu0 %vm13092_vm4, %v33250_v56  ;;  %v26470_v56 = vpack.c.bf16 %v15372_v41, %v15371_v27  ;;  %v33308_v27 = vld [vmem:[#allocation3 + $0xa9] sm:$0xff]  ;;  %v33312_v41 = vld [vmem:[#allocation3 + $0xb1] sm:$0xff] }
 0x8e7   :  { %25672 = vmatprep.mubr.msk.f32.mxu0 %vm13092_vm4, %v33254_v51  ;;  %v14595_v51 = vld [vmem:[#allocation3 + $0x11] sm:$0xff]  ;;  %35071 = vst [vmem:[#allocation38_spill] sm:$0xff] %v33308_v27  ;;  %35072 = vst [vmem:[#allocation39_spill] sm:$0xff] %v33312_v41 }
 0x8ea   :  { %25673 = vmatmul.mubr.msk.f32.gmra.mrb[124].mxu0 %vm13092_vm4, %v33258_v26  ;;  %v33272_v26 = vld [vmem:[#allocation3 + $0x29] sm:$0xff] }
 0x8eb   :  { %25675 = vmatprep.mubr.msk.f32.mxu0 %vm13092_vm4, %v33262_v2  ;;  %v33277_v2 = vpack.c.bf16 %v16080_v50, %v16079_v14  ;;  %v33296_v50 = vld [vmem:[#allocation3 + $0x71] sm:$0xff]  ;;  %v33300_v14 = vld [vmem:[#allocation3 + $0x89] sm:$0xff] }
 0x8ec   :  { %35068 = vst [vmem:[#allocation35_spill] sm:$0xff] %v33296_v50  ;;  %35069 = vst [vmem:[#allocation36_spill] sm:$0xff] %v33300_v14 }
 0x8ee   :  { %25676 = vmatmul.mubr.msk.f32.gmra.mrb[126].mxu0 %vm13092_vm4, %v33266_v9 }
 0x8ef   :  { %25686 = vmatprep.mubr.msk.f32.mxu0 %vm13092_vm4, %v14594_v3  ;;  %v33283_v3 = vld [vmem:[#allocation3 + $0x49] sm:$0xff] }
 0x8f2   :  { %25687 = vmatmul.mubr.msk.f32.vlgmr.msra.gmra.mrb[64].mxu0 %vm13092_vm4, %v14595_v51  ;;  %v33288_v51 = vld [vmem:[#allocation3 + $0x51] sm:$0xff] }
 0x8f3   :  { %25689 = vmatprep.mubr.msk.f32.mxu0 %vm13092_vm4, %v33272_v26  ;;  %26469 = vmatpush3.bf16.msra.mxu0 %v33029_v22  ;;  %35066 = vst [vmem:[#allocation33_spill] sm:$0xff] %v33288_v51  ;;  %v33292_v22 = vld [vmem:[#allocation3 + $0x69] sm:$0xff] }
 0x8f4   :  { %26471 = vmatprep.subr.bf16.mxu0 %v26470_v56  ;;  %35067 = vst [vmem:[#allocation34_spill] sm:$0xff] %v33292_v22 }
 0x8f6   :  { %25690 = vmatmul.mubr.msk.f32.gmra.mrb[66].mxu0 %vm13092_vm4, %v33279_v47 }
 0x8f7   :  { %25692 = vmatprep.mubr.msk.f32.mxu0 %vm13092_vm4, %v33283_v3  ;;  %26473 = vmatpush3.bf16.msra.mxu0 %v26470_v56  ;;  %v33304_v56 = vld [vmem:[#allocation3 + $0x91] sm:$0xff] }
 0x8f8   :  { %26475 = vmatprep.subr.bf16.mxu0 %v33277_v2  ;;  %35070 = vst [vmem:[#allocation37_spill] sm:$0xff] %v33304_v56 }
 0x8fa   :  { %25693 = vmatmul.mubr.msk.f32.gmra.mrb[68].mxu0 %vm13092_vm4, %v33288_v51  ;;  %v16082_v51 = vld [vmem:[#allocation11 + $0x98] sm:$0xff] }
 0x8fb   :  { %25695 = vmatprep.mubr.msk.f32.mxu0 %vm13092_vm4, %v33292_v22  ;;  %v33392_v22 = vld [vmem:[#allocation3 + $0x1f1] sm:$0xff] }
 0x8fc   :  { %35092 = vst [vmem:[#allocation56_spill] sm:$0xff] %v33392_v22 }
 0x8fe   :  { %25696 = vmatmul.mubr.msk.f32.gmra.mrb[70].mxu0 %vm13092_vm4, %v33296_v50  ;;  %v33316_v50 = vld [vmem:[#allocation3 + $0xc9] sm:$0xff] }
 0x8ff   :  { %25698 = vmatprep.mubr.msk.f32.mxu0 %vm13092_vm4, %v33300_v14  ;;  %35073 = vst [vmem:[#allocation40_spill] sm:$0xff] %v33316_v50  ;;  %v33320_v14 = vld [vmem:[#allocation3 + $0xd1] sm:$0xff] }
 0x900   :  { %35074 = vst [vmem:[#allocation41_spill] sm:$0xff] %v33320_v14 }
 0x902   :  { %25699 = vmatmul.mubr.msk.f32.gmra.mrb[72].mxu0 %vm13092_vm4, %v33304_v56  ;;  %v33324_v56 = vld [vmem:[#allocation3 + $0xe9] sm:$0xff] }
 0x903   :  { %25701 = vmatprep.mubr.msk.f32.mxu0 %vm13092_vm4, %v33308_v27  ;;  %35075 = vst [vmem:[#allocation42_spill] sm:$0xff] %v33324_v56  ;;  %v33328_v27 = vld [vmem:[#allocation3 + $0xf1] sm:$0xff] }
 0x904   :  { %35076 = vst [vmem:[#allocation43_spill] sm:$0xff] %v33328_v27 }
 0x906   :  { %25702 = vmatmul.mubr.msk.f32.gmra.mrb[74].mxu0 %vm13092_vm4, %v33312_v41  ;;  %v33332_v41 = vld [vmem:[#allocation3 + $0x109] sm:$0xff] }
 0x907   :  { %25704 = vmatprep.mubr.msk.f32.mxu0 %vm13092_vm4, %v33316_v50  ;;  %35077 = vst [vmem:[#allocation44_spill] sm:$0xff] %v33332_v41  ;;  %v33336_v50 = vld [vmem:[#allocation3 + $0x111] sm:$0xff] }
 0x908   :  { %35078 = vst [vmem:[#allocation45_spill] sm:$0xff] %v33336_v50 }
 0x90a   :  { %25705 = vmatmul.mubr.msk.f32.gmra.mrb[76].mxu0 %vm13092_vm4, %v33320_v14  ;;  %v33340_v14 = vld [vmem:[#allocation3 + $0x129] sm:$0xff] }
 0x90b   :  { %25707 = vmatprep.mubr.msk.f32.mxu0 %vm13092_vm4, %v33324_v56  ;;  %35079 = vst [vmem:[#allocation46_spill] sm:$0xff] %v33340_v14  ;;  %v33344_v56 = vld [vmem:[#allocation3 + $0x131] sm:$0xff] }
 0x90c   :  { %35080 = vst [vmem:[#allocation47_spill] sm:$0xff] %v33344_v56 }
 0x90e   :  { %25708 = vmatmul.mubr.msk.f32.gmra.mrb[78].mxu0 %vm13092_vm4, %v33328_v27  ;;  %v33348_v27 = vld [vmem:[#allocation3 + $0x149] sm:$0xff] }
 0x90f   :  { %25710 = vmatprep.mubr.msk.f32.mxu0 %vm13092_vm4, %v33332_v41  ;;  %35081 = vst [vmem:[#allocation48_spill] sm:$0xff] %v33348_v27  ;;  %v33352_v41 = vld [vmem:[#allocation3 + $0x151] sm:$0xff] }
 0x910   :  { %35082 = vst [vmem:[#allocation51_spill] sm:$0xff] %v33352_v41 }
 0x912   :  { %25711 = vmatmul.mubr.msk.f32.gmra.mrb[80].mxu0 %vm13092_vm4, %v33336_v50  ;;  %v33356_v50 = vld [vmem:[#allocation3 + $0x169] sm:$0xff] }
 0x913   :  { %25713 = vmatprep.mubr.msk.f32.mxu0 %vm13092_vm4, %v33340_v14  ;;  %35083 = vst [vmem:[#allocation52_spill] sm:$0xff] %v33356_v50  ;;  %v33360_v14 = vld [vmem:[#allocation3 + $0x171] sm:$0xff] }
 0x914   :  { %35084 = vst [vmem:[#allocation49_spill] sm:$0xff] %v33360_v14 }
 0x916   :  { %25714 = vmatmul.mubr.msk.f32.gmra.mrb[82].mxu0 %vm13092_vm4, %v33344_v56  ;;  %v33364_v56 = vld [vmem:[#allocation3 + $0x189] sm:$0xff] }
 0x917   :  { %25716 = vmatprep.mubr.msk.f32.mxu0 %vm13092_vm4, %v33348_v27  ;;  %35085 = vst [vmem:[#allocation50_spill] sm:$0xff] %v33364_v56  ;;  %v33368_v27 = vld [vmem:[#allocation3 + $0x191] sm:$0xff] }
 0x918   :  { %35086 = vst [vmem:[#allocation18_spill] sm:$0xff] %v33368_v27 }
 0x91a   :  { %25717 = vmatmul.mubr.msk.f32.gmra.mrb[84].mxu0 %vm13092_vm4, %v33352_v41  ;;  %v33372_v41 = vld [vmem:[#allocation3 + $0x1a9] sm:$0xff] }
 0x91b   :  { %25719 = vmatprep.mubr.msk.f32.mxu0 %vm13092_vm4, %v33356_v50  ;;  %35087 = vst [vmem:[#allocation19_spill] sm:$0xff] %v33372_v41  ;;  %v33376_v50 = vld [vmem:[#allocation3 + $0x1b1] sm:$0xff] }
 0x91c   :  { %35088 = vst [vmem:[#allocation20_spill] sm:$0xff] %v33376_v50 }
 0x91e   :  { %25720 = vmatmul.mubr.msk.f32.gmra.mrb[86].mxu0 %vm13092_vm4, %v33360_v14  ;;  %v33380_v14 = vld [vmem:[#allocation3 + $0x1c9] sm:$0xff] }
 0x91f   :  { %25722 = vmatprep.mubr.msk.f32.mxu0 %vm13092_vm4, %v33364_v56  ;;  %35089 = vst [vmem:[#allocation53_spill] sm:$0xff] %v33380_v14  ;;  %v33384_v56 = vld [vmem:[#allocation3 + $0x1d1] sm:$0xff] }
 0x920   :  { %35090 = vst [vmem:[#allocation54_spill] sm:$0xff] %v33384_v56 }
 0x922   :  { %25723 = vmatmul.mubr.msk.f32.gmra.mrb[88].mxu0 %vm13092_vm4, %v33368_v27  ;;  %v33388_v27 = vld [vmem:[#allocation3 + $0x1e9] sm:$0xff] }
 0x923   :  { %25725 = vmatprep.mubr.msk.f32.mxu0 %vm13092_vm4, %v33372_v41  ;;  %35091 = vst [vmem:[#allocation55_spill] sm:$0xff] %v33388_v27  ;;  %v14626_v41 = vld [vmem:[#allocation3 + $0x249] sm:$0xff] }
 0x926   :  { %25726 = vmatmul.mubr.msk.f32.gmra.mrb[90].mxu0 %vm13092_vm4, %v33376_v50  ;;  %v14627_v50 = vld [vmem:[#allocation3 + $0x251] sm:$0xff] }
 0x927   :  { %25728 = vmatprep.mubr.msk.f32.mxu0 %vm13092_vm4, %v33380_v14  ;;  %v33398_v14 = vld [vmem:[#allocation3 + $0x269] sm:$0xff] }
 0x928   :  { %35093 = vst [vmem:[#allocation57_spill] sm:$0xff] %v33398_v14 }
 0x92a   :  { %25729 = vmatmul.mubr.msk.f32.gmra.mrb[92].mxu0 %vm13092_vm4, %v33384_v56  ;;  %v33402_v56 = vld [vmem:[#allocation3 + $0x271] sm:$0xff] }
 0x92b   :  { %25731 = vmatprep.mubr.msk.f32.mxu0 %vm13092_vm4, %v33388_v27  ;;  %35094 = vst [vmem:[#allocation58_spill] sm:$0xff] %v33402_v56  ;;  %v33406_v27 = vld [vmem:[#allocation3 + $0x289] sm:$0xff] }
 0x92c   :  { %35095 = vst [vmem:[#allocation59_spill] sm:$0xff] %v33406_v27 }
 0x92e   :  { %25732 = vmatmul.mubr.msk.f32.gmra.mrb[94].mxu0 %vm13092_vm4, %v33392_v22  ;;  %v33410_v22 = vld [vmem:[#allocation3 + $0x291] sm:$0xff] }
 0x92f   :  { %25734 = vmatprep.mubr.msk.f32.mxu0 %vm13092_vm4, %v14626_v41  ;;  %35096 = vst [vmem:[#allocation60_spill] sm:$0xff] %v33410_v22  ;;  %v33418_v41 = vld [vmem:[#allocation3 + $0x2b1] sm:$0xff] }
 0x930   :  { %35098 = vst [vmem:[#allocation62_spill] sm:$0xff] %v33418_v41 }
 0x932   :  { %25735 = vmatmul.mubr.msk.f32.gmra.mrb[96].mxu0 %vm13092_vm4, %v14627_v50  ;;  %v33414_v50 = vld [vmem:[#allocation3 + $0x2a9] sm:$0xff] }
 0x933   :  { %25737 = vmatprep.mubr.msk.f32.mxu0 %vm13092_vm4, %v33398_v14  ;;  %35097 = vst [vmem:[#allocation61_spill] sm:$0xff] %v33414_v50  ;;  %v16081_v14 = vld [vmem:[#allocation11 + $0x90] sm:$0xff] }
 0x936   :  { %25738 = vmatmul.mubr.msk.f32.gmra.mrb[98].mxu0 %vm13092_vm4, %v33402_v56  ;;  %v33422_v56 = vld [vmem:[#allocation3 + $0x2c9] sm:$0xff] }
 0x937   :  { %25740 = vmatprep.mubr.msk.f32.mxu0 %vm13092_vm4, %v33406_v27  ;;  %35099 = vst [vmem:[#allocation63_spill] sm:$0xff] %v33422_v56  ;;  %v33426_v27 = vld [vmem:[#allocation3 + $0x2d1] sm:$0xff] }
 0x938   :  { %35100 = vst [vmem:[#allocation64_spill] sm:$0xff] %v33426_v27 }
 0x93a   :  { %25741 = vmatmul.mubr.msk.f32.gmra.mrb[100].mxu0 %vm13092_vm4, %v33410_v22  ;;  %v33430_v22 = vld [vmem:[#allocation3 + $0x2e9] sm:$0xff] }
 0x93b   :  { %25743 = vmatprep.mubr.msk.f32.mxu0 %vm13092_vm4, %v33414_v50  ;;  %35101 = vst [vmem:[#allocation65_spill] sm:$0xff] %v33430_v22  ;;  %v33434_v50 = vld [vmem:[#allocation3 + $0x2f1] sm:$0xff] }
 0x93c   :  { %35102 = vst [vmem:[#allocation66_spill] sm:$0xff] %v33434_v50 }
 0x93e   :  { %25744 = vmatmul.mubr.msk.f32.gmra.mrb[102].mxu0 %vm13092_vm4, %v33418_v41  ;;  %v33438_v41 = vld [vmem:[#allocation3 + $0x309] sm:$0xff] }
 0x93f   :  { %25746 = vmatprep.mubr.msk.f32.mxu0 %vm13092_vm4, %v33422_v56  ;;  %35103 = vst [vmem:[#allocation67_spill] sm:$0xff] %v33438_v41  ;;  %v33442_v56 = vld [vmem:[#allocation3 + $0x311] sm:$0xff] }
 0x940   :  { %35104 = vst [vmem:[#allocation68_spill] sm:$0xff] %v33442_v56 }
 0x942   :  { %25747 = vmatmul.mubr.msk.f32.gmra.mrb[104].mxu0 %vm13092_vm4, %v33426_v27  ;;  %v33446_v27 = vld [vmem:[#allocation3 + $0x329] sm:$0xff] }
 0x943   :  { %25749 = vmatprep.mubr.msk.f32.mxu0 %vm13092_vm4, %v33430_v22  ;;  %35105 = vst [vmem:[#allocation69_spill] sm:$0xff] %v33446_v27  ;;  %v33450_v22 = vld [vmem:[#allocation3 + $0x331] sm:$0xff] }
 0x944   :  { %35106 = vst [vmem:[#allocation70_spill] sm:$0xff] %v33450_v22 }
 0x946   :  { %25750 = vmatmul.mubr.msk.f32.gmra.mrb[106].mxu0 %vm13092_vm4, %v33434_v50  ;;  %v33454_v50 = vld [vmem:[#allocation3 + $0x349] sm:$0xff] }
 0x947   :  { %25752 = vmatprep.mubr.msk.f32.mxu0 %vm13092_vm4, %v33438_v41  ;;  %35107 = vst [vmem:[#allocation71_spill] sm:$0xff] %v33454_v50  ;;  %v33458_v41 = vld [vmem:[#allocation3 + $0x351] sm:$0xff] }
 0x948   :  { %35108 = vst [vmem:[#allocation72_spill] sm:$0xff] %v33458_v41 }
 0x94a   :  { %25753 = vmatmul.mubr.msk.f32.gmra.mrb[108].mxu0 %vm13092_vm4, %v33442_v56  ;;  %v33462_v56 = vld [vmem:[#allocation3 + $0x369] sm:$0xff] }
 0x94b   :  { %25755 = vmatprep.mubr.msk.f32.mxu0 %vm13092_vm4, %v33446_v27  ;;  %35109 = vst [vmem:[#allocation73_spill] sm:$0xff] %v33462_v56  ;;  %v33466_v27 = vld [vmem:[#allocation3 + $0x371] sm:$0xff] }
 0x94c   :  { %35110 = vst [vmem:[#allocation74_spill] sm:$0xff] %v33466_v27 }
 0x94e   :  { %25756 = vmatmul.mubr.msk.f32.gmra.mrb[110].mxu0 %vm13092_vm4, %v33450_v22  ;;  %v33470_v22 = vld [vmem:[#allocation3 + $0x389] sm:$0xff] }
 0x94f   :  { %25758 = vmatprep.mubr.msk.f32.mxu0 %vm13092_vm4, %v33454_v50  ;;  %35111 = vst [vmem:[#allocation75_spill] sm:$0xff] %v33470_v22  ;;  %v33474_v50 = vld [vmem:[#allocation3 + $0x391] sm:$0xff] }
 0x950   :  { %35112 = vst [vmem:[#allocation76_spill] sm:$0xff] %v33474_v50 }
 0x952   :  { %25759 = vmatmul.mubr.msk.f32.gmra.mrb[112].mxu0 %vm13092_vm4, %v33458_v41  ;;  %v33478_v41 = vld [vmem:[#allocation3 + $0x3a9] sm:$0xff] }
 0x953   :  { %25761 = vmatprep.mubr.msk.f32.mxu0 %vm13092_vm4, %v33462_v56  ;;  %35113 = vst [vmem:[#allocation77_spill] sm:$0xff] %v33478_v41  ;;  %v33482_v56 = vld [vmem:[#allocation3 + $0x3b1] sm:$0xff] }
 0x954   :  { %35114 = vst [vmem:[#allocation21_spill] sm:$0xff] %v33482_v56 }
 0x956   :  { %25762 = vmatmul.mubr.msk.f32.gmra.mrb[114].mxu0 %vm13092_vm4, %v33466_v27  ;;  %v33486_v27 = vld [vmem:[#allocation3 + $0x3c9] sm:$0xff] }
 0x957   :  { %25764 = vmatprep.mubr.msk.f32.mxu0 %vm13092_vm4, %v33470_v22  ;;  %35115 = vst [vmem:[#allocation22_spill] sm:$0xff] %v33486_v27  ;;  %v33490_v22 = vld [vmem:[#allocation3 + $0x3d1] sm:$0xff] }
 0x958   :  { %35116 = vst [vmem:[#allocation23_spill] sm:$0xff] %v33490_v22 }
 0x95a   :  { %25765 = vmatmul.mubr.msk.f32.gmra.mrb[116].mxu0 %vm13092_vm4, %v33474_v50  ;;  %v33494_v50 = vld [vmem:[#allocation3 + $0x3e9] sm:$0xff] }
 0x95b   :  { %25767 = vmatprep.mubr.msk.f32.mxu0 %vm13092_vm4, %v33478_v41  ;;  %35117 = vst [vmem:[#allocation24_spill] sm:$0xff] %v33494_v50  ;;  %v33498_v41 = vld [vmem:[#allocation3 + $0x3f1] sm:$0xff] }
 0x95c   :  { %35118 = vst [vmem:[#allocation78_spill] sm:$0xff] %v33498_v41 }
 0x95e   :  { %25768 = vmatmul.mubr.msk.f32.gmra.mrb[118].mxu0 %vm13092_vm4, %v33482_v56  ;;  %v33502_v56 = vld [vmem:[#allocation3 + $0x409] sm:$0xff] }
 0x95f   :  { %25770 = vmatprep.mubr.msk.f32.mxu0 %vm13092_vm4, %v33486_v27  ;;  %35119 = vst [vmem:[#allocation79_spill] sm:$0xff] %v33502_v56  ;;  %v33506_v27 = vld [vmem:[#allocation3 + $0x411] sm:$0xff] }
 0x960   :  { %35120 = vst [vmem:[#allocation80_spill] sm:$0xff] %v33506_v27 }
 0x962   :  { %25771 = vmatmul.mubr.msk.f32.gmra.mrb[120].mxu0 %vm13092_vm4, %v33490_v22  ;;  %v33510_v22 = vld [vmem:[#allocation3 + $0x429] sm:$0xff] }
 0x963   :  { %25773 = vmatprep.mubr.msk.f32.mxu0 %vm13092_vm4, %v33494_v50  ;;  %35121 = vst [vmem:[#allocation81_spill] sm:$0xff] %v33510_v22  ;;  %v33514_v50 = vld [vmem:[#allocation3 + $0x431] sm:$0xff] }
 0x966   :  { %25774 = vmatmul.mubr.msk.f32.gmra.mrb[122].mxu0 %vm13092_vm4, %v33498_v41  ;;  %v16790_v41 = vld [vmem:[#allocation11 + $0xa8] sm:$0xff] }
 0x967   :  { %25776 = vmatprep.mubr.msk.f32.mxu0 %vm13092_vm4, %v33502_v56  ;;  %v26478_v56 = vpack.c.bf16 %v16082_v51, %v16081_v14  ;;  %v33798_v51 = vld [vmem:[#allocation3 + $0x2b0] sm:$0xff] }
 0x968   :  { %v33806_v14 = vld [vmem:[#allocation3 + $0x2d0] sm:$0xff] }
 0x96a   :  { %25777 = vmatmul.mubr.msk.f32.gmra.mrb[124].mxu0 %vm13092_vm4, %v33506_v27  ;;  %v16789_v27 = vld [vmem:[#allocation11 + $0xa0] sm:$0xff] }
 0x96b   :  { %25779 = vmatprep.mubr.msk.f32.mxu0 %vm13092_vm4, %v33510_v22  ;;  %v33525_v22 = vpack.c.bf16 %v16790_v41, %v16789_v27  ;;  %v33814_v27 = vld [vmem:[#allocation3 + $0x2f0] sm:$0xff]  ;;  %v33818_v41 = vld [vmem:[#allocation3 + $0x308] sm:$0xff] }
 0x96e   :  { %25780 = vmatmul.mubr.msk.f32.gmra.mrb[126].mxu0 %vm13092_vm4, %v33514_v50 }
 0x96f   :  { %25790 = vmatprep.mubr.msk.f32.mxu0 %vm13092_vm4, %v33024_v0  ;;  %v33582_v0 = vld [vmem:[#allocation3 + $0x207] sm:$0xff] }
 0x972   :  { %25791 = vmatmul.mubr.msk.f32.vlgmr.msra.gmra.mrb[64].mxu0 %vm13092_vm4, %v33031_v62  ;;  %v33586_v62 = vld [vmem:[#allocation3 + $0x20f] sm:$0xff] }
 0x973   :  { %25793 = vmatprep.mubr.msk.f32.mxu0 %vm13092_vm4, %v33035_v34  ;;  %26477 = vmatpush3.bf16.msra.mxu0 %v33277_v2  ;;  %v35122_v34 = vld [vmem:[#allocation26_spill] sm:$0xff]  ;;  %v33790_v2 = vld [vmem:[#allocation3 + $0x290] sm:$0xff] }
 0x974   :  { %26479 = vmatprep.subr.bf16.mxu0 %v26478_v56 }
 0x976   :  { %25794 = vmatmul.mubr.msk.f32.gmra.mrb[66].mxu0 %vm13092_vm4, %v33040_v5  ;;  %v35123_v5 = vld [vmem:[#allocation27_spill] sm:$0xff] }
 0x977   :  { %25796 = vmatprep.mubr.msk.f32.mxu0 %vm13092_vm4, %v33044_v63  ;;  %26481 = vmatpush3.bf16.msra.mxu0 %v26478_v56  ;;  %v35124_v63 = vld [vmem:[#allocation28_spill] sm:$0xff] }
 0x978   :  { %26483 = vmatprep.subr.bf16.mxu0 %v33525_v22  ;;  %v33810_v56 = vld [vmem:[#allocation3 + $0x2e8] sm:$0xff] }
 0x97a   :  { %25797 = vmatmul.mubr.msk.f32.gmra.mrb[68].mxu0 %vm13092_vm4, %v33048_v17  ;;  %v35125_v17 = vld [vmem:[#allocation29_spill] sm:$0xff] }
 0x97b   :  { %25799 = vmatprep.mubr.msk.f32.mxu0 %vm13092_vm4, %v33052_v4  ;;  %v35126_v4 = vld [vmem:[#allocation30_spill] sm:$0xff] }
 0x97e   :  { %25800 = vmatmul.mubr.msk.f32.gmra.mrb[70].mxu0 %vm13092_vm4, %v33056_v19  ;;  %v35127_v19 = vld [vmem:[#allocation31_spill] sm:$0xff] }
 0x97f   :  { %25802 = vmatprep.mubr.msk.f32.mxu0 %vm13092_vm4, %v33060_v24  ;;  %v35128_v24 = vld [vmem:[#allocation32_spill] sm:$0xff] }
 0x982   :  { %25803 = vmatmul.mubr.msk.f32.gmra.mrb[72].mxu0 %vm13092_vm4, %v33064_v45  ;;  %v33650_v45 = vld [vmem:[#allocation3 + $0x447] sm:$0xff] }
 0x983   :  { %25805 = vmatprep.mubr.msk.f32.mxu0 %vm13092_vm4, %v33068_v8  ;;  %v33654_v8 = vld [vmem:[#allocation3 + $0x44f] sm:$0xff] }
 0x986   :  { %25806 = vmatmul.mubr.msk.f32.gmra.mrb[74].mxu0 %vm13092_vm4, %v33072_v49  ;;  %v16791_v49 = vld [vmem:[#allocation11 + $0xb0] sm:$0xff] }
 0x987   :  { %25808 = vmatprep.mubr.msk.f32.mxu0 %vm13092_vm4, %v33076_v54  ;;  %v16792_v54 = vld [vmem:[#allocation11 + $0xb8] sm:$0xff] }
 0x98a   :  { %25809 = vmatmul.mubr.msk.f32.gmra.mrb[76].mxu0 %vm13092_vm4, %v33080_v53  ;;  %v16014_v53 = vld [vmem:[#allocation3 + $0x28] sm:$0xff] }
 0x98b   :  { %25811 = vmatprep.mubr.msk.f32.mxu0 %vm13092_vm4, %v33084_v42  ;;  %v26486_v42 = vpack.c.bf16 %v16792_v54, %v16791_v49  ;;  %v33850_v49 = vld [vmem:[#allocation3 + $0x388] sm:$0xff]  ;;  %v33854_v54 = vld [vmem:[#allocation3 + $0x390] sm:$0xff] }
 0x98c   :  { %35129 = vst [vmem:[#allocation82_spill] sm:$0xff] %v33854_v54 }
 0x98e   :  { %25812 = vmatmul.mubr.msk.f32.gmra.mrb[78].mxu0 %vm13092_vm4, %v33088_v25  ;;  %v16015_v25 = vld [vmem:[#allocation3 + $0x30] sm:$0xff] }
 0x98f   :  { %25814 = vmatprep.mubr.msk.f32.mxu0 %vm13092_vm4, %v33092_v60  ;;  %v33660_v60 = vld [vmem:[#allocation3 + $0x48] sm:$0xff] }
 0x992   :  { %25815 = vmatmul.mubr.msk.f32.gmra.mrb[80].mxu0 %vm13092_vm4, %v33096_v12  ;;  %v17500_v12 = vld [vmem:[#allocation11 + $0xc0] sm:$0xff] }
 0x993   :  { %25817 = vmatprep.mubr.msk.f32.mxu0 %vm13092_vm4, %v33100_v39  ;;  %v17501_v39 = vld [vmem:[#allocation11 + $0xc8] sm:$0xff] }
 0x996   :  { %25818 = vmatmul.mubr.msk.f32.gmra.mrb[82].mxu0 %vm13092_vm4, %v33104_v38  ;;  %v33665_v38 = vpack.c.bf16 %v17501_v39, %v17500_v12  ;;  %v33870_v12 = vld [vmem:[#allocation3 + $0x3d0] sm:$0xff]  ;;  %v33874_v39 = vld [vmem:[#allocation3 + $0x3e8] sm:$0xff] }
 0x997   :  { %25820 = vmatprep.mubr.msk.f32.mxu0 %vm13092_vm4, %v33108_v35  ;;  %v33667_v35 = vld [vmem:[#allocation3 + $0x50] sm:$0xff]  ;;  %35133 = vst [vmem:[#allocation86_spill] sm:$0xff] %v33870_v12  ;;  %35134 = vst [vmem:[#allocation25_spill] sm:$0xff] %v33874_v39 }
 0x99a   :  { %25821 = vmatmul.mubr.msk.f32.gmra.mrb[84].mxu0 %vm13092_vm4, %v33112_v1  ;;  %v33671_v1 = vld [vmem:[#allocation3 + $0x68] sm:$0xff] }
 0x99b   :  { %25823 = vmatprep.mubr.msk.f32.mxu0 %vm13092_vm4, %v33116_v20  ;;  %v33676_v20 = vld [vmem:[#allocation3 + $0x70] sm:$0xff] }
 0x99e   :  { %25824 = vmatmul.mubr.msk.f32.gmra.mrb[86].mxu0 %vm13092_vm4, %v33120_v29  ;;  %v33680_v29 = vld [vmem:[#allocation3 + $0x88] sm:$0xff] }
 0x99f   :  { %25826 = vmatprep.mubr.msk.f32.mxu0 %vm13092_vm4, %v33124_v13  ;;  %v33684_v13 = vld [vmem:[#allocation3 + $0x90] sm:$0xff] }
 0x9a2   :  { %25827 = vmatmul.mubr.msk.f32.gmra.mrb[88].mxu0 %vm13092_vm4, %v33128_v33  ;;  %v33688_v33 = vld [vmem:[#allocation3 + $0xa8] sm:$0xff] }
 0x9a3   :  { %25829 = vmatprep.mubr.msk.f32.mxu0 %vm13092_vm4, %v33132_v31  ;;  %v33692_v31 = vld [vmem:[#allocation3 + $0xb0] sm:$0xff] }
 0x9a6   :  { %25830 = vmatmul.mubr.msk.f32.gmra.mrb[90].mxu0 %vm13092_vm4, %v33136_v37  ;;  %v33696_v37 = vld [vmem:[#allocation3 + $0xc8] sm:$0xff] }
 0x9a7   :  { %25832 = vmatprep.mubr.msk.f32.mxu0 %vm13092_vm4, %v33140_v40  ;;  %v33700_v40 = vld [vmem:[#allocation3 + $0xd0] sm:$0xff] }
 0x9aa   :  { %25833 = vmatmul.mubr.msk.f32.gmra.mrb[92].mxu0 %vm13092_vm4, %v33144_v21  ;;  %v33704_v21 = vld [vmem:[#allocation3 + $0xe8] sm:$0xff] }
 0x9ab   :  { %25835 = vmatprep.mubr.msk.f32.mxu0 %vm13092_vm4, %v33582_v0 }
 0x9ae   :  { %25836 = vmatmul.mubr.msk.f32.gmra.mrb[94].mxu0 %vm13092_vm4, %v33586_v62 }
 0x9af   :  { %25838 = vmatprep.mubr.msk.f32.mxu0 %vm13092_vm4, %v33150_v44  ;;  %v33708_v44 = vld [vmem:[#allocation3 + $0xf0] sm:$0xff] }
 0x9b2   :  { %25839 = vmatmul.mubr.msk.f32.gmra.mrb[96].mxu0 %vm13092_vm4, %v33154_v46  ;;  %v33712_v46 = vld [vmem:[#allocation3 + $0x108] sm:$0xff] }
 0x9b3   :  { %25841 = vmatprep.mubr.msk.f32.mxu0 %vm13092_vm4, %v33158_v30  ;;  %v33716_v30 = vld [vmem:[#allocation3 + $0x110] sm:$0xff] }
 0x9b6   :  { %25842 = vmatmul.mubr.msk.f32.gmra.mrb[98].mxu0 %vm13092_vm4, %v33162_v58  ;;  %v33720_v58 = vld [vmem:[#allocation3 + $0x128] sm:$0xff] }
 0x9b7   :  { %25844 = vmatprep.mubr.msk.f32.mxu0 %vm13092_vm4, %v33166_v7  ;;  %v33724_v7 = vld [vmem:[#allocation3 + $0x130] sm:$0xff] }
 0x9ba   :  { %25845 = vmatmul.mubr.msk.f32.gmra.mrb[100].mxu0 %vm13092_vm4, %v33170_v11  ;;  %v33728_v11 = vld [vmem:[#allocation3 + $0x148] sm:$0xff] }
 0x9bb   :  { %25847 = vmatprep.mubr.msk.f32.mxu0 %vm13092_vm4, %v33174_v15  ;;  %v33732_v15 = vld [vmem:[#allocation3 + $0x150] sm:$0xff] }
 0x9be   :  { %25848 = vmatmul.mubr.msk.f32.gmra.mrb[102].mxu0 %vm13092_vm4, %v33178_v61  ;;  %v33736_v61 = vld [vmem:[#allocation3 + $0x168] sm:$0xff] }
 0x9bf   :  { %25850 = vmatprep.mubr.msk.f32.mxu0 %vm13092_vm4, %v33182_v18  ;;  %v33740_v18 = vld [vmem:[#allocation3 + $0x170] sm:$0xff] }
 0x9c2   :  { %25851 = vmatmul.mubr.msk.f32.gmra.mrb[104].mxu0 %vm13092_vm4, %v33186_v23  ;;  %v33744_v23 = vld [vmem:[#allocation3 + $0x188] sm:$0xff] }
 0x9c3   :  { %25853 = vmatprep.mubr.msk.f32.mxu0 %vm13092_vm4, %v33190_v57  ;;  %v33748_v57 = vld [vmem:[#allocation3 + $0x190] sm:$0xff] }
 0x9c6   :  { %25854 = vmatmul.mubr.msk.f32.gmra.mrb[106].mxu0 %vm13092_vm4, %v33194_v28  ;;  %v33752_v28 = vld [vmem:[#allocation3 + $0x1a8] sm:$0xff] }
 0x9c7   :  { %25856 = vmatprep.mubr.msk.f32.mxu0 %vm13092_vm4, %v33198_v32  ;;  %v33756_v32 = vld [vmem:[#allocation3 + $0x1b0] sm:$0xff] }
 0x9ca   :  { %25857 = vmatmul.mubr.msk.f32.gmra.mrb[108].mxu0 %vm13092_vm4, %v33202_v59  ;;  %v33760_v59 = vld [vmem:[#allocation3 + $0x1c8] sm:$0xff] }
 0x9cb   :  { %25859 = vmatprep.mubr.msk.f32.mxu0 %vm13092_vm4, %v33206_v55  ;;  %v33764_v55 = vld [vmem:[#allocation3 + $0x1d0] sm:$0xff] }
 0x9ce   :  { %25860 = vmatmul.mubr.msk.f32.gmra.mrb[110].mxu0 %vm13092_vm4, %v33210_v36  ;;  %v33768_v36 = vld [vmem:[#allocation3 + $0x1e8] sm:$0xff] }
 0x9cf   :  { %25862 = vmatprep.mubr.msk.f32.mxu0 %vm13092_vm4, %v33214_v48  ;;  %v33772_v48 = vld [vmem:[#allocation3 + $0x1f0] sm:$0xff] }
 0x9d2   :  { %25863 = vmatmul.mubr.msk.f32.gmra.mrb[112].mxu0 %vm13092_vm4, %v33218_v10  ;;  %v33776_v10 = vld [vmem:[#allocation3 + $0x208] sm:$0xff] }
 0x9d3   :  { %25865 = vmatprep.mubr.msk.f32.mxu0 %vm13092_vm4, %v33222_v16  ;;  %v33780_v16 = vld [vmem:[#allocation3 + $0x210] sm:$0xff] }
 0x9d6   :  { %25866 = vmatmul.mubr.msk.f32.gmra.mrb[114].mxu0 %vm13092_vm4, %v33226_v6  ;;  %v16046_v6 = vld [vmem:[#allocation3 + $0x268] sm:$0xff] }
 0x9d7   :  { %25868 = vmatprep.mubr.msk.f32.mxu0 %vm13092_vm4, %v33230_v52  ;;  %v16047_v52 = vld [vmem:[#allocation3 + $0x270] sm:$0xff] }
 0x9da   :  { %25869 = vmatmul.mubr.msk.f32.gmra.mrb[116].mxu0 %vm13092_vm4, %v33234_v43  ;;  %v33786_v43 = vld [vmem:[#allocation3 + $0x288] sm:$0xff] }
 0x9db   :  { %25871 = vmatprep.mubr.msk.f32.mxu0 %vm13092_vm4, %v35122_v34  ;;  %v33822_v34 = vld [vmem:[#allocation3 + $0x310] sm:$0xff] }
 0x9de   :  { %25872 = vmatmul.mubr.msk.f32.gmra.mrb[118].mxu0 %vm13092_vm4, %v35123_v5  ;;  %v33826_v5 = vld [vmem:[#allocation3 + $0x328] sm:$0xff] }
 0x9df   :  { %25874 = vmatprep.mubr.msk.f32.mxu0 %vm13092_vm4, %v35124_v63  ;;  %v33830_v63 = vld [vmem:[#allocation3 + $0x330] sm:$0xff] }
 0x9e2   :  { %25875 = vmatmul.mubr.msk.f32.gmra.mrb[120].mxu0 %vm13092_vm4, %v35125_v17  ;;  %v33834_v17 = vld [vmem:[#allocation3 + $0x348] sm:$0xff] }
 0x9e3   :  { %25877 = vmatprep.mubr.msk.f32.mxu0 %vm13092_vm4, %v35126_v4  ;;  %v33838_v4 = vld [vmem:[#allocation3 + $0x350] sm:$0xff] }
 0x9e6   :  { %25878 = vmatmul.mubr.msk.f32.gmra.mrb[122].mxu0 %vm13092_vm4, %v35127_v19  ;;  %v33842_v19 = vld [vmem:[#allocation3 + $0x368] sm:$0xff] }
 0x9e7   :  { %25880 = vmatprep.mubr.msk.f32.mxu0 %vm13092_vm4, %v35128_v24  ;;  %v33846_v24 = vld [vmem:[#allocation3 + $0x370] sm:$0xff] }
 0x9ea   :  { %25881 = vmatmul.mubr.msk.f32.gmra.mrb[124].mxu0 %vm13092_vm4, %v33266_v9  ;;  %v33794_v9 = vld [vmem:[#allocation3 + $0x2a8] sm:$0xff] }
 0x9eb   :  { %25883 = vmatprep.mubr.msk.f32.mxu0 %vm13092_vm4, %v33650_v45 }
 0x9ee   :  { %25884 = vmatmul.mubr.msk.f32.gmra.mrb[126].mxu0 %vm13092_vm4, %v33654_v8 }
 0x9ef   :  { %25894 = vmatprep.mubr.msk.f32.mxu0 %vm13092_vm4, %v16014_v53  ;;  %v33858_v53 = vld [vmem:[#allocation3 + $0x3a8] sm:$0xff] }
 0x9f0   :  { %35130 = vst [vmem:[#allocation83_spill] sm:$0xff] %v33858_v53 }
 0x9f2   :  { %25895 = vmatmul.mubr.msk.f32.vlgmr.msra.gmra.mrb[64].mxu0 %vm13092_vm4, %v16015_v25  ;;  %v33866_v25 = vld [vmem:[#allocation3 + $0x3c8] sm:$0xff] }
 0x9f3   :  { %25897 = vmatprep.mubr.msk.f32.mxu0 %vm13092_vm4, %v33660_v60  ;;  %26485 = vmatpush3.bf16.msra.mxu0 %v33525_v22  ;;  %v33802_v22 = vld [vmem:[#allocation3 + $0x2c8] sm:$0xff]  ;;  %35132 = vst [vmem:[#allocation85_spill] sm:$0xff] %v33866_v25 }
 0x9f4   :  { %26487 = vmatprep.subr.bf16.mxu0 %v26486_v42 }
 0x9f6   :  { %25898 = vmatmul.mubr.msk.f32.gmra.mrb[66].mxu0 %vm13092_vm4, %v33667_v35 }
 0x9f7   :  { %25900 = vmatprep.mubr.msk.f32.mxu0 %vm13092_vm4, %v33671_v1  ;;  %26489 = vmatpush3.bf16.msra.mxu0 %v26486_v42  ;;  %v33862_v42 = vld [vmem:[#allocation3 + $0x3b0] sm:$0xff] }
 0x9f8   :  { %26491 = vmatprep.subr.bf16.mxu0 %v33665_v38  ;;  %35131 = vst [vmem:[#allocation84_spill] sm:$0xff] %v33862_v42 }
 0x9fa   :  { %25901 = vmatmul.mubr.msk.f32.gmra.mrb[68].mxu0 %vm13092_vm4, %v33676_v20 }
 0x9fb   :  { %25903 = vmatprep.mubr.msk.f32.mxu0 %vm13092_vm4, %v33680_v29 }
 0x9fe   :  { %25904 = vmatmul.mubr.msk.f32.gmra.mrb[70].mxu0 %vm13092_vm4, %v33684_v13 }
 0x9ff   :  { %25906 = vmatprep.mubr.msk.f32.mxu0 %vm13092_vm4, %v33688_v33 }
 0xa02   :  { %25907 = vmatmul.mubr.msk.f32.gmra.mrb[72].mxu0 %vm13092_vm4, %v33692_v31 }
 0xa03   :  { %25909 = vmatprep.mubr.msk.f32.mxu0 %vm13092_vm4, %v33696_v37 }
 0xa06   :  { %25910 = vmatmul.mubr.msk.f32.gmra.mrb[74].mxu0 %vm13092_vm4, %v33700_v40 }
 0xa07   :  { %25912 = vmatprep.mubr.msk.f32.mxu0 %vm13092_vm4, %v33704_v21 }
 0xa0a   :  { %25913 = vmatmul.mubr.msk.f32.gmra.mrb[76].mxu0 %vm13092_vm4, %v33708_v44 }
 0xa0b   :  { %25915 = vmatprep.mubr.msk.f32.mxu0 %vm13092_vm4, %v33712_v46 }
 0xa0e   :  { %25916 = vmatmul.mubr.msk.f32.gmra.mrb[78].mxu0 %vm13092_vm4, %v33716_v30 }
 0xa0f   :  { %25918 = vmatprep.mubr.msk.f32.mxu0 %vm13092_vm4, %v33720_v58 }
 0xa12   :  { %25919 = vmatmul.mubr.msk.f32.gmra.mrb[80].mxu0 %vm13092_vm4, %v33724_v7 }
 0xa13   :  { %25921 = vmatprep.mubr.msk.f32.mxu0 %vm13092_vm4, %v33728_v11 }
 0xa16   :  { %25922 = vmatmul.mubr.msk.f32.gmra.mrb[82].mxu0 %vm13092_vm4, %v33732_v15 }
 0xa17   :  { %25924 = vmatprep.mubr.msk.f32.mxu0 %vm13092_vm4, %v33736_v61 }
 0xa1a   :  { %25925 = vmatmul.mubr.msk.f32.gmra.mrb[84].mxu0 %vm13092_vm4, %v33740_v18 }
 0xa1b   :  { %25927 = vmatprep.mubr.msk.f32.mxu0 %vm13092_vm4, %v33744_v23 }
 0xa1e   :  { %25928 = vmatmul.mubr.msk.f32.gmra.mrb[86].mxu0 %vm13092_vm4, %v33748_v57 }
 0xa1f   :  { %25930 = vmatprep.mubr.msk.f32.mxu0 %vm13092_vm4, %v33752_v28 }
 0xa22   :  { %25931 = vmatmul.mubr.msk.f32.gmra.mrb[88].mxu0 %vm13092_vm4, %v33756_v32 }
 0xa23   :  { %25933 = vmatprep.mubr.msk.f32.mxu0 %vm13092_vm4, %v33760_v59 }
 0xa26   :  { %25934 = vmatmul.mubr.msk.f32.gmra.mrb[90].mxu0 %vm13092_vm4, %v33764_v55 }
 0xa27   :  { %25936 = vmatprep.mubr.msk.f32.mxu0 %vm13092_vm4, %v33768_v36 }
 0xa2a   :  { %25937 = vmatmul.mubr.msk.f32.gmra.mrb[92].mxu0 %vm13092_vm4, %v33772_v48 }
 0xa2b   :  { %25939 = vmatprep.mubr.msk.f32.mxu0 %vm13092_vm4, %v33776_v10 }
 0xa2e   :  { %25940 = vmatmul.mubr.msk.f32.gmra.mrb[94].mxu0 %vm13092_vm4, %v33780_v16 }
 0xa2f   :  { %25942 = vmatprep.mubr.msk.f32.mxu0 %vm13092_vm4, %v16046_v6  ;;  %v33878_v6 = vld [vmem:[#allocation3 + $0x3f0] sm:$0xff] }
 0xa30   :  { %35135 = vst [vmem:[#allocation26_spill] sm:$0xff] %v33878_v6 }
 0xa32   :  { %25943 = vmatmul.mubr.msk.f32.gmra.mrb[96].mxu0 %vm13092_vm4, %v16047_v52  ;;  %v33882_v52 = vld [vmem:[#allocation3 + $0x408] sm:$0xff] }
 0xa33   :  { %25945 = vmatprep.mubr.msk.f32.mxu0 %vm13092_vm4, %v33786_v43  ;;  %35136 = vst [vmem:[#allocation27_spill] sm:$0xff] %v33882_v52 }
 0xa36   :  { %25946 = vmatmul.mubr.msk.f32.gmra.mrb[98].mxu0 %vm13092_vm4, %v33790_v2 }
 0xa37   :  { %25948 = vmatprep.mubr.msk.f32.mxu0 %vm13092_vm4, %v33794_v9 }
 0xa3a   :  { %25949 = vmatmul.mubr.msk.f32.gmra.mrb[100].mxu0 %vm13092_vm4, %v33798_v51 }
 0xa3b   :  { %25951 = vmatprep.mubr.msk.f32.mxu0 %vm13092_vm4, %v33802_v22 }
 0xa3e   :  { %25952 = vmatmul.mubr.msk.f32.gmra.mrb[102].mxu0 %vm13092_vm4, %v33806_v14 }
 0xa3f   :  { %25954 = vmatprep.mubr.msk.f32.mxu0 %vm13092_vm4, %v33810_v56 }
 0xa42   :  { %25955 = vmatmul.mubr.msk.f32.gmra.mrb[104].mxu0 %vm13092_vm4, %v33814_v27 }
 0xa43   :  { %25957 = vmatprep.mubr.msk.f32.mxu0 %vm13092_vm4, %v33818_v41 }
 0xa46   :  { %25958 = vmatmul.mubr.msk.f32.gmra.mrb[106].mxu0 %vm13092_vm4, %v33822_v34 }
 0xa47   :  { %25960 = vmatprep.mubr.msk.f32.mxu0 %vm13092_vm4, %v33826_v5 }
 0xa4a   :  { %25961 = vmatmul.mubr.msk.f32.gmra.mrb[108].mxu0 %vm13092_vm4, %v33830_v63 }
 0xa4b   :  { %25963 = vmatprep.mubr.msk.f32.mxu0 %vm13092_vm4, %v33834_v17 }
 0xa4e   :  { %25964 = vmatmul.mubr.msk.f32.gmra.mrb[110].mxu0 %vm13092_vm4, %v33838_v4 }
 0xa4f   :  { %25966 = vmatprep.mubr.msk.f32.mxu0 %vm13092_vm4, %v33842_v19 }
 0xa52   :  { %25967 = vmatmul.mubr.msk.f32.gmra.mrb[112].mxu0 %vm13092_vm4, %v33846_v24 }
 0xa53   :  { %25969 = vmatprep.mubr.msk.f32.mxu0 %vm13092_vm4, %v33850_v49 }
 0xa56   :  { %25970 = vmatmul.mubr.msk.f32.gmra.mrb[114].mxu0 %vm13092_vm4, %v33854_v54  ;;  %v35142_v54 = vld [vmem:[#allocation33_spill] sm:$0xff] }
 0xa57   :  { %25972 = vmatprep.mubr.msk.f32.mxu0 %vm13092_vm4, %v33858_v53  ;;  %v17503_v53 = vld [vmem:[#allocation11 + $0xd8] sm:$0xff] }
 0xa5a   :  { %25973 = vmatmul.mubr.msk.f32.gmra.mrb[116].mxu0 %vm13092_vm4, %v33862_v42  ;;  %v17502_v42 = vld [vmem:[#allocation11 + $0xd0] sm:$0xff] }
 0xa5b   :  { %25975 = vmatprep.mubr.msk.f32.mxu0 %vm13092_vm4, %v33866_v25  ;;  %v33886_v25 = vld [vmem:[#allocation3 + $0x410] sm:$0xff] }
 0xa5c   :  { %35137 = vst [vmem:[#allocation28_spill] sm:$0xff] %v33886_v25 }
 0xa5e   :  { %25976 = vmatmul.mubr.msk.f32.gmra.mrb[118].mxu0 %vm13092_vm4, %v33870_v12  ;;  %v33890_v12 = vld [vmem:[#allocation3 + $0x428] sm:$0xff] }
 0xa5f   :  { %25978 = vmatprep.mubr.msk.f32.mxu0 %vm13092_vm4, %v33874_v39  ;;  %35138 = vst [vmem:[#allocation29_spill] sm:$0xff] %v33890_v12  ;;  %v33894_v39 = vld [vmem:[#allocation3 + $0x430] sm:$0xff] }
 0xa60   :  { %35139 = vst [vmem:[#allocation30_spill] sm:$0xff] %v33894_v39 }
 0xa62   :  { %25979 = vmatmul.mubr.msk.f32.gmra.mrb[120].mxu0 %vm13092_vm4, %v33878_v6  ;;  %v33898_v6 = vld [vmem:[#allocation3 + $0x448] sm:$0xff] }
 0xa63   :  { %25981 = vmatprep.mubr.msk.f32.mxu0 %vm13092_vm4, %v33882_v52  ;;  %35140 = vst [vmem:[#allocation31_spill] sm:$0xff] %v33898_v6  ;;  %v33902_v52 = vld [vmem:[#allocation3 + $0x450] sm:$0xff] }
 0xa64   :  { %35141 = vst [vmem:[#allocation32_spill] sm:$0xff] %v33902_v52 }
 0xa66   :  { %25982 = vmatmul.mubr.msk.f32.gmra.mrb[122].mxu0 %vm13092_vm4, %v33886_v25  ;;  %v18211_v25 = vld [vmem:[#allocation11 + $0xe8] sm:$0xff] }
 0xa67   :  { %25984 = vmatprep.mubr.msk.f32.mxu0 %vm13092_vm4, %v33890_v12  ;;  %v26494_v12 = vpack.c.bf16 %v17503_v53, %v17502_v42  ;;  %v35148_v53 = vld [vmem:[#allocation39_spill] sm:$0xff]  ;;  %v35150_v42 = vld [vmem:[#allocation41_spill] sm:$0xff] }
 0xa6a   :  { %25985 = vmatmul.mubr.msk.f32.gmra.mrb[124].mxu0 %vm13092_vm4, %v33894_v39  ;;  %v18210_v39 = vld [vmem:[#allocation11 + $0xe0] sm:$0xff] }
 0xa6b   :  { %25987 = vmatprep.mubr.msk.f32.mxu0 %vm13092_vm4, %v33898_v6  ;;  %v33913_v6 = vpack.c.bf16 %v18211_v25, %v18210_v39  ;;  %v35151_v25 = vld [vmem:[#allocation42_spill] sm:$0xff]  ;;  %v35153_v39 = vld [vmem:[#allocation44_spill] sm:$0xff] }
 0xa6e   :  { %25988 = vmatmul.mubr.msk.f32.gmra.mrb[126].mxu0 %vm13092_vm4, %v33902_v52  ;;  %v35143_v52 = vld [vmem:[#allocation34_spill] sm:$0xff] }
 0xa6f   :  { %25998 = vmatprep.mubr.msk.f32.mxu0 %vm13092_vm4, %v33272_v26  ;;  %v35145_v26 = vld [vmem:[#allocation36_spill] sm:$0xff] }
 0xa72   :  { %25999 = vmatmul.mubr.msk.f32.vlgmr.msra.gmra.mrb[64].mxu0 %vm13092_vm4, %v33279_v47  ;;  %v35144_v47 = vld [vmem:[#allocation35_spill] sm:$0xff] }
 0xa73   :  { %26001 = vmatprep.mubr.msk.f32.mxu0 %vm13092_vm4, %v33283_v3  ;;  %26493 = vmatpush3.bf16.msra.mxu0 %v33665_v38  ;;  %v35146_v3 = vld [vmem:[#allocation37_spill] sm:$0xff]  ;;  %v35147_v38 = vld [vmem:[#allocation38_spill] sm:$0xff] }
 0xa74   :  { %26495 = vmatprep.subr.bf16.mxu0 %v26494_v12 }
 0xa76   :  { %26002 = vmatmul.mubr.msk.f32.gmra.mrb[66].mxu0 %vm13092_vm4, %v35142_v54  ;;  %v35149_v54 = vld [vmem:[#allocation40_spill] sm:$0xff] }
 0xa77   :  { %26004 = vmatprep.mubr.msk.f32.mxu0 %vm13092_vm4, %v35143_v52  ;;  %26497 = vmatpush3.bf16.msra.mxu0 %v26494_v12  ;;  %v35152_v12 = vld [vmem:[#allocation43_spill] sm:$0xff]  ;;  %v35154_v52 = vld [vmem:[#allocation45_spill] sm:$0xff] }
 0xa78   :  { %26499 = vmatprep.subr.bf16.mxu0 %v33913_v6 }
 0xa7a   :  { %26005 = vmatmul.mubr.msk.f32.gmra.mrb[68].mxu0 %vm13092_vm4, %v35144_v47  ;;  %v35155_v47 = vld [vmem:[#allocation46_spill] sm:$0xff] }
 0xa7b   :  { %26007 = vmatprep.mubr.msk.f32.mxu0 %vm13092_vm4, %v35145_v26  ;;  %v35156_v26 = vld [vmem:[#allocation47_spill] sm:$0xff] }
 0xa7e   :  { %26008 = vmatmul.mubr.msk.f32.gmra.mrb[70].mxu0 %vm13092_vm4, %v35146_v3  ;;  %v35157_v3 = vld [vmem:[#allocation48_spill] sm:$0xff] }
 0xa7f   :  { %26010 = vmatprep.mubr.msk.f32.mxu0 %vm13092_vm4, %v35147_v38  ;;  %v35158_v38 = vld [vmem:[#allocation51_spill] sm:$0xff] }
 0xa82   :  { %26011 = vmatmul.mubr.msk.f32.gmra.mrb[72].mxu0 %vm13092_vm4, %v35148_v53  ;;  %v35159_v53 = vld [vmem:[#allocation52_spill] sm:$0xff] }
 0xa83   :  { %26013 = vmatprep.mubr.msk.f32.mxu0 %vm13092_vm4, %v35149_v54  ;;  %v35160_v54 = vld [vmem:[#allocation49_spill] sm:$0xff] }
 0xa86   :  { %26014 = vmatmul.mubr.msk.f32.gmra.mrb[74].mxu0 %vm13092_vm4, %v35150_v42  ;;  %v35161_v42 = vld [vmem:[#allocation50_spill] sm:$0xff] }
 0xa87   :  { %26016 = vmatprep.mubr.msk.f32.mxu0 %vm13092_vm4, %v35151_v25  ;;  %v35162_v25 = vld [vmem:[#allocation18_spill] sm:$0xff] }
 0xa8a   :  { %26017 = vmatmul.mubr.msk.f32.gmra.mrb[76].mxu0 %vm13092_vm4, %v35152_v12  ;;  %v35163_v12 = vld [vmem:[#allocation19_spill] sm:$0xff] }
 0xa8b   :  { %26019 = vmatprep.mubr.msk.f32.mxu0 %vm13092_vm4, %v35153_v39  ;;  %v35164_v39 = vld [vmem:[#allocation20_spill] sm:$0xff] }
 0xa8e   :  { %26020 = vmatmul.mubr.msk.f32.gmra.mrb[78].mxu0 %vm13092_vm4, %v35154_v52  ;;  %v35165_v52 = vld [vmem:[#allocation53_spill] sm:$0xff] }
 0xa8f   :  { %26022 = vmatprep.mubr.msk.f32.mxu0 %vm13092_vm4, %v35155_v47  ;;  %v35166_v47 = vld [vmem:[#allocation54_spill] sm:$0xff] }
 0xa92   :  { %26023 = vmatmul.mubr.msk.f32.gmra.mrb[80].mxu0 %vm13092_vm4, %v35156_v26  ;;  %v35167_v26 = vld [vmem:[#allocation55_spill] sm:$0xff] }
 0xa93   :  { %26025 = vmatprep.mubr.msk.f32.mxu0 %vm13092_vm4, %v35157_v3  ;;  %v35168_v3 = vld [vmem:[#allocation56_spill] sm:$0xff] }
 0xa96   :  { %26026 = vmatmul.mubr.msk.f32.gmra.mrb[82].mxu0 %vm13092_vm4, %v35158_v38  ;;  %v33970_v38 = vld [vmem:[#allocation3 + $0x209] sm:$0xff] }
 0xa97   :  { %26028 = vmatprep.mubr.msk.f32.mxu0 %vm13092_vm4, %v35159_v53  ;;  %v33974_v53 = vld [vmem:[#allocation3 + $0x211] sm:$0xff] }
 0xa98   :  { %35169 = vst [vmem:[#allocation33_spill] sm:$0xff] %v33974_v53 }
 0xa9a   :  { %26029 = vmatmul.mubr.msk.f32.gmra.mrb[84].mxu0 %vm13092_vm4, %v35160_v54  ;;  %v35170_v54 = vld [vmem:[#allocation57_spill] sm:$0xff] }
 0xa9b   :  { %26031 = vmatprep.mubr.msk.f32.mxu0 %vm13092_vm4, %v35161_v42  ;;  %v35171_v42 = vld [vmem:[#allocation58_spill] sm:$0xff] }
 0xa9e   :  { %26032 = vmatmul.mubr.msk.f32.gmra.mrb[86].mxu0 %vm13092_vm4, %v35162_v25  ;;  %v35172_v25 = vld [vmem:[#allocation59_spill] sm:$0xff] }
 0xa9f   :  { %26034 = vmatprep.mubr.msk.f32.mxu0 %vm13092_vm4, %v35163_v12  ;;  %v35173_v12 = vld [vmem:[#allocation60_spill] sm:$0xff] }
 0xaa2   :  { %26035 = vmatmul.mubr.msk.f32.gmra.mrb[88].mxu0 %vm13092_vm4, %v35164_v39  ;;  %v35174_v39 = vld [vmem:[#allocation61_spill] sm:$0xff] }
 0xaa3   :  { %26037 = vmatprep.mubr.msk.f32.mxu0 %vm13092_vm4, %v35165_v52  ;;  %v35175_v52 = vld [vmem:[#allocation62_spill] sm:$0xff] }
 0xaa6   :  { %26038 = vmatmul.mubr.msk.f32.gmra.mrb[90].mxu0 %vm13092_vm4, %v35166_v47  ;;  %v35176_v47 = vld [vmem:[#allocation63_spill] sm:$0xff] }
 0xaa7   :  { %26040 = vmatprep.mubr.msk.f32.mxu0 %vm13092_vm4, %v35167_v26  ;;  %v35177_v26 = vld [vmem:[#allocation64_spill] sm:$0xff] }
 0xaaa   :  { %26041 = vmatmul.mubr.msk.f32.gmra.mrb[92].mxu0 %vm13092_vm4, %v35168_v3  ;;  %v35178_v3 = vld [vmem:[#allocation65_spill] sm:$0xff] }
 0xaab   :  { %26043 = vmatprep.mubr.msk.f32.mxu0 %vm13092_vm4, %v33970_v38 }
 0xaae   :  { %26044 = vmatmul.mubr.msk.f32.gmra.mrb[94].mxu0 %vm13092_vm4, %v33974_v53  ;;  %v17438_v53 = vld [vmem:[#allocation3 + $0x6f] sm:$0xff] }
 0xaaf   :  { %26046 = vmatprep.mubr.msk.f32.mxu0 %vm13092_vm4, %v35170_v54  ;;  %v35179_v54 = vld [vmem:[#allocation66_spill] sm:$0xff] }
 0xab2   :  { %26047 = vmatmul.mubr.msk.f32.gmra.mrb[96].mxu0 %vm13092_vm4, %v35171_v42  ;;  %v35180_v42 = vld [vmem:[#allocation67_spill] sm:$0xff] }
 0xab3   :  { %26049 = vmatprep.mubr.msk.f32.mxu0 %vm13092_vm4, %v35172_v25  ;;  %v35181_v25 = vld [vmem:[#allocation68_spill] sm:$0xff] }
 0xab6   :  { %26050 = vmatmul.mubr.msk.f32.gmra.mrb[98].mxu0 %vm13092_vm4, %v35173_v12  ;;  %v35182_v12 = vld [vmem:[#allocation69_spill] sm:$0xff] }
 0xab7   :  { %26052 = vmatprep.mubr.msk.f32.mxu0 %vm13092_vm4, %v35174_v39  ;;  %v35183_v39 = vld [vmem:[#allocation70_spill] sm:$0xff] }
 0xaba   :  { %26053 = vmatmul.mubr.msk.f32.gmra.mrb[100].mxu0 %vm13092_vm4, %v35175_v52  ;;  %v35184_v52 = vld [vmem:[#allocation71_spill] sm:$0xff] }
 0xabb   :  { %26055 = vmatprep.mubr.msk.f32.mxu0 %vm13092_vm4, %v35176_v47  ;;  %v35185_v47 = vld [vmem:[#allocation72_spill] sm:$0xff] }
 0xabe   :  { %26056 = vmatmul.mubr.msk.f32.gmra.mrb[102].mxu0 %vm13092_vm4, %v35177_v26  ;;  %v35186_v26 = vld [vmem:[#allocation73_spill] sm:$0xff] }
 0xabf   :  { %26058 = vmatprep.mubr.msk.f32.mxu0 %vm13092_vm4, %v35178_v3  ;;  %v35187_v3 = vld [vmem:[#allocation74_spill] sm:$0xff] }
 0xac2   :  { %26059 = vmatmul.mubr.msk.f32.gmra.mrb[104].mxu0 %vm13092_vm4, %v35179_v54  ;;  %v35188_v54 = vld [vmem:[#allocation75_spill] sm:$0xff] }
 0xac3   :  { %26061 = vmatprep.mubr.msk.f32.mxu0 %vm13092_vm4, %v35180_v42  ;;  %v35189_v42 = vld [vmem:[#allocation76_spill] sm:$0xff] }
 0xac6   :  { %26062 = vmatmul.mubr.msk.f32.gmra.mrb[106].mxu0 %vm13092_vm4, %v35181_v25  ;;  %v35190_v25 = vld [vmem:[#allocation77_spill] sm:$0xff] }
 0xac7   :  { %26064 = vmatprep.mubr.msk.f32.mxu0 %vm13092_vm4, %v35182_v12  ;;  %v35191_v12 = vld [vmem:[#allocation21_spill] sm:$0xff] }
 0xaca   :  { %26065 = vmatmul.mubr.msk.f32.gmra.mrb[108].mxu0 %vm13092_vm4, %v35183_v39  ;;  %v35192_v39 = vld [vmem:[#allocation22_spill] sm:$0xff] }
 0xacb   :  { %26067 = vmatprep.mubr.msk.f32.mxu0 %vm13092_vm4, %v35184_v52  ;;  %v35193_v52 = vld [vmem:[#allocation23_spill] sm:$0xff] }
 0xace   :  { %26068 = vmatmul.mubr.msk.f32.gmra.mrb[110].mxu0 %vm13092_vm4, %v35185_v47  ;;  %v35194_v47 = vld [vmem:[#allocation24_spill] sm:$0xff] }
 0xacf   :  { %26070 = vmatprep.mubr.msk.f32.mxu0 %vm13092_vm4, %v35186_v26  ;;  %v35195_v26 = vld [vmem:[#allocation78_spill] sm:$0xff] }
 0xad2   :  { %26071 = vmatmul.mubr.msk.f32.gmra.mrb[112].mxu0 %vm13092_vm4, %v35187_v3  ;;  %v35196_v3 = vld [vmem:[#allocation79_spill] sm:$0xff] }
 0xad3   :  { %26073 = vmatprep.mubr.msk.f32.mxu0 %vm13092_vm4, %v35188_v54  ;;  %v35197_v54 = vld [vmem:[#allocation80_spill] sm:$0xff] }
 0xad6   :  { %26074 = vmatmul.mubr.msk.f32.gmra.mrb[114].mxu0 %vm13092_vm4, %v35189_v42  ;;  %v35198_v42 = vld [vmem:[#allocation81_spill] sm:$0xff] }
 0xad7   :  { %26076 = vmatprep.mubr.msk.f32.mxu0 %vm13092_vm4, %v35190_v25  ;;  %v34038_v25 = vld [vmem:[#allocation3 + $0x449] sm:$0xff] }
 0xad8   :  { %35199 = vst [vmem:[#allocation34_spill] sm:$0xff] %v34038_v25 }
 0xada   :  { %26077 = vmatmul.mubr.msk.f32.gmra.mrb[116].mxu0 %vm13092_vm4, %v35191_v12  ;;  %v34042_v12 = vld [vmem:[#allocation3 + $0x451] sm:$0xff] }
 0xadb   :  { %26079 = vmatprep.mubr.msk.f32.mxu0 %vm13092_vm4, %v35192_v39  ;;  %35200 = vst [vmem:[#allocation35_spill] sm:$0xff] %v34042_v12  ;;  %v18212_v39 = vld [vmem:[#allocation11 + $0xf0] sm:$0xff] }
 0xade   :  { %26080 = vmatmul.mubr.msk.f32.gmra.mrb[118].mxu0 %vm13092_vm4, %v35193_v52  ;;  %v18213_v52 = vld [vmem:[#allocation11 + $0xf8] sm:$0xff] }
 0xadf   :  { %26082 = vmatprep.mubr.msk.f32.mxu0 %vm13092_vm4, %v35194_v47  ;;  %v17435_v47 = vld [vmem:[#allocation3 + $0x47] sm:$0xff] }
 0xae2   :  { %26083 = vmatmul.mubr.msk.f32.gmra.mrb[120].mxu0 %vm13092_vm4, %v35195_v26  ;;  %v26502_v26 = vpack.c.bf16 %v18213_v52, %v18212_v39  ;;  %v17440_v39 = vld [vmem:[#allocation3 + $0x8f] sm:$0xff]  ;;  %v17441_v52 = vld [vmem:[#allocation3 + $0xa7] sm:$0xff] }
 0xae3   :  { %26085 = vmatprep.mubr.msk.f32.mxu0 %vm13092_vm4, %v35196_v3  ;;  %v17436_v3 = vld [vmem:[#allocation3 + $0x4f] sm:$0xff] }
 0xae6   :  { %26086 = vmatmul.mubr.msk.f32.gmra.mrb[122].mxu0 %vm13092_vm4, %v35197_v54  ;;  %v18920_v54 = vld [vmem:[#allocation11 + $0x100] sm:$0xff] }
 0xae7   :  { %26088 = vmatprep.mubr.msk.f32.mxu0 %vm13092_vm4, %v35198_v42  ;;  %v18921_v42 = vld [vmem:[#allocation11 + $0x108] sm:$0xff] }
 0xaea   :  { %26089 = vmatmul.mubr.msk.f32.gmra.mrb[124].mxu0 %vm13092_vm4, %v33514_v50  ;;  %v17437_v50 = vld [vmem:[#allocation3 + $0x67] sm:$0xff] }
 0xaeb   :  { %26091 = vmatprep.mubr.msk.f32.mxu0 %vm13092_vm4, %v34038_v25  ;;  %v34050_v25 = vpack.c.bf16 %v18921_v42, %v18920_v54  ;;  %v17449_v54 = vld [vmem:[#allocation3 + $0x127] sm:$0xff]  ;;  %v17450_v42 = vld [vmem:[#allocation3 + $0x12f] sm:$0xff] }
 0xaee   :  { %26092 = vmatmul.mubr.msk.f32.gmra.mrb[126].mxu0 %vm13092_vm4, %v34042_v12  ;;  %v17439_v12 = vld [vmem:[#allocation3 + $0x87] sm:$0xff] }
 0xaef   :  { %26102 = vmatprep.mubr.msk.f32.mxu0 %vm13092_vm4, %v17435_v47  ;;  %v17442_v47 = vld [vmem:[#allocation3 + $0xaf] sm:$0xff] }
 0xaf2   :  { %26103 = vmatmul.mubr.msk.f32.vlgmr.msra.gmra.mrb[64].mxu0 %vm13092_vm4, %v17436_v3  ;;  %v17444_v3 = vld [vmem:[#allocation3 + $0xcf] sm:$0xff] }
 0xaf3   :  { %26105 = vmatprep.mubr.msk.f32.mxu0 %vm13092_vm4, %v17437_v50  ;;  %26501 = vmatpush3.bf16.msra.mxu0 %v33913_v6  ;;  %v17443_v6 = vld [vmem:[#allocation3 + $0xc7] sm:$0xff]  ;;  %v17448_v50 = vld [vmem:[#allocation3 + $0x10f] sm:$0xff] }
 0xaf4   :  { %26503 = vmatprep.subr.bf16.mxu0 %v26502_v26 }
 0xaf6   :  { %26106 = vmatmul.mubr.msk.f32.gmra.mrb[66].mxu0 %vm13092_vm4, %v17438_v53  ;;  %v17445_v53 = vld [vmem:[#allocation3 + $0xe7] sm:$0xff] }
 0xaf7   :  { %26108 = vmatprep.mubr.msk.f32.mxu0 %vm13092_vm4, %v17439_v12  ;;  %26505 = vmatpush3.bf16.msra.mxu0 %v26502_v26  ;;  %v17446_v12 = vld [vmem:[#allocation3 + $0xef] sm:$0xff]  ;;  %v17447_v26 = vld [vmem:[#allocation3 + $0x107] sm:$0xff] }
 0xaf8   :  { %26507 = vmatprep.subr.bf16.mxu0 %v34050_v25 }
 0xafa   :  { %26109 = vmatmul.mubr.msk.f32.gmra.mrb[68].mxu0 %vm13092_vm4, %v17440_v39  ;;  %v17451_v39 = vld [vmem:[#allocation3 + $0x147] sm:$0xff] }
 0xafb   :  { %26111 = vmatprep.mubr.msk.f32.mxu0 %vm13092_vm4, %v17441_v52  ;;  %v17452_v52 = vld [vmem:[#allocation3 + $0x14f] sm:$0xff] }
 0xafe   :  { %26112 = vmatmul.mubr.msk.f32.gmra.mrb[70].mxu0 %vm13092_vm4, %v17442_v47  ;;  %v17453_v47 = vld [vmem:[#allocation3 + $0x167] sm:$0xff] }
 0xaff   :  { %26114 = vmatprep.mubr.msk.f32.mxu0 %vm13092_vm4, %v17443_v6  ;;  %v17454_v6 = vld [vmem:[#allocation3 + $0x16f] sm:$0xff] }
 0xb02   :  { %26115 = vmatmul.mubr.msk.f32.gmra.mrb[72].mxu0 %vm13092_vm4, %v17444_v3  ;;  %v17455_v3 = vld [vmem:[#allocation3 + $0x187] sm:$0xff] }
 0xb03   :  { %26117 = vmatprep.mubr.msk.f32.mxu0 %vm13092_vm4, %v17445_v53  ;;  %v17456_v53 = vld [vmem:[#allocation3 + $0x18f] sm:$0xff] }
 0xb06   :  { %26118 = vmatmul.mubr.msk.f32.gmra.mrb[74].mxu0 %vm13092_vm4, %v17446_v12  ;;  %v17457_v12 = vld [vmem:[#allocation3 + $0x1a7] sm:$0xff] }
 0xb07   :  { %26120 = vmatprep.mubr.msk.f32.mxu0 %vm13092_vm4, %v17447_v26  ;;  %v17458_v26 = vld [vmem:[#allocation3 + $0x1af] sm:$0xff] }
 0xb0a   :  { %26121 = vmatmul.mubr.msk.f32.gmra.mrb[76].mxu0 %vm13092_vm4, %v17448_v50  ;;  %v17459_v50 = vld [vmem:[#allocation3 + $0x1c7] sm:$0xff] }
 0xb0b   :  { %26123 = vmatprep.mubr.msk.f32.mxu0 %vm13092_vm4, %v17449_v54  ;;  %v17460_v54 = vld [vmem:[#allocation3 + $0x1cf] sm:$0xff] }
 0xb0e   :  { %26124 = vmatmul.mubr.msk.f32.gmra.mrb[78].mxu0 %vm13092_vm4, %v17450_v42  ;;  %v17461_v42 = vld [vmem:[#allocation3 + $0x1e7] sm:$0xff] }
 0xb0f   :  { %26126 = vmatprep.mubr.msk.f32.mxu0 %vm13092_vm4, %v17451_v39  ;;  %v17462_v39 = vld [vmem:[#allocation3 + $0x1ef] sm:$0xff] }
 0xb12   :  { %26127 = vmatmul.mubr.msk.f32.gmra.mrb[80].mxu0 %vm13092_vm4, %v17452_v52  ;;  %v17465_v52 = vld [vmem:[#allocation3 + $0x227] sm:$0xff] }
 0xb13   :  { %26129 = vmatprep.mubr.msk.f32.mxu0 %vm13092_vm4, %v17453_v47  ;;  %v17466_v47 = vld [vmem:[#allocation3 + $0x22f] sm:$0xff] }
 0xb16   :  { %26130 = vmatmul.mubr.msk.f32.gmra.mrb[82].mxu0 %vm13092_vm4, %v17454_v6  ;;  %v17467_v6 = vld [vmem:[#allocation3 + $0x287] sm:$0xff] }
 0xb17   :  { %26132 = vmatprep.mubr.msk.f32.mxu0 %vm13092_vm4, %v17455_v3  ;;  %v17468_v3 = vld [vmem:[#allocation3 + $0x28f] sm:$0xff] }
 0xb1a   :  { %26133 = vmatmul.mubr.msk.f32.gmra.mrb[84].mxu0 %vm13092_vm4, %v17456_v53  ;;  %v17469_v53 = vld [vmem:[#allocation3 + $0x2a7] sm:$0xff] }
 0xb1b   :  { %26135 = vmatprep.mubr.msk.f32.mxu0 %vm13092_vm4, %v17457_v12  ;;  %v17470_v12 = vld [vmem:[#allocation3 + $0x2af] sm:$0xff] }
 0xb1e   :  { %26136 = vmatmul.mubr.msk.f32.gmra.mrb[86].mxu0 %vm13092_vm4, %v17458_v26  ;;  %v17473_v26 = vld [vmem:[#allocation3 + $0x2e7] sm:$0xff] }
 0xb1f   :  { %26138 = vmatprep.mubr.msk.f32.mxu0 %vm13092_vm4, %v17459_v50  ;;  %v17474_v50 = vld [vmem:[#allocation3 + $0x2ef] sm:$0xff] }
 0xb22   :  { %26139 = vmatmul.mubr.msk.f32.gmra.mrb[88].mxu0 %vm13092_vm4, %v17460_v54  ;;  %v17475_v54 = vld [vmem:[#allocation3 + $0x307] sm:$0xff] }
 0xb23   :  { %26141 = vmatprep.mubr.msk.f32.mxu0 %vm13092_vm4, %v17461_v42  ;;  %v17476_v42 = vld [vmem:[#allocation3 + $0x30f] sm:$0xff] }
 0xb26   :  { %26142 = vmatmul.mubr.msk.f32.gmra.mrb[90].mxu0 %vm13092_vm4, %v17462_v39  ;;  %v17477_v39 = vld [vmem:[#allocation3 + $0x327] sm:$0xff] }
 0xb27   :  { %26144 = vmatprep.mubr.msk.f32.mxu0 %vm13092_vm4, %v33582_v0  ;;  %v17471_v0 = vld [vmem:[#allocation3 + $0x2c7] sm:$0xff] }
 0xb2a   :  { %26145 = vmatmul.mubr.msk.f32.gmra.mrb[92].mxu0 %vm13092_vm4, %v33586_v62  ;;  %v17472_v62 = vld [vmem:[#allocation3 + $0x2cf] sm:$0xff] }
 0xb2b   :  { %26147 = vmatprep.mubr.msk.f32.mxu0 %vm13092_vm4, %v17465_v52  ;;  %v17478_v52 = vld [vmem:[#allocation3 + $0x32f] sm:$0xff] }
 0xb2e   :  { %26148 = vmatmul.mubr.msk.f32.gmra.mrb[94].mxu0 %vm13092_vm4, %v17466_v47  ;;  %v17479_v47 = vld [vmem:[#allocation3 + $0x347] sm:$0xff] }
 0xb2f   :  { %26150 = vmatprep.mubr.msk.f32.mxu0 %vm13092_vm4, %v17467_v6  ;;  %v17480_v6 = vld [vmem:[#allocation3 + $0x34f] sm:$0xff] }
 0xb32   :  { %26151 = vmatmul.mubr.msk.f32.gmra.mrb[96].mxu0 %vm13092_vm4, %v17468_v3  ;;  %v17481_v3 = vld [vmem:[#allocation3 + $0x367] sm:$0xff] }
 0xb33   :  { %26153 = vmatprep.mubr.msk.f32.mxu0 %vm13092_vm4, %v17469_v53  ;;  %v17482_v53 = vld [vmem:[#allocation3 + $0x36f] sm:$0xff] }
 0xb36   :  { %26154 = vmatmul.mubr.msk.f32.gmra.mrb[98].mxu0 %vm13092_vm4, %v17470_v12  ;;  %v17483_v12 = vld [vmem:[#allocation3 + $0x387] sm:$0xff] }
 0xb37   :  { %26156 = vmatprep.mubr.msk.f32.mxu0 %vm13092_vm4, %v17471_v0  ;;  %v17484_v0 = vld [vmem:[#allocation3 + $0x38f] sm:$0xff] }
 0xb3a   :  { %26157 = vmatmul.mubr.msk.f32.gmra.mrb[100].mxu0 %vm13092_vm4, %v17472_v62  ;;  %v17485_v62 = vld [vmem:[#allocation3 + $0x3a7] sm:$0xff] }
 0xb3b   :  { %26159 = vmatprep.mubr.msk.f32.mxu0 %vm13092_vm4, %v17473_v26  ;;  %v17486_v26 = vld [vmem:[#allocation3 + $0x3af] sm:$0xff] }
 0xb3e   :  { %26160 = vmatmul.mubr.msk.f32.gmra.mrb[102].mxu0 %vm13092_vm4, %v17474_v50  ;;  %v17487_v50 = vld [vmem:[#allocation3 + $0x3c7] sm:$0xff] }
 0xb3f   :  { %26162 = vmatprep.mubr.msk.f32.mxu0 %vm13092_vm4, %v17475_v54  ;;  %v17488_v54 = vld [vmem:[#allocation3 + $0x3cf] sm:$0xff] }
 0xb42   :  { %26163 = vmatmul.mubr.msk.f32.gmra.mrb[104].mxu0 %vm13092_vm4, %v17476_v42  ;;  %v17489_v42 = vld [vmem:[#allocation3 + $0x3e7] sm:$0xff] }
 0xb43   :  { %26165 = vmatprep.mubr.msk.f32.mxu0 %vm13092_vm4, %v17477_v39  ;;  %v17490_v39 = vld [vmem:[#allocation3 + $0x3ef] sm:$0xff] }
 0xb46   :  { %26166 = vmatmul.mubr.msk.f32.gmra.mrb[106].mxu0 %vm13092_vm4, %v17478_v52  ;;  %v17491_v52 = vld [vmem:[#allocation3 + $0x407] sm:$0xff] }
 0xb47   :  { %26168 = vmatprep.mubr.msk.f32.mxu0 %vm13092_vm4, %v17479_v47  ;;  %v17492_v47 = vld [vmem:[#allocation3 + $0x40f] sm:$0xff] }
 0xb4a   :  { %26169 = vmatmul.mubr.msk.f32.gmra.mrb[108].mxu0 %vm13092_vm4, %v17480_v6  ;;  %v17493_v6 = vld [vmem:[#allocation3 + $0x427] sm:$0xff] }
 0xb4b   :  { %26171 = vmatprep.mubr.msk.f32.mxu0 %vm13092_vm4, %v17481_v3  ;;  %v17494_v3 = vld [vmem:[#allocation3 + $0x42f] sm:$0xff] }
 0xb4e   :  { %26172 = vmatmul.mubr.msk.f32.gmra.mrb[110].mxu0 %vm13092_vm4, %v17482_v53  ;;  %v17497_v53 = vld [vmem:[#allocation3 + $0x467] sm:$0xff] }
 0xb4f   :  { %26174 = vmatprep.mubr.msk.f32.mxu0 %vm13092_vm4, %v17483_v12  ;;  %v17498_v12 = vld [vmem:[#allocation3 + $0x46f] sm:$0xff] }
 0xb52   :  { %26175 = vmatmul.mubr.msk.f32.gmra.mrb[112].mxu0 %vm13092_vm4, %v17484_v0  ;;  %v18922_v0 = vld [vmem:[#allocation11 + $0x110] sm:$0xff] }
 0xb53   :  { %26177 = vmatprep.mubr.msk.f32.mxu0 %vm13092_vm4, %v17485_v62  ;;  %v18923_v62 = vld [vmem:[#allocation11 + $0x118] sm:$0xff] }
 0xb56   :  { %26178 = vmatmul.mubr.msk.f32.gmra.mrb[114].mxu0 %vm13092_vm4, %v17486_v26  ;;  %v26510_v26 = vpack.c.bf16 %v18923_v62, %v18922_v0  ;;  %v18900_v0 = vld [vmem:[#allocation3 + $0x351] sm:$0xff]  ;;  %v18901_v62 = vld [vmem:[#allocation3 + $0x369] sm:$0xff] }
 0xb57   :  { %26180 = vmatprep.mubr.msk.f32.mxu0 %vm13092_vm4, %v17487_v50  ;;  %v18889_v50 = vld [vmem:[#allocation3 + $0x2a9] sm:$0xff] }
 0xb5a   :  { %26181 = vmatmul.mubr.msk.f32.gmra.mrb[116].mxu0 %vm13092_vm4, %v17488_v54  ;;  %v18890_v54 = vld [vmem:[#allocation3 + $0x2b1] sm:$0xff] }
 0xb5b   :  { %26183 = vmatprep.mubr.msk.f32.mxu0 %vm13092_vm4, %v17489_v42  ;;  %v18892_v42 = vld [vmem:[#allocation3 + $0x2d1] sm:$0xff] }
 0xb5e   :  { %26184 = vmatmul.mubr.msk.f32.gmra.mrb[118].mxu0 %vm13092_vm4, %v17490_v39  ;;  %v18893_v39 = vld [vmem:[#allocation3 + $0x2e9] sm:$0xff] }
 0xb5f   :  { %26186 = vmatprep.mubr.msk.f32.mxu0 %vm13092_vm4, %v17491_v52  ;;  %v18894_v52 = vld [vmem:[#allocation3 + $0x2f1] sm:$0xff] }
 0xb62   :  { %26187 = vmatmul.mubr.msk.f32.gmra.mrb[120].mxu0 %vm13092_vm4, %v17492_v47  ;;  %v18895_v47 = vld [vmem:[#allocation3 + $0x309] sm:$0xff] }
 0xb63   :  { %26189 = vmatprep.mubr.msk.f32.mxu0 %vm13092_vm4, %v17493_v6  ;;  %v18896_v6 = vld [vmem:[#allocation3 + $0x311] sm:$0xff] }
 0xb66   :  { %26190 = vmatmul.mubr.msk.f32.gmra.mrb[122].mxu0 %vm13092_vm4, %v17494_v3  ;;  %v18897_v3 = vld [vmem:[#allocation3 + $0x329] sm:$0xff] }
 0xb67   :  { %26192 = vmatprep.mubr.msk.f32.mxu0 %vm13092_vm4, %v33650_v45  ;;  %v18175_v45 = vld [vmem:[#allocation3 + $0x228] sm:$0xff] }
 0xb6a   :  { %26193 = vmatmul.mubr.msk.f32.gmra.mrb[124].mxu0 %vm13092_vm4, %v33654_v8  ;;  %v18176_v8 = vld [vmem:[#allocation3 + $0x230] sm:$0xff] }
 0xb6b   :  { %26195 = vmatprep.mubr.msk.f32.mxu0 %vm13092_vm4, %v17497_v53  ;;  %v18898_v53 = vld [vmem:[#allocation3 + $0x331] sm:$0xff] }
 0xb6e   :  { %26196 = vmatmul.mubr.msk.f32.gmra.mrb[126].mxu0 %vm13092_vm4, %v17498_v12  ;;  %v18899_v12 = vld [vmem:[#allocation3 + $0x349] sm:$0xff] }
 0xb6f   :  { %26206 = vmatprep.mubr.msk.f32.mxu0 %vm13092_vm4, %v33660_v60  ;;  %v35201_v60 = vld [vmem:[#allocation82_spill] sm:$0xff] }
 0xb72   :  { %26207 = vmatmul.mubr.msk.f32.vlgmr.msra.gmra.mrb[64].mxu0 %vm13092_vm4, %v33667_v35  ;;  %v35202_v35 = vld [vmem:[#allocation83_spill] sm:$0xff] }
 0xb73   :  { %26209 = vmatprep.mubr.msk.f32.mxu0 %vm13092_vm4, %v33671_v1  ;;  %26509 = vmatpush3.bf16.msra.mxu0 %v34050_v25  ;;  %v35203_v1 = vld [vmem:[#allocation84_spill] sm:$0xff] }
 0xb74   :  { %26511 = vmatprep.subr.bf16.mxu0 %v26510_v26  ;;  %v18888_v25 = vld [vmem:[#allocation3 + $0x291] sm:$0xff] }
 0xb76   :  { %26210 = vmatmul.mubr.msk.f32.gmra.mrb[66].mxu0 %vm13092_vm4, %v33676_v20  ;;  %v35204_v20 = vld [vmem:[#allocation85_spill] sm:$0xff] }
 0xb77   :  { %26212 = vmatprep.mubr.msk.f32.mxu0 %vm13092_vm4, %v33680_v29  ;;  %26513 = vmatpush3.bf16.msra.mxu0 %v26510_v26  ;;  %v35205_v29 = vld [vmem:[#allocation86_spill] sm:$0xff]  ;;  %v18902_v26 = vld [vmem:[#allocation3 + $0x371] sm:$0xff] }
 0xb7a   :  { %26213 = vmatmul.mubr.msk.f32.gmra.mrb[68].mxu0 %vm13092_vm4, %v33684_v13  ;;  %v35206_v13 = vld [vmem:[#allocation25_spill] sm:$0xff] }
 0xb7b   :  { %26215 = vmatprep.mubr.msk.f32.mxu0 %vm13092_vm4, %v33688_v33  ;;  %v35207_v33 = vld [vmem:[#allocation26_spill] sm:$0xff] }
 0xb7e   :  { %26216 = vmatmul.mubr.msk.f32.gmra.mrb[70].mxu0 %vm13092_vm4, %v33692_v31  ;;  %v35208_v31 = vld [vmem:[#allocation27_spill] sm:$0xff] }
 0xb7f   :  { %26218 = vmatprep.mubr.msk.f32.mxu0 %vm13092_vm4, %v33696_v37  ;;  %v35209_v37 = vld [vmem:[#allocation28_spill] sm:$0xff] }
 0xb82   :  { %26219 = vmatmul.mubr.msk.f32.gmra.mrb[72].mxu0 %vm13092_vm4, %v33700_v40  ;;  %v35210_v40 = vld [vmem:[#allocation29_spill] sm:$0xff] }
 0xb83   :  { %26221 = vmatprep.mubr.msk.f32.mxu0 %vm13092_vm4, %v33704_v21  ;;  %v35211_v21 = vld [vmem:[#allocation30_spill] sm:$0xff] }
 0xb86   :  { %26222 = vmatmul.mubr.msk.f32.gmra.mrb[74].mxu0 %vm13092_vm4, %v33708_v44  ;;  %v35212_v44 = vld [vmem:[#allocation31_spill] sm:$0xff] }
 0xb87   :  { %26224 = vmatprep.mubr.msk.f32.mxu0 %vm13092_vm4, %v33712_v46  ;;  %v18207_v46 = vld [vmem:[#allocation3 + $0x468] sm:$0xff] }
 0xb8a   :  { %26225 = vmatmul.mubr.msk.f32.gmra.mrb[76].mxu0 %vm13092_vm4, %v33716_v30  ;;  %v35213_v30 = vld [vmem:[#allocation32_spill] sm:$0xff] }
 0xb8b   :  { %26227 = vmatprep.mubr.msk.f32.mxu0 %vm13092_vm4, %v33720_v58  ;;  %v18208_v58 = vld [vmem:[#allocation3 + $0x470] sm:$0xff] }
 0xb8e   :  { %26228 = vmatmul.mubr.msk.f32.gmra.mrb[78].mxu0 %vm13092_vm4, %v33724_v7  ;;  %v18855_v7 = vld [vmem:[#allocation3 + $0x49] sm:$0xff] }
 0xb8f   :  { %26230 = vmatprep.mubr.msk.f32.mxu0 %vm13092_vm4, %v33728_v11  ;;  %v18856_v11 = vld [vmem:[#allocation3 + $0x51] sm:$0xff] }
 0xb92   :  { %26231 = vmatmul.mubr.msk.f32.gmra.mrb[80].mxu0 %vm13092_vm4, %v33732_v15  ;;  %v18857_v15 = vld [vmem:[#allocation3 + $0x69] sm:$0xff] }
 0xb93   :  { %26233 = vmatprep.mubr.msk.f32.mxu0 %vm13092_vm4, %v33736_v61  ;;  %v18858_v61 = vld [vmem:[#allocation3 + $0x71] sm:$0xff] }
 0xb96   :  { %26234 = vmatmul.mubr.msk.f32.gmra.mrb[82].mxu0 %vm13092_vm4, %v33740_v18  ;;  %v18859_v18 = vld [vmem:[#allocation3 + $0x89] sm:$0xff] }
 0xb97   :  { %26236 = vmatprep.mubr.msk.f32.mxu0 %vm13092_vm4, %v33744_v23  ;;  %v18860_v23 = vld [vmem:[#allocation3 + $0x91] sm:$0xff] }
 0xb9a   :  { %26237 = vmatmul.mubr.msk.f32.gmra.mrb[84].mxu0 %vm13092_vm4, %v33748_v57  ;;  %v18861_v57 = vld [vmem:[#allocation3 + $0xa9] sm:$0xff] }
 0xb9b   :  { %26239 = vmatprep.mubr.msk.f32.mxu0 %vm13092_vm4, %v33752_v28  ;;  %v18862_v28 = vld [vmem:[#allocation3 + $0xb1] sm:$0xff] }
 0xb9e   :  { %26240 = vmatmul.mubr.msk.f32.gmra.mrb[86].mxu0 %vm13092_vm4, %v33756_v32  ;;  %v18863_v32 = vld [vmem:[#allocation3 + $0xc9] sm:$0xff] }
 0xb9f   :  { %26242 = vmatprep.mubr.msk.f32.mxu0 %vm13092_vm4, %v33760_v59  ;;  %v18864_v59 = vld [vmem:[#allocation3 + $0xd1] sm:$0xff] }
 0xba2   :  { %26243 = vmatmul.mubr.msk.f32.gmra.mrb[88].mxu0 %vm13092_vm4, %v33764_v55  ;;  %v18865_v55 = vld [vmem:[#allocation3 + $0xe9] sm:$0xff] }
 0xba3   :  { %26245 = vmatprep.mubr.msk.f32.mxu0 %vm13092_vm4, %v33768_v36  ;;  %v18866_v36 = vld [vmem:[#allocation3 + $0xf1] sm:$0xff] }
 0xba6   :  { %26246 = vmatmul.mubr.msk.f32.gmra.mrb[90].mxu0 %vm13092_vm4, %v33772_v48  ;;  %v18867_v48 = vld [vmem:[#allocation3 + $0x109] sm:$0xff] }
 0xba7   :  { %26248 = vmatprep.mubr.msk.f32.mxu0 %vm13092_vm4, %v33776_v10  ;;  %v18868_v10 = vld [vmem:[#allocation3 + $0x111] sm:$0xff] }
 0xbaa   :  { %26249 = vmatmul.mubr.msk.f32.gmra.mrb[92].mxu0 %vm13092_vm4, %v33780_v16  ;;  %v18869_v16 = vld [vmem:[#allocation3 + $0x129] sm:$0xff] }
 0xbab   :  { %26251 = vmatprep.mubr.msk.f32.mxu0 %vm13092_vm4, %v18175_v45  ;;  %v18903_v45 = vld [vmem:[#allocation3 + $0x389] sm:$0xff] }
 0xbae   :  { %26252 = vmatmul.mubr.msk.f32.gmra.mrb[94].mxu0 %vm13092_vm4, %v18176_v8  ;;  %v18904_v8 = vld [vmem:[#allocation3 + $0x391] sm:$0xff] }
 0xbaf   :  { %26254 = vmatprep.mubr.msk.f32.mxu0 %vm13092_vm4, %v33786_v43  ;;  %v18870_v43 = vld [vmem:[#allocation3 + $0x131] sm:$0xff] }
 0xbb2   :  { %26255 = vmatmul.mubr.msk.f32.gmra.mrb[96].mxu0 %vm13092_vm4, %v33790_v2  ;;  %v18871_v2 = vld [vmem:[#allocation3 + $0x149] sm:$0xff] }
 0xbb3   :  { %26257 = vmatprep.mubr.msk.f32.mxu0 %vm13092_vm4, %v33794_v9  ;;  %v18872_v9 = vld [vmem:[#allocation3 + $0x151] sm:$0xff] }
 0xbb6   :  { %26258 = vmatmul.mubr.msk.f32.gmra.mrb[98].mxu0 %vm13092_vm4, %v33798_v51  ;;  %v18873_v51 = vld [vmem:[#allocation3 + $0x169] sm:$0xff] }
 0xbb7   :  { %26260 = vmatprep.mubr.msk.f32.mxu0 %vm13092_vm4, %v33802_v22  ;;  %v18874_v22 = vld [vmem:[#allocation3 + $0x171] sm:$0xff] }
 0xbba   :  { %26261 = vmatmul.mubr.msk.f32.gmra.mrb[100].mxu0 %vm13092_vm4, %v33806_v14  ;;  %v18875_v14 = vld [vmem:[#allocation3 + $0x189] sm:$0xff] }
 0xbbb   :  { %26263 = vmatprep.mubr.msk.f32.mxu0 %vm13092_vm4, %v33810_v56  ;;  %v18876_v56 = vld [vmem:[#allocation3 + $0x191] sm:$0xff] }
 0xbbe   :  { %26264 = vmatmul.mubr.msk.f32.gmra.mrb[102].mxu0 %vm13092_vm4, %v33814_v27  ;;  %v18877_v27 = vld [vmem:[#allocation3 + $0x1a9] sm:$0xff] }
 0xbbf   :  { %26266 = vmatprep.mubr.msk.f32.mxu0 %vm13092_vm4, %v33818_v41  ;;  %v18878_v41 = vld [vmem:[#allocation3 + $0x1b1] sm:$0xff] }
 0xbc2   :  { %26267 = vmatmul.mubr.msk.f32.gmra.mrb[104].mxu0 %vm13092_vm4, %v33822_v34  ;;  %v18879_v34 = vld [vmem:[#allocation3 + $0x1c9] sm:$0xff] }
 0xbc3   :  { %26269 = vmatprep.mubr.msk.f32.mxu0 %vm13092_vm4, %v33826_v5  ;;  %v18880_v5 = vld [vmem:[#allocation3 + $0x1d1] sm:$0xff] }
 0xbc6   :  { %26270 = vmatmul.mubr.msk.f32.gmra.mrb[106].mxu0 %vm13092_vm4, %v33830_v63  ;;  %v18881_v63 = vld [vmem:[#allocation3 + $0x1e9] sm:$0xff] }
 0xbc7   :  { %26272 = vmatprep.mubr.msk.f32.mxu0 %vm13092_vm4, %v33834_v17  ;;  %v18882_v17 = vld [vmem:[#allocation3 + $0x1f1] sm:$0xff] }
 0xbca   :  { %26273 = vmatmul.mubr.msk.f32.gmra.mrb[108].mxu0 %vm13092_vm4, %v33838_v4  ;;  %v18885_v4 = vld [vmem:[#allocation3 + $0x229] sm:$0xff] }
 0xbcb   :  { %26275 = vmatprep.mubr.msk.f32.mxu0 %vm13092_vm4, %v33842_v19  ;;  %v35214_v19 = vld [vmem:[#allocation33_spill] sm:$0xff] }
 0xbce   :  { %26276 = vmatmul.mubr.msk.f32.gmra.mrb[110].mxu0 %vm13092_vm4, %v33846_v24  ;;  %v18886_v24 = vld [vmem:[#allocation3 + $0x231] sm:$0xff] }
 0xbcf   :  { %26278 = vmatprep.mubr.msk.f32.mxu0 %vm13092_vm4, %v33850_v49  ;;  %v18887_v49 = vld [vmem:[#allocation3 + $0x289] sm:$0xff] }
 0xbd2   :  { %26279 = vmatmul.mubr.msk.f32.gmra.mrb[112].mxu0 %vm13092_vm4, %v35201_v60  ;;  %v18905_v60 = vld [vmem:[#allocation3 + $0x3a9] sm:$0xff] }
 0xbd3   :  { %26281 = vmatprep.mubr.msk.f32.mxu0 %vm13092_vm4, %v35202_v35  ;;  %v18906_v35 = vld [vmem:[#allocation3 + $0x3b1] sm:$0xff] }
 0xbd6   :  { %26282 = vmatmul.mubr.msk.f32.gmra.mrb[114].mxu0 %vm13092_vm4, %v35203_v1  ;;  %v18907_v1 = vld [vmem:[#allocation3 + $0x3c9] sm:$0xff] }
 0xbd7   :  { %26284 = vmatprep.mubr.msk.f32.mxu0 %vm13092_vm4, %v35204_v20  ;;  %v18908_v20 = vld [vmem:[#allocation3 + $0x3d1] sm:$0xff] }
 0xbda   :  { %26285 = vmatmul.mubr.msk.f32.gmra.mrb[116].mxu0 %vm13092_vm4, %v35205_v29  ;;  %v18909_v29 = vld [vmem:[#allocation3 + $0x3e9] sm:$0xff] }
 0xbdb   :  { %26287 = vmatprep.mubr.msk.f32.mxu0 %vm13092_vm4, %v35206_v13  ;;  %v18910_v13 = vld [vmem:[#allocation3 + $0x3f1] sm:$0xff] }
 0xbde   :  { %26288 = vmatmul.mubr.msk.f32.gmra.mrb[118].mxu0 %vm13092_vm4, %v35207_v33  ;;  %v18911_v33 = vld [vmem:[#allocation3 + $0x409] sm:$0xff] }
 0xbdf   :  { %26290 = vmatprep.mubr.msk.f32.mxu0 %vm13092_vm4, %v35208_v31  ;;  %v18912_v31 = vld [vmem:[#allocation3 + $0x411] sm:$0xff] }
 0xbe2   :  { %26291 = vmatmul.mubr.msk.f32.gmra.mrb[120].mxu0 %vm13092_vm4, %v35209_v37  ;;  %v18913_v37 = vld [vmem:[#allocation3 + $0x429] sm:$0xff] }
 0xbe3   :  { %26293 = vmatprep.mubr.msk.f32.mxu0 %vm13092_vm4, %v35210_v40  ;;  %v18914_v40 = vld [vmem:[#allocation3 + $0x431] sm:$0xff] }
 0xbe6   :  { %26294 = vmatmul.mubr.msk.f32.gmra.mrb[122].mxu0 %vm13092_vm4, %v35211_v21  ;;  %v35215_v21 = vld [vmem:[#allocation34_spill] sm:$0xff] }
 0xbe7   :  { %26296 = vmatprep.mubr.msk.f32.mxu0 %vm13092_vm4, %v35212_v44  ;;  %v18917_v44 = vld [vmem:[#allocation3 + $0x469] sm:$0xff] }
 0xbea   :  { %26297 = vmatmul.mubr.msk.f32.gmra.mrb[124].mxu0 %vm13092_vm4, %v35213_v30  ;;  %v18918_v30 = vld [vmem:[#allocation3 + $0x471] sm:$0xff] }
 0xbeb   :  { %26299 = vmatprep.mubr.msk.f32.mxu0 %vm13092_vm4, %v18207_v46  ;;  %v35216_v46 = vld [vmem:[#allocation35_spill] sm:$0xff] }
 0xbee   :  { %26300 = vmatmul.mubr.msk.f32.gmra.mrb[126].mxu0 %vm13092_vm4, %v18208_v58  ;;  %v34311_v58 = vld [vmem:[#allocation12] ss:$0 sm:$0xff] }
 0xbef   :  { %26310 = vmatprep.mubr.msk.f32.mxu0 %vm13092_vm4, %v18855_v7 }
 0xbf2   :  { %26311 = vmatmul.mubr.msk.f32.vlgmr.msra.gmra.mrb[64].mxu0 %vm13092_vm4, %v18856_v11 }
 0xbf3   :  { %26313 = vmatprep.mubr.msk.f32.mxu0 %vm13092_vm4, %v18857_v15 }
 0xbf6   :  { %26314 = vmatmul.mubr.msk.f32.gmra.mrb[66].mxu0 %vm13092_vm4, %v18858_v61 }
 0xbf7   :  { %26316 = vmatprep.mubr.msk.f32.mxu0 %vm13092_vm4, %v18859_v18 }
 0xbfa   :  { %26317 = vmatmul.mubr.msk.f32.gmra.mrb[68].mxu0 %vm13092_vm4, %v18860_v23 }
 0xbfb   :  { %26319 = vmatprep.mubr.msk.f32.mxu0 %vm13092_vm4, %v18861_v57 }
 0xbfe   :  { %26320 = vmatmul.mubr.msk.f32.gmra.mrb[70].mxu0 %vm13092_vm4, %v18862_v28 }
 0xbff   :  { %26322 = vmatprep.mubr.msk.f32.mxu0 %vm13092_vm4, %v18863_v32 }
 0xc02   :  { %26323 = vmatmul.mubr.msk.f32.gmra.mrb[72].mxu0 %vm13092_vm4, %v18864_v59 }
 0xc03   :  { %26325 = vmatprep.mubr.msk.f32.mxu0 %vm13092_vm4, %v18865_v55 }
 0xc06   :  { %26326 = vmatmul.mubr.msk.f32.gmra.mrb[74].mxu0 %vm13092_vm4, %v18866_v36 }
 0xc07   :  { %26328 = vmatprep.mubr.msk.f32.mxu0 %vm13092_vm4, %v18867_v48 }
 0xc0a   :  { %26329 = vmatmul.mubr.msk.f32.gmra.mrb[76].mxu0 %vm13092_vm4, %v18868_v10 }
 0xc0b   :  { %26331 = vmatprep.mubr.msk.f32.mxu0 %vm13092_vm4, %v18869_v16 }
 0xc0e   :  { %26332 = vmatmul.mubr.msk.f32.gmra.mrb[78].mxu0 %vm13092_vm4, %v18870_v43 }
 0xc0f   :  { %26334 = vmatprep.mubr.msk.f32.mxu0 %vm13092_vm4, %v18871_v2 }
 0xc12   :  { %26335 = vmatmul.mubr.msk.f32.gmra.mrb[80].mxu0 %vm13092_vm4, %v18872_v9 }
 0xc13   :  { %26337 = vmatprep.mubr.msk.f32.mxu0 %vm13092_vm4, %v18873_v51 }
 0xc16   :  { %26338 = vmatmul.mubr.msk.f32.gmra.mrb[82].mxu0 %vm13092_vm4, %v18874_v22 }
 0xc17   :  { %26340 = vmatprep.mubr.msk.f32.mxu0 %vm13092_vm4, %v18875_v14 }
 0xc1a   :  { %26341 = vmatmul.mubr.msk.f32.gmra.mrb[84].mxu0 %vm13092_vm4, %v18876_v56 }
 0xc1b   :  { %26343 = vmatprep.mubr.msk.f32.mxu0 %vm13092_vm4, %v18877_v27 }
 0xc1e   :  { %26344 = vmatmul.mubr.msk.f32.gmra.mrb[86].mxu0 %vm13092_vm4, %v18878_v41 }
 0xc1f   :  { %26346 = vmatprep.mubr.msk.f32.mxu0 %vm13092_vm4, %v18879_v34 }
 0xc22   :  { %26347 = vmatmul.mubr.msk.f32.gmra.mrb[88].mxu0 %vm13092_vm4, %v18880_v5 }
 0xc23   :  { %26349 = vmatprep.mubr.msk.f32.mxu0 %vm13092_vm4, %v18881_v63 }
 0xc26   :  { %26350 = vmatmul.mubr.msk.f32.gmra.mrb[90].mxu0 %vm13092_vm4, %v18882_v17 }
 0xc27   :  { %26352 = vmatprep.mubr.msk.f32.mxu0 %vm13092_vm4, %v33970_v38  ;;  %v18891_v38 = vld [vmem:[#allocation3 + $0x2c9] sm:$0xff] }
 0xc2a   :  { %26353 = vmatmul.mubr.msk.f32.gmra.mrb[92].mxu0 %vm13092_vm4, %v35214_v19 }
 0xc2b   :  { %26355 = vmatprep.mubr.msk.f32.mxu0 %vm13092_vm4, %v18885_v4 }
 0xc2e   :  { %26356 = vmatmul.mubr.msk.f32.gmra.mrb[94].mxu0 %vm13092_vm4, %v18886_v24 }
 0xc2f   :  { %26358 = vmatprep.mubr.msk.f32.mxu0 %vm13092_vm4, %v18887_v49 }
 0xc32   :  { %26359 = vmatmul.mubr.msk.f32.gmra.mrb[96].mxu0 %vm13092_vm4, %v18888_v25 }
 0xc33   :  { %26361 = vmatprep.mubr.msk.f32.mxu0 %vm13092_vm4, %v18889_v50 }
 0xc36   :  { %26362 = vmatmul.mubr.msk.f32.gmra.mrb[98].mxu0 %vm13092_vm4, %v18890_v54 }
 0xc37   :  { %26364 = vmatprep.mubr.msk.f32.mxu0 %vm13092_vm4, %v18891_v38 }
 0xc3a   :  { %26365 = vmatmul.mubr.msk.f32.gmra.mrb[100].mxu0 %vm13092_vm4, %v18892_v42 }
 0xc3b   :  { %26367 = vmatprep.mubr.msk.f32.mxu0 %vm13092_vm4, %v18893_v39 }
 0xc3e   :  { %26368 = vmatmul.mubr.msk.f32.gmra.mrb[102].mxu0 %vm13092_vm4, %v18894_v52 }
 0xc3f   :  { %26370 = vmatprep.mubr.msk.f32.mxu0 %vm13092_vm4, %v18895_v47 }
 0xc42   :  { %26371 = vmatmul.mubr.msk.f32.gmra.mrb[104].mxu0 %vm13092_vm4, %v18896_v6 }
 0xc43   :  { %26373 = vmatprep.mubr.msk.f32.mxu0 %vm13092_vm4, %v18897_v3 }
 0xc46   :  { %26374 = vmatmul.mubr.msk.f32.gmra.mrb[106].mxu0 %vm13092_vm4, %v18898_v53 }
 0xc47   :  { %26376 = vmatprep.mubr.msk.f32.mxu0 %vm13092_vm4, %v18899_v12 }
 0xc4a   :  { %26377 = vmatmul.mubr.msk.f32.gmra.mrb[108].mxu0 %vm13092_vm4, %v18900_v0 }
 0xc4b   :  { %26379 = vmatprep.mubr.msk.f32.mxu0 %vm13092_vm4, %v18901_v62 }
 0xc4e   :  { %26380 = vmatmul.mubr.msk.f32.gmra.mrb[110].mxu0 %vm13092_vm4, %v18902_v26 }
 0xc4f   :  { %26382 = vmatprep.mubr.msk.f32.mxu0 %vm13092_vm4, %v18903_v45 }
 0xc52   :  { %26383 = vmatmul.mubr.msk.f32.gmra.mrb[112].mxu0 %vm13092_vm4, %v18904_v8 }
 0xc53   :  { %26385 = vmatprep.mubr.msk.f32.mxu0 %vm13092_vm4, %v18905_v60 }
 0xc56   :  { %26386 = vmatmul.mubr.msk.f32.gmra.mrb[114].mxu0 %vm13092_vm4, %v18906_v35 }
 0xc57   :  { %26388 = vmatprep.mubr.msk.f32.mxu0 %vm13092_vm4, %v18907_v1 }
 0xc5a   :  { %26389 = vmatmul.mubr.msk.f32.gmra.mrb[116].mxu0 %vm13092_vm4, %v18908_v20 }
 0xc5b   :  { %26391 = vmatprep.mubr.msk.f32.mxu0 %vm13092_vm4, %v18909_v29 }
 0xc5e   :  { %26392 = vmatmul.mubr.msk.f32.gmra.mrb[118].mxu0 %vm13092_vm4, %v18910_v13 }
 0xc5f   :  { %26394 = vmatprep.mubr.msk.f32.mxu0 %vm13092_vm4, %v18911_v33 }
 0xc62   :  { %26395 = vmatmul.mubr.msk.f32.gmra.mrb[120].mxu0 %vm13092_vm4, %v18912_v31 }
 0xc63   :  { %26397 = vmatprep.mubr.msk.f32.mxu0 %vm13092_vm4, %v18913_v37 }
 0xc66   :  { %26398 = vmatmul.mubr.msk.f32.gmra.mrb[122].mxu0 %vm13092_vm4, %v18914_v40 }
 0xc67   :  { %26400 = vmatprep.mubr.msk.f32.mxu0 %vm13092_vm4, %v35215_v21 }
 0xc6a   :  { %26401 = vmatmul.mubr.msk.f32.gmra.mrb[124].mxu0 %vm13092_vm4, %v35216_v46 }
 0xc6b   :  { %26403 = vmatprep.mubr.msk.f32.mxu0 %vm13092_vm4, %v18917_v44 }
 0xc6e   :  { %26404 = vmatmul.mubr.msk.f32.gmra.mrb[126].mxu0 %vm13092_vm4, %v18918_v30 }
 0xcc5   :  { %v26312_v7 = vpop.f32.mrb[64].mxu0 }
 0xcc6   :  { %v19573_v11 = vadd.f32 %v26312_v7, %v34311_v58  ;;  %v19182_v15 = vpop.f32.mrb[65].mxu0 }
 0xcc7   :  { %v19572_v61 = vadd.f32 %v34311_v58, %v19182_v15 }
 0xcc8   :  { %v19637_v18 = vmax.f32 %v19573_v11, 0.0 }
 0xcc9   :  { %v19636_v23 = vmax.f32 %v19572_v61, 0.0  ;;  %v26315_v57 = vpop.f32.mrb[66].mxu0 }
 0xcca   :  { %19702 = vst.msk [vmem:[%s34640_s7 + $0x8] sm:$0xff] %vm19700_vm6, %v19637_v18  ;;  %v19575_v28 = vadd.f32 %v26315_v57, %v34311_v58  ;;  %v19192_v32 = vpop.f32.mrb[67].mxu0 }
 0xccb   :  { %19701 = vst.msk [vmem:[%s34640_s7] sm:$0xff] %vm19700_vm6, %v19636_v23  ;;  %v19574_v59 = vadd.f32 %v34311_v58, %v19192_v32 }
 0xccc   :  { %v19639_v55 = vmax.f32 %v19575_v28, 0.0 }
 0xccd   :  { %v19638_v36 = vmax.f32 %v19574_v59, 0.0  ;;  %v26318_v48 = vpop.f32.mrb[68].mxu0 }
 0xcce   :  { %19704 = vst.msk [vmem:[%s34640_s7 + $0x18] sm:$0xff] %vm19700_vm6, %v19639_v55  ;;  %v19577_v10 = vadd.f32 %v26318_v48, %v34311_v58  ;;  %v19202_v16 = vpop.f32.mrb[69].mxu0 }
 0xccf   :  { %19703 = vst.msk [vmem:[%s34640_s7 + $0x10] sm:$0xff] %vm19700_vm6, %v19638_v36  ;;  %v19576_v43 = vadd.f32 %v34311_v58, %v19202_v16 }
 0xcd0   :  { %v19641_v2 = vmax.f32 %v19577_v10, 0.0 }
 0xcd1   :  { %v19640_v9 = vmax.f32 %v19576_v43, 0.0  ;;  %v26321_v51 = vpop.f32.mrb[70].mxu0 }
 0xcd2   :  { %19706 = vst.msk [vmem:[%s34640_s7 + $0x28] sm:$0xff] %vm19700_vm6, %v19641_v2  ;;  %v19579_v22 = vadd.f32 %v26321_v51, %v34311_v58  ;;  %v19212_v14 = vpop.f32.mrb[71].mxu0 }
 0xcd3   :  { %19705 = vst.msk [vmem:[%s34640_s7 + $0x20] sm:$0xff] %vm19700_vm6, %v19640_v9  ;;  %v19578_v56 = vadd.f32 %v34311_v58, %v19212_v14 }
 0xcd4   :  { %v19643_v27 = vmax.f32 %v19579_v22, 0.0 }
 0xcd5   :  { %v19642_v41 = vmax.f32 %v19578_v56, 0.0  ;;  %v26324_v34 = vpop.f32.mrb[72].mxu0 }
 0xcd6   :  { %19708 = vst.msk [vmem:[%s34640_s7 + $0x38] sm:$0xff] %vm19700_vm6, %v19643_v27  ;;  %v19581_v5 = vadd.f32 %v26324_v34, %v34311_v58  ;;  %v19222_v63 = vpop.f32.mrb[73].mxu0 }
 0xcd7   :  { %19707 = vst.msk [vmem:[%s34640_s7 + $0x30] sm:$0xff] %vm19700_vm6, %v19642_v41  ;;  %v19580_v17 = vadd.f32 %v34311_v58, %v19222_v63 }
 0xcd8   :  { %v19645_v4 = vmax.f32 %v19581_v5, 0.0 }
 0xcd9   :  { %v19644_v19 = vmax.f32 %v19580_v17, 0.0  ;;  %v26327_v24 = vpop.f32.mrb[74].mxu0 }
 0xcda   :  { %19710 = vst.msk [vmem:[%s34640_s7 + $0x48] sm:$0xff] %vm19700_vm6, %v19645_v4  ;;  %v19583_v49 = vadd.f32 %v26327_v24, %v34311_v58  ;;  %v19232_v25 = vpop.f32.mrb[75].mxu0 }
 0xcdb   :  { %19709 = vst.msk [vmem:[%s34640_s7 + $0x40] sm:$0xff] %vm19700_vm6, %v19644_v19  ;;  %v19582_v50 = vadd.f32 %v34311_v58, %v19232_v25 }
 0xcdc   :  { %v19647_v54 = vmax.f32 %v19583_v49, 0.0 }
 0xcdd   :  { %v19646_v38 = vmax.f32 %v19582_v50, 0.0  ;;  %v26330_v42 = vpop.f32.mrb[76].mxu0 }
 0xcde   :  { %19712 = vst.msk [vmem:[%s34640_s7 + $0x58] sm:$0xff] %vm19700_vm6, %v19647_v54  ;;  %v19585_v39 = vadd.f32 %v26330_v42, %v34311_v58  ;;  %v19242_v52 = vpop.f32.mrb[77].mxu0 }
 0xcdf   :  { %19711 = vst.msk [vmem:[%s34640_s7 + $0x50] sm:$0xff] %vm19700_vm6, %v19646_v38  ;;  %v19584_v47 = vadd.f32 %v34311_v58, %v19242_v52 }
 0xce0   :  { %v19649_v6 = vmax.f32 %v19585_v39, 0.0 }
 0xce1   :  { %v19648_v3 = vmax.f32 %v19584_v47, 0.0  ;;  %v26333_v53 = vpop.f32.mrb[78].mxu0 }
 0xce2   :  { %19714 = vst.msk [vmem:[%s34640_s7 + $0x68] sm:$0xff] %vm19700_vm6, %v19649_v6  ;;  %v19587_v12 = vadd.f32 %v26333_v53, %v34311_v58  ;;  %v19252_v0 = vpop.f32.mrb[79].mxu0 }
 0xce3   :  { %19713 = vst.msk [vmem:[%s34640_s7 + $0x60] sm:$0xff] %vm19700_vm6, %v19648_v3  ;;  %v19586_v62 = vadd.f32 %v34311_v58, %v19252_v0 }
 0xce4   :  { %v19651_v26 = vmax.f32 %v19587_v12, 0.0 }
 0xce5   :  { %v19650_v45 = vmax.f32 %v19586_v62, 0.0  ;;  %v26336_v8 = vpop.f32.mrb[80].mxu0 }
 0xce6   :  { %19716 = vst.msk [vmem:[%s34640_s7 + $0x78] sm:$0xff] %vm19700_vm6, %v19651_v26  ;;  %v19589_v60 = vadd.f32 %v26336_v8, %v34311_v58  ;;  %v19262_v35 = vpop.f32.mrb[81].mxu0 }
 0xce7   :  { %19715 = vst.msk [vmem:[%s34640_s7 + $0x70] sm:$0xff] %vm19700_vm6, %v19650_v45  ;;  %v19588_v1 = vadd.f32 %v34311_v58, %v19262_v35 }
 0xce8   :  { %v19653_v20 = vmax.f32 %v19589_v60, 0.0 }
 0xce9   :  { %v19652_v29 = vmax.f32 %v19588_v1, 0.0  ;;  %v26339_v13 = vpop.f32.mrb[82].mxu0 }
 0xcea   :  { %19718 = vst.msk [vmem:[%s34640_s7 + $0x88] sm:$0xff] %vm19700_vm6, %v19653_v20  ;;  %v19591_v33 = vadd.f32 %v26339_v13, %v34311_v58  ;;  %v19272_v31 = vpop.f32.mrb[83].mxu0 }
 0xceb   :  { %19717 = vst.msk [vmem:[%s34640_s7 + $0x80] sm:$0xff] %vm19700_vm6, %v19652_v29  ;;  %v19590_v37 = vadd.f32 %v34311_v58, %v19272_v31 }
 0xcec   :  { %v19655_v40 = vmax.f32 %v19591_v33, 0.0 }
 0xced   :  { %v19654_v21 = vmax.f32 %v19590_v37, 0.0  ;;  %v26342_v44 = vpop.f32.mrb[84].mxu0 }
 0xcee   :  { %19720 = vst.msk [vmem:[%s34640_s7 + $0x98] sm:$0xff] %vm19700_vm6, %v19655_v40  ;;  %v19593_v46 = vadd.f32 %v26342_v44, %v34311_v58  ;;  %v19282_v30 = vpop.f32.mrb[85].mxu0 }
 0xcef   :  { %19719 = vst.msk [vmem:[%s34640_s7 + $0x90] sm:$0xff] %vm19700_vm6, %v19654_v21  ;;  %v19592_v7 = vadd.f32 %v34311_v58, %v19282_v30 }
 0xcf0   :  { %v19657_v11 = vmax.f32 %v19593_v46, 0.0 }
 0xcf1   :  { %v19656_v15 = vmax.f32 %v19592_v7, 0.0  ;;  %v26345_v61 = vpop.f32.mrb[86].mxu0 }
 0xcf2   :  { %19722 = vst.msk [vmem:[%s34640_s7 + $0xa8] sm:$0xff] %vm19700_vm6, %v19657_v11  ;;  %v19595_v18 = vadd.f32 %v26345_v61, %v34311_v58  ;;  %v19292_v23 = vpop.f32.mrb[87].mxu0 }
 0xcf3   :  { %19721 = vst.msk [vmem:[%s34640_s7 + $0xa0] sm:$0xff] %vm19700_vm6, %v19656_v15  ;;  %v19594_v57 = vadd.f32 %v34311_v58, %v19292_v23 }
 0xcf4   :  { %v19659_v28 = vmax.f32 %v19595_v18, 0.0 }
 0xcf5   :  { %v19658_v32 = vmax.f32 %v19594_v57, 0.0  ;;  %v26348_v59 = vpop.f32.mrb[88].mxu0 }
 0xcf6   :  { %19724 = vst.msk [vmem:[%s34640_s7 + $0xb8] sm:$0xff] %vm19700_vm6, %v19659_v28  ;;  %v19597_v55 = vadd.f32 %v26348_v59, %v34311_v58  ;;  %v19302_v36 = vpop.f32.mrb[89].mxu0 }
 0xcf7   :  { %19723 = vst.msk [vmem:[%s34640_s7 + $0xb0] sm:$0xff] %vm19700_vm6, %v19658_v32  ;;  %v19596_v48 = vadd.f32 %v34311_v58, %v19302_v36 }
 0xcf8   :  { %v19661_v10 = vmax.f32 %v19597_v55, 0.0 }
 0xcf9   :  { %v19660_v16 = vmax.f32 %v19596_v48, 0.0  ;;  %v26351_v43 = vpop.f32.mrb[90].mxu0 }
 0xcfa   :  { %19726 = vst.msk [vmem:[%s34640_s7 + $0xc8] sm:$0xff] %vm19700_vm6, %v19661_v10  ;;  %v19599_v2 = vadd.f32 %v26351_v43, %v34311_v58  ;;  %v19312_v9 = vpop.f32.mrb[91].mxu0 }
 0xcfb   :  { %19725 = vst.msk [vmem:[%s34640_s7 + $0xc0] sm:$0xff] %vm19700_vm6, %v19660_v16  ;;  %v19598_v51 = vadd.f32 %v34311_v58, %v19312_v9 }
 0xcfc   :  { %v19663_v22 = vmax.f32 %v19599_v2, 0.0 }
 0xcfd   :  { %v19662_v14 = vmax.f32 %v19598_v51, 0.0  ;;  %v26354_v56 = vpop.f32.mrb[92].mxu0 }
 0xcfe   :  { %19728 = vst.msk [vmem:[%s34640_s7 + $0xd8] sm:$0xff] %vm19700_vm6, %v19663_v22  ;;  %v19601_v27 = vadd.f32 %v26354_v56, %v34311_v58  ;;  %v19322_v41 = vpop.f32.mrb[93].mxu0 }
 0xcff   :  { %19727 = vst.msk [vmem:[%s34640_s7 + $0xd0] sm:$0xff] %vm19700_vm6, %v19662_v14  ;;  %v19600_v34 = vadd.f32 %v34311_v58, %v19322_v41 }
 0xd00   :  { %v19665_v5 = vmax.f32 %v19601_v27, 0.0 }
 0xd01   :  { %v19664_v63 = vmax.f32 %v19600_v34, 0.0  ;;  %v26357_v17 = vpop.f32.mrb[94].mxu0 }
 0xd02   :  { %19730 = vst.msk [vmem:[%s34640_s7 + $0xe8] sm:$0xff] %vm19700_vm6, %v19665_v5  ;;  %v19603_v4 = vadd.f32 %v26357_v17, %v34311_v58  ;;  %v19332_v19 = vpop.f32.mrb[95].mxu0 }
 0xd03   :  { %19729 = vst.msk [vmem:[%s34640_s7 + $0xe0] sm:$0xff] %vm19700_vm6, %v19664_v63  ;;  %v19602_v24 = vadd.f32 %v34311_v58, %v19332_v19 }
 0xd04   :  { %v19667_v49 = vmax.f32 %v19603_v4, 0.0 }
 0xd05   :  { %v19666_v25 = vmax.f32 %v19602_v24, 0.0  ;;  %v26360_v50 = vpop.f32.mrb[96].mxu0 }
 0xd06   :  { %19732 = vst.msk [vmem:[%s34640_s7 + $0xf8] sm:$0xff] %vm19700_vm6, %v19667_v49  ;;  %v19605_v54 = vadd.f32 %v26360_v50, %v34311_v58  ;;  %v19342_v38 = vpop.f32.mrb[97].mxu0 }
 0xd07   :  { %19731 = vst.msk [vmem:[%s34640_s7 + $0xf0] sm:$0xff] %vm19700_vm6, %v19666_v25  ;;  %v19604_v42 = vadd.f32 %v34311_v58, %v19342_v38 }
 0xd08   :  { %v19669_v39 = vmax.f32 %v19605_v54, 0.0 }
 0xd09   :  { %v19668_v52 = vmax.f32 %v19604_v42, 0.0  ;;  %v26363_v47 = vpop.f32.mrb[98].mxu0 }
 0xd0a   :  { %19734 = vst.msk [vmem:[%s34640_s7 + $0x108] sm:$0xff] %vm19700_vm6, %v19669_v39  ;;  %v19607_v6 = vadd.f32 %v26363_v47, %v34311_v58  ;;  %v19352_v3 = vpop.f32.mrb[99].mxu0 }
 0xd0b   :  { %19733 = vst.msk [vmem:[%s34640_s7 + $0x100] sm:$0xff] %vm19700_vm6, %v19668_v52  ;;  %v19606_v53 = vadd.f32 %v34311_v58, %v19352_v3 }
 0xd0c   :  { %v19671_v12 = vmax.f32 %v19607_v6, 0.0 }
 0xd0d   :  { %v19670_v0 = vmax.f32 %v19606_v53, 0.0  ;;  %v26366_v62 = vpop.f32.mrb[100].mxu0 }
 0xd0e   :  { %19736 = vst.msk [vmem:[%s34640_s7 + $0x118] sm:$0xff] %vm19700_vm6, %v19671_v12  ;;  %v19609_v26 = vadd.f32 %v26366_v62, %v34311_v58  ;;  %v19362_v45 = vpop.f32.mrb[101].mxu0 }
 0xd0f   :  { %19735 = vst.msk [vmem:[%s34640_s7 + $0x110] sm:$0xff] %vm19700_vm6, %v19670_v0  ;;  %v19608_v8 = vadd.f32 %v34311_v58, %v19362_v45 }
 0xd10   :  { %v19673_v60 = vmax.f32 %v19609_v26, 0.0 }
 0xd11   :  { %v19672_v35 = vmax.f32 %v19608_v8, 0.0  ;;  %v26369_v1 = vpop.f32.mrb[102].mxu0 }
 0xd12   :  { %19738 = vst.msk [vmem:[%s34640_s7 + $0x128] sm:$0xff] %vm19700_vm6, %v19673_v60  ;;  %v19611_v20 = vadd.f32 %v26369_v1, %v34311_v58  ;;  %v19372_v29 = vpop.f32.mrb[103].mxu0 }
 0xd13   :  { %19737 = vst.msk [vmem:[%s34640_s7 + $0x120] sm:$0xff] %vm19700_vm6, %v19672_v35  ;;  %v19610_v13 = vadd.f32 %v34311_v58, %v19372_v29 }
 0xd14   :  { %v19675_v33 = vmax.f32 %v19611_v20, 0.0 }
 0xd15   :  { %v19674_v31 = vmax.f32 %v19610_v13, 0.0  ;;  %v26372_v37 = vpop.f32.mrb[104].mxu0 }
 0xd16   :  { %19740 = vst.msk [vmem:[%s34640_s7 + $0x138] sm:$0xff] %vm19700_vm6, %v19675_v33  ;;  %v19613_v40 = vadd.f32 %v26372_v37, %v34311_v58  ;;  %v19382_v21 = vpop.f32.mrb[105].mxu0 }
 0xd17   :  { %19739 = vst.msk [vmem:[%s34640_s7 + $0x130] sm:$0xff] %vm19700_vm6, %v19674_v31  ;;  %v19612_v44 = vadd.f32 %v34311_v58, %v19382_v21 }
 0xd18   :  { %v19677_v46 = vmax.f32 %v19613_v40, 0.0 }
 0xd19   :  { %v19676_v30 = vmax.f32 %v19612_v44, 0.0  ;;  %v26375_v7 = vpop.f32.mrb[106].mxu0 }
 0xd1a   :  { %19742 = vst.msk [vmem:[%s34640_s7 + $0x148] sm:$0xff] %vm19700_vm6, %v19677_v46  ;;  %v19615_v11 = vadd.f32 %v26375_v7, %v34311_v58  ;;  %v19392_v15 = vpop.f32.mrb[107].mxu0 }
 0xd1b   :  { %19741 = vst.msk [vmem:[%s34640_s7 + $0x140] sm:$0xff] %vm19700_vm6, %v19676_v30  ;;  %v19614_v61 = vadd.f32 %v34311_v58, %v19392_v15 }
 0xd1c   :  { %v19679_v18 = vmax.f32 %v19615_v11, 0.0 }
 0xd1d   :  { %v19678_v23 = vmax.f32 %v19614_v61, 0.0  ;;  %v26378_v57 = vpop.f32.mrb[108].mxu0 }
 0xd1e   :  { %19744 = vst.msk [vmem:[%s34640_s7 + $0x158] sm:$0xff] %vm19700_vm6, %v19679_v18  ;;  %v19617_v28 = vadd.f32 %v26378_v57, %v34311_v58  ;;  %v19402_v32 = vpop.f32.mrb[109].mxu0 }
 0xd1f   :  { %19743 = vst.msk [vmem:[%s34640_s7 + $0x150] sm:$0xff] %vm19700_vm6, %v19678_v23  ;;  %v19616_v59 = vadd.f32 %v34311_v58, %v19402_v32 }
 0xd20   :  { %v19681_v55 = vmax.f32 %v19617_v28, 0.0 }
 0xd21   :  { %v19680_v36 = vmax.f32 %v19616_v59, 0.0  ;;  %v26381_v48 = vpop.f32.mrb[110].mxu0 }
 0xd22   :  { %19746 = vst.msk [vmem:[%s34640_s7 + $0x168] sm:$0xff] %vm19700_vm6, %v19681_v55  ;;  %v19619_v10 = vadd.f32 %v26381_v48, %v34311_v58  ;;  %v19412_v16 = vpop.f32.mrb[111].mxu0 }
 0xd23   :  { %19745 = vst.msk [vmem:[%s34640_s7 + $0x160] sm:$0xff] %vm19700_vm6, %v19680_v36  ;;  %v19618_v43 = vadd.f32 %v34311_v58, %v19412_v16 }
 0xd24   :  { %v19683_v2 = vmax.f32 %v19619_v10, 0.0 }
 0xd25   :  { %v19682_v9 = vmax.f32 %v19618_v43, 0.0  ;;  %v26384_v51 = vpop.f32.mrb[112].mxu0 }
 0xd26   :  { %19748 = vst.msk [vmem:[%s34640_s7 + $0x178] sm:$0xff] %vm19700_vm6, %v19683_v2  ;;  %v19621_v22 = vadd.f32 %v26384_v51, %v34311_v58  ;;  %v19422_v14 = vpop.f32.mrb[113].mxu0 }
 0xd27   :  { %19747 = vst.msk [vmem:[%s34640_s7 + $0x170] sm:$0xff] %vm19700_vm6, %v19682_v9  ;;  %v19620_v56 = vadd.f32 %v34311_v58, %v19422_v14 }
 0xd28   :  { %v19685_v27 = vmax.f32 %v19621_v22, 0.0 }
 0xd29   :  { %v19684_v41 = vmax.f32 %v19620_v56, 0.0  ;;  %v26387_v34 = vpop.f32.mrb[114].mxu0 }
 0xd2a   :  { %19750 = vst.msk [vmem:[%s34640_s7 + $0x188] sm:$0xff] %vm19700_vm6, %v19685_v27  ;;  %v19623_v5 = vadd.f32 %v26387_v34, %v34311_v58  ;;  %v19432_v63 = vpop.f32.mrb[115].mxu0 }
 0xd2b   :  { %19749 = vst.msk [vmem:[%s34640_s7 + $0x180] sm:$0xff] %vm19700_vm6, %v19684_v41  ;;  %v19622_v17 = vadd.f32 %v34311_v58, %v19432_v63 }
 0xd2c   :  { %v19687_v4 = vmax.f32 %v19623_v5, 0.0 }
 0xd2d   :  { %v19686_v19 = vmax.f32 %v19622_v17, 0.0  ;;  %v26390_v24 = vpop.f32.mrb[116].mxu0 }
 0xd2e   :  { %19752 = vst.msk [vmem:[%s34640_s7 + $0x198] sm:$0xff] %vm19700_vm6, %v19687_v4  ;;  %v19625_v49 = vadd.f32 %v26390_v24, %v34311_v58  ;;  %v19442_v25 = vpop.f32.mrb[117].mxu0 }
 0xd2f   :  { %19751 = vst.msk [vmem:[%s34640_s7 + $0x190] sm:$0xff] %vm19700_vm6, %v19686_v19  ;;  %v19624_v50 = vadd.f32 %v34311_v58, %v19442_v25 }
 0xd30   :  { %v19689_v54 = vmax.f32 %v19625_v49, 0.0 }
 0xd31   :  { %v19688_v38 = vmax.f32 %v19624_v50, 0.0  ;;  %v26393_v42 = vpop.f32.mrb[118].mxu0 }
 0xd32   :  { %19754 = vst.msk [vmem:[%s34640_s7 + $0x1a8] sm:$0xff] %vm19700_vm6, %v19689_v54  ;;  %v19627_v39 = vadd.f32 %v26393_v42, %v34311_v58  ;;  %v19452_v52 = vpop.f32.mrb[119].mxu0 }
 0xd33   :  { %19753 = vst.msk [vmem:[%s34640_s7 + $0x1a0] sm:$0xff] %vm19700_vm6, %v19688_v38  ;;  %v19626_v47 = vadd.f32 %v34311_v58, %v19452_v52 }
 0xd34   :  { %v19691_v6 = vmax.f32 %v19627_v39, 0.0 }
 0xd35   :  { %v19690_v3 = vmax.f32 %v19626_v47, 0.0  ;;  %v26396_v53 = vpop.f32.mrb[120].mxu0 }
 0xd36   :  { %19756 = vst.msk [vmem:[%s34640_s7 + $0x1b8] sm:$0xff] %vm19700_vm6, %v19691_v6  ;;  %v19629_v12 = vadd.f32 %v26396_v53, %v34311_v58  ;;  %v19462_v0 = vpop.f32.mrb[121].mxu0 }
 0xd37   :  { %19755 = vst.msk [vmem:[%s34640_s7 + $0x1b0] sm:$0xff] %vm19700_vm6, %v19690_v3  ;;  %v19628_v62 = vadd.f32 %v34311_v58, %v19462_v0 }
 0xd38   :  { %v19693_v26 = vmax.f32 %v19629_v12, 0.0 }
 0xd39   :  { %v19692_v45 = vmax.f32 %v19628_v62, 0.0  ;;  %v26399_v8 = vpop.f32.mrb[122].mxu0 }
 0xd3a   :  { %19758 = vst.msk [vmem:[%s34640_s7 + $0x1c8] sm:$0xff] %vm19700_vm6, %v19693_v26  ;;  %v19631_v60 = vadd.f32 %v26399_v8, %v34311_v58  ;;  %v19472_v35 = vpop.f32.mrb[123].mxu0 }
 0xd3b   :  { %19757 = vst.msk [vmem:[%s34640_s7 + $0x1c0] sm:$0xff] %vm19700_vm6, %v19692_v45  ;;  %v19630_v1 = vadd.f32 %v34311_v58, %v19472_v35 }
 0xd3c   :  { %v19695_v20 = vmax.f32 %v19631_v60, 0.0 }
 0xd3d   :  { %v19694_v29 = vmax.f32 %v19630_v1, 0.0  ;;  %v26402_v13 = vpop.f32.mrb[124].mxu0 }
 0xd3e   :  { %19760 = vst.msk [vmem:[%s34640_s7 + $0x1d8] sm:$0xff] %vm19700_vm6, %v19695_v20  ;;  %v19633_v33 = vadd.f32 %v26402_v13, %v34311_v58  ;;  %v19482_v31 = vpop.f32.mrb[125].mxu0 }
 0xd3f   :  { %19759 = vst.msk [vmem:[%s34640_s7 + $0x1d0] sm:$0xff] %vm19700_vm6, %v19694_v29  ;;  %v19632_v37 = vadd.f32 %v34311_v58, %v19482_v31 }
 0xd40   :  { %v19697_v40 = vmax.f32 %v19633_v33, 0.0 }
 0xd41   :  { %v19696_v21 = vmax.f32 %v19632_v37, 0.0  ;;  %v26405_v44 = vpop.f32.mrb[126].mxu0 }
 0xd42   :  { %19762 = vst.msk [vmem:[%s34640_s7 + $0x1e8] sm:$0xff] %vm19700_vm6, %v19697_v40  ;;  %v19635_v46 = vadd.f32 %v26405_v44, %v34311_v58  ;;  %v19492_v30 = vpop.f32.mrb[127].mxu0 }
 0xd43   :  { %19761 = vst.msk [vmem:[%s34640_s7 + $0x1e0] sm:$0xff] %vm19700_vm6, %v19696_v21  ;;  %v19634_v7 = vadd.f32 %v34311_v58, %v19492_v30 }
 0xd44   :  { %v19699_v11 = vmax.f32 %v19635_v46, 0.0 }
 0xd45   :  { %v19698_v15 = vmax.f32 %v19634_v7, 0.0 }
 0xd46   :  { %19764 = vst.msk [vmem:[%s34640_s7 + $0x1f8] sm:$0xff] %vm19700_vm6, %v19699_v11 }
 0xd47   :  { %19763 = vst.msk [vmem:[%s34640_s7 + $0x1f0] sm:$0xff] %vm19700_vm6, %v19698_v15 }
 0xd48   :  { %19769 = vsyncpa [#allocation5], 1 }
 0xd49   :  { %19770 = vsyncpa [#allocation7], 1 }
 0xd4a   :  { %19771 = vsyncpa [#allocation10], 1 }
 0xd4b   :  { %19772 = vsyncpa [#allocation13], 1 }

</bundles_post_ra>
